<compile_context>
chip_gen: v6e
topology: v6e:2x2x1
jax: 0.10.0
libtpu: 0.0.40
codegen_flags: <defaults>
</compile_context>

<pallas_src>
import functools

import jax
import jax.numpy as jnp
from jax.experimental import pallas as pl
from jax.experimental.pallas import tpu as pltpu


def _encoder_block_kernel(x_ref, w_ref, b_ref, o_ref, *, K, eps):
    """One batch block per grid step.

    x_ref : (bt, H+4, W+4, Cin)   spatially pre-padded input block (VMEM)
    w_ref : (K*K*Cin, Cout)       conv weights, taps flattened in (kh, kw, cin) order
    b_ref : (1, Cout)             conv bias
    o_ref : (bt, Ho, Wo*Cout)     pooled output, lane-dense last dim
    """
    bt, hp, wp, cin = x_ref.shape
    h, w = hp - (K - 1), wp - (K - 1)            # conv output size == input H, W
    cout = w_ref.shape[1]
    ho, wo = o_ref.shape[1], o_ref.shape[2] // cout

    # ---- Conv2d(k=5, s=1, p=2): in-kernel im2col + a single MXU matmul -------
    taps = []
    for kh in range(K):
        for kw in range(K):
            taps.append(x_ref[:, kh:kh + h, kw:kw + w, :])      # (bt, h, w, cin)
    patches = jnp.concatenate(taps, axis=-1)                     # (bt, h, w, K*K*cin)
    patches = patches.reshape(bt * h * w, K * K * cin)
    acc = jnp.dot(patches, w_ref[...], preferred_element_type=jnp.float32)
    acc = acc + b_ref[...]                                       # (bt*h*w, cout)

    # ---- ReLU -----------------------------------------------------------------
    acc = jnp.maximum(acc, 0.0)

    # ---- InstanceNorm2d (affine=False, biased variance) per image -------------
    acc = acc.reshape(bt, h * w, cout)
    mean = jnp.mean(acc, axis=1, keepdims=True)
    var = jnp.mean(jnp.square(acc - mean), axis=1, keepdims=True)
    acc = (acc - mean) * jax.lax.rsqrt(var + eps)

    # ---- Dropout(0.25) ---------------------------------------------------------
    # TODO(synk): Dropout is identity in eval mode; training-mode stochastic dropout omitted.

    # ---- MaxPool2d(kernel=2, stride=2), entirely in registers ------------------
    acc = acc.reshape(bt, h, w, cout)[:, :2 * ho, :2 * wo, :]    # floor odd edges (PyTorch)
    acc = jnp.max(acc.reshape(bt, ho, 2, 2 * wo, cout), axis=2)  # pool rows    -> (bt, ho, 2*wo, cout)
    acc = jnp.max(acc.reshape(bt, ho, wo, 2, cout), axis=3)      # pool columns -> (bt, ho, wo, cout)

    # ---- Lane-dense output store ------------------------------------------------
    o_ref[...] = acc.reshape(bt, ho, wo * cout).astype(o_ref.dtype)


def _pick_batch_tile(batch, bytes_per_image, vmem_budget_bytes):
    """Largest batch tile that divides B, fits the VMEM budget, and keeps >=2 grid steps."""
    bt = max(1, min(batch, vmem_budget_bytes // max(1, bytes_per_image)))
    if batch >= 2:
        bt = min(bt, batch // 2)      # >=2 parallel grid steps keeps both v7x TensorCores busy
    while batch % bt:
        bt -= 1
    return bt


@jax.jit
def encoder_block(x_nchw, w_oihw, bias):
    """EncoderBlock forward (eval mode). x: (B, Cin, H, W); w: (Cout, Cin, K, K); bias: (Cout,)."""
    B, Cin, H, W = x_nchw.shape
    Cout, _, K, _ = w_oihw.shape
    pad = (K - 1) // 2
    Ho, Wo = H // 2, W // 2

    # Layout glue only: NCHW -> NHWC, spatial zero padding, flatten taps of the weights.
    x = jnp.transpose(x_nchw, (0, 2, 3, 1))
    x = jnp.pad(x, ((0, 0), (pad, pad), (pad, pad), (0, 0)))
    w_flat = jnp.transpose(w_oihw, (2, 3, 1, 0)).reshape(K * K * Cin, Cout)   # (kh,kw,cin) x cout
    b2 = bias.reshape(1, Cout)

    # Batch blocking: amortize per-step pipeline overhead within a conservative VMEM budget.
    bytes_per_image = 4 * (2 * (H + 2 * pad) * (W + 2 * pad) * Cin    # double-buffered input tile
                           + 2 * H * W * K * K * Cin                  # im2col patches (live values)
                           + 4 * H * W * Cout                         # conv/norm intermediates
                           + 2 * Ho * Wo * Cout)                      # double-buffered output tile
    bt = _pick_batch_tile(B, bytes_per_image, vmem_budget_bytes=8 * 1024 * 1024)

    kernel = functools.partial(_encoder_block_kernel, K=K, eps=1e-5)
    out = pl.pallas_call(
        kernel,
        out_shape=jax.ShapeDtypeStruct((B, Ho, Wo * Cout), x.dtype),
        grid=(B // bt,),
        in_specs=[
            pl.BlockSpec((bt, H + 2 * pad, W + 2 * pad, Cin), lambda b: (b, 0, 0, 0)),
            pl.BlockSpec((K * K * Cin, Cout), lambda b: (0, 0)),
            pl.BlockSpec((1, Cout), lambda b: (0, 0)),
        ],
        out_specs=pl.BlockSpec((bt, Ho, Wo * Cout), lambda b: (b, 0, 0)),
        compiler_params=pltpu.CompilerParams(
            dimension_semantics=("parallel",),
            vmem_limit_bytes=32 * 1024 * 1024,
        ),
    )(x, w_flat, b2)

    out = out.reshape(B, Ho, Wo, Cout)
    return jnp.transpose(out, (0, 3, 1, 2))          # back to NCHW


def encoder_block_reference(x, w, b, eps=1e-5):
    """Pure-JAX reference of the PyTorch forward (eval mode), NCHW."""
    y = jax.lax.conv_general_dilated(
        x, w, window_strides=(1, 1), padding=((2, 2), (2, 2)),
        dimension_numbers=("NCHW", "OIHW", "NCHW"))
    y = y + b[None, :, None, None]
    y = jnp.maximum(y, 0.0)
    mean = jnp.mean(y, axis=(2, 3), keepdims=True)
    var = jnp.mean((y - mean) ** 2, axis=(2, 3), keepdims=True)
    y = (y - mean) / jnp.sqrt(var + eps)
    B, C, H, W = y.shape
    y = y[:, :, :2 * (H // 2), :2 * (W // 2)]
    y = y.reshape(B, C, H // 2, 2, W // 2, 2).max(axis=(3, 5))
    return y


if __name__ == "__main__":
    key = jax.random.PRNGKey(0)
    kx, kw, kb = jax.random.split(key, 3)

    B, Cin, H, W = 2, 4, 16, 16
    Cout, K = 8, 5

    x = jax.random.normal(kx, (B, Cin, H, W), dtype=jnp.float32)
    w = 0.1 * jax.random.normal(kw, (Cout, Cin, K, K), dtype=jnp.float32)
    b = 0.1 * jax.random.normal(kb, (Cout,), dtype=jnp.float32)

    out = encoder_block(x, w, b)
    out = jax.block_until_ready(out)

    ref = encoder_block_reference(x, w, b)
    assert out.shape == (B, Cout, H // 2, W // 2), out.shape
    assert jnp.allclose(out, ref, atol=1e-4, rtol=1e-4), float(jnp.max(jnp.abs(out - ref)))

    print("KERNEL_OK")
</pallas_src>

<mosaic_0001>
module attributes {stable_mosaic.version = 11 : i64} {
  func.func @_encoder_block_kernel(%arg0: i32, %arg1: memref<1x20x20x4xf32, #tpu.memory_space<vmem>>, %arg2: memref<100x8xf32, #tpu.memory_space<vmem>>, %arg3: memref<1x8xf32, #tpu.memory_space<vmem>>, %arg4: memref<1x8x64xf32, #tpu.memory_space<vmem>>) attributes {dimension_semantics = [#tpu.dimension_semantics<parallel>], iteration_bounds = array<i64: 2>, scalar_prefetch = 0 : i64, scratch_operands = 0 : i64, tpu.core_type = #tpu.core_type<tc>, window_params = [{transform_indices = @transform_0, window_bounds = array<i64: 1, 20, 20, 4>}, {pipeline_mode = #tpu.pipeline_mode<synchronous>, transform_indices = @transform_1, window_bounds = array<i64: 100, 8>}, {pipeline_mode = #tpu.pipeline_mode<synchronous>, transform_indices = @transform_2, window_bounds = array<i64: 1, 8>}, {transform_indices = @transform_3, window_bounds = array<i64: 1, 8, 64>}]} {
    %c0 = arith.constant 0 : index
    %c0_0 = arith.constant 0 : index
    %c0_1 = arith.constant 0 : index
    %c0_2 = arith.constant 0 : index
    %0 = vector.load %arg1[%c0, %c0_0, %c0_1, %c0_2] : memref<1x20x20x4xf32, #tpu.memory_space<vmem>>, vector<1x16x16x4xf32>
    %c0_3 = arith.constant 0 : index
    %c0_4 = arith.constant 0 : index
    %c1 = arith.constant 1 : index
    %c0_5 = arith.constant 0 : index
    %1 = vector.load %arg1[%c0_3, %c0_4, %c1, %c0_5] : memref<1x20x20x4xf32, #tpu.memory_space<vmem>>, vector<1x16x16x4xf32>
    %c0_6 = arith.constant 0 : index
    %c0_7 = arith.constant 0 : index
    %c2 = arith.constant 2 : index
    %c0_8 = arith.constant 0 : index
    %2 = vector.load %arg1[%c0_6, %c0_7, %c2, %c0_8] : memref<1x20x20x4xf32, #tpu.memory_space<vmem>>, vector<1x16x16x4xf32>
    %c0_9 = arith.constant 0 : index
    %c0_10 = arith.constant 0 : index
    %c3 = arith.constant 3 : index
    %c0_11 = arith.constant 0 : index
    %3 = vector.load %arg1[%c0_9, %c0_10, %c3, %c0_11] : memref<1x20x20x4xf32, #tpu.memory_space<vmem>>, vector<1x16x16x4xf32>
    %c0_12 = arith.constant 0 : index
    %c0_13 = arith.constant 0 : index
    %c4 = arith.constant 4 : index
    %c0_14 = arith.constant 0 : index
    %4 = vector.load %arg1[%c0_12, %c0_13, %c4, %c0_14] : memref<1x20x20x4xf32, #tpu.memory_space<vmem>>, vector<1x16x16x4xf32>
    %c0_15 = arith.constant 0 : index
    %c1_16 = arith.constant 1 : index
    %c0_17 = arith.constant 0 : index
    %c0_18 = arith.constant 0 : index
    %5 = vector.load %arg1[%c0_15, %c1_16, %c0_17, %c0_18] : memref<1x20x20x4xf32, #tpu.memory_space<vmem>>, vector<1x16x16x4xf32>
    %c0_19 = arith.constant 0 : index
    %c1_20 = arith.constant 1 : index
    %c1_21 = arith.constant 1 : index
    %c0_22 = arith.constant 0 : index
    %6 = vector.load %arg1[%c0_19, %c1_20, %c1_21, %c0_22] : memref<1x20x20x4xf32, #tpu.memory_space<vmem>>, vector<1x16x16x4xf32>
    %c0_23 = arith.constant 0 : index
    %c1_24 = arith.constant 1 : index
    %c2_25 = arith.constant 2 : index
    %c0_26 = arith.constant 0 : index
    %7 = vector.load %arg1[%c0_23, %c1_24, %c2_25, %c0_26] : memref<1x20x20x4xf32, #tpu.memory_space<vmem>>, vector<1x16x16x4xf32>
    %c0_27 = arith.constant 0 : index
    %c1_28 = arith.constant 1 : index
    %c3_29 = arith.constant 3 : index
    %c0_30 = arith.constant 0 : index
    %8 = vector.load %arg1[%c0_27, %c1_28, %c3_29, %c0_30] : memref<1x20x20x4xf32, #tpu.memory_space<vmem>>, vector<1x16x16x4xf32>
    %c0_31 = arith.constant 0 : index
    %c1_32 = arith.constant 1 : index
    %c4_33 = arith.constant 4 : index
    %c0_34 = arith.constant 0 : index
    %9 = vector.load %arg1[%c0_31, %c1_32, %c4_33, %c0_34] : memref<1x20x20x4xf32, #tpu.memory_space<vmem>>, vector<1x16x16x4xf32>
    %c0_35 = arith.constant 0 : index
    %c2_36 = arith.constant 2 : index
    %c0_37 = arith.constant 0 : index
    %c0_38 = arith.constant 0 : index
    %10 = vector.load %arg1[%c0_35, %c2_36, %c0_37, %c0_38] : memref<1x20x20x4xf32, #tpu.memory_space<vmem>>, vector<1x16x16x4xf32>
    %c0_39 = arith.constant 0 : index
    %c2_40 = arith.constant 2 : index
    %c1_41 = arith.constant 1 : index
    %c0_42 = arith.constant 0 : index
    %11 = vector.load %arg1[%c0_39, %c2_40, %c1_41, %c0_42] : memref<1x20x20x4xf32, #tpu.memory_space<vmem>>, vector<1x16x16x4xf32>
    %c0_43 = arith.constant 0 : index
    %c2_44 = arith.constant 2 : index
    %c2_45 = arith.constant 2 : index
    %c0_46 = arith.constant 0 : index
    %12 = vector.load %arg1[%c0_43, %c2_44, %c2_45, %c0_46] : memref<1x20x20x4xf32, #tpu.memory_space<vmem>>, vector<1x16x16x4xf32>
    %c0_47 = arith.constant 0 : index
    %c2_48 = arith.constant 2 : index
    %c3_49 = arith.constant 3 : index
    %c0_50 = arith.constant 0 : index
    %13 = vector.load %arg1[%c0_47, %c2_48, %c3_49, %c0_50] : memref<1x20x20x4xf32, #tpu.memory_space<vmem>>, vector<1x16x16x4xf32>
    %c0_51 = arith.constant 0 : index
    %c2_52 = arith.constant 2 : index
    %c4_53 = arith.constant 4 : index
    %c0_54 = arith.constant 0 : index
    %14 = vector.load %arg1[%c0_51, %c2_52, %c4_53, %c0_54] : memref<1x20x20x4xf32, #tpu.memory_space<vmem>>, vector<1x16x16x4xf32>
    %c0_55 = arith.constant 0 : index
    %c3_56 = arith.constant 3 : index
    %c0_57 = arith.constant 0 : index
    %c0_58 = arith.constant 0 : index
    %15 = vector.load %arg1[%c0_55, %c3_56, %c0_57, %c0_58] : memref<1x20x20x4xf32, #tpu.memory_space<vmem>>, vector<1x16x16x4xf32>
    %c0_59 = arith.constant 0 : index
    %c3_60 = arith.constant 3 : index
    %c1_61 = arith.constant 1 : index
    %c0_62 = arith.constant 0 : index
    %16 = vector.load %arg1[%c0_59, %c3_60, %c1_61, %c0_62] : memref<1x20x20x4xf32, #tpu.memory_space<vmem>>, vector<1x16x16x4xf32>
    %c0_63 = arith.constant 0 : index
    %c3_64 = arith.constant 3 : index
    %c2_65 = arith.constant 2 : index
    %c0_66 = arith.constant 0 : index
    %17 = vector.load %arg1[%c0_63, %c3_64, %c2_65, %c0_66] : memref<1x20x20x4xf32, #tpu.memory_space<vmem>>, vector<1x16x16x4xf32>
    %c0_67 = arith.constant 0 : index
    %c3_68 = arith.constant 3 : index
    %c3_69 = arith.constant 3 : index
    %c0_70 = arith.constant 0 : index
    %18 = vector.load %arg1[%c0_67, %c3_68, %c3_69, %c0_70] : memref<1x20x20x4xf32, #tpu.memory_space<vmem>>, vector<1x16x16x4xf32>
    %c0_71 = arith.constant 0 : index
    %c3_72 = arith.constant 3 : index
    %c4_73 = arith.constant 4 : index
    %c0_74 = arith.constant 0 : index
    %19 = vector.load %arg1[%c0_71, %c3_72, %c4_73, %c0_74] : memref<1x20x20x4xf32, #tpu.memory_space<vmem>>, vector<1x16x16x4xf32>
    %c0_75 = arith.constant 0 : index
    %c4_76 = arith.constant 4 : index
    %c0_77 = arith.constant 0 : index
    %c0_78 = arith.constant 0 : index
    %20 = vector.load %arg1[%c0_75, %c4_76, %c0_77, %c0_78] : memref<1x20x20x4xf32, #tpu.memory_space<vmem>>, vector<1x16x16x4xf32>
    %c0_79 = arith.constant 0 : index
    %c4_80 = arith.constant 4 : index
    %c1_81 = arith.constant 1 : index
    %c0_82 = arith.constant 0 : index
    %21 = vector.load %arg1[%c0_79, %c4_80, %c1_81, %c0_82] : memref<1x20x20x4xf32, #tpu.memory_space<vmem>>, vector<1x16x16x4xf32>
    %c0_83 = arith.constant 0 : index
    %c4_84 = arith.constant 4 : index
    %c2_85 = arith.constant 2 : index
    %c0_86 = arith.constant 0 : index
    %22 = vector.load %arg1[%c0_83, %c4_84, %c2_85, %c0_86] : memref<1x20x20x4xf32, #tpu.memory_space<vmem>>, vector<1x16x16x4xf32>
    %c0_87 = arith.constant 0 : index
    %c4_88 = arith.constant 4 : index
    %c3_89 = arith.constant 3 : index
    %c0_90 = arith.constant 0 : index
    %23 = vector.load %arg1[%c0_87, %c4_88, %c3_89, %c0_90] : memref<1x20x20x4xf32, #tpu.memory_space<vmem>>, vector<1x16x16x4xf32>
    %c0_91 = arith.constant 0 : index
    %c4_92 = arith.constant 4 : index
    %c4_93 = arith.constant 4 : index
    %c0_94 = arith.constant 0 : index
    %24 = vector.load %arg1[%c0_91, %c4_92, %c4_93, %c0_94] : memref<1x20x20x4xf32, #tpu.memory_space<vmem>>, vector<1x16x16x4xf32>
    %25 = tpu.concatenate %0, %1, %2, %3, %4, %5, %6, %7, %8, %9, %10, %11, %12, %13, %14, %15 in 3 : vector<1x16x16x4xf32>, vector<1x16x16x4xf32>, vector<1x16x16x4xf32>, vector<1x16x16x4xf32>, vector<1x16x16x4xf32>, vector<1x16x16x4xf32>, vector<1x16x16x4xf32>, vector<1x16x16x4xf32>, vector<1x16x16x4xf32>, vector<1x16x16x4xf32>, vector<1x16x16x4xf32>, vector<1x16x16x4xf32>, vector<1x16x16x4xf32>, vector<1x16x16x4xf32>, vector<1x16x16x4xf32>, vector<1x16x16x4xf32> -> vector<1x16x16x64xf32>
    %26 = tpu.concatenate %16, %17, %18, %19, %20, %21, %22, %23, %24 in 3 : vector<1x16x16x4xf32>, vector<1x16x16x4xf32>, vector<1x16x16x4xf32>, vector<1x16x16x4xf32>, vector<1x16x16x4xf32>, vector<1x16x16x4xf32>, vector<1x16x16x4xf32>, vector<1x16x16x4xf32>, vector<1x16x16x4xf32> -> vector<1x16x16x36xf32>
    %27 = tpu.concatenate %25, %26 in 3 : vector<1x16x16x64xf32>, vector<1x16x16x36xf32> -> vector<1x16x16x100xf32>
    %28 = vector.shape_cast %27 : vector<1x16x16x100xf32> to vector<256x100xf32>
    %c0_95 = arith.constant 0 : index
    %c0_96 = arith.constant 0 : index
    %29 = vector.load %arg2[%c0_95, %c0_96] : memref<100x8xf32, #tpu.memory_space<vmem>>, vector<100x8xf32>
    %cst = arith.constant dense<0.000000e+00> : vector<256x8xf32>
    %30 = tpu.matmul %28, %29, %cst {dimension_numbers = #tpu.dot_dimension_numbers<[1], [0], [0], [1], [0, 0, 1, 1], [], []>} : vector<256x100xf32>, vector<100x8xf32>, vector<256x8xf32> -> vector<256x8xf32>
    %c0_97 = arith.constant 0 : index
    %c0_98 = arith.constant 0 : index
    %31 = vector.load %arg3[%c0_97, %c0_98] : memref<1x8xf32, #tpu.memory_space<vmem>>, vector<1x8xf32>
    %32 = vector.broadcast %31 : vector<1x8xf32> to vector<256x8xf32>
    %33 = arith.addf %30, %32 : vector<256x8xf32>
    %cst_99 = arith.constant 0.000000e+00 : f32
    %34 = vector.broadcast %cst_99 : f32 to vector<256x8xf32>
    %35 = arith.maximumf %33, %34 : vector<256x8xf32>
    %36 = vector.shape_cast %35 : vector<256x8xf32> to vector<1x256x8xf32>
    %cst_100 = arith.constant dense<0.000000e+00> : vector<1x8xf32>
    %37 = vector.multi_reduction <add>, %36, %cst_100 [1] : vector<1x256x8xf32> to vector<1x8xf32>
    %38 = vector.shape_cast %37 : vector<1x8xf32> to vector<1x1x8xf32>
    %cst_101 = arith.constant 2.560000e+02 : f32
    %39 = vector.broadcast %cst_101 : f32 to vector<1x1x8xf32>
    %40 = arith.divf %38, %39 : vector<1x1x8xf32>
    %41 = vector.broadcast %40 : vector<1x1x8xf32> to vector<1x256x8xf32>
    %42 = arith.subf %36, %41 : vector<1x256x8xf32>
    %43 = arith.mulf %42, %42 : vector<1x256x8xf32>
    %cst_102 = arith.constant dense<0.000000e+00> : vector<1x8xf32>
    %44 = vector.multi_reduction <add>, %43, %cst_102 [1] : vector<1x256x8xf32> to vector<1x8xf32>
    %45 = vector.shape_cast %44 : vector<1x8xf32> to vector<1x1x8xf32>
    %cst_103 = arith.constant 2.560000e+02 : f32
    %46 = vector.broadcast %cst_103 : f32 to vector<1x1x8xf32>
    %47 = arith.divf %45, %46 : vector<1x1x8xf32>
    %48 = vector.broadcast %40 : vector<1x1x8xf32> to vector<1x256x8xf32>
    %49 = arith.subf %36, %48 : vector<1x256x8xf32>
    %cst_104 = arith.constant 9.99999974E-6 : f32
    %50 = vector.broadcast %cst_104 : f32 to vector<1x1x8xf32>
    %51 = arith.addf %47, %50 : vector<1x1x8xf32>
    %52 = math.rsqrt %51 : vector<1x1x8xf32>
    %53 = vector.broadcast %52 : vector<1x1x8xf32> to vector<1x256x8xf32>
    %54 = arith.mulf %49, %53 : vector<1x256x8xf32>
    %55 = vector.shape_cast %54 : vector<1x256x8xf32> to vector<1x16x16x8xf32>
    %56 = vector.shape_cast %55 : vector<1x16x16x8xf32> to vector<1x8x2x16x8xf32>
    %cst_105 = arith.constant dense<0xFF800000> : vector<1x8x16x8xf32>
    %57 = vector.multi_reduction <maximumf>, %56, %cst_105 [2] : vector<1x8x2x16x8xf32> to vector<1x8x16x8xf32>
    %58 = vector.shape_cast %57 : vector<1x8x16x8xf32> to vector<1x8x8x2x8xf32>
    %cst_106 = arith.constant dense<0xFF800000> : vector<1x8x8x8xf32>
    %59 = vector.multi_reduction <maximumf>, %58, %cst_106 [3] : vector<1x8x8x2x8xf32> to vector<1x8x8x8xf32>
    %60 = vector.shape_cast %59 : vector<1x8x8x8xf32> to vector<1x8x64xf32>
    %c0_107 = arith.constant 0 : index
    %c0_108 = arith.constant 0 : index
    %c0_109 = arith.constant 0 : index
    %61 = vector.load %arg4[%c0_107, %c0_108, %c0_109] : memref<1x8x64xf32, #tpu.memory_space<vmem>>, vector<1x8x64xf32>
    tpu.vector_store %arg4[%c0_107, %c0_108, %c0_109], %60 {strides = array<i32>} : memref<1x8x64xf32, #tpu.memory_space<vmem>>, vector<1x8x64xf32>,
    return
  }
  func.func @transform_0(%arg0: i32) -> (i32, i32, i32, i32) {
    %c0_i32 = arith.constant 0 : i32
    %c0_i32_0 = arith.constant 0 : i32
    %c0_i32_1 = arith.constant 0 : i32
    %c0_i32_2 = arith.constant 0 : i32
    return %arg0, %c0_i32, %c0_i32_0, %c0_i32_1 : i32, i32, i32, i32
  }
  func.func @transform_1(%arg0: i32) -> (i32, i32) {
    %c0_i32 = arith.constant 0 : i32
    %c0_i32_0 = arith.constant 0 : i32
    %c0_i32_1 = arith.constant 0 : i32
    return %c0_i32, %c0_i32_0 : i32, i32
  }
  func.func @transform_2(%arg0: i32) -> (i32, i32) {
    %c0_i32 = arith.constant 0 : i32
    %c0_i32_0 = arith.constant 0 : i32
    %c0_i32_1 = arith.constant 0 : i32
    return %c0_i32, %c0_i32_0 : i32, i32
  }
  func.func @transform_3(%arg0: i32) -> (i32, i32, i32) {
    %c0_i32 = arith.constant 0 : i32
    %c0_i32_0 = arith.constant 0 : i32
    %c0_i32_1 = arith.constant 0 : i32
    return %arg0, %c0_i32, %c0_i32_0 : i32, i32, i32
  }
}

</mosaic_0001>

<bundles_post_ra>
// kernel: encoder_block.1
= control target key start
LH: loop header
LB: loop body
LE: loop exit
PB: predicated region body
PF: predicated region fallthrough
CT: control target
= control target key end

     0   :  { %s7623_s12 = smov 0   ;;  %s13591_s0 = inlined_call_operand.vmem [shape: f32[2,20,20,4], index: 0, kind: input, shape index: {}]   ;;  %s13592_s1 = inlined_call_operand.vmem [shape: f32[100,8], index: 1, kind: input, shape index: {}]   ;;  %s13593_s2 = inlined_call_operand.vmem [shape: f32[1,8], index: 2, kind: input, shape index: {}]   ;;  %s13594_s3 = inlined_call_operand.vmem [shape: f32[2,8,64], index: 3, kind: output, shape index: {}]  }
   0x1 LB: > { %s6655_s13 = sadd.s32 4294967295, %s7583_s12   ;;  %p6659_p0 = scmp.ge.s32.totalorder %s7583_s12, 1  ;;  %s7583_s12 = sphi %s7623_s12, %s13_s12  }
   0x2   : > { %p137_p1 = scmp.lt.s32.totalorder %s7583_s12, 3 }
   0x4   : > { %p138_p2 = pnand %p6659_p0, %p137_p1 }
   0x6   : > { %141 = sbr.rel (%p138_p2) target bundleno = 2355 (0x933), region = 32 }
   0xb   : > { %p160_p3 = scmp.lt.s32.totalorder %s6655_s13, 1  ;;  %s7585_s18 = smov 4   ;;  %vm2893_vm0 = vcmask 31744   ;;  %vm2926_vm1 = vcmask 64512   ;;  %vm2959_vm2 = vcmask 97280   ;;  %vm2992_vm3 = vcmask 130048  }
   0xc   : > { %s7586_s19 = smov 8   ;;  %s7587_s20 = smov 12   ;;  %vm3025_vm4 = vcmask 162816   ;;  %vm3058_vm5 = vcmask 195584   ;;  %vm3091_vm6 = vcmask 228352   ;;  %vm13613_vm7 = vcmask 261120  }
   0xd   : > { %s14849_s13 = smov (!%p160_p3, %s6655_s13), 1  ;;  %s7588_s21 = smov 16   ;;  %vm3157_vm8 = vcmask 293888   ;;  %vm3190_vm9 = vcmask 326656   ;;  %vm3223_vm10 = vcmask 359424   ;;  %vm3256_vm11 = vcmask 392192  }
   0xe   : > { %s7483_s14 = smul.u32 480, %s14849_s13  ;;  %s7589_s22 = smov 20   ;;  %vm3289_vm12 = vcmask 424960   ;;  %vm4946_vm13 = vcmask 1043456   ;;  %vm3322_vm14 = vcmask 457728   ;;  %vm3355_vm15 = vcmask 490496  }
   0xf   : > { %s7590_s23 = smov 24   ;;  %s7591_s24 = smov 28  }
  0x10   : > { %s7637_s17 = scalar_lea.vmem %s13591_s0, %s7483_s14  ;;  %s7592_s25 = smov 32  }
  0x11   : > { %v203_v0 = vld [vmem:[%s7637_s17 + $0x19] sm:$0xff]  ;;  %v201_v1 = vld [vmem:[%s7637_s17 + $0x1] sm:$0xff]  ;;  %v202_v3 = vld [vmem:[%s7637_s17 + $0x9] sm:$0xff]  ;;  %s7593_s26 = smov 36   ;;  %s7594_s27 = smov 40  }
  0x12   : > { %1009 = vrot.lane.b32.xlu1 %v203_v0, %s7585_s18  ;;  %1005 = vrot.lane.b32.xlu0 %v201_v1, %s7585_s18  ;;  %v204_v2 = vld [vmem:[%s7637_s17 + $0x21] sm:$0xff]  ;;  %v206_v4 = vld [vmem:[%s7637_s17 + $0x39] sm:$0xff]  ;;  %s7595_s28 = smov 44   ;;  %s7596_s29 = smov 48  }
  0x13   : > { %v205_v5 = vld [vmem:[%s7637_s17 + $0x31] sm:$0xff]  ;;  %v207_v7 = vld [vmem:[%s7637_s17 + $0x49] sm:$0xff]  ;;  %v209_v9 = vld [vmem:[%s7637_s17 + $0x61] sm:$0xff]  ;;  %s7597_s30 = smov 52   ;;  %s7598_s4 = smov 56  }
  0x14   : > { %v208_v6 = vld [vmem:[%s7637_s17 + $0x51] sm:$0xff]  ;;  %v210_v8 = vld [vmem:[%s7637_s17 + $0x69] sm:$0xff]  ;;  %v212_v10 = vld [vmem:[%s7637_s17 + $0x81] sm:$0xff]  ;;  %s7599_s5 = smov 60  }
  0x15   : > { %v211_v11 = vld [vmem:[%s7637_s17 + $0x79] sm:$0xff]  ;;  %v213_v13 = vld [vmem:[%s7637_s17 + $0x91] sm:$0xff]  ;;  %v215_v15 = vld [vmem:[%s7637_s17 + $0xa9] sm:$0xff] }
  0x16   : > { %1011 = vrot.lane.b32.xlu1 %v204_v2, %s7585_s18  ;;  %1007 = vrot.lane.b32.xlu0 %v202_v3, %s7585_s18  ;;  %v214_v12 = vld [vmem:[%s7637_s17 + $0x99] sm:$0xff]  ;;  %v216_v14 = vld [vmem:[%s7637_s17 + $0xb1] sm:$0xff] }
  0x17   : > { %v218_v16 = vld [vmem:[%s7637_s17 + $0xc9] sm:$0xff]  ;;  %v217_v17 = vld [vmem:[%s7637_s17 + $0xc1] sm:$0xff]  ;;  %v219_v19 = vld [vmem:[%s7637_s17 + $0xd9] sm:$0xff] }
  0x18   : > { %v220_v18 = vld [vmem:[%s7637_s17 + $0xe1] sm:$0xff]  ;;  %v222_v20 = vld [vmem:[%s7637_s17 + $0xf9] sm:$0xff]  ;;  %v221_v21 = vld [vmem:[%s7637_s17 + $0xf1] sm:$0xff] }
  0x19   : > { %v224_v22 = vld [vmem:[%s7637_s17 + $0x111] sm:$0xff]  ;;  %v223_v23 = vld [vmem:[%s7637_s17 + $0x109] sm:$0xff]  ;;  %v225_v25 = vld [vmem:[%s7637_s17 + $0x121] sm:$0xff] }
  0x1a   : > { %1015 = vrot.lane.b32.xlu1 %v206_v4, %s7585_s18  ;;  %1013 = vrot.lane.b32.xlu0 %v205_v5, %s7585_s18  ;;  %v226_v24 = vld [vmem:[%s7637_s17 + $0x129] sm:$0xff]  ;;  %v228_v26 = vld [vmem:[%s7637_s17 + $0x141] sm:$0xff] }
  0x1b   : > { %v227_v27 = vld [vmem:[%s7637_s17 + $0x139] sm:$0xff]  ;;  %v229_v29 = vld [vmem:[%s7637_s17 + $0x151] sm:$0xff]  ;;  %v231_v31 = vld [vmem:[%s7637_s17 + $0x169] sm:$0xff] }
  0x1c   : > { %v230_v28 = vld [vmem:[%s7637_s17 + $0x159] sm:$0xff]  ;;  %v232_v30 = vld [vmem:[%s7637_s17 + $0x171] sm:$0xff]  ;;  %v233_v33 = vld [vmem:[%s7637_s17 + $0x2] sm:$0xff] }
  0x1d   : > { %v234_v32 = vld [vmem:[%s7637_s17 + $0xa] sm:$0xff]  ;;  %v236_v34 = vld [vmem:[%s7637_s17 + $0x22] sm:$0xff]  ;;  %v235_v35 = vld [vmem:[%s7637_s17 + $0x1a] sm:$0xff] }
  0x1e   : > { %1019 = vrot.lane.b32.xlu1 %v208_v6, %s7585_s18  ;;  %1017 = vrot.lane.b32.xlu0 %v207_v7, %s7585_s18  ;;  %v238_v36 = vld [vmem:[%s7637_s17 + $0x3a] sm:$0xff]  ;;  %v237_v37 = vld [vmem:[%s7637_s17 + $0x32] sm:$0xff] }
  0x1f   : > { %v240_v38 = vld [vmem:[%s7637_s17 + $0x52] sm:$0xff]  ;;  %v239_v39 = vld [vmem:[%s7637_s17 + $0x4a] sm:$0xff]  ;;  %v241_v41 = vld [vmem:[%s7637_s17 + $0x62] sm:$0xff] }
  0x20   : > { %v242_v40 = vld [vmem:[%s7637_s17 + $0x6a] sm:$0xff]  ;;  %v244_v42 = vld [vmem:[%s7637_s17 + $0x82] sm:$0xff]  ;;  %v243_v43 = vld [vmem:[%s7637_s17 + $0x7a] sm:$0xff] }
  0x21   : > { %v246_v44 = vld [vmem:[%s7637_s17 + $0x9a] sm:$0xff]  ;;  %v245_v45 = vld [vmem:[%s7637_s17 + $0x92] sm:$0xff]  ;;  %v247_v47 = vld [vmem:[%s7637_s17 + $0xaa] sm:$0xff] }
  0x22   : > { %1023 = vrot.lane.b32.xlu1 %v210_v8, %s7585_s18  ;;  %1021 = vrot.lane.b32.xlu0 %v209_v9, %s7585_s18  ;;  %v248_v46 = vld [vmem:[%s7637_s17 + $0xb2] sm:$0xff]  ;;  %v250_v48 = vld [vmem:[%s7637_s17 + $0xca] sm:$0xff] }
  0x23   : > { %v249_v49 = vld [vmem:[%s7637_s17 + $0xc2] sm:$0xff]  ;;  %v251_v51 = vld [vmem:[%s7637_s17 + $0xda] sm:$0xff]  ;;  %v253_v53 = vld [vmem:[%s7637_s17 + $0xf2] sm:$0xff] }
  0x24   : > { %v252_v50 = vld [vmem:[%s7637_s17 + $0xe2] sm:$0xff]  ;;  %v254_v52 = vld [vmem:[%s7637_s17 + $0xfa] sm:$0xff]  ;;  %v256_v54 = vld [vmem:[%s7637_s17 + $0x112] sm:$0xff] }
  0x25   : > { %v255_v55 = vld [vmem:[%s7637_s17 + $0x10a] sm:$0xff]  ;;  %v257_v57 = vld [vmem:[%s7637_s17 + $0x122] sm:$0xff]  ;;  %v259_v59 = vld [vmem:[%s7637_s17 + $0x13a] sm:$0xff] }
  0x26   : > { %1027 = vrot.lane.b32.xlu1 %v212_v10, %s7585_s18  ;;  %1025 = vrot.lane.b32.xlu0 %v211_v11, %s7585_s18  ;;  %v258_v56 = vld [vmem:[%s7637_s17 + $0x12a] sm:$0xff]  ;;  %v260_v58 = vld [vmem:[%s7637_s17 + $0x142] sm:$0xff] }
  0x27   : > { %v262_v62 = vld [vmem:[%s7637_s17 + $0x15a] sm:$0xff]  ;;  %v261_v63 = vld [vmem:[%s7637_s17 + $0x152] sm:$0xff]  ;;  %v263_v3 = vld [vmem:[%s7637_s17 + $0x16a] sm:$0xff] }
  0x28   : > { %v264_v2 = vld [vmem:[%s7637_s17 + $0x172] sm:$0xff]  ;;  %v265_v7 = vld [vmem:[%s7637_s17 + $0x3] sm:$0xff]  ;;  %v267_v11 = vld [vmem:[%s7637_s17 + $0x1b] sm:$0xff] }
  0x29   : > { %v266_v6 = vld [vmem:[%s7637_s17 + $0xb] sm:$0xff]  ;;  %v268_v10 = vld [vmem:[%s7637_s17 + $0x23] sm:$0xff] }
  0x2a   : > { %1031 = vrot.lane.b32.xlu1 %v214_v12, %s7585_s18  ;;  %1029 = vrot.lane.b32.xlu0 %v213_v13, %s7585_s18 }
  0x2e   : > { %1035 = vrot.lane.b32.xlu1 %v216_v14, %s7585_s18  ;;  %1033 = vrot.lane.b32.xlu0 %v215_v15, %s7585_s18  ;;  %v270_v14 = vld [vmem:[%s7637_s17 + $0x3b] sm:$0xff]  ;;  %v269_v15 = vld [vmem:[%s7637_s17 + $0x33] sm:$0xff] }
  0x32   : > { %1039 = vrot.lane.b32.xlu1 %v218_v16, %s7585_s18  ;;  %1037 = vrot.lane.b32.xlu0 %v217_v17, %s7585_s18 }
  0x36   : > { %1043 = vrot.lane.b32.xlu1 %v220_v18, %s7585_s18  ;;  %1041 = vrot.lane.b32.xlu0 %v219_v19, %s7585_s18  ;;  %v272_v18 = vld [vmem:[%s7637_s17 + $0x53] sm:$0xff]  ;;  %v271_v19 = vld [vmem:[%s7637_s17 + $0x4b] sm:$0xff] }
  0x3a   : > { %1047 = vrot.lane.b32.xlu1 %v222_v20, %s7585_s18  ;;  %1045 = vrot.lane.b32.xlu0 %v221_v21, %s7585_s18 }
  0x3e   : > { %1051 = vrot.lane.b32.xlu1 %v224_v22, %s7585_s18  ;;  %1049 = vrot.lane.b32.xlu0 %v223_v23, %s7585_s18  ;;  %v274_v22 = vld [vmem:[%s7637_s17 + $0x6b] sm:$0xff]  ;;  %v273_v23 = vld [vmem:[%s7637_s17 + $0x63] sm:$0xff] }
  0x42   : > { %1055 = vrot.lane.b32.xlu1 %v226_v24, %s7585_s18  ;;  %1053 = vrot.lane.b32.xlu0 %v225_v25, %s7585_s18 }
  0x46   : > { %1059 = vrot.lane.b32.xlu1 %v228_v26, %s7585_s18  ;;  %1057 = vrot.lane.b32.xlu0 %v227_v27, %s7585_s18  ;;  %v276_v26 = vld [vmem:[%s7637_s17 + $0x83] sm:$0xff]  ;;  %v275_v27 = vld [vmem:[%s7637_s17 + $0x7b] sm:$0xff] }
  0x4a   : > { %1063 = vrot.lane.b32.xlu1 %v230_v28, %s7585_s18  ;;  %1061 = vrot.lane.b32.xlu0 %v229_v29, %s7585_s18 }
  0x4e   : > { %1067 = vrot.lane.b32.xlu1 %v232_v30, %s7585_s18  ;;  %1065 = vrot.lane.b32.xlu0 %v231_v31, %s7585_s18  ;;  %v278_v30 = vld [vmem:[%s7637_s17 + $0x9b] sm:$0xff]  ;;  %v277_v31 = vld [vmem:[%s7637_s17 + $0x93] sm:$0xff] }
  0x52   : > { %1135 = vrot.lane.b32.xlu1 %v234_v32, %s7586_s19  ;;  %1133 = vrot.lane.b32.xlu0 %v233_v33, %s7586_s19 }
  0x56   : > { %1139 = vrot.lane.b32.xlu1 %v236_v34, %s7586_s19  ;;  %1137 = vrot.lane.b32.xlu0 %v235_v35, %s7586_s19  ;;  %v280_v34 = vld [vmem:[%s7637_s17 + $0xb3] sm:$0xff]  ;;  %v279_v35 = vld [vmem:[%s7637_s17 + $0xab] sm:$0xff] }
  0x5a   : > { %1143 = vrot.lane.b32.xlu1 %v238_v36, %s7586_s19  ;;  %1141 = vrot.lane.b32.xlu0 %v237_v37, %s7586_s19 }
  0x5e   : > { %1147 = vrot.lane.b32.xlu1 %v240_v38, %s7586_s19  ;;  %1145 = vrot.lane.b32.xlu0 %v239_v39, %s7586_s19  ;;  %v282_v38 = vld [vmem:[%s7637_s17 + $0xcb] sm:$0xff]  ;;  %v281_v39 = vld [vmem:[%s7637_s17 + $0xc3] sm:$0xff] }
  0x62   : > { %1151 = vrot.lane.b32.xlu1 %v242_v40, %s7586_s19  ;;  %1149 = vrot.lane.b32.xlu0 %v241_v41, %s7586_s19 }
  0x66   : > { %1155 = vrot.lane.b32.xlu1 %v244_v42, %s7586_s19  ;;  %1153 = vrot.lane.b32.xlu0 %v243_v43, %s7586_s19  ;;  %v284_v42 = vld [vmem:[%s7637_s17 + $0xe3] sm:$0xff]  ;;  %v283_v43 = vld [vmem:[%s7637_s17 + $0xdb] sm:$0xff] }
  0x6a   : > { %1159 = vrot.lane.b32.xlu1 %v246_v44, %s7586_s19  ;;  %1157 = vrot.lane.b32.xlu0 %v245_v45, %s7586_s19 }
  0x6e   : > { %1163 = vrot.lane.b32.xlu1 %v248_v46, %s7586_s19  ;;  %1161 = vrot.lane.b32.xlu0 %v247_v47, %s7586_s19  ;;  %v286_v46 = vld [vmem:[%s7637_s17 + $0xfb] sm:$0xff]  ;;  %v285_v47 = vld [vmem:[%s7637_s17 + $0xf3] sm:$0xff] }
  0x72   : > { %1167 = vrot.lane.b32.xlu1 %v250_v48, %s7586_s19  ;;  %1165 = vrot.lane.b32.xlu0 %v249_v49, %s7586_s19 }
  0x76   : > { %1171 = vrot.lane.b32.xlu1 %v252_v50, %s7586_s19  ;;  %1169 = vrot.lane.b32.xlu0 %v251_v51, %s7586_s19  ;;  %v288_v50 = vld [vmem:[%s7637_s17 + $0x113] sm:$0xff]  ;;  %v287_v51 = vld [vmem:[%s7637_s17 + $0x10b] sm:$0xff] }
  0x7a   : > { %1175 = vrot.lane.b32.xlu1 %v254_v52, %s7586_s19  ;;  %1173 = vrot.lane.b32.xlu0 %v253_v53, %s7586_s19 }
  0x7e   : > { %1179 = vrot.lane.b32.xlu1 %v256_v54, %s7586_s19  ;;  %1177 = vrot.lane.b32.xlu0 %v255_v55, %s7586_s19  ;;  %v290_v54 = vld [vmem:[%s7637_s17 + $0x12b] sm:$0xff]  ;;  %v289_v55 = vld [vmem:[%s7637_s17 + $0x123] sm:$0xff] }
  0x82   : > { %1183 = vrot.lane.b32.xlu1 %v258_v56, %s7586_s19  ;;  %1181 = vrot.lane.b32.xlu0 %v257_v57, %s7586_s19 }
  0x84   : > { %v7757_v60 = vpop.permute.xlu1 %1009  ;;  %v7759_v61 = vpop.permute.xlu0 %1005 }
  0x85   : > { %13631 = vst [vmem:[#allocation2_spill] sm:$0xff] %v7757_v60  ;;  %13632 = vst [vmem:[#allocation3_spill] sm:$0xff] %v7759_v61 }
  0x86   : > { %1187 = vrot.lane.b32.xlu1 %v260_v58, %s7586_s19  ;;  %1185 = vrot.lane.b32.xlu0 %v259_v59, %s7586_s19  ;;  %v292_v58 = vld [vmem:[%s7637_s17 + $0x143] sm:$0xff]  ;;  %v291_v59 = vld [vmem:[%s7637_s17 + $0x13b] sm:$0xff] }
  0x88   : > { %v7765_v0 = vpop.permute.xlu1 %1011  ;;  %v7767_v1 = vpop.permute.xlu0 %1007 }
  0x89   : > { %13633 = vst [vmem:[#allocation4_spill] sm:$0xff] %v7765_v0  ;;  %13634 = vst [vmem:[#allocation5_spill] sm:$0xff] %v7767_v1  ;;  %v6882_v0 = vld [vmem:[%s7637_s17 + $0x181] sm:$0xff] }
  0x8a   : > { %1191 = vrot.lane.b32.xlu1 %v262_v62, %s7586_s19  ;;  %1189 = vrot.lane.b32.xlu0 %v261_v63, %s7586_s19 }
  0x8c   : > { %v7773_v4 = vpop.permute.xlu1 %1015  ;;  %v7775_v5 = vpop.permute.xlu0 %1013 }
  0x8d   : > { %13635 = vst [vmem:[#allocation6_spill] sm:$0xff] %v7773_v4  ;;  %13636 = vst [vmem:[#allocation7_spill] sm:$0xff] %v7775_v5  ;;  %v6880_v4 = vld [vmem:[%s7637_s17 + $0x169] sm:$0xff] }
  0x8e   : > { %1195 = vrot.lane.b32.xlu1 %v264_v2, %s7586_s19  ;;  %1193 = vrot.lane.b32.xlu0 %v263_v3, %s7586_s19  ;;  %v294_v2 = vld [vmem:[%s7637_s17 + $0x15b] sm:$0xff]  ;;  %v293_v3 = vld [vmem:[%s7637_s17 + $0x153] sm:$0xff] }
  0x90   : > { %v7781_v8 = vpop.permute.xlu1 %1019  ;;  %v7783_v9 = vpop.permute.xlu0 %1017 }
  0x91   : > { %13637 = vst [vmem:[#allocation8_spill] sm:$0xff] %v7781_v8  ;;  %13638 = vst [vmem:[#allocation9_spill] sm:$0xff] %v7783_v9 }
  0x92   : > { %1263 = vrot.lane.b32.xlu1 %v266_v6, %s7587_s20  ;;  %1261 = vrot.lane.b32.xlu0 %v265_v7, %s7587_s20 }
  0x94   : > { %v7789_v12 = vpop.permute.xlu1 %1023  ;;  %v7791_v13 = vpop.permute.xlu0 %1021 }
  0x95   : > { %13639 = vst [vmem:[#allocation10_spill] sm:$0xff] %v7789_v12  ;;  %13640 = vst [vmem:[#allocation11_spill] sm:$0xff] %v7791_v13  ;;  %v6850_v12 = vld [vmem:[%s7637_s17 + $0x180] sm:$0xff] }
  0x96   : > { %1267 = vrot.lane.b32.xlu1 %v268_v10, %s7587_s20  ;;  %1265 = vrot.lane.b32.xlu0 %v267_v11, %s7587_s20  ;;  %v296_v10 = vld [vmem:[%s7637_s17 + $0x173] sm:$0xff]  ;;  %v295_v11 = vld [vmem:[%s7637_s17 + $0x16b] sm:$0xff] }
  0x98   : > { %v7797_v16 = vpop.permute.xlu1 %1027  ;;  %v7799_v17 = vpop.permute.xlu0 %1025 }
  0x99   : > { %13641 = vst [vmem:[#allocation12_spill] sm:$0xff] %v7797_v16  ;;  %13642 = vst [vmem:[#allocation13_spill] sm:$0xff] %v7799_v17  ;;  %v6848_v16 = vld [vmem:[%s7637_s17 + $0x168] sm:$0xff] }
  0x9a   : > { %1271 = vrot.lane.b32.xlu1 %v270_v14, %s7587_s20  ;;  %1269 = vrot.lane.b32.xlu0 %v269_v15, %s7587_s20 }
  0x9c   : > { %v7805_v20 = vpop.permute.xlu1 %1031  ;;  %v7807_v21 = vpop.permute.xlu0 %1029 }
  0x9d   : > { %13643 = vst [vmem:[#allocation14_spill] sm:$0xff] %v7805_v20  ;;  %13644 = vst [vmem:[#allocation15_spill] sm:$0xff] %v7807_v21 }
  0x9e   : > { %1275 = vrot.lane.b32.xlu1 %v272_v18, %s7587_s20  ;;  %1273 = vrot.lane.b32.xlu0 %v271_v19, %s7587_s20  ;;  %v298_v18 = vld [vmem:[%s7637_s17 + $0xc] sm:$0xff]  ;;  %v297_v19 = vld [vmem:[%s7637_s17 + $0x4] sm:$0xff] }
  0xa0   : > { %v7813_v24 = vpop.permute.xlu1 %1035  ;;  %v7815_v25 = vpop.permute.xlu0 %1033 }
  0xa1   : > { %13645 = vst [vmem:[#allocation16_spill] sm:$0xff] %v7813_v24  ;;  %13646 = vst [vmem:[#allocation17_spill] sm:$0xff] %v7815_v25  ;;  %v6818_v24 = vld [vmem:[%s7637_s17 + $0x16c] sm:$0xff] }
  0xa2   : > { %1279 = vrot.lane.b32.xlu1 %v274_v22, %s7587_s20  ;;  %1277 = vrot.lane.b32.xlu0 %v273_v23, %s7587_s20 }
  0xa4   : > { %v7821_v28 = vpop.permute.xlu1 %1039  ;;  %v7823_v29 = vpop.permute.xlu0 %1037 }
  0xa5   : > { %13647 = vst [vmem:[#allocation18_spill] sm:$0xff] %v7821_v28  ;;  %13648 = vst [vmem:[#allocation19_spill] sm:$0xff] %v7823_v29  ;;  %v6816_v28 = vld [vmem:[%s7637_s17 + $0x154] sm:$0xff] }
  0xa6   : > { %1283 = vrot.lane.b32.xlu1 %v276_v26, %s7587_s20  ;;  %1281 = vrot.lane.b32.xlu0 %v275_v27, %s7587_s20  ;;  %v300_v26 = vld [vmem:[%s7637_s17 + $0x24] sm:$0xff]  ;;  %v299_v27 = vld [vmem:[%s7637_s17 + $0x1c] sm:$0xff] }
  0xa8   : > { %v7829_v32 = vpop.permute.xlu1 %1043  ;;  %v7831_v33 = vpop.permute.xlu0 %1041 }
  0xa9   : > { %13649 = vst [vmem:[#allocation20_spill] sm:$0xff] %v7829_v32  ;;  %13650 = vst [vmem:[#allocation21_spill] sm:$0xff] %v7831_v33 }
  0xaa   : > { %1287 = vrot.lane.b32.xlu1 %v278_v30, %s7587_s20  ;;  %1285 = vrot.lane.b32.xlu0 %v277_v31, %s7587_s20 }
  0xac   : > { %v7837_v36 = vpop.permute.xlu1 %1047  ;;  %v7839_v37 = vpop.permute.xlu0 %1045 }
  0xad   : > { %13651 = vst [vmem:[#allocation22_spill] sm:$0xff] %v7837_v36  ;;  %13652 = vst [vmem:[#allocation23_spill] sm:$0xff] %v7839_v37  ;;  %v6786_v36 = vld [vmem:[%s7637_s17 + $0x16b] sm:$0xff] }
  0xae   : > { %1291 = vrot.lane.b32.xlu1 %v280_v34, %s7587_s20  ;;  %1289 = vrot.lane.b32.xlu0 %v279_v35, %s7587_s20  ;;  %v302_v34 = vld [vmem:[%s7637_s17 + $0x3c] sm:$0xff]  ;;  %v301_v35 = vld [vmem:[%s7637_s17 + $0x34] sm:$0xff] }
  0xb0   : > { %v7845_v40 = vpop.permute.xlu1 %1051  ;;  %v7847_v41 = vpop.permute.xlu0 %1049 }
  0xb1   : > { %13653 = vst [vmem:[#allocation24_spill] sm:$0xff] %v7845_v40  ;;  %13654 = vst [vmem:[#allocation25_spill] sm:$0xff] %v7847_v41  ;;  %v6784_v40 = vld [vmem:[%s7637_s17 + $0x153] sm:$0xff] }
  0xb2   : > { %1295 = vrot.lane.b32.xlu1 %v282_v38, %s7587_s20  ;;  %1293 = vrot.lane.b32.xlu0 %v281_v39, %s7587_s20 }
  0xb4   : > { %v7853_v44 = vpop.permute.xlu1 %1055  ;;  %v7855_v45 = vpop.permute.xlu0 %1053 }
  0xb5   : > { %13655 = vst [vmem:[#allocation26_spill] sm:$0xff] %v7853_v44  ;;  %13656 = vst [vmem:[#allocation27_spill] sm:$0xff] %v7855_v45 }
  0xb6   : > { %1299 = vrot.lane.b32.xlu1 %v284_v42, %s7587_s20  ;;  %1297 = vrot.lane.b32.xlu0 %v283_v43, %s7587_s20  ;;  %v304_v42 = vld [vmem:[%s7637_s17 + $0x54] sm:$0xff]  ;;  %v303_v43 = vld [vmem:[%s7637_s17 + $0x4c] sm:$0xff] }
  0xb8   : > { %v7861_v48 = vpop.permute.xlu1 %1059  ;;  %v7863_v49 = vpop.permute.xlu0 %1057 }
  0xba   : > { %1303 = vrot.lane.b32.xlu1 %v286_v46, %s7587_s20  ;;  %1301 = vrot.lane.b32.xlu0 %v285_v47, %s7587_s20 }
  0xbc   : > { %v7869_v52 = vpop.permute.xlu1 %1063  ;;  %v7871_v53 = vpop.permute.xlu0 %1061 }
  0xbe   : > { %1307 = vrot.lane.b32.xlu1 %v288_v50, %s7587_s20  ;;  %1305 = vrot.lane.b32.xlu0 %v287_v51, %s7587_s20  ;;  %v306_v50 = vld [vmem:[%s7637_s17 + $0x6c] sm:$0xff]  ;;  %v305_v51 = vld [vmem:[%s7637_s17 + $0x64] sm:$0xff] }
  0xc0   : > { %v7877_v56 = vpop.permute.xlu1 %1067  ;;  %v7879_v57 = vpop.permute.xlu0 %1065 }
  0xc2   : > { %1311 = vrot.lane.b32.xlu1 %v290_v54, %s7587_s20  ;;  %1309 = vrot.lane.b32.xlu0 %v289_v55, %s7587_s20 }
  0xc4   : > { %v7885_v62 = vpop.permute.xlu1 %1135  ;;  %v7887_v63 = vpop.permute.xlu0 %1133 }
  0xc5   : > { %13657 = vst [vmem:[#allocation28_spill] sm:$0xff] %v7885_v62  ;;  %13658 = vst [vmem:[#allocation29_spill] sm:$0xff] %v7887_v63  ;;  %v6754_v62 = vld [vmem:[%s7637_s17 + $0x16a] sm:$0xff] }
  0xc6   : > { %1315 = vrot.lane.b32.xlu1 %v292_v58, %s7587_s20  ;;  %1313 = vrot.lane.b32.xlu0 %v291_v59, %s7587_s20  ;;  %v308_v58 = vld [vmem:[%s7637_s17 + $0x84] sm:$0xff]  ;;  %v307_v59 = vld [vmem:[%s7637_s17 + $0x7c] sm:$0xff] }
  0xc8   : > { %v7893_v6 = vpop.permute.xlu1 %1139  ;;  %v7895_v7 = vpop.permute.xlu0 %1137 }
  0xc9   : > { %13659 = vst [vmem:[#allocation30_spill] sm:$0xff] %v7893_v6  ;;  %13660 = vst [vmem:[#allocation31_spill] sm:$0xff] %v7895_v7  ;;  %v6752_v6 = vld [vmem:[%s7637_s17 + $0x152] sm:$0xff] }
  0xca   : > { %1319 = vrot.lane.b32.xlu1 %v294_v2, %s7587_s20  ;;  %1317 = vrot.lane.b32.xlu0 %v293_v3, %s7587_s20 }
  0xcc   : > { %v7901_v14 = vpop.permute.xlu1 %1143  ;;  %v7903_v15 = vpop.permute.xlu0 %1141 }
  0xcd   : > { %13661 = vst [vmem:[#allocation32_spill] sm:$0xff] %v7901_v14  ;;  %13662 = vst [vmem:[#allocation33_spill] sm:$0xff] %v7903_v15 }
  0xce   : > { %1323 = vrot.lane.b32.xlu1 %v296_v10, %s7587_s20  ;;  %1321 = vrot.lane.b32.xlu0 %v295_v11, %s7587_s20  ;;  %v310_v10 = vld [vmem:[%s7637_s17 + $0x9c] sm:$0xff]  ;;  %v309_v11 = vld [vmem:[%s7637_s17 + $0x94] sm:$0xff] }
  0xd0   : > { %v7909_v22 = vpop.permute.xlu1 %1147  ;;  %v7911_v23 = vpop.permute.xlu0 %1145 }
  0xd1   : > { %13663 = vst [vmem:[#allocation34_spill] sm:$0xff] %v7909_v22  ;;  %13664 = vst [vmem:[#allocation35_spill] sm:$0xff] %v7911_v23  ;;  %v6722_v22 = vld [vmem:[%s7637_s17 + $0x169] sm:$0xff] }
  0xd2   : > { %1391 = vrot.lane.b32.xlu1 %v298_v18, %s7588_s21  ;;  %1389 = vrot.lane.b32.xlu0 %v297_v19, %s7588_s21 }
  0xd4   : > { %v7917_v30 = vpop.permute.xlu1 %1151  ;;  %v7919_v31 = vpop.permute.xlu0 %1149 }
  0xd5   : > { %13665 = vst [vmem:[#allocation36_spill] sm:$0xff] %v7917_v30  ;;  %13666 = vst [vmem:[#allocation37_spill] sm:$0xff] %v7919_v31  ;;  %v6720_v30 = vld [vmem:[%s7637_s17 + $0x151] sm:$0xff] }
  0xd6   : > { %1395 = vrot.lane.b32.xlu1 %v300_v26, %s7588_s21  ;;  %1393 = vrot.lane.b32.xlu0 %v299_v27, %s7588_s21  ;;  %v312_v26 = vld [vmem:[%s7637_s17 + $0xb4] sm:$0xff]  ;;  %v311_v27 = vld [vmem:[%s7637_s17 + $0xac] sm:$0xff] }
  0xd8   : > { %v7925_v38 = vpop.permute.xlu1 %1155  ;;  %v7927_v39 = vpop.permute.xlu0 %1153 }
  0xd9   : > { %13667 = vst [vmem:[#allocation38_spill] sm:$0xff] %v7925_v38  ;;  %13668 = vst [vmem:[#allocation39_spill] sm:$0xff] %v7927_v39  ;;  %v200_v39 = vld [vmem:[%s7637_s17 + $0x170] sm:$0xff] }
  0xda   : > { %1399 = vrot.lane.b32.xlu1 %v302_v34, %s7588_s21  ;;  %1397 = vrot.lane.b32.xlu0 %v301_v35, %s7588_s21 }
  0xdc   : > { %v7933_v46 = vpop.permute.xlu1 %1159  ;;  %v7935_v47 = vpop.permute.xlu0 %1157 }
  0xdd   : > { %13669 = vst [vmem:[#allocation40_spill] sm:$0xff] %v7933_v46  ;;  %13670 = vst [vmem:[#allocation41_spill] sm:$0xff] %v7935_v47 }
  0xde   : > { %1403 = vrot.lane.b32.xlu1 %v304_v42, %s7588_s21  ;;  %1401 = vrot.lane.b32.xlu0 %v303_v43, %s7588_s21  ;;  %v314_v42 = vld [vmem:[%s7637_s17 + $0xcc] sm:$0xff]  ;;  %v313_v43 = vld [vmem:[%s7637_s17 + $0xc4] sm:$0xff] }
  0xe0   : > { %v7941_v54 = vpop.permute.xlu1 %1163  ;;  %v7943_v55 = vpop.permute.xlu0 %1161 }
  0xe1   : > { %13671 = vst [vmem:[#allocation42_spill] sm:$0xff] %v7941_v54  ;;  %13672 = vst [vmem:[#allocation43_spill] sm:$0xff] %v7943_v55 }
  0xe2   : > { %1407 = vrot.lane.b32.xlu1 %v306_v50, %s7588_s21  ;;  %1405 = vrot.lane.b32.xlu0 %v305_v51, %s7588_s21 }
  0xe4   : > { %v7949_v2 = vpop.permute.xlu1 %1167  ;;  %v7951_v3 = vpop.permute.xlu0 %1165 }
  0xe5   : > { %13673 = vst [vmem:[#allocation44_spill] sm:$0xff] %v7949_v2  ;;  %13674 = vst [vmem:[#allocation45_spill] sm:$0xff] %v7951_v3 }
  0xe6   : > { %1411 = vrot.lane.b32.xlu1 %v308_v58, %s7588_s21  ;;  %1409 = vrot.lane.b32.xlu0 %v307_v59, %s7588_s21  ;;  %v316_v58 = vld [vmem:[%s7637_s17 + $0xe4] sm:$0xff]  ;;  %v315_v59 = vld [vmem:[%s7637_s17 + $0xdc] sm:$0xff] }
  0xe8   : > { %v7957_v18 = vpop.permute.xlu1 %1171  ;;  %v7959_v19 = vpop.permute.xlu0 %1169 }
  0xe9   : > { %13675 = vst [vmem:[#allocation46_spill] sm:$0xff] %v7957_v18  ;;  %13676 = vst [vmem:[#allocation47_spill] sm:$0xff] %v7959_v19 }
  0xea   : > { %1415 = vrot.lane.b32.xlu1 %v310_v10, %s7588_s21  ;;  %1413 = vrot.lane.b32.xlu0 %v309_v11, %s7588_s21 }
  0xec   : > { %v7965_v34 = vpop.permute.xlu1 %1175  ;;  %v7967_v35 = vpop.permute.xlu0 %1173 }
  0xed   : > { %13677 = vst [vmem:[#allocation48_spill] sm:$0xff] %v7965_v34  ;;  %13678 = vst [vmem:[#allocation49_spill] sm:$0xff] %v7967_v35  ;;  %v323_v34 = vld [vmem:[%s7637_s17 + $0x13c] sm:$0xff] }
  0xee   : > { %1419 = vrot.lane.b32.xlu1 %v312_v26, %s7588_s21  ;;  %1417 = vrot.lane.b32.xlu0 %v311_v27, %s7588_s21  ;;  %v318_v26 = vld [vmem:[%s7637_s17 + $0xfc] sm:$0xff]  ;;  %v317_v27 = vld [vmem:[%s7637_s17 + $0xf4] sm:$0xff] }
  0xf0   : > { %v7973_v50 = vpop.permute.xlu1 %1179  ;;  %v7975_v51 = vpop.permute.xlu0 %1177 }
  0xf1   : > { %13679 = vst [vmem:[#allocation50_spill] sm:$0xff] %v7973_v50  ;;  %13680 = vst [vmem:[#allocation51_spill] sm:$0xff] %v7975_v51  ;;  %v321_v50 = vld [vmem:[%s7637_s17 + $0x124] sm:$0xff] }
  0xf2   : > { %1423 = vrot.lane.b32.xlu1 %v314_v42, %s7588_s21  ;;  %1421 = vrot.lane.b32.xlu0 %v313_v43, %s7588_s21  ;;  %v320_v43 = vld [vmem:[%s7637_s17 + $0x114] sm:$0xff] }
  0xf4   : > { %v7981_v10 = vpop.permute.xlu1 %1183  ;;  %v7983_v11 = vpop.permute.xlu0 %1181 }
  0xf5   : > { %13681 = vst [vmem:[#allocation52_spill] sm:$0xff] %v7981_v10  ;;  %13682 = vst [vmem:[#allocation53_spill] sm:$0xff] %v7983_v11  ;;  %v319_v10 = vld [vmem:[%s7637_s17 + $0x10c] sm:$0xff] }
  0xf6   : > { %1427 = vrot.lane.b32.xlu1 %v316_v58, %s7588_s21  ;;  %1425 = vrot.lane.b32.xlu0 %v315_v59, %s7588_s21  ;;  %v322_v59 = vld [vmem:[%s7637_s17 + $0x12c] sm:$0xff] }
  0xf8   : > { %v7989_v51 = vpop.permute.xlu1 %1187  ;;  %v7991_v42 = vpop.permute.xlu0 %1185 }
  0xfa   : > { %1431 = vrot.lane.b32.xlu1 %v318_v26, %s7588_s21  ;;  %1429 = vrot.lane.b32.xlu0 %v317_v27, %s7588_s21  ;;  %v324_v27 = vld [vmem:[%s7637_s17 + $0x144] sm:$0xff] }
  0xfc   : > { %v7997_v11 = vpop.permute.xlu1 %1191  ;;  %v7999_v58 = vpop.permute.xlu0 %1189 }
  0xfe   : > { %1435 = vrot.lane.b32.xlu1 %v320_v43, %s7588_s21  ;;  %1433 = vrot.lane.b32.xlu0 %v319_v10, %s7588_s21  ;;  %v326_v10 = vld [vmem:[%s7637_s17 + $0x15c] sm:$0xff]  ;;  %v325_v43 = vld [vmem:[%s7637_s17 + $0x154] sm:$0xff] }
 0x100   : > { %v8005_v35 = vpop.permute.xlu1 %1195  ;;  %v8007_v26 = vpop.permute.xlu0 %1193 }
 0x102   : > { %1439 = vrot.lane.b32.xlu1 %v322_v59, %s7588_s21  ;;  %1437 = vrot.lane.b32.xlu0 %v321_v50, %s7588_s21  ;;  %v328_v50 = vld [vmem:[%s7637_s17 + $0x174] sm:$0xff]  ;;  %v327_v59 = vld [vmem:[%s7637_s17 + $0x16c] sm:$0xff] }
 0x104   : > { %v8013_v19 = vpop.permute.xlu1 %1263  ;;  %v8015_v18 = vpop.permute.xlu0 %1261 }
 0x105   : > { %13683 = vst [vmem:[#allocation54_spill] sm:$0xff] %v8013_v19  ;;  %13684 = vst [vmem:[#allocation55_spill] sm:$0xff] %v8015_v18 }
 0x106   : > { %1443 = vrot.lane.b32.xlu1 %v324_v27, %s7588_s21  ;;  %1441 = vrot.lane.b32.xlu0 %v323_v34, %s7588_s21 }
 0x108   : > { %v8021_v3 = vpop.permute.xlu1 %1267  ;;  %v8023_v2 = vpop.permute.xlu0 %1265 }
 0x109   : > { %13685 = vst [vmem:[#allocation56_spill] sm:$0xff] %v8021_v3  ;;  %13686 = vst [vmem:[#allocation57_spill] sm:$0xff] %v8023_v2  ;;  %v175_v3 = vld [vmem:[%s7637_s17 + $0x48] sm:$0xff] }
 0x10a   : > { %1447 = vrot.lane.b32.xlu1 %v326_v10, %s7588_s21  ;;  %1445 = vrot.lane.b32.xlu0 %v325_v43, %s7588_s21  ;;  %v171_v10 = vld [vmem:[%s7637_s17 + $0x18] sm:$0xff]  ;;  %v172_v43 = vld [vmem:[%s7637_s17 + $0x20] sm:$0xff] }
 0x10c   : > { %v8029_v18 = vpop.permute.xlu1 %1271  ;;  %v8031_v27 = vpop.permute.xlu0 %1269 }
 0x10d   : > { %13687 = vst [vmem:[#allocation58_spill] sm:$0xff] %v8029_v18  ;;  %13688 = vst [vmem:[#allocation59_spill] sm:$0xff] %v8031_v27  ;;  %v173_v18 = vld [vmem:[%s7637_s17 + $0x30] sm:$0xff] }
 0x10e   : > { %1451 = vrot.lane.b32.xlu1 %v328_v50, %s7588_s21  ;;  %1449 = vrot.lane.b32.xlu0 %v327_v59, %s7588_s21  ;;  %v174_v59 = vld [vmem:[%s7637_s17 + $0x38] sm:$0xff] }
 0x110   : > { %v8035_v34 = vpop.permute.xlu1 %1275  ;;  %v8037_v2 = vpop.permute.xlu0 %1273 }
 0x111   : > { %13689 = vst [vmem:[#allocation60_spill] sm:$0xff] %v8035_v34  ;;  %13690 = vst [vmem:[#allocation61_spill] sm:$0xff] %v8037_v2 }
 0x112   : > { %1519 = vrot.lane.b32.xlu1 %v172_v43, %s7589_s22  ;;  %1517 = vrot.lane.b32.xlu0 %v171_v10, %s7589_s22  ;;  %v176_v43 = vld [vmem:[%s7637_s17 + $0x50] sm:$0xff] }
 0x114   : > { %v8043_v27 = vpop.permute.xlu1 %1279  ;;  %v8045_v50 = vpop.permute.xlu0 %1277 }
 0x115   : > { %13691 = vst [vmem:[#allocation62_spill] sm:$0xff] %v8043_v27  ;;  %13692 = vst [vmem:[#allocation63_spill] sm:$0xff] %v8045_v50  ;;  %v177_v27 = vld [vmem:[%s7637_s17 + $0x60] sm:$0xff] }
 0x116   : > { %1523 = vrot.lane.b32.xlu1 %v174_v59, %s7589_s22  ;;  %1521 = vrot.lane.b32.xlu0 %v173_v18, %s7589_s22  ;;  %v178_v59 = vld [vmem:[%s7637_s17 + $0x68] sm:$0xff] }
 0x118   : > { %v8051_v2 = vpop.permute.xlu1 %1283  ;;  %v8053_v34 = vpop.permute.xlu0 %1281 }
 0x119   : > { %13693 = vst [vmem:[#allocation64_spill] sm:$0xff] %v8051_v2  ;;  %13694 = vst [vmem:[#allocation65_spill] sm:$0xff] %v8053_v34  ;;  %v179_v2 = vld [vmem:[%s7637_s17 + $0x78] sm:$0xff] }
 0x11a   : > { %1527 = vrot.lane.b32.xlu1 %v176_v43, %s7589_s22  ;;  %1525 = vrot.lane.b32.xlu0 %v175_v3, %s7589_s22  ;;  %v180_v43 = vld [vmem:[%s7637_s17 + $0x80] sm:$0xff] }
 0x11c   : > { %v8059_v10 = vpop.permute.xlu1 %1287  ;;  %v8061_v50 = vpop.permute.xlu0 %1285 }
 0x11d   : > { %13695 = vst [vmem:[#allocation66_spill] sm:$0xff] %v8059_v10  ;;  %13696 = vst [vmem:[#allocation67_spill] sm:$0xff] %v8061_v50  ;;  %v181_v10 = vld [vmem:[%s7637_s17 + $0x90] sm:$0xff] }
 0x11e   : > { %1531 = vrot.lane.b32.xlu1 %v178_v59, %s7589_s22  ;;  %1529 = vrot.lane.b32.xlu0 %v177_v27, %s7589_s22  ;;  %v182_v59 = vld [vmem:[%s7637_s17 + $0x98] sm:$0xff] }
 0x120   : > { %v8067_v18 = vpop.permute.xlu1 %1291  ;;  %v8069_v34 = vpop.permute.xlu0 %1289 }
 0x121   : > { %13697 = vst [vmem:[#allocation68_spill] sm:$0xff] %v8067_v18  ;;  %13698 = vst [vmem:[#allocation69_spill] sm:$0xff] %v8069_v34  ;;  %v183_v18 = vld [vmem:[%s7637_s17 + $0xa8] sm:$0xff] }
 0x122   : > { %1535 = vrot.lane.b32.xlu1 %v180_v43, %s7589_s22  ;;  %1533 = vrot.lane.b32.xlu0 %v179_v2, %s7589_s22  ;;  %v184_v43 = vld [vmem:[%s7637_s17 + $0xb0] sm:$0xff] }
 0x124   : > { %v8075_v3 = vpop.permute.xlu1 %1295  ;;  %v8077_v50 = vpop.permute.xlu0 %1293 }
 0x125   : > { %13699 = vst [vmem:[#allocation70_spill] sm:$0xff] %v8075_v3  ;;  %13700 = vst [vmem:[#allocation71_spill] sm:$0xff] %v8077_v50  ;;  %v185_v3 = vld [vmem:[%s7637_s17 + $0xc0] sm:$0xff] }
 0x126   : > { %1539 = vrot.lane.b32.xlu1 %v182_v59, %s7589_s22  ;;  %1537 = vrot.lane.b32.xlu0 %v181_v10, %s7589_s22  ;;  %v186_v59 = vld [vmem:[%s7637_s17 + $0xc8] sm:$0xff] }
 0x128   : > { %v8083_v27 = vpop.permute.xlu1 %1299  ;;  %v8085_v34 = vpop.permute.xlu0 %1297 }
 0x129   : > { %13701 = vst [vmem:[#allocation72_spill] sm:$0xff] %v8083_v27  ;;  %13702 = vst [vmem:[#allocation73_spill] sm:$0xff] %v8085_v34  ;;  %v187_v27 = vld [vmem:[%s7637_s17 + $0xd8] sm:$0xff] }
 0x12a   : > { %1543 = vrot.lane.b32.xlu1 %v184_v43, %s7589_s22  ;;  %1541 = vrot.lane.b32.xlu0 %v183_v18, %s7589_s22  ;;  %v188_v43 = vld [vmem:[%s7637_s17 + $0xe0] sm:$0xff] }
 0x12c   : > { %v8091_v2 = vpop.permute.xlu1 %1303  ;;  %v8093_v50 = vpop.permute.xlu0 %1301 }
 0x12d   : > { %13703 = vst [vmem:[#allocation74_spill] sm:$0xff] %v8091_v2  ;;  %13704 = vst [vmem:[#allocation75_spill] sm:$0xff] %v8093_v50  ;;  %v189_v2 = vld [vmem:[%s7637_s17 + $0xf0] sm:$0xff] }
 0x12e   : > { %1547 = vrot.lane.b32.xlu1 %v186_v59, %s7589_s22  ;;  %1545 = vrot.lane.b32.xlu0 %v185_v3, %s7589_s22  ;;  %v190_v59 = vld [vmem:[%s7637_s17 + $0xf8] sm:$0xff] }
 0x130   : > { %v8099_v10 = vpop.permute.xlu1 %1307  ;;  %v8101_v34 = vpop.permute.xlu0 %1305 }
 0x131   : > { %13705 = vst [vmem:[#allocation76_spill] sm:$0xff] %v8099_v10  ;;  %13706 = vst [vmem:[#allocation77_spill] sm:$0xff] %v8101_v34  ;;  %v191_v10 = vld [vmem:[%s7637_s17 + $0x108] sm:$0xff] }
 0x132   : > { %1551 = vrot.lane.b32.xlu1 %v188_v43, %s7589_s22  ;;  %1549 = vrot.lane.b32.xlu0 %v187_v27, %s7589_s22  ;;  %v192_v43 = vld [vmem:[%s7637_s17 + $0x110] sm:$0xff] }
 0x134   : > { %v8107_v18 = vpop.permute.xlu1 %1311  ;;  %v8109_v50 = vpop.permute.xlu0 %1309 }
 0x135   : > { %13707 = vst [vmem:[#allocation78_spill] sm:$0xff] %v8107_v18  ;;  %13708 = vst [vmem:[#allocation79_spill] sm:$0xff] %v8109_v50  ;;  %v193_v18 = vld [vmem:[%s7637_s17 + $0x120] sm:$0xff] }
 0x136   : > { %1555 = vrot.lane.b32.xlu1 %v190_v59, %s7589_s22  ;;  %1553 = vrot.lane.b32.xlu0 %v189_v2, %s7589_s22  ;;  %v194_v59 = vld [vmem:[%s7637_s17 + $0x128] sm:$0xff] }
 0x138   : > { %v8115_v3 = vpop.permute.xlu1 %1315  ;;  %v8117_v34 = vpop.permute.xlu0 %1313 }
 0x13a   : > { %1559 = vrot.lane.b32.xlu1 %v192_v43, %s7589_s22  ;;  %1557 = vrot.lane.b32.xlu0 %v191_v10, %s7589_s22  ;;  %v196_v43 = vld [vmem:[%s7637_s17 + $0x140] sm:$0xff]  ;;  %v195_v10 = vld [vmem:[%s7637_s17 + $0x138] sm:$0xff] }
 0x13c   : > { %v8123_v27 = vpop.permute.xlu1 %1319  ;;  %v8125_v50 = vpop.permute.xlu0 %1317 }
 0x13e   : > { %1563 = vrot.lane.b32.xlu1 %v194_v59, %s7589_s22  ;;  %1561 = vrot.lane.b32.xlu0 %v193_v18, %s7589_s22  ;;  %v198_v59 = vld [vmem:[%s7637_s17 + $0x158] sm:$0xff]  ;;  %v197_v18 = vld [vmem:[%s7637_s17 + $0x150] sm:$0xff] }
 0x140   : > { %v8131_v2 = vpop.permute.xlu1 %1323  ;;  %v8133_v19 = vpop.permute.xlu0 %1321 }
 0x142   : > { %1567 = vrot.lane.b32.xlu1 %v196_v43, %s7589_s22  ;;  %1565 = vrot.lane.b32.xlu0 %v195_v10, %s7589_s22  ;;  %v199_v43 = vld [vmem:[%s7637_s17 + $0x168] sm:$0xff] }
 0x143   : > { %v6693_v10 = vld [vmem:[%s7637_s17 + $0x188] sm:$0xff] }
 0x144   : > { %v8139_v55 = vpop.permute.xlu1 %1391  ;;  %v8141_v54 = vpop.permute.xlu0 %1389 }
 0x145   : > { %13709 = vst [vmem:[#allocation80_spill] sm:$0xff] %v8139_v55  ;;  %13710 = vst [vmem:[#allocation81_spill] sm:$0xff] %v8141_v54  ;;  %v6692_v54 = vld [vmem:[%s7637_s17 + $0x180] sm:$0xff] }
 0x146   : > { %1571 = vrot.lane.b32.xlu1 %v198_v59, %s7589_s22  ;;  %1569 = vrot.lane.b32.xlu0 %v197_v18, %s7589_s22  ;;  %v6695_v59 = vld [vmem:[%s7637_s17 + $0x21] sm:$0xff]  ;;  %v6694_v18 = vld [vmem:[%s7637_s17 + $0x19] sm:$0xff] }
 0x148   : > { %v8147_v47 = vpop.permute.xlu1 %1395  ;;  %v8149_v46 = vpop.permute.xlu0 %1393 }
 0x149   : > { %13711 = vst [vmem:[#allocation82_spill] sm:$0xff] %v8147_v47  ;;  %13712 = vst [vmem:[#allocation83_spill] sm:$0xff] %v8149_v46  ;;  %v6718_v47 = vld [vmem:[%s7637_s17 + $0x139] sm:$0xff] }
 0x14a   : > { %1575 = vrot.lane.b32.xlu1 %v200_v39, %s7589_s22  ;;  %1573 = vrot.lane.b32.xlu0 %v199_v43, %s7589_s22  ;;  %v6697_v43 = vld [vmem:[%s7637_s17 + $0x39] sm:$0xff] }
 0x14c   : > { %v8157_v55 = vpop.permute.xlu1 %1399  ;;  %v8159_v38 = vpop.permute.xlu0 %1397 }
 0x14d   : > { %13713 = vst [vmem:[#allocation84_spill] sm:$0xff] %v8157_v55  ;;  %13714 = vst [vmem:[#allocation85_spill] sm:$0xff] %v8159_v38  ;;  %v6696_v38 = vld [vmem:[%s7637_s17 + $0x31] sm:$0xff] }
 0x14e   : > { %1579 = vrot.lane.b32.xlu1 %v6693_v10, %s7589_s22  ;;  %1577 = vrot.lane.b32.xlu0 %v6692_v54, %s7589_s22  ;;  %v6699_v54 = vld [vmem:[%s7637_s17 + $0x51] sm:$0xff] }
 0x150   : > { %v8165_v46 = vpop.permute.xlu1 %1403  ;;  %v8167_v39 = vpop.permute.xlu0 %1401 }
 0x151   : > { %13715 = vst [vmem:[#allocation86_spill] sm:$0xff] %v8165_v46  ;;  %13716 = vst [vmem:[#allocation87_spill] sm:$0xff] %v8167_v39  ;;  %v6698_v39 = vld [vmem:[%s7637_s17 + $0x49] sm:$0xff] }
 0x152   : > { %1647 = vrot.lane.b32.xlu1 %v6695_v59, %s7590_s23  ;;  %1645 = vrot.lane.b32.xlu0 %v6694_v18, %s7590_s23  ;;  %v6701_v18 = vld [vmem:[%s7637_s17 + $0x69] sm:$0xff] }
 0x154   : > { %v8173_v55 = vpop.permute.xlu1 %1407  ;;  %v8175_v10 = vpop.permute.xlu0 %1405 }
 0x155   : > { %13717 = vst [vmem:[#allocation88_spill] sm:$0xff] %v8173_v55  ;;  %13718 = vst [vmem:[#allocation89_spill] sm:$0xff] %v8175_v10  ;;  %v6700_v55 = vld [vmem:[%s7637_s17 + $0x61] sm:$0xff] }
 0x156   : > { %1651 = vrot.lane.b32.xlu1 %v6697_v43, %s7590_s23  ;;  %1649 = vrot.lane.b32.xlu0 %v6696_v38, %s7590_s23  ;;  %v6703_v38 = vld [vmem:[%s7637_s17 + $0x81] sm:$0xff] }
 0x158   : > { %v8181_v46 = vpop.permute.xlu1 %1411  ;;  %v8183_v59 = vpop.permute.xlu0 %1409 }
 0x159   : > { %13719 = vst [vmem:[#allocation90_spill] sm:$0xff] %v8181_v46  ;;  %13720 = vst [vmem:[#allocation91_spill] sm:$0xff] %v8183_v59  ;;  %v6702_v46 = vld [vmem:[%s7637_s17 + $0x79] sm:$0xff] }
 0x15a   : > { %1655 = vrot.lane.b32.xlu1 %v6699_v54, %s7590_s23  ;;  %1653 = vrot.lane.b32.xlu0 %v6698_v39, %s7590_s23  ;;  %v6705_v39 = vld [vmem:[%s7637_s17 + $0x99] sm:$0xff] }
 0x15c   : > { %v8189_v10 = vpop.permute.xlu1 %1415  ;;  %v8191_v43 = vpop.permute.xlu0 %1413 }
 0x15d   : > { %13721 = vst [vmem:[#allocation92_spill] sm:$0xff] %v8189_v10  ;;  %13722 = vst [vmem:[#allocation93_spill] sm:$0xff] %v8191_v43  ;;  %v6704_v10 = vld [vmem:[%s7637_s17 + $0x91] sm:$0xff] }
 0x15e   : > { %1659 = vrot.lane.b32.xlu1 %v6701_v18, %s7590_s23  ;;  %1657 = vrot.lane.b32.xlu0 %v6700_v55, %s7590_s23  ;;  %v6707_v55 = vld [vmem:[%s7637_s17 + $0xb1] sm:$0xff] }
 0x160   : > { %v8197_v59 = vpop.permute.xlu1 %1419  ;;  %v8199_v54 = vpop.permute.xlu0 %1417 }
 0x161   : > { %13723 = vst [vmem:[#allocation94_spill] sm:$0xff] %v8197_v59  ;;  %13724 = vst [vmem:[#allocation95_spill] sm:$0xff] %v8199_v54  ;;  %v6706_v59 = vld [vmem:[%s7637_s17 + $0xa9] sm:$0xff] }
 0x162   : > { %1663 = vrot.lane.b32.xlu1 %v6703_v38, %s7590_s23  ;;  %1661 = vrot.lane.b32.xlu0 %v6702_v46, %s7590_s23  ;;  %v6709_v46 = vld [vmem:[%s7637_s17 + $0xc9] sm:$0xff] }
 0x164   : > { %v8205_v43 = vpop.permute.xlu1 %1423  ;;  %v8207_v18 = vpop.permute.xlu0 %1421 }
 0x165   : > { %13725 = vst [vmem:[#allocation96_spill] sm:$0xff] %v8205_v43  ;;  %13726 = vst [vmem:[#allocation97_spill] sm:$0xff] %v8207_v18  ;;  %v6708_v43 = vld [vmem:[%s7637_s17 + $0xc1] sm:$0xff] }
 0x166   : > { %1667 = vrot.lane.b32.xlu1 %v6705_v39, %s7590_s23  ;;  %1665 = vrot.lane.b32.xlu0 %v6704_v10, %s7590_s23  ;;  %v6711_v10 = vld [vmem:[%s7637_s17 + $0xe1] sm:$0xff] }
 0x168   : > { %v8213_v54 = vpop.permute.xlu1 %1427  ;;  %v8215_v38 = vpop.permute.xlu0 %1425 }
 0x169   : > { %13727 = vst [vmem:[#allocation98_spill] sm:$0xff] %v8213_v54  ;;  %13728 = vst [vmem:[#allocation99_spill] sm:$0xff] %v8215_v38  ;;  %v6710_v54 = vld [vmem:[%s7637_s17 + $0xd9] sm:$0xff] }
 0x16a   : > { %1671 = vrot.lane.b32.xlu1 %v6707_v55, %s7590_s23  ;;  %1669 = vrot.lane.b32.xlu0 %v6706_v59, %s7590_s23  ;;  %v6713_v59 = vld [vmem:[%s7637_s17 + $0xf9] sm:$0xff] }
 0x16c   : > { %v8221_v18 = vpop.permute.xlu1 %1431  ;;  %v8223_v39 = vpop.permute.xlu0 %1429 }
 0x16d   : > { %13729 = vst [vmem:[#allocation100_spill] sm:$0xff] %v8221_v18  ;;  %13730 = vst [vmem:[#allocation101_spill] sm:$0xff] %v8223_v39  ;;  %v6712_v18 = vld [vmem:[%s7637_s17 + $0xf1] sm:$0xff] }
 0x16e   : > { %1675 = vrot.lane.b32.xlu1 %v6709_v46, %s7590_s23  ;;  %1673 = vrot.lane.b32.xlu0 %v6708_v43, %s7590_s23  ;;  %v6715_v43 = vld [vmem:[%s7637_s17 + $0x111] sm:$0xff] }
 0x170   : > { %v8229_v38 = vpop.permute.xlu1 %1435  ;;  %v8231_v55 = vpop.permute.xlu0 %1433 }
 0x171   : > { %13731 = vst [vmem:[#allocation102_spill] sm:$0xff] %v8229_v38  ;;  %13732 = vst [vmem:[#allocation103_spill] sm:$0xff] %v8231_v55  ;;  %v6714_v38 = vld [vmem:[%s7637_s17 + $0x109] sm:$0xff] }
 0x172   : > { %1679 = vrot.lane.b32.xlu1 %v6711_v10, %s7590_s23  ;;  %1677 = vrot.lane.b32.xlu0 %v6710_v54, %s7590_s23  ;;  %v6717_v54 = vld [vmem:[%s7637_s17 + $0x129] sm:$0xff] }
 0x174   : > { %v8237_v39 = vpop.permute.xlu1 %1439  ;;  %v8239_v46 = vpop.permute.xlu0 %1437 }
 0x175   : > { %13733 = vst [vmem:[#allocation104_spill] sm:$0xff] %v8237_v39  ;;  %13734 = vst [vmem:[#allocation105_spill] sm:$0xff] %v8239_v46  ;;  %v6716_v39 = vld [vmem:[%s7637_s17 + $0x121] sm:$0xff] }
 0x176   : > { %1683 = vrot.lane.b32.xlu1 %v6713_v59, %s7590_s23  ;;  %1681 = vrot.lane.b32.xlu0 %v6712_v18, %s7590_s23  ;;  %v6719_v18 = vld [vmem:[%s7637_s17 + $0x141] sm:$0xff] }
 0x178   : > { %v8245_v55 = vpop.permute.xlu1 %1443  ;;  %v8247_v10 = vpop.permute.xlu0 %1441 }
 0x17a   : > { %1687 = vrot.lane.b32.xlu1 %v6715_v43, %s7590_s23  ;;  %1685 = vrot.lane.b32.xlu0 %v6714_v38, %s7590_s23  ;;  %v6721_v38 = vld [vmem:[%s7637_s17 + $0x159] sm:$0xff] }
 0x17c   : > { %v8253_v46 = vpop.permute.xlu1 %1447  ;;  %v8255_v59 = vpop.permute.xlu0 %1445 }
 0x17e   : > { %1691 = vrot.lane.b32.xlu1 %v6717_v54, %s7590_s23  ;;  %1689 = vrot.lane.b32.xlu0 %v6716_v39, %s7590_s23  ;;  %v6723_v39 = vld [vmem:[%s7637_s17 + $0x171] sm:$0xff] }
 0x180   : > { %v8261_v31 = vpop.permute.xlu1 %1451  ;;  %v8263_v43 = vpop.permute.xlu0 %1449 }
 0x182   : > { %1695 = vrot.lane.b32.xlu1 %v6719_v18, %s7590_s23  ;;  %1693 = vrot.lane.b32.xlu0 %v6718_v47, %s7590_s23  ;;  %v6725_v47 = vld [vmem:[%s7637_s17 + $0x189] sm:$0xff]  ;;  %v6724_v18 = vld [vmem:[%s7637_s17 + $0x181] sm:$0xff] }
 0x184   : > { %v8269_v23 = vpop.permute.xlu1 %1519  ;;  %v8271_v54 = vpop.permute.xlu0 %1517 }
 0x185   : > { %13735 = vst [vmem:[#allocation106_spill] sm:$0xff] %v8269_v23  ;;  %13736 = vst [vmem:[#allocation107_spill] sm:$0xff] %v8271_v54 }
 0x186   : > { %1699 = vrot.lane.b32.xlu1 %v6721_v38, %s7590_s23  ;;  %1697 = vrot.lane.b32.xlu0 %v6720_v30, %s7590_s23  ;;  %v6727_v30 = vld [vmem:[%s7637_s17 + $0x22] sm:$0xff]  ;;  %v6726_v38 = vld [vmem:[%s7637_s17 + $0x1a] sm:$0xff] }
 0x188   : > { %v8277_v15 = vpop.permute.xlu1 %1523  ;;  %v8279_v14 = vpop.permute.xlu0 %1521 }
 0x189   : > { %13737 = vst [vmem:[#allocation108_spill] sm:$0xff] %v8277_v15  ;;  %13738 = vst [vmem:[#allocation109_spill] sm:$0xff] %v8279_v14  ;;  %v6750_v15 = vld [vmem:[%s7637_s17 + $0x13a] sm:$0xff] }
 0x18a   : > { %1703 = vrot.lane.b32.xlu1 %v6723_v39, %s7590_s23  ;;  %1701 = vrot.lane.b32.xlu0 %v6722_v22, %s7590_s23  ;;  %v6729_v22 = vld [vmem:[%s7637_s17 + $0x3a] sm:$0xff] }
 0x18c   : > { %v8285_v54 = vpop.permute.xlu1 %1527  ;;  %v8287_v23 = vpop.permute.xlu0 %1525 }
 0x18d   : > { %13739 = vst [vmem:[#allocation110_spill] sm:$0xff] %v8285_v54  ;;  %13740 = vst [vmem:[#allocation111_spill] sm:$0xff] %v8287_v23  ;;  %v6728_v23 = vld [vmem:[%s7637_s17 + $0x32] sm:$0xff] }
 0x18e   : > { %1707 = vrot.lane.b32.xlu1 %v6725_v47, %s7590_s23  ;;  %1705 = vrot.lane.b32.xlu0 %v6724_v18, %s7590_s23  ;;  %v6731_v18 = vld [vmem:[%s7637_s17 + $0x52] sm:$0xff] }
 0x190   : > { %v8293_v14 = vpop.permute.xlu1 %1531  ;;  %v8295_v39 = vpop.permute.xlu0 %1529 }
 0x191   : > { %13741 = vst [vmem:[#allocation112_spill] sm:$0xff] %v8293_v14  ;;  %13742 = vst [vmem:[#allocation113_spill] sm:$0xff] %v8295_v39  ;;  %v6730_v39 = vld [vmem:[%s7637_s17 + $0x4a] sm:$0xff] }
 0x192   : > { %1775 = vrot.lane.b32.xlu1 %v6727_v30, %s7591_s24  ;;  %1773 = vrot.lane.b32.xlu0 %v6726_v38, %s7591_s24  ;;  %v6733_v38 = vld [vmem:[%s7637_s17 + $0x6a] sm:$0xff] }
 0x194   : > { %v8301_v54 = vpop.permute.xlu1 %1535  ;;  %v8303_v47 = vpop.permute.xlu0 %1533 }
 0x195   : > { %13743 = vst [vmem:[#allocation114_spill] sm:$0xff] %v8301_v54  ;;  %13744 = vst [vmem:[#allocation115_spill] sm:$0xff] %v8303_v47  ;;  %v6732_v54 = vld [vmem:[%s7637_s17 + $0x62] sm:$0xff] }
 0x196   : > { %1779 = vrot.lane.b32.xlu1 %v6729_v22, %s7591_s24  ;;  %1777 = vrot.lane.b32.xlu0 %v6728_v23, %s7591_s24  ;;  %v6735_v23 = vld [vmem:[%s7637_s17 + $0x82] sm:$0xff] }
 0x198   : > { %v8309_v14 = vpop.permute.xlu1 %1539  ;;  %v8311_v30 = vpop.permute.xlu0 %1537 }
 0x199   : > { %13745 = vst [vmem:[#allocation116_spill] sm:$0xff] %v8309_v14  ;;  %13746 = vst [vmem:[#allocation117_spill] sm:$0xff] %v8311_v30  ;;  %v6734_v14 = vld [vmem:[%s7637_s17 + $0x7a] sm:$0xff] }
 0x19a   : > { %1783 = vrot.lane.b32.xlu1 %v6731_v18, %s7591_s24  ;;  %1781 = vrot.lane.b32.xlu0 %v6730_v39, %s7591_s24  ;;  %v6737_v39 = vld [vmem:[%s7637_s17 + $0x9a] sm:$0xff] }
 0x19c   : > { %v8317_v47 = vpop.permute.xlu1 %1543  ;;  %v8319_v22 = vpop.permute.xlu0 %1541 }
 0x19d   : > { %13747 = vst [vmem:[#allocation118_spill] sm:$0xff] %v8317_v47  ;;  %13748 = vst [vmem:[#allocation119_spill] sm:$0xff] %v8319_v22  ;;  %v6736_v47 = vld [vmem:[%s7637_s17 + $0x92] sm:$0xff] }
 0x19e   : > { %1787 = vrot.lane.b32.xlu1 %v6733_v38, %s7591_s24  ;;  %1785 = vrot.lane.b32.xlu0 %v6732_v54, %s7591_s24  ;;  %v6739_v54 = vld [vmem:[%s7637_s17 + $0xb2] sm:$0xff] }
 0x1a0   : > { %v8325_v30 = vpop.permute.xlu1 %1547  ;;  %v8327_v18 = vpop.permute.xlu0 %1545 }
 0x1a1   : > { %13749 = vst [vmem:[#allocation120_spill] sm:$0xff] %v8325_v30  ;;  %13750 = vst [vmem:[#allocation121_spill] sm:$0xff] %v8327_v18  ;;  %v6738_v30 = vld [vmem:[%s7637_s17 + $0xaa] sm:$0xff] }
 0x1a2   : > { %1791 = vrot.lane.b32.xlu1 %v6735_v23, %s7591_s24  ;;  %1789 = vrot.lane.b32.xlu0 %v6734_v14, %s7591_s24  ;;  %v6741_v14 = vld [vmem:[%s7637_s17 + $0xca] sm:$0xff] }
 0x1a4   : > { %v8333_v22 = vpop.permute.xlu1 %1551  ;;  %v8335_v38 = vpop.permute.xlu0 %1549 }
 0x1a5   : > { %13751 = vst [vmem:[#allocation122_spill] sm:$0xff] %v8333_v22  ;;  %13752 = vst [vmem:[#allocation123_spill] sm:$0xff] %v8335_v38  ;;  %v6740_v22 = vld [vmem:[%s7637_s17 + $0xc2] sm:$0xff] }
 0x1a6   : > { %1795 = vrot.lane.b32.xlu1 %v6737_v39, %s7591_s24  ;;  %1793 = vrot.lane.b32.xlu0 %v6736_v47, %s7591_s24  ;;  %v6743_v47 = vld [vmem:[%s7637_s17 + $0xe2] sm:$0xff] }
 0x1a8   : > { %v8341_v18 = vpop.permute.xlu1 %1555  ;;  %v8343_v23 = vpop.permute.xlu0 %1553 }
 0x1a9   : > { %13753 = vst [vmem:[#allocation124_spill] sm:$0xff] %v8341_v18  ;;  %13754 = vst [vmem:[#allocation125_spill] sm:$0xff] %v8343_v23  ;;  %v6742_v18 = vld [vmem:[%s7637_s17 + $0xda] sm:$0xff] }
 0x1aa   : > { %1799 = vrot.lane.b32.xlu1 %v6739_v54, %s7591_s24  ;;  %1797 = vrot.lane.b32.xlu0 %v6738_v30, %s7591_s24  ;;  %v6745_v30 = vld [vmem:[%s7637_s17 + $0xfa] sm:$0xff] }
 0x1ac   : > { %v8349_v38 = vpop.permute.xlu1 %1559  ;;  %v8351_v39 = vpop.permute.xlu0 %1557 }
 0x1ad   : > { %13755 = vst [vmem:[#allocation126_spill] sm:$0xff] %v8349_v38  ;;  %13756 = vst [vmem:[#allocation127_spill] sm:$0xff] %v8351_v39  ;;  %v6744_v38 = vld [vmem:[%s7637_s17 + $0xf2] sm:$0xff] }
 0x1ae   : > { %1803 = vrot.lane.b32.xlu1 %v6741_v14, %s7591_s24  ;;  %1801 = vrot.lane.b32.xlu0 %v6740_v22, %s7591_s24  ;;  %v6747_v22 = vld [vmem:[%s7637_s17 + $0x112] sm:$0xff] }
 0x1b0   : > { %v8357_v23 = vpop.permute.xlu1 %1563  ;;  %v8359_v54 = vpop.permute.xlu0 %1561 }
 0x1b1   : > { %13757 = vst [vmem:[#allocation128_spill] sm:$0xff] %v8357_v23  ;;  %13758 = vst [vmem:[#allocation129_spill] sm:$0xff] %v8359_v54  ;;  %v6746_v23 = vld [vmem:[%s7637_s17 + $0x10a] sm:$0xff] }
 0x1b2   : > { %1807 = vrot.lane.b32.xlu1 %v6743_v47, %s7591_s24  ;;  %1805 = vrot.lane.b32.xlu0 %v6742_v18, %s7591_s24  ;;  %v6749_v18 = vld [vmem:[%s7637_s17 + $0x12a] sm:$0xff] }
 0x1b4   : > { %v8365_v39 = vpop.permute.xlu1 %1567  ;;  %v8367_v14 = vpop.permute.xlu0 %1565 }
 0x1b5   : > { %13759 = vst [vmem:[#allocation130_spill] sm:$0xff] %v8365_v39  ;;  %13760 = vst [vmem:[#allocation131_spill] sm:$0xff] %v8367_v14  ;;  %v6748_v39 = vld [vmem:[%s7637_s17 + $0x122] sm:$0xff] }
 0x1b6   : > { %1811 = vrot.lane.b32.xlu1 %v6745_v30, %s7591_s24  ;;  %1809 = vrot.lane.b32.xlu0 %v6744_v38, %s7591_s24  ;;  %v6751_v38 = vld [vmem:[%s7637_s17 + $0x142] sm:$0xff] }
 0x1b8   : > { %v8373_v54 = vpop.permute.xlu1 %1571  ;;  %v8375_v47 = vpop.permute.xlu0 %1569 }
 0x1ba   : > { %1815 = vrot.lane.b32.xlu1 %v6747_v22, %s7591_s24  ;;  %1813 = vrot.lane.b32.xlu0 %v6746_v23, %s7591_s24  ;;  %v6753_v23 = vld [vmem:[%s7637_s17 + $0x15a] sm:$0xff] }
 0x1bc   : > { %v8381_v14 = vpop.permute.xlu1 %1575  ;;  %v8383_v30 = vpop.permute.xlu0 %1573 }
 0x1be   : > { %1819 = vrot.lane.b32.xlu1 %v6749_v18, %s7591_s24  ;;  %1817 = vrot.lane.b32.xlu0 %v6748_v39, %s7591_s24  ;;  %v6755_v39 = vld [vmem:[%s7637_s17 + $0x172] sm:$0xff] }
 0x1c0   : > { %v8389_v7 = vpop.permute.xlu1 %1579  ;;  %v8391_v22 = vpop.permute.xlu0 %1577 }
 0x1c2   : > { %1823 = vrot.lane.b32.xlu1 %v6751_v38, %s7591_s24  ;;  %1821 = vrot.lane.b32.xlu0 %v6750_v15, %s7591_s24  ;;  %v6757_v15 = vld [vmem:[%s7637_s17 + $0x18a] sm:$0xff]  ;;  %v6756_v38 = vld [vmem:[%s7637_s17 + $0x182] sm:$0xff] }
 0x1c4   : > { %v8397_v63 = vpop.permute.xlu1 %1647  ;;  %v8399_v18 = vpop.permute.xlu0 %1645 }
 0x1c5   : > { %13761 = vst [vmem:[#allocation132_spill] sm:$0xff] %v8397_v63  ;;  %13762 = vst [vmem:[#allocation133_spill] sm:$0xff] %v8399_v18 }
 0x1c6   : > { %1827 = vrot.lane.b32.xlu1 %v6753_v23, %s7591_s24  ;;  %1825 = vrot.lane.b32.xlu0 %v6752_v6, %s7591_s24  ;;  %v6759_v6 = vld [vmem:[%s7637_s17 + $0x23] sm:$0xff]  ;;  %v6758_v23 = vld [vmem:[%s7637_s17 + $0x1b] sm:$0xff] }
 0x1c8   : > { %v8405_v45 = vpop.permute.xlu1 %1651  ;;  %v8407_v44 = vpop.permute.xlu0 %1649 }
 0x1c9   : > { %13763 = vst [vmem:[#allocation134_spill] sm:$0xff] %v8405_v45  ;;  %13764 = vst [vmem:[#allocation135_spill] sm:$0xff] %v8407_v44  ;;  %v6782_v45 = vld [vmem:[%s7637_s17 + $0x13b] sm:$0xff] }
 0x1ca   : > { %1831 = vrot.lane.b32.xlu1 %v6755_v39, %s7591_s24  ;;  %1829 = vrot.lane.b32.xlu0 %v6754_v62, %s7591_s24  ;;  %v6761_v62 = vld [vmem:[%s7637_s17 + $0x3b] sm:$0xff] }
 0x1cc   : > { %v8413_v18 = vpop.permute.xlu1 %1655  ;;  %v8415_v63 = vpop.permute.xlu0 %1653 }
 0x1cd   : > { %13765 = vst [vmem:[#allocation136_spill] sm:$0xff] %v8413_v18  ;;  %13766 = vst [vmem:[#allocation137_spill] sm:$0xff] %v8415_v63  ;;  %v6760_v63 = vld [vmem:[%s7637_s17 + $0x33] sm:$0xff] }
 0x1ce   : > { %1835 = vrot.lane.b32.xlu1 %v6757_v15, %s7591_s24  ;;  %1833 = vrot.lane.b32.xlu0 %v6756_v38, %s7591_s24  ;;  %v6763_v38 = vld [vmem:[%s7637_s17 + $0x53] sm:$0xff] }
 0x1d0   : > { %v8421_v44 = vpop.permute.xlu1 %1659  ;;  %v8423_v39 = vpop.permute.xlu0 %1657 }
 0x1d1   : > { %13767 = vst [vmem:[#allocation138_spill] sm:$0xff] %v8421_v44  ;;  %13768 = vst [vmem:[#allocation139_spill] sm:$0xff] %v8423_v39  ;;  %v6762_v39 = vld [vmem:[%s7637_s17 + $0x4b] sm:$0xff] }
 0x1d2   : > { %1903 = vrot.lane.b32.xlu1 %v6759_v6, %s7592_s25  ;;  %1901 = vrot.lane.b32.xlu0 %v6758_v23, %s7592_s25  ;;  %v6765_v23 = vld [vmem:[%s7637_s17 + $0x6b] sm:$0xff] }
 0x1d4   : > { %v8429_v18 = vpop.permute.xlu1 %1663  ;;  %v8431_v15 = vpop.permute.xlu0 %1661 }
 0x1d5   : > { %13769 = vst [vmem:[#allocation140_spill] sm:$0xff] %v8429_v18  ;;  %13770 = vst [vmem:[#allocation141_spill] sm:$0xff] %v8431_v15  ;;  %v6764_v18 = vld [vmem:[%s7637_s17 + $0x63] sm:$0xff] }
 0x1d6   : > { %1907 = vrot.lane.b32.xlu1 %v6761_v62, %s7592_s25  ;;  %1905 = vrot.lane.b32.xlu0 %v6760_v63, %s7592_s25  ;;  %v6767_v63 = vld [vmem:[%s7637_s17 + $0x83] sm:$0xff] }
 0x1d8   : > { %v8437_v44 = vpop.permute.xlu1 %1667  ;;  %v8439_v6 = vpop.permute.xlu0 %1665 }
 0x1d9   : > { %13771 = vst [vmem:[#allocation142_spill] sm:$0xff] %v8437_v44  ;;  %13772 = vst [vmem:[#allocation143_spill] sm:$0xff] %v8439_v6  ;;  %v6766_v44 = vld [vmem:[%s7637_s17 + $0x7b] sm:$0xff] }
 0x1da   : > { %1911 = vrot.lane.b32.xlu1 %v6763_v38, %s7592_s25  ;;  %1909 = vrot.lane.b32.xlu0 %v6762_v39, %s7592_s25  ;;  %v6769_v39 = vld [vmem:[%s7637_s17 + $0x9b] sm:$0xff] }
 0x1dc   : > { %v8445_v15 = vpop.permute.xlu1 %1671  ;;  %v8447_v62 = vpop.permute.xlu0 %1669 }
 0x1dd   : > { %13773 = vst [vmem:[#allocation144_spill] sm:$0xff] %v8445_v15  ;;  %13774 = vst [vmem:[#allocation145_spill] sm:$0xff] %v8447_v62  ;;  %v6768_v15 = vld [vmem:[%s7637_s17 + $0x93] sm:$0xff] }
 0x1de   : > { %1915 = vrot.lane.b32.xlu1 %v6765_v23, %s7592_s25  ;;  %1913 = vrot.lane.b32.xlu0 %v6764_v18, %s7592_s25  ;;  %v6771_v18 = vld [vmem:[%s7637_s17 + $0xb3] sm:$0xff] }
 0x1e0   : > { %v8453_v6 = vpop.permute.xlu1 %1675  ;;  %v8455_v38 = vpop.permute.xlu0 %1673 }
 0x1e1   : > { %13775 = vst [vmem:[#allocation146_spill] sm:$0xff] %v8453_v6  ;;  %13776 = vst [vmem:[#allocation147_spill] sm:$0xff] %v8455_v38  ;;  %v6770_v6 = vld [vmem:[%s7637_s17 + $0xab] sm:$0xff] }
 0x1e2   : > { %1919 = vrot.lane.b32.xlu1 %v6767_v63, %s7592_s25  ;;  %1917 = vrot.lane.b32.xlu0 %v6766_v44, %s7592_s25  ;;  %v6773_v44 = vld [vmem:[%s7637_s17 + $0xcb] sm:$0xff] }
 0x1e4   : > { %v8461_v62 = vpop.permute.xlu1 %1679  ;;  %v8463_v23 = vpop.permute.xlu0 %1677 }
 0x1e5   : > { %13777 = vst [vmem:[#allocation148_spill] sm:$0xff] %v8461_v62  ;;  %13778 = vst [vmem:[#allocation149_spill] sm:$0xff] %v8463_v23  ;;  %v6772_v62 = vld [vmem:[%s7637_s17 + $0xc3] sm:$0xff] }
 0x1e6   : > { %1923 = vrot.lane.b32.xlu1 %v6769_v39, %s7592_s25  ;;  %1921 = vrot.lane.b32.xlu0 %v6768_v15, %s7592_s25  ;;  %v6775_v15 = vld [vmem:[%s7637_s17 + $0xe3] sm:$0xff] }
 0x1e8   : > { %v8469_v38 = vpop.permute.xlu1 %1683  ;;  %v8471_v63 = vpop.permute.xlu0 %1681 }
 0x1e9   : > { %13779 = vst [vmem:[#allocation150_spill] sm:$0xff] %v8469_v38  ;;  %13780 = vst [vmem:[#allocation151_spill] sm:$0xff] %v8471_v63  ;;  %v6774_v38 = vld [vmem:[%s7637_s17 + $0xdb] sm:$0xff] }
 0x1ea   : > { %1927 = vrot.lane.b32.xlu1 %v6771_v18, %s7592_s25  ;;  %1925 = vrot.lane.b32.xlu0 %v6770_v6, %s7592_s25  ;;  %v6777_v6 = vld [vmem:[%s7637_s17 + $0xfb] sm:$0xff] }
 0x1ec   : > { %v8477_v23 = vpop.permute.xlu1 %1687  ;;  %v8479_v39 = vpop.permute.xlu0 %1685 }
 0x1ed   : > { %13781 = vst [vmem:[#allocation152_spill] sm:$0xff] %v8477_v23  ;;  %13782 = vst [vmem:[#allocation153_spill] sm:$0xff] %v8479_v39  ;;  %v6776_v23 = vld [vmem:[%s7637_s17 + $0xf3] sm:$0xff] }
 0x1ee   : > { %1931 = vrot.lane.b32.xlu1 %v6773_v44, %s7592_s25  ;;  %1929 = vrot.lane.b32.xlu0 %v6772_v62, %s7592_s25  ;;  %v6779_v62 = vld [vmem:[%s7637_s17 + $0x113] sm:$0xff] }
 0x1f0   : > { %v8485_v63 = vpop.permute.xlu1 %1691  ;;  %v8487_v18 = vpop.permute.xlu0 %1689 }
 0x1f1   : > { %13783 = vst [vmem:[#allocation154_spill] sm:$0xff] %v8485_v63  ;;  %13784 = vst [vmem:[#allocation155_spill] sm:$0xff] %v8487_v18  ;;  %v6778_v63 = vld [vmem:[%s7637_s17 + $0x10b] sm:$0xff] }
 0x1f2   : > { %1935 = vrot.lane.b32.xlu1 %v6775_v15, %s7592_s25  ;;  %1933 = vrot.lane.b32.xlu0 %v6774_v38, %s7592_s25  ;;  %v6781_v38 = vld [vmem:[%s7637_s17 + $0x12b] sm:$0xff] }
 0x1f4   : > { %v8493_v39 = vpop.permute.xlu1 %1695  ;;  %v8495_v44 = vpop.permute.xlu0 %1693 }
 0x1f5   : > { %13785 = vst [vmem:[#allocation156_spill] sm:$0xff] %v8493_v39  ;;  %13786 = vst [vmem:[#allocation157_spill] sm:$0xff] %v8495_v44  ;;  %v6780_v39 = vld [vmem:[%s7637_s17 + $0x123] sm:$0xff] }
 0x1f6   : > { %1939 = vrot.lane.b32.xlu1 %v6777_v6, %s7592_s25  ;;  %1937 = vrot.lane.b32.xlu0 %v6776_v23, %s7592_s25  ;;  %v6783_v23 = vld [vmem:[%s7637_s17 + $0x143] sm:$0xff] }
 0x1f8   : > { %v8501_v18 = vpop.permute.xlu1 %1699  ;;  %v8503_v15 = vpop.permute.xlu0 %1697 }
 0x1fa   : > { %1943 = vrot.lane.b32.xlu1 %v6779_v62, %s7592_s25  ;;  %1941 = vrot.lane.b32.xlu0 %v6778_v63, %s7592_s25  ;;  %v6785_v63 = vld [vmem:[%s7637_s17 + $0x15b] sm:$0xff] }
 0x1fc   : > { %v8509_v44 = vpop.permute.xlu1 %1703  ;;  %v8511_v6 = vpop.permute.xlu0 %1701 }
 0x1fe   : > { %1947 = vrot.lane.b32.xlu1 %v6781_v38, %s7592_s25  ;;  %1945 = vrot.lane.b32.xlu0 %v6780_v39, %s7592_s25  ;;  %v6787_v39 = vld [vmem:[%s7637_s17 + $0x173] sm:$0xff] }
 0x200   : > { %v8517_v41 = vpop.permute.xlu1 %1707  ;;  %v8519_v62 = vpop.permute.xlu0 %1705 }
 0x202   : > { %1951 = vrot.lane.b32.xlu1 %v6783_v23, %s7592_s25  ;;  %1949 = vrot.lane.b32.xlu0 %v6782_v45, %s7592_s25  ;;  %v6789_v45 = vld [vmem:[%s7637_s17 + $0x18b] sm:$0xff]  ;;  %v6788_v23 = vld [vmem:[%s7637_s17 + $0x183] sm:$0xff] }
 0x204   : > { %v8525_v37 = vpop.permute.xlu1 %1775  ;;  %v8527_v38 = vpop.permute.xlu0 %1773 }
 0x205   : > { %13787 = vst [vmem:[#allocation158_spill] sm:$0xff] %v8525_v37  ;;  %13788 = vst [vmem:[#allocation159_spill] sm:$0xff] %v8527_v38 }
 0x206   : > { %1955 = vrot.lane.b32.xlu1 %v6785_v63, %s7592_s25  ;;  %1953 = vrot.lane.b32.xlu0 %v6784_v40, %s7592_s25  ;;  %v6791_v40 = vld [vmem:[%s7637_s17 + $0x24] sm:$0xff]  ;;  %v6790_v63 = vld [vmem:[%s7637_s17 + $0x1c] sm:$0xff] }
 0x208   : > { %v8533_v33 = vpop.permute.xlu1 %1779  ;;  %v8535_v32 = vpop.permute.xlu0 %1777 }
 0x209   : > { %13789 = vst [vmem:[#allocation160_spill] sm:$0xff] %v8533_v33  ;;  %13790 = vst [vmem:[#allocation161_spill] sm:$0xff] %v8535_v32  ;;  %v6814_v33 = vld [vmem:[%s7637_s17 + $0x13c] sm:$0xff] }
 0x20a   : > { %1959 = vrot.lane.b32.xlu1 %v6787_v39, %s7592_s25  ;;  %1957 = vrot.lane.b32.xlu0 %v6786_v36, %s7592_s25  ;;  %v6793_v36 = vld [vmem:[%s7637_s17 + $0x3c] sm:$0xff] }
 0x20c   : > { %v8541_v38 = vpop.permute.xlu1 %1783  ;;  %v8543_v37 = vpop.permute.xlu0 %1781 }
 0x20d   : > { %13791 = vst [vmem:[#allocation162_spill] sm:$0xff] %v8541_v38  ;;  %13792 = vst [vmem:[#allocation163_spill] sm:$0xff] %v8543_v37  ;;  %v6792_v37 = vld [vmem:[%s7637_s17 + $0x34] sm:$0xff] }
 0x20e   : > { %1963 = vrot.lane.b32.xlu1 %v6789_v45, %s7592_s25  ;;  %1961 = vrot.lane.b32.xlu0 %v6788_v23, %s7592_s25  ;;  %v6795_v23 = vld [vmem:[%s7637_s17 + $0x54] sm:$0xff] }
 0x210   : > { %v8549_v32 = vpop.permute.xlu1 %1787  ;;  %v8551_v39 = vpop.permute.xlu0 %1785 }
 0x211   : > { %13793 = vst [vmem:[#allocation164_spill] sm:$0xff] %v8549_v32  ;;  %13794 = vst [vmem:[#allocation165_spill] sm:$0xff] %v8551_v39  ;;  %v6794_v39 = vld [vmem:[%s7637_s17 + $0x4c] sm:$0xff] }
 0x212   : > { %2031 = vrot.lane.b32.xlu1 %v6791_v40, %s7593_s26  ;;  %2029 = vrot.lane.b32.xlu0 %v6790_v63, %s7593_s26  ;;  %v6797_v63 = vld [vmem:[%s7637_s17 + $0x6c] sm:$0xff] }
 0x214   : > { %v8557_v38 = vpop.permute.xlu1 %1791  ;;  %v8559_v45 = vpop.permute.xlu0 %1789 }
 0x215   : > { %13795 = vst [vmem:[#allocation166_spill] sm:$0xff] %v8557_v38  ;;  %13796 = vst [vmem:[#allocation167_spill] sm:$0xff] %v8559_v45  ;;  %v6796_v38 = vld [vmem:[%s7637_s17 + $0x64] sm:$0xff] }
 0x216   : > { %2035 = vrot.lane.b32.xlu1 %v6793_v36, %s7593_s26  ;;  %2033 = vrot.lane.b32.xlu0 %v6792_v37, %s7593_s26  ;;  %v6799_v37 = vld [vmem:[%s7637_s17 + $0x84] sm:$0xff] }
 0x218   : > { %v8565_v32 = vpop.permute.xlu1 %1795  ;;  %v8567_v40 = vpop.permute.xlu0 %1793 }
 0x219   : > { %13797 = vst [vmem:[#allocation168_spill] sm:$0xff] %v8565_v32  ;;  %13798 = vst [vmem:[#allocation169_spill] sm:$0xff] %v8567_v40  ;;  %v6798_v32 = vld [vmem:[%s7637_s17 + $0x7c] sm:$0xff] }
 0x21a   : > { %2039 = vrot.lane.b32.xlu1 %v6795_v23, %s7593_s26  ;;  %2037 = vrot.lane.b32.xlu0 %v6794_v39, %s7593_s26  ;;  %v6801_v39 = vld [vmem:[%s7637_s17 + $0x9c] sm:$0xff] }
 0x21c   : > { %v8573_v45 = vpop.permute.xlu1 %1799  ;;  %v8575_v36 = vpop.permute.xlu0 %1797 }
 0x21d   : > { %13799 = vst [vmem:[#allocation170_spill] sm:$0xff] %v8573_v45  ;;  %13800 = vst [vmem:[#allocation171_spill] sm:$0xff] %v8575_v36  ;;  %v6800_v45 = vld [vmem:[%s7637_s17 + $0x94] sm:$0xff] }
 0x21e   : > { %2043 = vrot.lane.b32.xlu1 %v6797_v63, %s7593_s26  ;;  %2041 = vrot.lane.b32.xlu0 %v6796_v38, %s7593_s26  ;;  %v6803_v38 = vld [vmem:[%s7637_s17 + $0xb4] sm:$0xff] }
 0x220   : > { %v8581_v40 = vpop.permute.xlu1 %1803  ;;  %v8583_v23 = vpop.permute.xlu0 %1801 }
 0x221   : > { %13801 = vst [vmem:[#allocation172_spill] sm:$0xff] %v8581_v40  ;;  %13802 = vst [vmem:[#allocation173_spill] sm:$0xff] %v8583_v23  ;;  %v6802_v40 = vld [vmem:[%s7637_s17 + $0xac] sm:$0xff] }
 0x222   : > { %2047 = vrot.lane.b32.xlu1 %v6799_v37, %s7593_s26  ;;  %2045 = vrot.lane.b32.xlu0 %v6798_v32, %s7593_s26  ;;  %v6805_v32 = vld [vmem:[%s7637_s17 + $0xcc] sm:$0xff] }
 0x224   : > { %v8589_v36 = vpop.permute.xlu1 %1807  ;;  %v8591_v63 = vpop.permute.xlu0 %1805 }
 0x225   : > { %13803 = vst [vmem:[#allocation174_spill] sm:$0xff] %v8589_v36  ;;  %13804 = vst [vmem:[#allocation175_spill] sm:$0xff] %v8591_v63  ;;  %v6804_v36 = vld [vmem:[%s7637_s17 + $0xc4] sm:$0xff] }
 0x226   : > { %2051 = vrot.lane.b32.xlu1 %v6801_v39, %s7593_s26  ;;  %2049 = vrot.lane.b32.xlu0 %v6800_v45, %s7593_s26  ;;  %v6807_v45 = vld [vmem:[%s7637_s17 + $0xe4] sm:$0xff] }
 0x228   : > { %v8597_v23 = vpop.permute.xlu1 %1811  ;;  %v8599_v37 = vpop.permute.xlu0 %1809 }
 0x229   : > { %13805 = vst [vmem:[#allocation176_spill] sm:$0xff] %v8597_v23  ;;  %13806 = vst [vmem:[#allocation177_spill] sm:$0xff] %v8599_v37  ;;  %v6806_v23 = vld [vmem:[%s7637_s17 + $0xdc] sm:$0xff] }
 0x22a   : > { %2055 = vrot.lane.b32.xlu1 %v6803_v38, %s7593_s26  ;;  %2053 = vrot.lane.b32.xlu0 %v6802_v40, %s7593_s26  ;;  %v6809_v40 = vld [vmem:[%s7637_s17 + $0xfc] sm:$0xff] }
 0x22c   : > { %v8605_v63 = vpop.permute.xlu1 %1815  ;;  %v8607_v39 = vpop.permute.xlu0 %1813 }
 0x22d   : > { %13807 = vst [vmem:[#allocation178_spill] sm:$0xff] %v8605_v63  ;;  %13808 = vst [vmem:[#allocation179_spill] sm:$0xff] %v8607_v39  ;;  %v6808_v63 = vld [vmem:[%s7637_s17 + $0xf4] sm:$0xff] }
 0x22e   : > { %2059 = vrot.lane.b32.xlu1 %v6805_v32, %s7593_s26  ;;  %2057 = vrot.lane.b32.xlu0 %v6804_v36, %s7593_s26  ;;  %v6811_v36 = vld [vmem:[%s7637_s17 + $0x114] sm:$0xff] }
 0x230   : > { %v8613_v37 = vpop.permute.xlu1 %1819  ;;  %v8615_v38 = vpop.permute.xlu0 %1817 }
 0x231   : > { %13809 = vst [vmem:[#allocation180_spill] sm:$0xff] %v8613_v37  ;;  %13810 = vst [vmem:[#allocation181_spill] sm:$0xff] %v8615_v38  ;;  %v6810_v37 = vld [vmem:[%s7637_s17 + $0x10c] sm:$0xff] }
 0x232   : > { %2063 = vrot.lane.b32.xlu1 %v6807_v45, %s7593_s26  ;;  %2061 = vrot.lane.b32.xlu0 %v6806_v23, %s7593_s26  ;;  %v6813_v23 = vld [vmem:[%s7637_s17 + $0x12c] sm:$0xff] }
 0x234   : > { %v8621_v39 = vpop.permute.xlu1 %1823  ;;  %v8623_v32 = vpop.permute.xlu0 %1821 }
 0x235   : > { %13811 = vst [vmem:[#allocation182_spill] sm:$0xff] %v8621_v39  ;;  %13812 = vst [vmem:[#allocation183_spill] sm:$0xff] %v8623_v32  ;;  %v6812_v39 = vld [vmem:[%s7637_s17 + $0x124] sm:$0xff] }
 0x236   : > { %2067 = vrot.lane.b32.xlu1 %v6809_v40, %s7593_s26  ;;  %2065 = vrot.lane.b32.xlu0 %v6808_v63, %s7593_s26  ;;  %v6815_v63 = vld [vmem:[%s7637_s17 + $0x144] sm:$0xff] }
 0x238   : > { %v8629_v38 = vpop.permute.xlu1 %1827  ;;  %v8631_v45 = vpop.permute.xlu0 %1825 }
 0x23a   : > { %2071 = vrot.lane.b32.xlu1 %v6811_v36, %s7593_s26  ;;  %2069 = vrot.lane.b32.xlu0 %v6810_v37, %s7593_s26  ;;  %v6817_v37 = vld [vmem:[%s7637_s17 + $0x15c] sm:$0xff] }
 0x23c   : > { %v8637_v32 = vpop.permute.xlu1 %1831  ;;  %v8639_v40 = vpop.permute.xlu0 %1829 }
 0x23e   : > { %2075 = vrot.lane.b32.xlu1 %v6813_v23, %s7593_s26  ;;  %2073 = vrot.lane.b32.xlu0 %v6812_v39, %s7593_s26  ;;  %v6819_v39 = vld [vmem:[%s7637_s17 + $0x174] sm:$0xff] }
 0x240   : > { %v8645_v29 = vpop.permute.xlu1 %1835  ;;  %v8647_v36 = vpop.permute.xlu0 %1833 }
 0x241   : > { %13813 = vst [vmem:[#allocation184_spill] sm:$0xff] %v8645_v29  ;;  %13814 = vst [vmem:[#allocation185_spill] sm:$0xff] %v8647_v36  ;;  %v7515_v36 = vld [vmem:[%s7637_s17 + $0x150] sm:$0xff] }
 0x242   : > { %2079 = vrot.lane.b32.xlu1 %v6815_v63, %s7593_s26  ;;  %2077 = vrot.lane.b32.xlu0 %v6814_v33, %s7593_s26  ;;  %v6821_v33 = vld [vmem:[%s7637_s17 + $0x18c] sm:$0xff]  ;;  %v6820_v63 = vld [vmem:[%s7637_s17 + $0x184] sm:$0xff] }
 0x244   : > { %v8653_v25 = vpop.permute.xlu1 %1903  ;;  %v8655_v23 = vpop.permute.xlu0 %1901 }
 0x245   : > { %13815 = vst [vmem:[#allocation186_spill] sm:$0xff] %v8653_v25  ;;  %13816 = vst [vmem:[#allocation187_spill] sm:$0xff] %v8655_v23 }
 0x246   : > { %2083 = vrot.lane.b32.xlu1 %v6817_v37, %s7593_s26  ;;  %2081 = vrot.lane.b32.xlu0 %v6816_v28, %s7593_s26  ;;  %v6823_v28 = vld [vmem:[%s7637_s17 + $0x38] sm:$0xff]  ;;  %v6822_v37 = vld [vmem:[%s7637_s17 + $0x30] sm:$0xff] }
 0x248   : > { %v8661_v21 = vpop.permute.xlu1 %1907  ;;  %v8663_v20 = vpop.permute.xlu0 %1905 }
 0x249   : > { %13817 = vst [vmem:[#allocation188_spill] sm:$0xff] %v8661_v21  ;;  %13818 = vst [vmem:[#allocation189_spill] sm:$0xff] %v8663_v20  ;;  %v6846_v21 = vld [vmem:[%s7637_s17 + $0x150] sm:$0xff] }
 0x24a   : > { %2087 = vrot.lane.b32.xlu1 %v6819_v39, %s7593_s26  ;;  %2085 = vrot.lane.b32.xlu0 %v6818_v24, %s7593_s26  ;;  %v6825_v24 = vld [vmem:[%s7637_s17 + $0x50] sm:$0xff] }
 0x24c   : > { %v8669_v23 = vpop.permute.xlu1 %1911  ;;  %v8671_v25 = vpop.permute.xlu0 %1909 }
 0x24d   : > { %13819 = vst [vmem:[#allocation190_spill] sm:$0xff] %v8669_v23  ;;  %13820 = vst [vmem:[#allocation191_spill] sm:$0xff] %v8671_v25  ;;  %v6824_v25 = vld [vmem:[%s7637_s17 + $0x48] sm:$0xff] }
 0x24e   : > { %2091 = vrot.lane.b32.xlu1 %v6821_v33, %s7593_s26  ;;  %2089 = vrot.lane.b32.xlu0 %v6820_v63, %s7593_s26  ;;  %v6827_v63 = vld [vmem:[%s7637_s17 + $0x68] sm:$0xff] }
 0x250   : > { %v8677_v20 = vpop.permute.xlu1 %1915  ;;  %v8679_v39 = vpop.permute.xlu0 %1913 }
 0x251   : > { %13821 = vst [vmem:[#allocation192_spill] sm:$0xff] %v8677_v20  ;;  %13822 = vst [vmem:[#allocation193_spill] sm:$0xff] %v8679_v39  ;;  %v6826_v39 = vld [vmem:[%s7637_s17 + $0x60] sm:$0xff] }
 0x252   : > { %2159 = vrot.lane.b32.xlu1 %v6823_v28, %s7594_s27  ;;  %2157 = vrot.lane.b32.xlu0 %v6822_v37, %s7594_s27  ;;  %v6829_v37 = vld [vmem:[%s7637_s17 + $0x80] sm:$0xff] }
 0x254   : > { %v8685_v23 = vpop.permute.xlu1 %1919  ;;  %v8687_v33 = vpop.permute.xlu0 %1917 }
 0x255   : > { %13823 = vst [vmem:[#allocation194_spill] sm:$0xff] %v8685_v23  ;;  %13824 = vst [vmem:[#allocation195_spill] sm:$0xff] %v8687_v33  ;;  %v6828_v23 = vld [vmem:[%s7637_s17 + $0x78] sm:$0xff] }
 0x256   : > { %2163 = vrot.lane.b32.xlu1 %v6825_v24, %s7594_s27  ;;  %2161 = vrot.lane.b32.xlu0 %v6824_v25, %s7594_s27  ;;  %v6831_v25 = vld [vmem:[%s7637_s17 + $0x98] sm:$0xff] }
 0x258   : > { %v8693_v20 = vpop.permute.xlu1 %1923  ;;  %v8695_v28 = vpop.permute.xlu0 %1921 }
 0x259   : > { %13825 = vst [vmem:[#allocation196_spill] sm:$0xff] %v8693_v20  ;;  %13826 = vst [vmem:[#allocation197_spill] sm:$0xff] %v8695_v28  ;;  %v6830_v20 = vld [vmem:[%s7637_s17 + $0x90] sm:$0xff] }
 0x25a   : > { %2167 = vrot.lane.b32.xlu1 %v6827_v63, %s7594_s27  ;;  %2165 = vrot.lane.b32.xlu0 %v6826_v39, %s7594_s27  ;;  %v6833_v39 = vld [vmem:[%s7637_s17 + $0xb0] sm:$0xff] }
 0x25c   : > { %v8701_v33 = vpop.permute.xlu1 %1927  ;;  %v8703_v24 = vpop.permute.xlu0 %1925 }
 0x25d   : > { %13827 = vst [vmem:[#allocation198_spill] sm:$0xff] %v8701_v33  ;;  %13828 = vst [vmem:[#allocation199_spill] sm:$0xff] %v8703_v24  ;;  %v6832_v33 = vld [vmem:[%s7637_s17 + $0xa8] sm:$0xff] }
 0x25e   : > { %2171 = vrot.lane.b32.xlu1 %v6829_v37, %s7594_s27  ;;  %2169 = vrot.lane.b32.xlu0 %v6828_v23, %s7594_s27  ;;  %v6835_v23 = vld [vmem:[%s7637_s17 + $0xc8] sm:$0xff] }
 0x260   : > { %v8709_v28 = vpop.permute.xlu1 %1931  ;;  %v8711_v63 = vpop.permute.xlu0 %1929 }
 0x261   : > { %13829 = vst [vmem:[#allocation200_spill] sm:$0xff] %v8709_v28  ;;  %13830 = vst [vmem:[#allocation201_spill] sm:$0xff] %v8711_v63  ;;  %v6834_v28 = vld [vmem:[%s7637_s17 + $0xc0] sm:$0xff] }
 0x262   : > { %2175 = vrot.lane.b32.xlu1 %v6831_v25, %s7594_s27  ;;  %2173 = vrot.lane.b32.xlu0 %v6830_v20, %s7594_s27  ;;  %v6837_v20 = vld [vmem:[%s7637_s17 + $0xe0] sm:$0xff] }
 0x264   : > { %v8717_v24 = vpop.permute.xlu1 %1935  ;;  %v8719_v37 = vpop.permute.xlu0 %1933 }
 0x265   : > { %13831 = vst [vmem:[#allocation202_spill] sm:$0xff] %v8717_v24  ;;  %13832 = vst [vmem:[#allocation203_spill] sm:$0xff] %v8719_v37  ;;  %v6836_v24 = vld [vmem:[%s7637_s17 + $0xd8] sm:$0xff] }
 0x266   : > { %2179 = vrot.lane.b32.xlu1 %v6833_v39, %s7594_s27  ;;  %2177 = vrot.lane.b32.xlu0 %v6832_v33, %s7594_s27  ;;  %v6839_v33 = vld [vmem:[%s7637_s17 + $0xf8] sm:$0xff] }
 0x268   : > { %v8725_v63 = vpop.permute.xlu1 %1939  ;;  %v8727_v25 = vpop.permute.xlu0 %1937 }
 0x269   : > { %13833 = vst [vmem:[#allocation204_spill] sm:$0xff] %v8725_v63  ;;  %13834 = vst [vmem:[#allocation205_spill] sm:$0xff] %v8727_v25  ;;  %v6838_v63 = vld [vmem:[%s7637_s17 + $0xf0] sm:$0xff] }
 0x26a   : > { %2183 = vrot.lane.b32.xlu1 %v6835_v23, %s7594_s27  ;;  %2181 = vrot.lane.b32.xlu0 %v6834_v28, %s7594_s27  ;;  %v6841_v28 = vld [vmem:[%s7637_s17 + $0x110] sm:$0xff] }
 0x26c   : > { %v8733_v37 = vpop.permute.xlu1 %1943  ;;  %v8735_v39 = vpop.permute.xlu0 %1941 }
 0x26d   : > { %13835 = vst [vmem:[#allocation206_spill] sm:$0xff] %v8733_v37  ;;  %13836 = vst [vmem:[#allocation207_spill] sm:$0xff] %v8735_v39  ;;  %v6840_v37 = vld [vmem:[%s7637_s17 + $0x108] sm:$0xff] }
 0x26e   : > { %2187 = vrot.lane.b32.xlu1 %v6837_v20, %s7594_s27  ;;  %2185 = vrot.lane.b32.xlu0 %v6836_v24, %s7594_s27  ;;  %v6843_v24 = vld [vmem:[%s7637_s17 + $0x128] sm:$0xff] }
 0x270   : > { %v8741_v25 = vpop.permute.xlu1 %1947  ;;  %v8743_v23 = vpop.permute.xlu0 %1945 }
 0x271   : > { %13837 = vst [vmem:[#allocation208_spill] sm:$0xff] %v8741_v25  ;;  %13838 = vst [vmem:[#allocation209_spill] sm:$0xff] %v8743_v23  ;;  %v6842_v25 = vld [vmem:[%s7637_s17 + $0x120] sm:$0xff] }
 0x272   : > { %2191 = vrot.lane.b32.xlu1 %v6839_v33, %s7594_s27  ;;  %2189 = vrot.lane.b32.xlu0 %v6838_v63, %s7594_s27  ;;  %v6845_v63 = vld [vmem:[%s7637_s17 + $0x140] sm:$0xff] }
 0x274   : > { %v8749_v39 = vpop.permute.xlu1 %1951  ;;  %v8751_v20 = vpop.permute.xlu0 %1949 }
 0x275   : > { %13839 = vst [vmem:[#allocation210_spill] sm:$0xff] %v8749_v39  ;;  %13840 = vst [vmem:[#allocation211_spill] sm:$0xff] %v8751_v20  ;;  %v6844_v39 = vld [vmem:[%s7637_s17 + $0x138] sm:$0xff] }
 0x276   : > { %2195 = vrot.lane.b32.xlu1 %v6841_v28, %s7594_s27  ;;  %2193 = vrot.lane.b32.xlu0 %v6840_v37, %s7594_s27  ;;  %v6847_v37 = vld [vmem:[%s7637_s17 + $0x158] sm:$0xff] }
 0x278   : > { %v8757_v23 = vpop.permute.xlu1 %1955  ;;  %v8759_v33 = vpop.permute.xlu0 %1953 }
 0x27a   : > { %2199 = vrot.lane.b32.xlu1 %v6843_v24, %s7594_s27  ;;  %2197 = vrot.lane.b32.xlu0 %v6842_v25, %s7594_s27  ;;  %v6849_v25 = vld [vmem:[%s7637_s17 + $0x170] sm:$0xff] }
 0x27c   : > { %v8765_v20 = vpop.permute.xlu1 %1959  ;;  %v8767_v28 = vpop.permute.xlu0 %1957 }
 0x27e   : > { %2203 = vrot.lane.b32.xlu1 %v6845_v63, %s7594_s27  ;;  %2201 = vrot.lane.b32.xlu0 %v6844_v39, %s7594_s27  ;;  %v6851_v39 = vld [vmem:[%s7637_s17 + $0x188] sm:$0xff] }
 0x280   : > { %v8773_v17 = vpop.permute.xlu1 %1963  ;;  %v8775_v24 = vpop.permute.xlu0 %1961 }
 0x281   : > { %13841 = vst [vmem:[#allocation212_spill] sm:$0xff] %v8773_v17  ;;  %13842 = vst [vmem:[#allocation213_spill] sm:$0xff] %v8775_v24 }
 0x282   : > { %2207 = vrot.lane.b32.xlu1 %v6847_v37, %s7594_s27  ;;  %2205 = vrot.lane.b32.xlu0 %v6846_v21, %s7594_s27  ;;  %v6853_v21 = vld [vmem:[%s7637_s17 + $0x1a0] sm:$0xff]  ;;  %v6852_v37 = vld [vmem:[%s7637_s17 + $0x198] sm:$0xff] }
 0x284   : > { %v8781_v13 = vpop.permute.xlu1 %2031  ;;  %v8783_v63 = vpop.permute.xlu0 %2029 }
 0x285   : > { %13843 = vst [vmem:[#allocation214_spill] sm:$0xff] %v8781_v13  ;;  %13844 = vst [vmem:[#allocation215_spill] sm:$0xff] %v8783_v63 }
 0x286   : > { %2211 = vrot.lane.b32.xlu1 %v6849_v25, %s7594_s27  ;;  %2209 = vrot.lane.b32.xlu0 %v6848_v16, %s7594_s27  ;;  %v6855_v16 = vld [vmem:[%s7637_s17 + $0x39] sm:$0xff]  ;;  %v6854_v25 = vld [vmem:[%s7637_s17 + $0x31] sm:$0xff] }
 0x288   : > { %v8789_v9 = vpop.permute.xlu1 %2035  ;;  %v8791_v8 = vpop.permute.xlu0 %2033 }
 0x289   : > { %13845 = vst [vmem:[#allocation216_spill] sm:$0xff] %v8789_v9  ;;  %13846 = vst [vmem:[#allocation217_spill] sm:$0xff] %v8791_v8  ;;  %v6878_v9 = vld [vmem:[%s7637_s17 + $0x151] sm:$0xff] }
 0x28a   : > { %2215 = vrot.lane.b32.xlu1 %v6851_v39, %s7594_s27  ;;  %2213 = vrot.lane.b32.xlu0 %v6850_v12, %s7594_s27  ;;  %v6857_v12 = vld [vmem:[%s7637_s17 + $0x51] sm:$0xff] }
 0x28c   : > { %v8797_v13 = vpop.permute.xlu1 %2039  ;;  %v8799_v63 = vpop.permute.xlu0 %2037 }
 0x28d   : > { %13847 = vst [vmem:[#allocation218_spill] sm:$0xff] %v8797_v13  ;;  %13848 = vst [vmem:[#allocation219_spill] sm:$0xff] %v8799_v63  ;;  %v6856_v63 = vld [vmem:[%s7637_s17 + $0x49] sm:$0xff] }
 0x28e   : > { %2219 = vrot.lane.b32.xlu1 %v6853_v21, %s7594_s27  ;;  %2217 = vrot.lane.b32.xlu0 %v6852_v37, %s7594_s27  ;;  %v6859_v37 = vld [vmem:[%s7637_s17 + $0x69] sm:$0xff] }
 0x290   : > { %v8805_v8 = vpop.permute.xlu1 %2043  ;;  %v8807_v39 = vpop.permute.xlu0 %2041 }
 0x291   : > { %13849 = vst [vmem:[#allocation220_spill] sm:$0xff] %v8805_v8  ;;  %13850 = vst [vmem:[#allocation221_spill] sm:$0xff] %v8807_v39  ;;  %v6858_v39 = vld [vmem:[%s7637_s17 + $0x61] sm:$0xff] }
 0x292   : > { %2287 = vrot.lane.b32.xlu1 %v6855_v16, %s7595_s28  ;;  %2285 = vrot.lane.b32.xlu0 %v6854_v25, %s7595_s28  ;;  %v6861_v25 = vld [vmem:[%s7637_s17 + $0x81] sm:$0xff] }
 0x294   : > { %v8813_v13 = vpop.permute.xlu1 %2047  ;;  %v8815_v21 = vpop.permute.xlu0 %2045 }
 0x295   : > { %13851 = vst [vmem:[#allocation222_spill] sm:$0xff] %v8813_v13  ;;  %13852 = vst [vmem:[#allocation223_spill] sm:$0xff] %v8815_v21  ;;  %v6860_v13 = vld [vmem:[%s7637_s17 + $0x79] sm:$0xff] }
 0x296   : > { %2291 = vrot.lane.b32.xlu1 %v6857_v12, %s7595_s28  ;;  %2289 = vrot.lane.b32.xlu0 %v6856_v63, %s7595_s28  ;;  %v6863_v63 = vld [vmem:[%s7637_s17 + $0x99] sm:$0xff] }
 0x298   : > { %v8821_v8 = vpop.permute.xlu1 %2051  ;;  %v8823_v16 = vpop.permute.xlu0 %2049 }
 0x299   : > { %13853 = vst [vmem:[#allocation224_spill] sm:$0xff] %v8821_v8  ;;  %13854 = vst [vmem:[#allocation225_spill] sm:$0xff] %v8823_v16  ;;  %v6862_v8 = vld [vmem:[%s7637_s17 + $0x91] sm:$0xff] }
 0x29a   : > { %2295 = vrot.lane.b32.xlu1 %v6859_v37, %s7595_s28  ;;  %2293 = vrot.lane.b32.xlu0 %v6858_v39, %s7595_s28  ;;  %v6865_v39 = vld [vmem:[%s7637_s17 + $0xb1] sm:$0xff] }
 0x29c   : > { %v8829_v21 = vpop.permute.xlu1 %2055  ;;  %v8831_v12 = vpop.permute.xlu0 %2053 }
 0x29d   : > { %13855 = vst [vmem:[#allocation226_spill] sm:$0xff] %v8829_v21  ;;  %13856 = vst [vmem:[#allocation227_spill] sm:$0xff] %v8831_v12  ;;  %v6864_v21 = vld [vmem:[%s7637_s17 + $0xa9] sm:$0xff] }
 0x29e   : > { %2299 = vrot.lane.b32.xlu1 %v6861_v25, %s7595_s28  ;;  %2297 = vrot.lane.b32.xlu0 %v6860_v13, %s7595_s28  ;;  %v6867_v13 = vld [vmem:[%s7637_s17 + $0xc9] sm:$0xff] }
 0x2a0   : > { %v8837_v16 = vpop.permute.xlu1 %2059  ;;  %v8839_v37 = vpop.permute.xlu0 %2057 }
 0x2a1   : > { %13857 = vst [vmem:[#allocation228_spill] sm:$0xff] %v8837_v16  ;;  %13858 = vst [vmem:[#allocation229_spill] sm:$0xff] %v8839_v37  ;;  %v6866_v16 = vld [vmem:[%s7637_s17 + $0xc1] sm:$0xff] }
 0x2a2   : > { %2303 = vrot.lane.b32.xlu1 %v6863_v63, %s7595_s28  ;;  %2301 = vrot.lane.b32.xlu0 %v6862_v8, %s7595_s28  ;;  %v6869_v8 = vld [vmem:[%s7637_s17 + $0xe1] sm:$0xff] }
 0x2a4   : > { %v8845_v12 = vpop.permute.xlu1 %2063  ;;  %v8847_v25 = vpop.permute.xlu0 %2061 }
 0x2a5   : > { %13859 = vst [vmem:[#allocation230_spill] sm:$0xff] %v8845_v12  ;;  %13860 = vst [vmem:[#allocation231_spill] sm:$0xff] %v8847_v25  ;;  %v6868_v12 = vld [vmem:[%s7637_s17 + $0xd9] sm:$0xff] }
 0x2a6   : > { %2307 = vrot.lane.b32.xlu1 %v6865_v39, %s7595_s28  ;;  %2305 = vrot.lane.b32.xlu0 %v6864_v21, %s7595_s28  ;;  %v6871_v21 = vld [vmem:[%s7637_s17 + $0xf9] sm:$0xff] }
 0x2a8   : > { %v8853_v37 = vpop.permute.xlu1 %2067  ;;  %v8855_v63 = vpop.permute.xlu0 %2065 }
 0x2a9   : > { %13861 = vst [vmem:[#allocation232_spill] sm:$0xff] %v8853_v37  ;;  %13862 = vst [vmem:[#allocation233_spill] sm:$0xff] %v8855_v63  ;;  %v6870_v37 = vld [vmem:[%s7637_s17 + $0xf1] sm:$0xff] }
 0x2aa   : > { %2311 = vrot.lane.b32.xlu1 %v6867_v13, %s7595_s28  ;;  %2309 = vrot.lane.b32.xlu0 %v6866_v16, %s7595_s28  ;;  %v6873_v16 = vld [vmem:[%s7637_s17 + $0x111] sm:$0xff] }
 0x2ac   : > { %v8861_v25 = vpop.permute.xlu1 %2071  ;;  %v8863_v39 = vpop.permute.xlu0 %2069 }
 0x2ad   : > { %13863 = vst [vmem:[#allocation234_spill] sm:$0xff] %v8861_v25  ;;  %13864 = vst [vmem:[#allocation235_spill] sm:$0xff] %v8863_v39  ;;  %v6872_v25 = vld [vmem:[%s7637_s17 + $0x109] sm:$0xff] }
 0x2ae   : > { %2315 = vrot.lane.b32.xlu1 %v6869_v8, %s7595_s28  ;;  %2313 = vrot.lane.b32.xlu0 %v6868_v12, %s7595_s28  ;;  %v6875_v12 = vld [vmem:[%s7637_s17 + $0x129] sm:$0xff] }
 0x2b0   : > { %v8869_v63 = vpop.permute.xlu1 %2075  ;;  %v8871_v13 = vpop.permute.xlu0 %2073 }
 0x2b1   : > { %13865 = vst [vmem:[#allocation236_spill] sm:$0xff] %v8869_v63  ;;  %13866 = vst [vmem:[#allocation237_spill] sm:$0xff] %v8871_v13  ;;  %v6874_v63 = vld [vmem:[%s7637_s17 + $0x121] sm:$0xff] }
 0x2b2   : > { %2319 = vrot.lane.b32.xlu1 %v6871_v21, %s7595_s28  ;;  %2317 = vrot.lane.b32.xlu0 %v6870_v37, %s7595_s28  ;;  %v6877_v37 = vld [vmem:[%s7637_s17 + $0x141] sm:$0xff] }
 0x2b4   : > { %v8877_v39 = vpop.permute.xlu1 %2079  ;;  %v8879_v8 = vpop.permute.xlu0 %2077 }
 0x2b5   : > { %13867 = vst [vmem:[#allocation238_spill] sm:$0xff] %v8877_v39  ;;  %13868 = vst [vmem:[#allocation239_spill] sm:$0xff] %v8879_v8  ;;  %v6876_v39 = vld [vmem:[%s7637_s17 + $0x139] sm:$0xff] }
 0x2b6   : > { %2323 = vrot.lane.b32.xlu1 %v6873_v16, %s7595_s28  ;;  %2321 = vrot.lane.b32.xlu0 %v6872_v25, %s7595_s28  ;;  %v6879_v25 = vld [vmem:[%s7637_s17 + $0x159] sm:$0xff] }
 0x2b8   : > { %v8885_v13 = vpop.permute.xlu1 %2083  ;;  %v8887_v21 = vpop.permute.xlu0 %2081 }
 0x2ba   : > { %2327 = vrot.lane.b32.xlu1 %v6875_v12, %s7595_s28  ;;  %2325 = vrot.lane.b32.xlu0 %v6874_v63, %s7595_s28  ;;  %v6881_v63 = vld [vmem:[%s7637_s17 + $0x171] sm:$0xff] }
 0x2bc   : > { %v8893_v8 = vpop.permute.xlu1 %2087  ;;  %v8895_v16 = vpop.permute.xlu0 %2085 }
 0x2be   : > { %2331 = vrot.lane.b32.xlu1 %v6877_v37, %s7595_s28  ;;  %2329 = vrot.lane.b32.xlu0 %v6876_v39, %s7595_s28  ;;  %v6883_v39 = vld [vmem:[%s7637_s17 + $0x189] sm:$0xff] }
 0x2c0   : > { %v8901_v5 = vpop.permute.xlu1 %2091  ;;  %v8903_v12 = vpop.permute.xlu0 %2089 }
 0x2c1   : > { %13869 = vst [vmem:[#allocation240_spill] sm:$0xff] %v8901_v5  ;;  %13870 = vst [vmem:[#allocation241_spill] sm:$0xff] %v8903_v12  ;;  %v6912_v5 = vld [vmem:[%s7637_s17 + $0x16a] sm:$0xff] }
 0x2c2   : > { %2335 = vrot.lane.b32.xlu1 %v6879_v25, %s7595_s28  ;;  %2333 = vrot.lane.b32.xlu0 %v6878_v9, %s7595_s28  ;;  %v6885_v9 = vld [vmem:[%s7637_s17 + $0x1a1] sm:$0xff]  ;;  %v6884_v25 = vld [vmem:[%s7637_s17 + $0x199] sm:$0xff] }
 0x2c4   : > { %v8909_v1 = vpop.permute.xlu1 %2159  ;;  %v8911_v37 = vpop.permute.xlu0 %2157 }
 0x2c5   : > { %13871 = vst [vmem:[#allocation242_spill] sm:$0xff] %v8909_v1  ;;  %13872 = vst [vmem:[#allocation243_spill] sm:$0xff] %v8911_v37 }
 0x2c6   : > { %2339 = vrot.lane.b32.xlu1 %v6881_v63, %s7595_s28  ;;  %2337 = vrot.lane.b32.xlu0 %v6880_v4, %s7595_s28  ;;  %v6887_v4 = vld [vmem:[%s7637_s17 + $0x3a] sm:$0xff]  ;;  %v6886_v63 = vld [vmem:[%s7637_s17 + $0x32] sm:$0xff] }
 0x2c8   : > { %v8917_v61 = vpop.permute.xlu1 %2163  ;;  %v8919_v60 = vpop.permute.xlu0 %2161 }
 0x2c9   : > { %13873 = vst [vmem:[#allocation244_spill] sm:$0xff] %v8917_v61  ;;  %13874 = vst [vmem:[#allocation245_spill] sm:$0xff] %v8919_v60 }
 0x2ca   : > { %2343 = vrot.lane.b32.xlu1 %v6883_v39, %s7595_s28  ;;  %2341 = vrot.lane.b32.xlu0 %v6882_v0, %s7595_s28  ;;  %v8940_v0 = vld [vmem:[%s7637_s17 + $0x52] sm:$0xff] }
 0x2cb   : > { %13879 = vst [vmem:[#allocation250_spill] sm:$0xff] %v8940_v0 }
 0x2cc   : > { %v8925_v1 = vpop.permute.xlu1 %2167  ;;  %v8927_v37 = vpop.permute.xlu0 %2165 }
 0x2cd   : > { %13875 = vst [vmem:[#allocation246_spill] sm:$0xff] %v8925_v1  ;;  %13876 = vst [vmem:[#allocation247_spill] sm:$0xff] %v8927_v37  ;;  %v8943_v1 = vld [vmem:[%s7637_s17 + $0x4a] sm:$0xff] }
 0x2ce   : > { %2347 = vrot.lane.b32.xlu1 %v6885_v9, %s7595_s28  ;;  %2345 = vrot.lane.b32.xlu0 %v6884_v25, %s7595_s28  ;;  %13880 = vst [vmem:[#allocation251_spill] sm:$0xff] %v8943_v1  ;;  %s7600_s28 = smov 64  }
 0x2d0   : > { %v8933_v61 = vpop.permute.xlu1 %2171  ;;  %v8935_v39 = vpop.permute.xlu0 %2169 }
 0x2d1   : > { %13877 = vst [vmem:[#allocation248_spill] sm:$0xff] %v8933_v61  ;;  %13878 = vst [vmem:[#allocation249_spill] sm:$0xff] %v8935_v39  ;;  %v8954_v61 = vld [vmem:[%s7637_s17 + $0x6a] sm:$0xff] }
 0x2d2   : > { %2415 = vrot.lane.b32.xlu1 %v6887_v4, %s7596_s29  ;;  %2413 = vrot.lane.b32.xlu0 %v6886_v63, %s7596_s29  ;;  %13883 = vst [vmem:[#allocation254_spill] sm:$0xff] %v8954_v61  ;;  %v8957_v4 = vld [vmem:[%s7637_s17 + $0x62] sm:$0xff] }
 0x2d3   : > { %13884 = vst [vmem:[#allocation255_spill] sm:$0xff] %v8957_v4 }
 0x2d4   : > { %v8945_v9 = vpop.permute.xlu1 %2175  ;;  %v8947_v25 = vpop.permute.xlu0 %2173 }
 0x2d5   : > { %13881 = vst [vmem:[#allocation252_spill] sm:$0xff] %v8945_v9  ;;  %13882 = vst [vmem:[#allocation253_spill] sm:$0xff] %v8947_v25  ;;  %v6893_v9 = vld [vmem:[%s7637_s17 + $0x82] sm:$0xff]  ;;  %v6892_v25 = vld [vmem:[%s7637_s17 + $0x7a] sm:$0xff] }
 0x2d6   : > { %2419 = vrot.lane.b32.xlu1 %v8940_v0, %s7596_s29  ;;  %2417 = vrot.lane.b32.xlu0 %v8943_v1, %s7596_s29  ;;  %v6910_v1 = vld [vmem:[%s7637_s17 + $0x152] sm:$0xff] }
 0x2d8   : > { %v8959_v63 = vpop.permute.xlu1 %2179  ;;  %v8961_v39 = vpop.permute.xlu0 %2177 }
 0x2d9   : > { %13885 = vst [vmem:[#allocation256_spill] sm:$0xff] %v8959_v63  ;;  %13886 = vst [vmem:[#allocation257_spill] sm:$0xff] %v8961_v39  ;;  %v6895_v63 = vld [vmem:[%s7637_s17 + $0x9a] sm:$0xff]  ;;  %v6894_v39 = vld [vmem:[%s7637_s17 + $0x92] sm:$0xff] }
 0x2da   : > { %2423 = vrot.lane.b32.xlu1 %v8954_v61, %s7596_s29  ;;  %2421 = vrot.lane.b32.xlu0 %v8957_v4, %s7596_s29  ;;  %v6896_v4 = vld [vmem:[%s7637_s17 + $0xaa] sm:$0xff] }
 0x2dc   : > { %v8969_v37 = vpop.permute.xlu1 %2183  ;;  %v8971_v60 = vpop.permute.xlu0 %2181 }
 0x2dd   : > { %13887 = vst [vmem:[#allocation258_spill] sm:$0xff] %v8969_v37  ;;  %13888 = vst [vmem:[#allocation259_spill] sm:$0xff] %v8971_v60  ;;  %v6897_v37 = vld [vmem:[%s7637_s17 + $0xb2] sm:$0xff] }
 0x2de   : > { %2427 = vrot.lane.b32.xlu1 %v6893_v9, %s7596_s29  ;;  %2425 = vrot.lane.b32.xlu0 %v6892_v25, %s7596_s29  ;;  %v6899_v25 = vld [vmem:[%s7637_s17 + $0xca] sm:$0xff] }
 0x2e0   : > { %v8977_v0 = vpop.permute.xlu1 %2187  ;;  %v8979_v61 = vpop.permute.xlu0 %2185 }
 0x2e1   : > { %13889 = vst [vmem:[#allocation260_spill] sm:$0xff] %v8977_v0  ;;  %13890 = vst [vmem:[#allocation261_spill] sm:$0xff] %v8979_v61  ;;  %v6898_v0 = vld [vmem:[%s7637_s17 + $0xc2] sm:$0xff] }
 0x2e2   : > { %2431 = vrot.lane.b32.xlu1 %v6895_v63, %s7596_s29  ;;  %2429 = vrot.lane.b32.xlu0 %v6894_v39, %s7596_s29  ;;  %v6901_v39 = vld [vmem:[%s7637_s17 + $0xe2] sm:$0xff] }
 0x2e4   : > { %v8985_v60 = vpop.permute.xlu1 %2191  ;;  %v8987_v9 = vpop.permute.xlu0 %2189 }
 0x2e5   : > { %13891 = vst [vmem:[#allocation262_spill] sm:$0xff] %v8985_v60  ;;  %13892 = vst [vmem:[#allocation263_spill] sm:$0xff] %v8987_v9  ;;  %v6900_v60 = vld [vmem:[%s7637_s17 + $0xda] sm:$0xff] }
 0x2e6   : > { %2435 = vrot.lane.b32.xlu1 %v6897_v37, %s7596_s29  ;;  %2433 = vrot.lane.b32.xlu0 %v6896_v4, %s7596_s29  ;;  %v6903_v4 = vld [vmem:[%s7637_s17 + $0xfa] sm:$0xff] }
 0x2e8   : > { %v8993_v61 = vpop.permute.xlu1 %2195  ;;  %v8995_v63 = vpop.permute.xlu0 %2193 }
 0x2e9   : > { %13893 = vst [vmem:[#allocation264_spill] sm:$0xff] %v8993_v61  ;;  %13894 = vst [vmem:[#allocation265_spill] sm:$0xff] %v8995_v63  ;;  %v6902_v61 = vld [vmem:[%s7637_s17 + $0xf2] sm:$0xff] }
 0x2ea   : > { %2439 = vrot.lane.b32.xlu1 %v6899_v25, %s7596_s29  ;;  %2437 = vrot.lane.b32.xlu0 %v6898_v0, %s7596_s29  ;;  %v6905_v0 = vld [vmem:[%s7637_s17 + $0x112] sm:$0xff] }
 0x2ec   : > { %v9001_v9 = vpop.permute.xlu1 %2199  ;;  %v9003_v37 = vpop.permute.xlu0 %2197 }
 0x2ed   : > { %13895 = vst [vmem:[#allocation266_spill] sm:$0xff] %v9001_v9  ;;  %13896 = vst [vmem:[#allocation267_spill] sm:$0xff] %v9003_v37  ;;  %v6904_v9 = vld [vmem:[%s7637_s17 + $0x10a] sm:$0xff] }
 0x2ee   : > { %2443 = vrot.lane.b32.xlu1 %v6901_v39, %s7596_s29  ;;  %2441 = vrot.lane.b32.xlu0 %v6900_v60, %s7596_s29  ;;  %v6907_v60 = vld [vmem:[%s7637_s17 + $0x12a] sm:$0xff] }
 0x2f0   : > { %v9009_v63 = vpop.permute.xlu1 %2203  ;;  %v9011_v25 = vpop.permute.xlu0 %2201 }
 0x2f1   : > { %13897 = vst [vmem:[#allocation268_spill] sm:$0xff] %v9009_v63  ;;  %13898 = vst [vmem:[#allocation269_spill] sm:$0xff] %v9011_v25  ;;  %v6906_v63 = vld [vmem:[%s7637_s17 + $0x122] sm:$0xff] }
 0x2f2   : > { %2447 = vrot.lane.b32.xlu1 %v6903_v4, %s7596_s29  ;;  %2445 = vrot.lane.b32.xlu0 %v6902_v61, %s7596_s29  ;;  %v6909_v61 = vld [vmem:[%s7637_s17 + $0x142] sm:$0xff] }
 0x2f4   : > { %v9017_v37 = vpop.permute.xlu1 %2207  ;;  %v9019_v39 = vpop.permute.xlu0 %2205 }
 0x2f5   : > { %13899 = vst [vmem:[#allocation270_spill] sm:$0xff] %v9017_v37  ;;  %13900 = vst [vmem:[#allocation271_spill] sm:$0xff] %v9019_v39  ;;  %v6908_v37 = vld [vmem:[%s7637_s17 + $0x13a] sm:$0xff] }
 0x2f6   : > { %2451 = vrot.lane.b32.xlu1 %v6905_v0, %s7596_s29  ;;  %2449 = vrot.lane.b32.xlu0 %v6904_v9, %s7596_s29  ;;  %v6911_v9 = vld [vmem:[%s7637_s17 + $0x15a] sm:$0xff] }
 0x2f8   : > { %v9025_v25 = vpop.permute.xlu1 %2211  ;;  %v9027_v4 = vpop.permute.xlu0 %2209 }
 0x2fa   : > { %2455 = vrot.lane.b32.xlu1 %v6907_v60, %s7596_s29  ;;  %2453 = vrot.lane.b32.xlu0 %v6906_v63, %s7596_s29  ;;  %v6913_v63 = vld [vmem:[%s7637_s17 + $0x172] sm:$0xff] }
 0x2fc   : > { %v9033_v39 = vpop.permute.xlu1 %2215  ;;  %v9035_v0 = vpop.permute.xlu0 %2213 }
 0x2fe   : > { %2459 = vrot.lane.b32.xlu1 %v6909_v61, %s7596_s29  ;;  %2457 = vrot.lane.b32.xlu0 %v6908_v37, %s7596_s29  ;;  %v6915_v37 = vld [vmem:[%s7637_s17 + $0x18a] sm:$0xff] }
 0x300   : > { %v9041_v12 = vpop.permute.xlu1 %2219  ;;  %v9043_v60 = vpop.permute.xlu0 %2217 }
 0x301   : > { %13901 = vst [vmem:[#allocation272_spill] sm:$0xff] %v9041_v12  ;;  %13902 = vst [vmem:[#allocation273_spill] sm:$0xff] %v9043_v60  ;;  %v6914_v12 = vld [vmem:[%s7637_s17 + $0x182] sm:$0xff] }
 0x302   : > { %2463 = vrot.lane.b32.xlu1 %v6911_v9, %s7596_s29  ;;  %2461 = vrot.lane.b32.xlu0 %v6910_v1, %s7596_s29  ;;  %v6917_v1 = vld [vmem:[%s7637_s17 + $0x1a2] sm:$0xff]  ;;  %v6916_v9 = vld [vmem:[%s7637_s17 + $0x19a] sm:$0xff] }
 0x304   : > { %v9049_v24 = vpop.permute.xlu1 %2287  ;;  %v9051_v61 = vpop.permute.xlu0 %2285 }
 0x305   : > { %13903 = vst [vmem:[#allocation274_spill] sm:$0xff] %v9049_v24  ;;  %13904 = vst [vmem:[#allocation275_spill] sm:$0xff] %v9051_v61 }
 0x306   : > { %2467 = vrot.lane.b32.xlu1 %v6913_v63, %s7596_s29  ;;  %2465 = vrot.lane.b32.xlu0 %v6912_v5, %s7596_s29  ;;  %v6919_v5 = vld [vmem:[%s7637_s17 + $0x3b] sm:$0xff]  ;;  %v6918_v63 = vld [vmem:[%s7637_s17 + $0x33] sm:$0xff] }
 0x308   : > { %v9057_v60 = vpop.permute.xlu1 %2291  ;;  %v9059_v17 = vpop.permute.xlu0 %2289 }
 0x309   : > { %13905 = vst [vmem:[#allocation276_spill] sm:$0xff] %v9057_v60  ;;  %13906 = vst [vmem:[#allocation277_spill] sm:$0xff] %v9059_v17 }
 0x30a   : > { %2471 = vrot.lane.b32.xlu1 %v6915_v37, %s7596_s29  ;;  %2469 = vrot.lane.b32.xlu0 %v6914_v12, %s7596_s29  ;;  %v9080_v12 = vld [vmem:[%s7637_s17 + $0x53] sm:$0xff] }
 0x30b   : > { %13911 = vst [vmem:[#allocation282_spill] sm:$0xff] %v9080_v12 }
 0x30c   : > { %v9065_v24 = vpop.permute.xlu1 %2295  ;;  %v9067_v61 = vpop.permute.xlu0 %2293 }
 0x30d   : > { %13907 = vst [vmem:[#allocation278_spill] sm:$0xff] %v9065_v24  ;;  %13908 = vst [vmem:[#allocation279_spill] sm:$0xff] %v9067_v61  ;;  %v9083_v24 = vld [vmem:[%s7637_s17 + $0x4b] sm:$0xff] }
 0x30e   : > { %2475 = vrot.lane.b32.xlu1 %v6917_v1, %s7596_s29  ;;  %2473 = vrot.lane.b32.xlu0 %v6916_v9, %s7596_s29  ;;  %13912 = vst [vmem:[#allocation283_spill] sm:$0xff] %v9083_v24 }
 0x310   : > { %v9073_v60 = vpop.permute.xlu1 %2299  ;;  %v9075_v37 = vpop.permute.xlu0 %2297 }
 0x311   : > { %13909 = vst [vmem:[#allocation280_spill] sm:$0xff] %v9073_v60  ;;  %13910 = vst [vmem:[#allocation281_spill] sm:$0xff] %v9075_v37  ;;  %v9094_v60 = vld [vmem:[%s7637_s17 + $0x6b] sm:$0xff] }
 0x312   : > { %2543 = vrot.lane.b32.xlu1 %v6919_v5, %s7597_s30  ;;  %2541 = vrot.lane.b32.xlu0 %v6918_v63, %s7597_s30  ;;  %13915 = vst [vmem:[#allocation286_spill] sm:$0xff] %v9094_v60  ;;  %v9097_v5 = vld [vmem:[%s7637_s17 + $0x63] sm:$0xff] }
 0x313   : > { %13916 = vst [vmem:[#allocation287_spill] sm:$0xff] %v9097_v5 }
 0x314   : > { %v9085_v1 = vpop.permute.xlu1 %2303  ;;  %v9087_v9 = vpop.permute.xlu0 %2301 }
 0x315   : > { %13913 = vst [vmem:[#allocation284_spill] sm:$0xff] %v9085_v1  ;;  %13914 = vst [vmem:[#allocation285_spill] sm:$0xff] %v9087_v9  ;;  %v9108_v1 = vld [vmem:[%s7637_s17 + $0x83] sm:$0xff]  ;;  %v9111_v9 = vld [vmem:[%s7637_s17 + $0x7b] sm:$0xff] }
 0x316   : > { %2547 = vrot.lane.b32.xlu1 %v9080_v12, %s7597_s30  ;;  %2545 = vrot.lane.b32.xlu0 %v9083_v24, %s7597_s30  ;;  %13919 = vst [vmem:[#allocation290_spill] sm:$0xff] %v9108_v1  ;;  %13920 = vst [vmem:[#allocation291_spill] sm:$0xff] %v9111_v9  ;;  %v7514_v24 = vld [vmem:[%s7637_s17 + $0x158] sm:$0xff] }
 0x318   : > { %v9099_v63 = vpop.permute.xlu1 %2307  ;;  %v9101_v37 = vpop.permute.xlu0 %2305 }
 0x319   : > { %13917 = vst [vmem:[#allocation288_spill] sm:$0xff] %v9099_v63  ;;  %13918 = vst [vmem:[#allocation289_spill] sm:$0xff] %v9101_v37  ;;  %v9122_v63 = vld [vmem:[%s7637_s17 + $0x9b] sm:$0xff]  ;;  %v9125_v37 = vld [vmem:[%s7637_s17 + $0x93] sm:$0xff] }
 0x31a   : > { %2551 = vrot.lane.b32.xlu1 %v9094_v60, %s7597_s30  ;;  %2549 = vrot.lane.b32.xlu0 %v9097_v5, %s7597_s30  ;;  %13923 = vst [vmem:[#allocation294_spill] sm:$0xff] %v9122_v63  ;;  %13924 = vst [vmem:[#allocation295_spill] sm:$0xff] %v9125_v37 }
 0x31c   : > { %v9113_v61 = vpop.permute.xlu1 %2311  ;;  %v9115_v17 = vpop.permute.xlu0 %2309 }
 0x31d   : > { %13921 = vst [vmem:[#allocation292_spill] sm:$0xff] %v9113_v61  ;;  %13922 = vst [vmem:[#allocation293_spill] sm:$0xff] %v9115_v17  ;;  %v6929_v61 = vld [vmem:[%s7637_s17 + $0xb3] sm:$0xff]  ;;  %v6928_v17 = vld [vmem:[%s7637_s17 + $0xab] sm:$0xff] }
 0x31e   : > { %2555 = vrot.lane.b32.xlu1 %v9108_v1, %s7597_s30  ;;  %2553 = vrot.lane.b32.xlu0 %v9111_v9, %s7597_s30 }
 0x320   : > { %v9127_v60 = vpop.permute.xlu1 %2315  ;;  %v9129_v5 = vpop.permute.xlu0 %2313 }
 0x321   : > { %13925 = vst [vmem:[#allocation296_spill] sm:$0xff] %v9127_v60  ;;  %13926 = vst [vmem:[#allocation297_spill] sm:$0xff] %v9129_v5  ;;  %v6931_v60 = vld [vmem:[%s7637_s17 + $0xcb] sm:$0xff]  ;;  %v6930_v5 = vld [vmem:[%s7637_s17 + $0xc3] sm:$0xff] }
 0x322   : > { %2559 = vrot.lane.b32.xlu1 %v9122_v63, %s7597_s30  ;;  %2557 = vrot.lane.b32.xlu0 %v9125_v37, %s7597_s30  ;;  %v7512_v37 = vld [vmem:[%s7637_s17 + $0x140] sm:$0xff] }
 0x324   : > { %v9137_v1 = vpop.permute.xlu1 %2319  ;;  %v9139_v9 = vpop.permute.xlu0 %2317 }
 0x325   : > { %13927 = vst [vmem:[#allocation298_spill] sm:$0xff] %v9137_v1  ;;  %13928 = vst [vmem:[#allocation299_spill] sm:$0xff] %v9139_v9  ;;  %v6933_v1 = vld [vmem:[%s7637_s17 + $0xe3] sm:$0xff]  ;;  %v6932_v9 = vld [vmem:[%s7637_s17 + $0xdb] sm:$0xff] }
 0x326   : > { %2563 = vrot.lane.b32.xlu1 %v6929_v61, %s7597_s30  ;;  %2561 = vrot.lane.b32.xlu0 %v6928_v17, %s7597_s30 }
 0x328   : > { %v9145_v12 = vpop.permute.xlu1 %2323  ;;  %v9147_v63 = vpop.permute.xlu0 %2321 }
 0x329   : > { %13929 = vst [vmem:[#allocation300_spill] sm:$0xff] %v9145_v12  ;;  %13930 = vst [vmem:[#allocation301_spill] sm:$0xff] %v9147_v63  ;;  %v2921_v12 = vsel %vm2893_vm0, %v7512_v37, %v7861_v48  ;;  %v7513_v63 = vld [vmem:[%s7637_s17 + $0x138] sm:$0xff]  ;;  %v7517_v48 = vld [vmem:[%s7637_s17 + $0x168] sm:$0xff] }
 0x32a   : > { %2567 = vrot.lane.b32.xlu1 %v6931_v60, %s7597_s30  ;;  %2565 = vrot.lane.b32.xlu0 %v6930_v5, %s7597_s30  ;;  %v2920_v60 = vsel %vm2893_vm0, %v7513_v63, %v7863_v49  ;;  %v2923_v5 = vsel %vm2893_vm0, %v7514_v24, %v7869_v52  ;;  %v2924_v37 = vsel %vm2893_vm0, %v7517_v48, %v7879_v57  ;;  %v6934_v24 = vld [vmem:[%s7637_s17 + $0xf3] sm:$0xff] }
 0x32b   : > { %v2954_v49 = vsel %vm2926_vm1, %v2921_v12, %v7989_v51  ;;  %v2953_v52 = vsel %vm2926_vm1, %v2920_v60, %v7991_v42 }
 0x32c   : > { %v9153_v61 = vpop.permute.xlu1 %2327  ;;  %v9155_v17 = vpop.permute.xlu0 %2325  ;;  %v2987_v51 = vsel %vm2959_vm2, %v2954_v49, %v8115_v3 }
 0x32d   : > { %13931 = vst [vmem:[#allocation302_spill] sm:$0xff] %v9153_v61  ;;  %13932 = vst [vmem:[#allocation303_spill] sm:$0xff] %v9155_v17  ;;  %v2922_v61 = vsel %vm2893_vm0, %v7515_v36, %v7871_v53  ;;  %v7516_v17 = vld [vmem:[%s7637_s17 + $0x170] sm:$0xff]  ;;  %v2956_v53 = vsel %vm2926_vm1, %v2923_v5, %v7997_v11  ;;  %v6935_v36 = vld [vmem:[%s7637_s17 + $0xfb] sm:$0xff]  ;;  %v2986_v11 = vsel %vm2959_vm2, %v2953_v52, %v8117_v34 }
 0x32e   : > { %v2925_v29 = vsel %vm2893_vm0, %v7516_v17, %v7877_v56  ;;  %2571 = vrot.lane.b32.xlu1 %v6933_v1, %s7597_s30  ;;  %2569 = vrot.lane.b32.xlu0 %v6932_v9, %s7597_s30  ;;  %v2955_v56 = vsel %vm2926_vm1, %v2922_v61, %v7999_v58  ;;  %v2957_v1 = vsel %vm2926_vm1, %v2924_v37, %v8007_v26 }
 0x32f   : > { %v2958_v57 = vsel %vm2926_vm1, %v2925_v29, %v8005_v35  ;;  %v2989_v58 = vsel %vm2959_vm2, %v2956_v53, %v8123_v27  ;;  %v2988_v29 = vsel %vm2959_vm2, %v2955_v56, %v8125_v50  ;;  %v2990_v26 = vsel %vm2959_vm2, %v2957_v1, %v8133_v19  ;;  %v6940_v53 = vld [vmem:[%s7637_s17 + $0x13b] sm:$0xff] }
 0x330   : > { %v9193_v12 = vpop.permute.xlu1 %2331  ;;  %v9195_v42 = vpop.permute.xlu0 %2329  ;;  %v2991_v35 = vsel %vm2959_vm2, %v2958_v57, %v8131_v2  ;;  %v3020_v3 = vsel %vm2992_vm3, %v2987_v51, %v8245_v55  ;;  %v3019_v9 = vsel %vm2992_vm3, %v2986_v11, %v8247_v10  ;;  %v3022_v34 = vsel %vm2992_vm3, %v2989_v58, %v8253_v46  ;;  %v6937_v2 = vld [vmem:[%s7637_s17 + $0x113] sm:$0xff]  ;;  %v6936_v55 = vld [vmem:[%s7637_s17 + $0x10b] sm:$0xff] }
 0x331   : > { %13933 = vst [vmem:[#allocation304_spill] sm:$0xff] %v9193_v12  ;;  %13934 = vst [vmem:[#allocation305_spill] sm:$0xff] %v9195_v42  ;;  %v3021_v50 = vsel %vm2992_vm3, %v2988_v29, %v8255_v59  ;;  %v3053_v19 = vsel %vm3025_vm4, %v3020_v3, %v8373_v54  ;;  %v3052_v27 = vsel %vm3025_vm4, %v3019_v9, %v8375_v47  ;;  %v13938_v57 = vld [vmem:[#allocation185_spill] sm:$0xff]  ;;  %v13939_v51 = vld [vmem:[#allocation212_spill] sm:$0xff] }
 0x332   : > { %2575 = vrot.lane.b32.xlu1 %v6935_v36, %s7597_s30  ;;  %2573 = vrot.lane.b32.xlu0 %v6934_v24, %s7597_s30  ;;  %v3024_v10 = vsel %vm2992_vm3, %v2991_v35, %v8261_v31  ;;  %v3086_v63 = vsel %vm3058_vm5, %v3053_v19, %v8501_v18  ;;  %v3085_v46 = vsel %vm3058_vm5, %v3052_v27, %v8503_v15  ;;  %v13937_v24 = vld [vmem:[#allocation184_spill] sm:$0xff]  ;;  %v13940_v11 = vld [vmem:[#allocation213_spill] sm:$0xff] }
 0x333   : > { %v3055_v54 = vsel %vm3025_vm4, %v3022_v34, %v8381_v14  ;;  %v3119_v47 = vsel %vm3091_vm6, %v3086_v63, %v8629_v38  ;;  %v3118_v31 = vsel %vm3091_vm6, %v3085_v46, %v8631_v45  ;;  %v3054_v18 = vsel %vm3025_vm4, %v3021_v50, %v8383_v30  ;;  %v6939_v45 = vld [vmem:[%s7637_s17 + $0x12b] sm:$0xff]  ;;  %v13942_v35 = vld [vmem:[#allocation241_spill] sm:$0xff] }
 0x334   : > { %v9229_v61 = vpop.permute.xlu1 %2335  ;;  %v9231_v59 = vpop.permute.xlu0 %2333  ;;  %v3152_v15 = vsel %vm13613_vm7, %v3119_v47, %v8757_v23  ;;  %v3151_v17 = vsel %vm13613_vm7, %v3118_v31, %v8759_v33  ;;  %v3088_v14 = vsel %vm3058_vm5, %v3055_v54, %v8509_v44  ;;  %v6938_v23 = vld [vmem:[%s7637_s17 + $0x123] sm:$0xff]  ;;  %v3087_v33 = vsel %vm3058_vm5, %v3054_v18, %v8511_v6  ;;  %v13941_v58 = vld [vmem:[#allocation240_spill] sm:$0xff]  ;;  %v6943_v3 = vld [vmem:[%s7637_s17 + $0x15b] sm:$0xff] }
 0x335   : > { %13935 = vst [vmem:[#allocation306_spill] sm:$0xff] %v9229_v61  ;;  %13936 = vst [vmem:[#allocation307_spill] sm:$0xff] %v9231_v59  ;;  %v3185_v38 = vsel %vm3157_vm8, %v3152_v15, %v8885_v13  ;;  %v3184_v30 = vsel %vm3157_vm8, %v3151_v17, %v8887_v21  ;;  %v3121_v21 = vsel %vm3091_vm6, %v3088_v14, %v8637_v32  ;;  %v6942_v9 = vld [vmem:[%s7637_s17 + $0x153] sm:$0xff]  ;;  %v6944_v54 = vld [vmem:[%s7637_s17 + $0x16b] sm:$0xff] }
 0x336   : > { %2579 = vrot.lane.b32.xlu1 %v6937_v2, %s7597_s30  ;;  %2577 = vrot.lane.b32.xlu0 %v6936_v55, %s7597_s30  ;;  %v3218_v60 = vsel %vm3190_vm9, %v3185_v38, %v9025_v25  ;;  %v3217_v5 = vsel %vm3190_vm9, %v3184_v30, %v9027_v4  ;;  %v3120_v48 = vsel %vm3091_vm6, %v3087_v33, %v8639_v40  ;;  %v13943_v34 = vld [vmem:[#allocation272_spill] sm:$0xff]  ;;  %v13944_v19 = vld [vmem:[#allocation273_spill] sm:$0xff]  ;;  %v6946_v15 = vld [vmem:[%s7637_s17 + $0x183] sm:$0xff] }
 0x337   : > { %v3023_v25 = vsel %vm2992_vm3, %v2990_v26, %v8263_v43  ;;  %v3154_v4 = vsel %vm13613_vm7, %v3121_v21, %v8765_v20  ;;  %v3153_v49 = vsel %vm13613_vm7, %v3120_v48, %v8767_v28  ;;  %v3057_v32 = vsel %vm3025_vm4, %v3024_v10, %v8389_v7  ;;  %v6941_v20 = vld [vmem:[%s7637_s17 + $0x143] sm:$0xff]  ;;  %v6945_v46 = vld [vmem:[%s7637_s17 + $0x173] sm:$0xff]  ;;  %v6947_v18 = vld [vmem:[%s7637_s17 + $0x18b] sm:$0xff] }
 0x338   : > { %v2340_v44 = vpop.permute.xlu1 %2339  ;;  %v2338_v13 = vpop.permute.xlu0 %2337  ;;  %v3056_v40 = vsel %vm3025_vm4, %v3023_v25, %v8391_v22  ;;  %v3187_v52 = vsel %vm3157_vm8, %v3154_v4, %v8893_v8  ;;  %v3186_v43 = vsel %vm3157_vm8, %v3153_v49, %v8895_v16  ;;  %v3090_v28 = vsel %vm3058_vm5, %v3057_v32, %v8517_v41  ;;  %v6949_v38 = vld [vmem:[%s7637_s17 + $0x1a3] sm:$0xff]  ;;  %v6948_v30 = vld [vmem:[%s7637_s17 + $0x19b] sm:$0xff]  ;;  %v9367_v21 = vld [vmem:[%s7637_s17 + $0x4c] sm:$0xff] }
 0x339   : > { %v9266_v37 = vsel %vm3223_vm10, %v3218_v60, %v2340_v44  ;;  %v9269_v6 = vsel %vm3223_vm10, %v3217_v5, %v2338_v13  ;;  %v3089_v56 = vsel %vm3058_vm5, %v3056_v40, %v8519_v62  ;;  %v3220_v7 = vsel %vm3190_vm9, %v3187_v52, %v9033_v39  ;;  %v6951_v33 = vld [vmem:[%s7637_s17 + $0x3c] sm:$0xff]  ;;  %v6950_v60 = vld [vmem:[%s7637_s17 + $0x34] sm:$0xff]  ;;  %v9378_v4 = vld [vmem:[%s7637_s17 + $0x6c] sm:$0xff] }
 0x33a   : > { %2583 = vrot.lane.b32.xlu1 %v6939_v45, %s7597_s30  ;;  %2581 = vrot.lane.b32.xlu0 %v6938_v23, %s7597_s30  ;;  %v3219_v22 = vsel %vm3190_vm9, %v3186_v43, %v9035_v0  ;;  %v3123_v16 = vsel %vm3091_vm6, %v3090_v28, %v13937_v24  ;;  %v3122_v1 = vsel %vm3091_vm6, %v3089_v56, %v13938_v57  ;;  %v9364_v13 = vld [vmem:[%s7637_s17 + $0x54] sm:$0xff]  ;;  %v9381_v49 = vld [vmem:[%s7637_s17 + $0x64] sm:$0xff] }
 0x33b   : > { %v3156_v39 = vsel %vm13613_vm7, %v3123_v16, %v13939_v51  ;;  %v3155_v0 = vsel %vm13613_vm7, %v3122_v1, %v13940_v11  ;;  %v9392_v52 = vld [vmem:[%s7637_s17 + $0x84] sm:$0xff]  ;;  %v9395_v43 = vld [vmem:[%s7637_s17 + $0x7c] sm:$0xff]  ;;  %v9409_v56 = vld [vmem:[%s7637_s17 + $0x94] sm:$0xff] }
 0x33c   : > { %v2344_v8 = vpop.permute.xlu1 %2343  ;;  %v2342_v36 = vpop.permute.xlu0 %2341  ;;  %v3189_v29 = vsel %vm3157_vm8, %v3156_v39, %v13941_v58  ;;  %v3188_v26 = vsel %vm3157_vm8, %v3155_v0, %v13942_v35  ;;  %v9406_v28 = vld [vmem:[%s7637_s17 + $0x9c] sm:$0xff]  ;;  %v6963_v57 = vld [vmem:[%s7637_s17 + $0xcc] sm:$0xff]  ;;  %v9435_v1 = vld [vmem:[%s7637_s17 + $0xc4] sm:$0xff] }
 0x33d   : > { %v9302_v41 = vsel %vm3223_vm10, %v3220_v7, %v2344_v8  ;;  %v9305_v62 = vsel %vm3223_vm10, %v3219_v22, %v2342_v36  ;;  %v3222_v50 = vsel %vm3190_vm9, %v3189_v29, %v13943_v34  ;;  %v3221_v27 = vsel %vm3190_vm9, %v3188_v26, %v13944_v19  ;;  %v9420_v8 = vld [vmem:[%s7637_s17 + $0xb4] sm:$0xff]  ;;  %v9423_v36 = vld [vmem:[%s7637_s17 + $0xac] sm:$0xff]  ;;  %v6965_v11 = vld [vmem:[%s7637_s17 + $0xe4] sm:$0xff] }
 0x33e   : > { %2587 = vrot.lane.b32.xlu1 %v6941_v20, %s7597_s30  ;;  %2585 = vrot.lane.b32.xlu0 %v6940_v53, %s7597_s30  ;;  %v6964_v0 = vld [vmem:[%s7637_s17 + $0xdc] sm:$0xff]  ;;  %v6966_v26 = vld [vmem:[%s7637_s17 + $0xf4] sm:$0xff] }
 0x33f   : > { %v6967_v35 = vld [vmem:[%s7637_s17 + $0xfc] sm:$0xff]  ;;  %v6969_v34 = vld [vmem:[%s7637_s17 + $0x114] sm:$0xff] }
 0x340   : > { %v2348_v2 = vpop.permute.xlu1 %2347  ;;  %v2346_v55 = vpop.permute.xlu0 %2345  ;;  %v9528_v59 = vld [vmem:[%s7637_s17 + $0x60] sm:$0xff]  ;;  %v9553_v12 = vld [vmem:[%s7637_s17 + $0x98] sm:$0xff] }
 0x341   : > { %v9324_v10 = vsel %vm3223_vm10, %v3222_v50, %v2348_v2  ;;  %v9327_v63 = vsel %vm3223_vm10, %v3221_v27, %v2346_v55  ;;  %v6968_v50 = vld [vmem:[%s7637_s17 + $0x10c] sm:$0xff]  ;;  %v6970_v55 = vld [vmem:[%s7637_s17 + $0x124] sm:$0xff] }
 0x342   : > { %2591 = vrot.lane.b32.xlu1 %v6943_v3, %s7597_s30  ;;  %2589 = vrot.lane.b32.xlu0 %v6942_v9, %s7597_s30  ;;  %v6971_v2 = vld [vmem:[%s7637_s17 + $0x12c] sm:$0xff]  ;;  %v9539_v61 = vld [vmem:[%s7637_s17 + $0x80] sm:$0xff] }
 0x344   : > { %v9333_v47 = vpop.permute.xlu1 %2415  ;;  %v9335_v31 = vpop.permute.xlu0 %2413 }
 0x345   : > { %13945 = vst [vmem:[#allocation184_spill] sm:$0xff] %v9333_v47  ;;  %13946 = vst [vmem:[#allocation185_spill] sm:$0xff] %v9335_v31 }
 0x346   : > { %2595 = vrot.lane.b32.xlu1 %v6945_v46, %s7597_s30  ;;  %2593 = vrot.lane.b32.xlu0 %v6944_v54, %s7597_s30 }
 0x348   : > { %v9341_v17 = vpop.permute.xlu1 %2419  ;;  %v9343_v14 = vpop.permute.xlu0 %2417 }
 0x349   : > { %13947 = vst [vmem:[#allocation212_spill] sm:$0xff] %v9341_v17  ;;  %13948 = vst [vmem:[#allocation213_spill] sm:$0xff] %v9343_v14 }
 0x34a   : > { %2599 = vrot.lane.b32.xlu1 %v6947_v18, %s7597_s30  ;;  %2597 = vrot.lane.b32.xlu0 %v6946_v15, %s7597_s30  ;;  %v6973_v18 = vld [vmem:[%s7637_s17 + $0x144] sm:$0xff]  ;;  %v6972_v15 = vld [vmem:[%s7637_s17 + $0x13c] sm:$0xff] }
 0x34c   : > { %v9349_v45 = vpop.permute.xlu1 %2423  ;;  %v9351_v23 = vpop.permute.xlu0 %2421 }
 0x34d   : > { %13949 = vst [vmem:[#allocation240_spill] sm:$0xff] %v9349_v45  ;;  %13950 = vst [vmem:[#allocation241_spill] sm:$0xff] %v9351_v23 }
 0x34e   : > { %2603 = vrot.lane.b32.xlu1 %v6949_v38, %s7597_s30  ;;  %2601 = vrot.lane.b32.xlu0 %v6948_v30, %s7597_s30 }
 0x350   : > { %v9357_v5 = vpop.permute.xlu1 %2427  ;;  %v9359_v44 = vpop.permute.xlu0 %2425 }
 0x351   : > { %13951 = vst [vmem:[#allocation272_spill] sm:$0xff] %v9357_v5  ;;  %13952 = vst [vmem:[#allocation273_spill] sm:$0xff] %v9359_v44  ;;  %v7090_v44 = vld [vmem:[%s7637_s17 + $0xdb] sm:$0xff] }
 0x352   : > { %2671 = vrot.lane.b32.xlu1 %v6951_v33, %s7598_s4  ;;  %2669 = vrot.lane.b32.xlu0 %v6950_v60, %s7598_s4  ;;  %v6975_v33 = vld [vmem:[%s7637_s17 + $0x15c] sm:$0xff]  ;;  %v6974_v60 = vld [vmem:[%s7637_s17 + $0x154] sm:$0xff] }
 0x354   : > { %v9369_v48 = vpop.permute.xlu1 %2431  ;;  %v9371_v25 = vpop.permute.xlu0 %2429 }
 0x355   : > { %13953 = vst [vmem:[#allocation308_spill] sm:$0xff] %v9369_v48  ;;  %13954 = vst [vmem:[#allocation309_spill] sm:$0xff] %v9371_v25 }
 0x356   : > { %2675 = vrot.lane.b32.xlu1 %v9364_v13, %s7598_s4  ;;  %2673 = vrot.lane.b32.xlu0 %v9367_v21, %s7598_s4 }
 0x358   : > { %v9383_v32 = vpop.permute.xlu1 %2435  ;;  %v9385_v40 = vpop.permute.xlu0 %2433 }
 0x359   : > { %13955 = vst [vmem:[#allocation310_spill] sm:$0xff] %v9383_v32  ;;  %13956 = vst [vmem:[#allocation311_spill] sm:$0xff] %v9385_v40 }
 0x35a   : > { %2679 = vrot.lane.b32.xlu1 %v9378_v4, %s7598_s4  ;;  %2677 = vrot.lane.b32.xlu0 %v9381_v49, %s7598_s4 }
 0x35c   : > { %v9397_v20 = vpop.permute.xlu1 %2439  ;;  %v9399_v53 = vpop.permute.xlu0 %2437 }
 0x35d   : > { %13957 = vst [vmem:[#allocation312_spill] sm:$0xff] %v9397_v20  ;;  %13958 = vst [vmem:[#allocation313_spill] sm:$0xff] %v9399_v53 }
 0x35e   : > { %2683 = vrot.lane.b32.xlu1 %v9392_v52, %s7598_s4  ;;  %2681 = vrot.lane.b32.xlu0 %v9395_v43, %s7598_s4 }
 0x360   : > { %v9411_v7 = vpop.permute.xlu1 %2443  ;;  %v9413_v22 = vpop.permute.xlu0 %2441 }
 0x361   : > { %13959 = vst [vmem:[#allocation314_spill] sm:$0xff] %v9411_v7  ;;  %13960 = vst [vmem:[#allocation315_spill] sm:$0xff] %v9413_v22  ;;  %v9584_v7 = vld [vmem:[%s7637_s17 + $0xc0] sm:$0xff] }
 0x362   : > { %2687 = vrot.lane.b32.xlu1 %v9406_v28, %s7598_s4  ;;  %2685 = vrot.lane.b32.xlu0 %v9409_v56, %s7598_s4 }
 0x364   : > { %v9425_v24 = vpop.permute.xlu1 %2447  ;;  %v9427_v16 = vpop.permute.xlu0 %2445 }
 0x365   : > { %13961 = vst [vmem:[#allocation316_spill] sm:$0xff] %v9425_v24  ;;  %13962 = vst [vmem:[#allocation317_spill] sm:$0xff] %v9427_v16  ;;  %v9581_v16 = vld [vmem:[%s7637_s17 + $0xc8] sm:$0xff] }
 0x366   : > { %2691 = vrot.lane.b32.xlu1 %v9420_v8, %s7598_s4  ;;  %2689 = vrot.lane.b32.xlu0 %v9423_v36, %s7598_s4 }
 0x368   : > { %v9437_v51 = vpop.permute.xlu1 %2451  ;;  %v9439_v39 = vpop.permute.xlu0 %2449 }
 0x369   : > { %13963 = vst [vmem:[#allocation318_spill] sm:$0xff] %v9437_v51  ;;  %13964 = vst [vmem:[#allocation319_spill] sm:$0xff] %v9439_v39  ;;  %v9570_v51 = vld [vmem:[%s7637_s17 + $0xa8] sm:$0xff] }
 0x36a   : > { %2695 = vrot.lane.b32.xlu1 %v6963_v57, %s7598_s4  ;;  %2693 = vrot.lane.b32.xlu0 %v9435_v1, %s7598_s4 }
 0x36c   : > { %v9446_v58 = vpop.permute.xlu1 %2455  ;;  %v9448_v29 = vpop.permute.xlu0 %2453 }
 0x36d   : > { %13965 = vst [vmem:[#allocation320_spill] sm:$0xff] %v9446_v58  ;;  %13966 = vst [vmem:[#allocation321_spill] sm:$0xff] %v9448_v29  ;;  %v9567_v29 = vld [vmem:[%s7637_s17 + $0xb0] sm:$0xff] }
 0x36e   : > { %2699 = vrot.lane.b32.xlu1 %v6965_v11, %s7598_s4  ;;  %2697 = vrot.lane.b32.xlu0 %v6964_v0, %s7598_s4  ;;  %v6977_v0 = vld [vmem:[%s7637_s17 + $0x174] sm:$0xff] }
 0x370   : > { %v9454_v3 = vpop.permute.xlu1 %2459  ;;  %v9456_v9 = vpop.permute.xlu0 %2457 }
 0x371   : > { %13967 = vst [vmem:[#allocation322_spill] sm:$0xff] %v9454_v3  ;;  %13968 = vst [vmem:[#allocation323_spill] sm:$0xff] %v9456_v9  ;;  %v9556_v9 = vld [vmem:[%s7637_s17 + $0x90] sm:$0xff] }
 0x372   : > { %2703 = vrot.lane.b32.xlu1 %v6967_v35, %s7598_s4  ;;  %2701 = vrot.lane.b32.xlu0 %v6966_v26, %s7598_s4  ;;  %v6976_v35 = vld [vmem:[%s7637_s17 + $0x16c] sm:$0xff] }
 0x374   : > { %v9462_v19 = vpop.permute.xlu1 %2463  ;;  %v9464_v27 = vpop.permute.xlu0 %2461 }
 0x375   : > { %13969 = vst [vmem:[#allocation324_spill] sm:$0xff] %v9462_v19  ;;  %13970 = vst [vmem:[#allocation325_spill] sm:$0xff] %v9464_v27 }
 0x376   : > { %2707 = vrot.lane.b32.xlu1 %v6969_v34, %s7598_s4  ;;  %2705 = vrot.lane.b32.xlu0 %v6968_v50, %s7598_s4  ;;  %v6979_v50 = vld [vmem:[%s7637_s17 + $0x18c] sm:$0xff] }
 0x378   : > { %v9470_v46 = vpop.permute.xlu1 %2467  ;;  %v9472_v54 = vpop.permute.xlu0 %2465 }
 0x379   : > { %v3283_v48 = vsel %vm3256_vm11, %v9269_v6, %v9472_v54 }
 0x37a   : > { %2711 = vrot.lane.b32.xlu1 %v6971_v2, %s7598_s4  ;;  %2709 = vrot.lane.b32.xlu0 %v6970_v55, %s7598_s4  ;;  %v6978_v2 = vld [vmem:[%s7637_s17 + $0x184] sm:$0xff] }
 0x37c   : > { %v9478_v38 = vpop.permute.xlu1 %2471  ;;  %v9480_v30 = vpop.permute.xlu0 %2469 }
 0x37d   : > { %v3286_v6 = vsel %vm3256_vm11, %v9302_v41, %v9478_v38 }
 0x37e   : > { %2715 = vrot.lane.b32.xlu1 %v6973_v18, %s7598_s4  ;;  %2713 = vrot.lane.b32.xlu0 %v6972_v15, %s7598_s4  ;;  %v6981_v15 = vld [vmem:[%s7637_s17 + $0x1a4] sm:$0xff] }
 0x380   : > { %v9486_v57 = vpop.permute.xlu1 %2475  ;;  %v9488_v11 = vpop.permute.xlu0 %2473 }
 0x381   : > { %v3288_v41 = vsel %vm3256_vm11, %v9324_v10, %v9486_v57  ;;  %v14007_v57 = vld [vmem:[#allocation250_spill] sm:$0xff] }
 0x382   : > { %2719 = vrot.lane.b32.xlu1 %v6975_v33, %s7598_s4  ;;  %2717 = vrot.lane.b32.xlu0 %v6974_v60, %s7598_s4  ;;  %v6980_v33 = vld [vmem:[%s7637_s17 + $0x19c] sm:$0xff] }
 0x384   : > { %v9494_v26 = vpop.permute.xlu1 %2543  ;;  %v9496_v34 = vpop.permute.xlu0 %2541 }
 0x385   : > { %13971 = vst [vmem:[#allocation326_spill] sm:$0xff] %v9494_v26  ;;  %13972 = vst [vmem:[#allocation327_spill] sm:$0xff] %v9496_v34 }
 0x386   : > { %2723 = vrot.lane.b32.xlu1 %v6977_v0, %s7598_s4  ;;  %2721 = vrot.lane.b32.xlu0 %v6976_v35, %s7598_s4  ;;  %v6983_v0 = vld [vmem:[%s7637_s17 + $0x50] sm:$0xff]  ;;  %v6982_v35 = vld [vmem:[%s7637_s17 + $0x48] sm:$0xff] }
 0x388   : > { %v9502_v55 = vpop.permute.xlu1 %2547  ;;  %v9504_v18 = vpop.permute.xlu0 %2545 }
 0x389   : > { %13973 = vst [vmem:[#allocation328_spill] sm:$0xff] %v9502_v55  ;;  %13974 = vst [vmem:[#allocation329_spill] sm:$0xff] %v9504_v18 }
 0x38a   : > { %2727 = vrot.lane.b32.xlu1 %v6979_v50, %s7598_s4  ;;  %2725 = vrot.lane.b32.xlu0 %v6978_v2, %s7598_s4  ;;  %v9525_v2 = vld [vmem:[%s7637_s17 + $0x68] sm:$0xff] }
 0x38c   : > { %v9510_v60 = vpop.permute.xlu1 %2551  ;;  %v9512_v27 = vpop.permute.xlu0 %2549 }
 0x38d   : > { %13975 = vst [vmem:[#allocation330_spill] sm:$0xff] %v9510_v60  ;;  %13976 = vst [vmem:[#allocation331_spill] sm:$0xff] %v9512_v27 }
 0x38e   : > { %2731 = vrot.lane.b32.xlu1 %v6981_v15, %s7598_s4  ;;  %2729 = vrot.lane.b32.xlu0 %v6980_v33, %s7598_s4 }
 0x390   : > { %v9518_v19 = vpop.permute.xlu1 %2555  ;;  %v9520_v50 = vpop.permute.xlu0 %2553 }
 0x391   : > { %13977 = vst [vmem:[#allocation332_spill] sm:$0xff] %v9518_v19  ;;  %13978 = vst [vmem:[#allocation333_spill] sm:$0xff] %v9520_v50 }
 0x392   : > { %2799 = vrot.lane.b32.xlu1 %v6983_v0, %s7599_s5  ;;  %2797 = vrot.lane.b32.xlu0 %v6982_v35, %s7599_s5  ;;  %v9542_v0 = vld [vmem:[%s7637_s17 + $0x78] sm:$0xff] }
 0x394   : > { %v9530_v15 = vpop.permute.xlu1 %2559  ;;  %v9532_v33 = vpop.permute.xlu0 %2557 }
 0x395   : > { %13979 = vst [vmem:[#allocation334_spill] sm:$0xff] %v9530_v15  ;;  %13980 = vst [vmem:[#allocation335_spill] sm:$0xff] %v9532_v33 }
 0x396   : > { %2803 = vrot.lane.b32.xlu1 %v9525_v2, %s7599_s5  ;;  %2801 = vrot.lane.b32.xlu0 %v9528_v59, %s7599_s5 }
 0x398   : > { %v9544_v35 = vpop.permute.xlu1 %2563  ;;  %v9546_v3 = vpop.permute.xlu0 %2561 }
 0x399   : > { %13981 = vst [vmem:[#allocation336_spill] sm:$0xff] %v9544_v35  ;;  %13982 = vst [vmem:[#allocation337_spill] sm:$0xff] %v9546_v3 }
 0x39a   : > { %2807 = vrot.lane.b32.xlu1 %v9539_v61, %s7599_s5  ;;  %2805 = vrot.lane.b32.xlu0 %v9542_v0, %s7599_s5 }
 0x39c   : > { %v9558_v58 = vpop.permute.xlu1 %2567  ;;  %v9560_v42 = vpop.permute.xlu0 %2565 }
 0x39d   : > { %13983 = vst [vmem:[#allocation338_spill] sm:$0xff] %v9558_v58  ;;  %13984 = vst [vmem:[#allocation339_spill] sm:$0xff] %v9560_v42 }
 0x39e   : > { %2811 = vrot.lane.b32.xlu1 %v9553_v12, %s7599_s5  ;;  %2809 = vrot.lane.b32.xlu0 %v9556_v9, %s7599_s5 }
 0x3a0   : > { %v9572_v39 = vpop.permute.xlu1 %2571  ;;  %v9574_v24 = vpop.permute.xlu0 %2569 }
 0x3a1   : > { %13985 = vst [vmem:[#allocation340_spill] sm:$0xff] %v9572_v39  ;;  %13986 = vst [vmem:[#allocation341_spill] sm:$0xff] %v9574_v24  ;;  %v9595_v39 = vld [vmem:[%s7637_s17 + $0xe0] sm:$0xff]  ;;  %v9598_v24 = vld [vmem:[%s7637_s17 + $0xd8] sm:$0xff] }
 0x3a2   : > { %2815 = vrot.lane.b32.xlu1 %v9567_v29, %s7599_s5  ;;  %2813 = vrot.lane.b32.xlu0 %v9570_v51, %s7599_s5 }
 0x3a4   : > { %v9586_v58 = vpop.permute.xlu1 %2575  ;;  %v9588_v22 = vpop.permute.xlu0 %2573 }
 0x3a5   : > { %13987 = vst [vmem:[#allocation342_spill] sm:$0xff] %v9586_v58  ;;  %13988 = vst [vmem:[#allocation343_spill] sm:$0xff] %v9588_v22  ;;  %v9609_v58 = vld [vmem:[%s7637_s17 + $0xf8] sm:$0xff]  ;;  %v9612_v22 = vld [vmem:[%s7637_s17 + $0xf0] sm:$0xff] }
 0x3a6   : > { %2819 = vrot.lane.b32.xlu1 %v9581_v16, %s7599_s5  ;;  %2817 = vrot.lane.b32.xlu0 %v9584_v7, %s7599_s5 }
 0x3a8   : > { %v9600_v20 = vpop.permute.xlu1 %2579  ;;  %v9602_v42 = vpop.permute.xlu0 %2577 }
 0x3a9   : > { %13989 = vst [vmem:[#allocation344_spill] sm:$0xff] %v9600_v20  ;;  %13990 = vst [vmem:[#allocation345_spill] sm:$0xff] %v9602_v42  ;;  %v6999_v20 = vld [vmem:[%s7637_s17 + $0x110] sm:$0xff]  ;;  %v9624_v42 = vld [vmem:[%s7637_s17 + $0x108] sm:$0xff] }
 0x3aa   : > { %2823 = vrot.lane.b32.xlu1 %v9595_v39, %s7599_s5  ;;  %2821 = vrot.lane.b32.xlu0 %v9598_v24, %s7599_s5 }
 0x3ac   : > { %v9614_v35 = vpop.permute.xlu1 %2583  ;;  %v9616_v53 = vpop.permute.xlu0 %2581 }
 0x3ad   : > { %13991 = vst [vmem:[#allocation346_spill] sm:$0xff] %v9614_v35  ;;  %13992 = vst [vmem:[#allocation347_spill] sm:$0xff] %v9616_v53  ;;  %v7001_v35 = vld [vmem:[%s7637_s17 + $0x128] sm:$0xff]  ;;  %v7000_v53 = vld [vmem:[%s7637_s17 + $0x120] sm:$0xff] }
 0x3ae   : > { %2827 = vrot.lane.b32.xlu1 %v9609_v58, %s7599_s5  ;;  %2825 = vrot.lane.b32.xlu0 %v9612_v22, %s7599_s5 }
 0x3b0   : > { %v9626_v32 = vpop.permute.xlu1 %2587  ;;  %v9628_v3 = vpop.permute.xlu0 %2585 }
 0x3b1   : > { %13993 = vst [vmem:[#allocation348_spill] sm:$0xff] %v9626_v32  ;;  %13994 = vst [vmem:[#allocation349_spill] sm:$0xff] %v9628_v3  ;;  %v7003_v32 = vld [vmem:[%s7637_s17 + $0x140] sm:$0xff]  ;;  %v7002_v3 = vld [vmem:[%s7637_s17 + $0x138] sm:$0xff] }
 0x3b2   : > { %2831 = vrot.lane.b32.xlu1 %v6999_v20, %s7599_s5  ;;  %2829 = vrot.lane.b32.xlu0 %v9624_v42, %s7599_s5  ;;  %v3284_v20 = vsel %vm3256_vm11, %v9266_v37, %v9470_v46  ;;  %v7004_v37 = vld [vmem:[%s7637_s17 + $0x150] sm:$0xff]  ;;  %v3285_v46 = vsel %vm3256_vm11, %v9305_v62, %v9480_v30  ;;  %v3287_v62 = vsel %vm3256_vm11, %v9327_v63, %v9488_v11  ;;  %v14006_v63 = vld [vmem:[#allocation283_spill] sm:$0xff] }
 0x3b4   : > { %v9635_v15 = vpop.permute.xlu1 %2591  ;;  %v9637_v40 = vpop.permute.xlu0 %2589 }
 0x3b5   : > { %13995 = vst [vmem:[#allocation350_spill] sm:$0xff] %v9635_v15  ;;  %13996 = vst [vmem:[#allocation351_spill] sm:$0xff] %v9637_v40 }
 0x3b6   : > { %2835 = vrot.lane.b32.xlu1 %v7001_v35, %s7599_s5  ;;  %2833 = vrot.lane.b32.xlu0 %v7000_v53, %s7599_s5  ;;  %v7005_v35 = vld [vmem:[%s7637_s17 + $0x158] sm:$0xff] }
 0x3b8   : > { %v2596_v15 = vpop.permute.xlu1 %2595  ;;  %v2594_v40 = vpop.permute.xlu0 %2593 }
 0x3b9   : > { %v9650_v33 = vsel %vm3289_vm12, %v3284_v20, %v2596_v15  ;;  %v9653_v53 = vsel %vm3289_vm12, %v3283_v48, %v2594_v40 }
 0x3ba   : > { %13997 = vst [vmem:[#allocation352_spill] sm:$0xff] %v9650_v33  ;;  %13998 = vst [vmem:[#allocation353_spill] sm:$0xff] %v9653_v53  ;;  %2839 = vrot.lane.b32.xlu1 %v7003_v32, %s7599_s5  ;;  %2837 = vrot.lane.b32.xlu0 %v7002_v3, %s7599_s5  ;;  %v7006_v32 = vld [vmem:[%s7637_s17 + $0x168] sm:$0xff] }
 0x3bc   : > { %v2600_v54 = vpop.permute.xlu1 %2599  ;;  %v2598_v15 = vpop.permute.xlu0 %2597 }
 0x3bd   : > { %v9666_v20 = vsel %vm3289_vm12, %v3286_v6, %v2600_v54  ;;  %v9669_v48 = vsel %vm3289_vm12, %v3285_v46, %v2598_v15  ;;  %v14010_v46 = vld [vmem:[#allocation282_spill] sm:$0xff] }
 0x3be   : > { %13999 = vst [vmem:[#allocation354_spill] sm:$0xff] %v9666_v20  ;;  %14000 = vst [vmem:[#allocation355_spill] sm:$0xff] %v9669_v48  ;;  %2843 = vrot.lane.b32.xlu1 %v7005_v35, %s7599_s5  ;;  %2841 = vrot.lane.b32.xlu0 %v7004_v37, %s7599_s5  ;;  %v14003_v35 = vld [vmem:[#allocation251_spill] sm:$0xff] }
 0x3c0   : > { %v2604_v40 = vpop.permute.xlu1 %2603  ;;  %v2602_v3 = vpop.permute.xlu0 %2601 }
 0x3c1   : > { %v9681_v38 = vsel %vm3289_vm12, %v3288_v41, %v2604_v40  ;;  %v9684_v30 = vsel %vm3289_vm12, %v3287_v62, %v2602_v3  ;;  %v7174_v62 = vld [vmem:[%s7637_s17 + $0x61] sm:$0xff] }
 0x3c2   : > { %14001 = vst [vmem:[#allocation356_spill] sm:$0xff] %v9681_v38  ;;  %14002 = vst [vmem:[#allocation357_spill] sm:$0xff] %v9684_v30  ;;  %3420 = vrot.lane.b32.xlu1 %v14003_v35, %s7585_s18  ;;  %2845 = vrot.lane.b32.xlu0 %v7006_v32, %s7599_s5  ;;  %v14024_v38 = vld [vmem:[#allocation286_spill] sm:$0xff] }
 0x3c4   : > { %v9689_v37 = vpop.permute.xlu1 %2671  ;;  %v9691_v10 = vpop.permute.xlu0 %2669 }
 0x3c5   : > { %14004 = vst [vmem:[#allocation251_spill] sm:$0xff] %v9689_v37  ;;  %14005 = vst [vmem:[#allocation358_spill] sm:$0xff] %v9691_v10 }
 0x3c6   : > { %3548 = vrot.lane.b32.xlu1 %v14006_v63, %s7586_s19  ;;  %3422 = vrot.lane.b32.xlu0 %v14007_v57, %s7585_s18  ;;  %v7206_v57 = vld [vmem:[%s7637_s17 + $0x62] sm:$0xff] }
 0x3c8   : > { %v9697_v11 = vpop.permute.xlu1 %2675  ;;  %v9699_v6 = vpop.permute.xlu0 %2673 }
 0x3c9   : > { %14008 = vst [vmem:[#allocation283_spill] sm:$0xff] %v9697_v11  ;;  %14009 = vst [vmem:[#allocation250_spill] sm:$0xff] %v9699_v6 }
 0x3ca   : > { %3676 = vrot.lane.b32.xlu1 %v9367_v21, %s7587_s20  ;;  %3550 = vrot.lane.b32.xlu0 %v14010_v46, %s7586_s19  ;;  %v14015_v21 = vld [vmem:[#allocation255_spill] sm:$0xff] }
 0x3cc   : > { %v9705_v54 = vpop.permute.xlu1 %2679  ;;  %v9707_v15 = vpop.permute.xlu0 %2677 }
 0x3cd   : > { %14011 = vst [vmem:[#allocation282_spill] sm:$0xff] %v9705_v54  ;;  %14012 = vst [vmem:[#allocation359_spill] sm:$0xff] %v9707_v15 }
 0x3ce   : > { %3804 = vrot.lane.b32.xlu1 %v9528_v59, %s7588_s21  ;;  %3678 = vrot.lane.b32.xlu0 %v9364_v13, %s7587_s20  ;;  %v14018_v59 = vld [vmem:[#allocation254_spill] sm:$0xff]  ;;  %v7175_v13 = vld [vmem:[%s7637_s17 + $0x69] sm:$0xff] }
 0x3d0   : > { %v9713_v32 = vpop.permute.xlu1 %2683  ;;  %v9715_v41 = vpop.permute.xlu0 %2681 }
 0x3d1   : > { %14013 = vst [vmem:[#allocation360_spill] sm:$0xff] %v9713_v32  ;;  %14014 = vst [vmem:[#allocation361_spill] sm:$0xff] %v9715_v41 }
 0x3d2   : > { %3806 = vrot.lane.b32.xlu1 %v9525_v2, %s7588_s21  ;;  %3424 = vrot.lane.b32.xlu0 %v14015_v21, %s7585_s18  ;;  %v14021_v2 = vld [vmem:[#allocation287_spill] sm:$0xff] }
 0x3d4   : > { %v9722_v40 = vpop.permute.xlu1 %2687  ;;  %v9724_v3 = vpop.permute.xlu0 %2685 }
 0x3d5   : > { %14016 = vst [vmem:[#allocation255_spill] sm:$0xff] %v9722_v40  ;;  %14017 = vst [vmem:[#allocation362_spill] sm:$0xff] %v9724_v3 }
 0x3d6   : > { %3426 = vrot.lane.b32.xlu1 %v14018_v59, %s7585_s18  ;;  %3932 = vrot.lane.b32.xlu0 %v7174_v62, %s7589_s22  ;;  %v7207_v62 = vld [vmem:[%s7637_s17 + $0x6a] sm:$0xff] }
 0x3d8   : > { %v9730_v35 = vpop.permute.xlu1 %2691  ;;  %v9732_v63 = vpop.permute.xlu0 %2689 }
 0x3d9   : > { %14019 = vst [vmem:[#allocation254_spill] sm:$0xff] %v9730_v35  ;;  %14020 = vst [vmem:[#allocation363_spill] sm:$0xff] %v9732_v63 }
 0x3da   : > { %3934 = vrot.lane.b32.xlu1 %v7175_v13, %s7589_s22  ;;  %3552 = vrot.lane.b32.xlu0 %v14021_v2, %s7586_s19 }
 0x3dc   : > { %v9738_v46 = vpop.permute.xlu1 %2695  ;;  %v9740_v21 = vpop.permute.xlu0 %2693 }
 0x3dd   : > { %14022 = vst [vmem:[#allocation287_spill] sm:$0xff] %v9738_v46  ;;  %14023 = vst [vmem:[#allocation364_spill] sm:$0xff] %v9740_v21  ;;  %v14060_v46 = vld [vmem:[#allocation294_spill] sm:$0xff] }
 0x3de   : > { %3554 = vrot.lane.b32.xlu1 %v14024_v38, %s7586_s19  ;;  %4060 = vrot.lane.b32.xlu0 %v7206_v57, %s7590_s23 }
 0x3e0   : > { %v9746_v59 = vpop.permute.xlu1 %2699  ;;  %v9748_v30 = vpop.permute.xlu0 %2697 }
 0x3e1   : > { %14025 = vst [vmem:[#allocation286_spill] sm:$0xff] %v9746_v59  ;;  %14026 = vst [vmem:[#allocation365_spill] sm:$0xff] %v9748_v30 }
 0x3e2   : > { %4062 = vrot.lane.b32.xlu1 %v7207_v62, %s7590_s23  ;;  %3680 = vrot.lane.b32.xlu0 %v9381_v49, %s7587_s20  ;;  %v7050_v62 = vld [vmem:[%s7637_s17 + $0x7a] sm:$0xff] }
 0x3e4   : > { %v9753_v13 = vpop.permute.xlu1 %2703  ;;  %v9755_v20 = vpop.permute.xlu0 %2701 }
 0x3e5   : > { %14027 = vst [vmem:[#allocation366_spill] sm:$0xff] %v9753_v13  ;;  %14028 = vst [vmem:[#allocation367_spill] sm:$0xff] %v9755_v20 }
 0x3e6   : > { %3682 = vrot.lane.b32.xlu1 %v9378_v4, %s7587_s20  ;;  %4188 = vrot.lane.b32.xlu0 %v14021_v2, %s7591_s24  ;;  %v7176_v2 = vld [vmem:[%s7637_s17 + $0x79] sm:$0xff] }
 0x3e8   : > { %v9761_v57 = vpop.permute.xlu1 %2707  ;;  %v9763_v48 = vpop.permute.xlu0 %2705 }
 0x3e9   : > { %14029 = vst [vmem:[#allocation368_spill] sm:$0xff] %v9761_v57  ;;  %14030 = vst [vmem:[#allocation369_spill] sm:$0xff] %v9763_v48 }
 0x3ea   : > { %4190 = vrot.lane.b32.xlu1 %v14024_v38, %s7591_s24  ;;  %3808 = vrot.lane.b32.xlu0 %v9542_v0, %s7588_s21  ;;  %v7051_v0 = vld [vmem:[%s7637_s17 + $0x82] sm:$0xff] }
 0x3ec   : > { %v9770_v33 = vpop.permute.xlu1 %2711  ;;  %v9772_v53 = vpop.permute.xlu0 %2709 }
 0x3ed   : > { %14031 = vst [vmem:[#allocation370_spill] sm:$0xff] %v9770_v33  ;;  %14032 = vst [vmem:[#allocation371_spill] sm:$0xff] %v9772_v53 }
 0x3ee   : > { %3428 = vrot.lane.b32.xlu1 %v7050_v62, %s7585_s18  ;;  %4316 = vrot.lane.b32.xlu0 %v9381_v49, %s7592_s25  ;;  %v7177_v49 = vld [vmem:[%s7637_s17 + $0x81] sm:$0xff] }
 0x3f0   : > { %v9778_v57 = vpop.permute.xlu1 %2715  ;;  %v9780_v48 = vpop.permute.xlu0 %2713 }
 0x3f1   : > { %14033 = vst [vmem:[#allocation372_spill] sm:$0xff] %v9778_v57  ;;  %14034 = vst [vmem:[#allocation373_spill] sm:$0xff] %v9780_v48 }
 0x3f2   : > { %3936 = vrot.lane.b32.xlu1 %v7176_v2, %s7589_s22  ;;  %3810 = vrot.lane.b32.xlu0 %v9539_v61, %s7588_s21  ;;  %v14039_v2 = vld [vmem:[#allocation291_spill] sm:$0xff] }
 0x3f4   : > { %v9786_v38 = vpop.permute.xlu1 %2719  ;;  %v9788_v33 = vpop.permute.xlu0 %2717 }
 0x3f5   : > { %14035 = vst [vmem:[#allocation374_spill] sm:$0xff] %v9786_v38  ;;  %14036 = vst [vmem:[#allocation375_spill] sm:$0xff] %v9788_v33  ;;  %v14042_v33 = vld [vmem:[#allocation290_spill] sm:$0xff] }
 0x3f6   : > { %3430 = vrot.lane.b32.xlu1 %v7051_v0, %s7585_s18  ;;  %4318 = vrot.lane.b32.xlu0 %v9378_v4, %s7592_s25 }
 0x3f8   : > { %v9794_v53 = vpop.permute.xlu1 %2723  ;;  %v9796_v57 = vpop.permute.xlu0 %2721 }
 0x3f9   : > { %14037 = vst [vmem:[#allocation376_spill] sm:$0xff] %v9794_v53  ;;  %14038 = vst [vmem:[#allocation377_spill] sm:$0xff] %v9796_v57 }
 0x3fa   : > { %3938 = vrot.lane.b32.xlu1 %v7177_v49, %s7589_s22  ;;  %3556 = vrot.lane.b32.xlu0 %v14039_v2, %s7586_s19 }
 0x3fc   : > { %v9801_v61 = vpop.permute.xlu1 %2727  ;;  %v9803_v38 = vpop.permute.xlu0 %2725 }
 0x3fd   : > { %14040 = vst [vmem:[#allocation291_spill] sm:$0xff] %v9801_v61  ;;  %14041 = vst [vmem:[#allocation378_spill] sm:$0xff] %v9803_v38 }
 0x3fe   : > { %3558 = vrot.lane.b32.xlu1 %v14042_v33, %s7586_s19  ;;  %4064 = vrot.lane.b32.xlu0 %v7050_v62, %s7590_s23 }
 0x400   : > { %v9808_v4 = vpop.permute.xlu1 %2731  ;;  %v9810_v53 = vpop.permute.xlu0 %2729 }
 0x401   : > { %14043 = vst [vmem:[#allocation290_spill] sm:$0xff] %v9808_v4  ;;  %14044 = vst [vmem:[#allocation379_spill] sm:$0xff] %v9810_v53 }
 0x402   : > { %4066 = vrot.lane.b32.xlu1 %v7051_v0, %s7590_s23  ;;  %3684 = vrot.lane.b32.xlu0 %v9395_v43, %s7587_s20  ;;  %v7052_v0 = vld [vmem:[%s7637_s17 + $0x92] sm:$0xff] }
 0x404   : > { %v9815_v49 = vpop.permute.xlu1 %2799  ;;  %v9817_v61 = vpop.permute.xlu0 %2797 }
 0x405   : > { %14045 = vst [vmem:[#allocation380_spill] sm:$0xff] %v9815_v49  ;;  %14046 = vst [vmem:[#allocation381_spill] sm:$0xff] %v9817_v61  ;;  %v7092_v49 = vld [vmem:[%s7637_s17 + $0xf3] sm:$0xff] }
 0x406   : > { %3686 = vrot.lane.b32.xlu1 %v9392_v52, %s7587_s20  ;;  %4192 = vrot.lane.b32.xlu0 %v14039_v2, %s7591_s24  ;;  %v7178_v2 = vld [vmem:[%s7637_s17 + $0x91] sm:$0xff] }
 0x408   : > { %v9823_v62 = vpop.permute.xlu1 %2803  ;;  %v9825_v4 = vpop.permute.xlu0 %2801 }
 0x409   : > { %14047 = vst [vmem:[#allocation382_spill] sm:$0xff] %v9823_v62  ;;  %14048 = vst [vmem:[#allocation383_spill] sm:$0xff] %v9825_v4 }
 0x40a   : > { %4194 = vrot.lane.b32.xlu1 %v14042_v33, %s7591_s24  ;;  %3812 = vrot.lane.b32.xlu0 %v9556_v9, %s7588_s21  ;;  %v7053_v9 = vld [vmem:[%s7637_s17 + $0x9a] sm:$0xff] }
 0x40c   : > { %v9832_v53 = vpop.permute.xlu1 %2807  ;;  %v9834_v38 = vpop.permute.xlu0 %2805 }
 0x40d   : > { %14049 = vst [vmem:[#allocation384_spill] sm:$0xff] %v9832_v53  ;;  %14050 = vst [vmem:[#allocation385_spill] sm:$0xff] %v9834_v38 }
 0x40e   : > { %3432 = vrot.lane.b32.xlu1 %v7052_v0, %s7585_s18  ;;  %4320 = vrot.lane.b32.xlu0 %v9395_v43, %s7592_s25  ;;  %v7179_v43 = vld [vmem:[%s7637_s17 + $0x99] sm:$0xff] }
 0x410   : > { %v9840_v57 = vpop.permute.xlu1 %2811  ;;  %v9842_v48 = vpop.permute.xlu0 %2809 }
 0x411   : > { %14051 = vst [vmem:[#allocation386_spill] sm:$0xff] %v9840_v57  ;;  %14052 = vst [vmem:[#allocation387_spill] sm:$0xff] %v9842_v48 }
 0x412   : > { %3940 = vrot.lane.b32.xlu1 %v7178_v2, %s7589_s22  ;;  %3814 = vrot.lane.b32.xlu0 %v9553_v12, %s7588_s21  ;;  %v14057_v12 = vld [vmem:[#allocation295_spill] sm:$0xff] }
 0x414   : > { %v9848_v33 = vpop.permute.xlu1 %2815  ;;  %v9850_v13 = vpop.permute.xlu0 %2813 }
 0x415   : > { %14053 = vst [vmem:[#allocation388_spill] sm:$0xff] %v9848_v33  ;;  %14054 = vst [vmem:[#allocation389_spill] sm:$0xff] %v9850_v13  ;;  %v7088_v13 = vld [vmem:[%s7637_s17 + $0xc3] sm:$0xff] }
 0x416   : > { %3434 = vrot.lane.b32.xlu1 %v7053_v9, %s7585_s18  ;;  %4322 = vrot.lane.b32.xlu0 %v9392_v52, %s7592_s25 }
 0x418   : > { %v9856_v20 = vpop.permute.xlu1 %2819  ;;  %v9858_v59 = vpop.permute.xlu0 %2817 }
 0x419   : > { %14055 = vst [vmem:[#allocation390_spill] sm:$0xff] %v9856_v20  ;;  %14056 = vst [vmem:[#allocation391_spill] sm:$0xff] %v9858_v59 }
 0x41a   : > { %3942 = vrot.lane.b32.xlu1 %v7179_v43, %s7589_s22  ;;  %3560 = vrot.lane.b32.xlu0 %v14057_v12, %s7586_s19  ;;  %v7242_v43 = vld [vmem:[%s7637_s17 + $0x93] sm:$0xff] }
 0x41c   : > { %v9863_v2 = vpop.permute.xlu1 %2823  ;;  %v9865_v30 = vpop.permute.xlu0 %2821 }
 0x41d   : > { %14058 = vst [vmem:[#allocation295_spill] sm:$0xff] %v9863_v2  ;;  %14059 = vst [vmem:[#allocation392_spill] sm:$0xff] %v9865_v30 }
 0x41e   : > { %3562 = vrot.lane.b32.xlu1 %v14060_v46, %s7586_s19  ;;  %4068 = vrot.lane.b32.xlu0 %v7052_v0, %s7590_s23  ;;  %v7243_v46 = vld [vmem:[%s7637_s17 + $0x9b] sm:$0xff] }
 0x420   : > { %v9870_v52 = vpop.permute.xlu1 %2827  ;;  %v9872_v20 = vpop.permute.xlu0 %2825 }
 0x421   : > { %14061 = vst [vmem:[#allocation294_spill] sm:$0xff] %v9870_v52  ;;  %14062 = vst [vmem:[#allocation393_spill] sm:$0xff] %v9872_v20 }
 0x422   : > { %4070 = vrot.lane.b32.xlu1 %v7053_v9, %s7590_s23  ;;  %3688 = vrot.lane.b32.xlu0 %v9409_v56, %s7587_s20  ;;  %v7054_v9 = vld [vmem:[%s7637_s17 + $0xaa] sm:$0xff] }
 0x424   : > { %v9878_v12 = vpop.permute.xlu1 %2831  ;;  %v9880_v2 = vpop.permute.xlu0 %2829 }
 0x425   : > { %14063 = vst [vmem:[#allocation394_spill] sm:$0xff] %v9878_v12  ;;  %14064 = vst [vmem:[#allocation395_spill] sm:$0xff] %v9880_v2 }
 0x426   : > { %3690 = vrot.lane.b32.xlu1 %v9406_v28, %s7587_s20  ;;  %4196 = vrot.lane.b32.xlu0 %v7242_v43, %s7591_s24  ;;  %v7180_v43 = vld [vmem:[%s7637_s17 + $0xa9] sm:$0xff] }
 0x428   : > { %v9886_v0 = vpop.permute.xlu1 %2835  ;;  %v9888_v52 = vpop.permute.xlu0 %2833 }
 0x429   : > { %14065 = vst [vmem:[#allocation396_spill] sm:$0xff] %v9886_v0  ;;  %14066 = vst [vmem:[#allocation397_spill] sm:$0xff] %v9888_v52  ;;  %v7086_v52 = vld [vmem:[%s7637_s17 + $0xab] sm:$0xff] }
 0x42a   : > { %4198 = vrot.lane.b32.xlu1 %v7243_v46, %s7591_s24  ;;  %3816 = vrot.lane.b32.xlu0 %v9570_v51, %s7588_s21  ;;  %v7055_v51 = vld [vmem:[%s7637_s17 + $0xb2] sm:$0xff] }
 0x42c   : > { %v9894_v12 = vpop.permute.xlu1 %2839  ;;  %v9896_v2 = vpop.permute.xlu0 %2837 }
 0x42d   : > { %14067 = vst [vmem:[#allocation398_spill] sm:$0xff] %v9894_v12  ;;  %14068 = vst [vmem:[#allocation399_spill] sm:$0xff] %v9896_v2 }
 0x42e   : > { %3436 = vrot.lane.b32.xlu1 %v7054_v9, %s7585_s18  ;;  %4324 = vrot.lane.b32.xlu0 %v9409_v56, %s7592_s25  ;;  %v7181_v56 = vld [vmem:[%s7637_s17 + $0xb1] sm:$0xff] }
 0x430   : > { %v9902_v0 = vpop.permute.xlu1 %2843  ;;  %v9904_v46 = vpop.permute.xlu0 %2841 }
 0x431   : > { %14069 = vst [vmem:[#allocation400_spill] sm:$0xff] %v9902_v0  ;;  %14070 = vst [vmem:[#allocation401_spill] sm:$0xff] %v9904_v46 }
 0x432   : > { %3944 = vrot.lane.b32.xlu1 %v7180_v43, %s7589_s22  ;;  %3818 = vrot.lane.b32.xlu0 %v9567_v29, %s7588_s21  ;;  %v7087_v29 = vld [vmem:[%s7637_s17 + $0xb3] sm:$0xff] }
 0x434   : > { %v9910_v12 = vpop.permute.xlu1 %3420  ;;  %v9912_v2 = vpop.permute.xlu0 %2845 }
 0x435   : > { %14071 = vst [vmem:[#allocation402_spill] sm:$0xff] %v9912_v2 }
 0x436   : > { %3438 = vrot.lane.b32.xlu1 %v7055_v51, %s7585_s18  ;;  %4326 = vrot.lane.b32.xlu0 %v9406_v28, %s7592_s25 }
 0x438   : > { %v9919_v0 = vpop.permute.xlu1 %3548  ;;  %v9921_v46 = vpop.permute.xlu0 %3422 }
 0x43a   : > { %3946 = vrot.lane.b32.xlu1 %v7181_v56, %s7589_s22  ;;  %3564 = vrot.lane.b32.xlu0 %v7086_v52, %s7586_s19 }
 0x43c   : > { %v9926_v43 = vpop.permute.xlu1 %3676  ;;  %v9928_v2 = vpop.permute.xlu0 %3550 }
 0x43e   : > { %3566 = vrot.lane.b32.xlu1 %v7087_v29, %s7586_s19  ;;  %4072 = vrot.lane.b32.xlu0 %v7054_v9, %s7590_s23 }
 0x440   : > { %v9932_v28 = vpop.permute.xlu1 %3804  ;;  %v9934_v20 = vpop.permute.xlu0 %3678 }
 0x442   : > { %4074 = vrot.lane.b32.xlu1 %v7055_v51, %s7590_s23  ;;  %3692 = vrot.lane.b32.xlu0 %v9423_v36, %s7587_s20  ;;  %v7056_v51 = vld [vmem:[%s7637_s17 + $0xc2] sm:$0xff] }
 0x444   : > { %v9939_v56 = vpop.permute.xlu1 %3806  ;;  %v9941_v30 = vpop.permute.xlu0 %3424 }
 0x446   : > { %3694 = vrot.lane.b32.xlu1 %v9420_v8, %s7587_s20  ;;  %4200 = vrot.lane.b32.xlu0 %v7086_v52, %s7591_s24  ;;  %v7182_v52 = vld [vmem:[%s7637_s17 + $0xc1] sm:$0xff] }
 0x448   : > { %v9946_v9 = vpop.permute.xlu1 %3426  ;;  %v9948_v21 = vpop.permute.xlu0 %3932 }
 0x44a   : > { %4202 = vrot.lane.b32.xlu1 %v7087_v29, %s7591_s24  ;;  %3820 = vrot.lane.b32.xlu0 %v9584_v7, %s7588_s21  ;;  %v7057_v7 = vld [vmem:[%s7637_s17 + $0xca] sm:$0xff] }
 0x44c   : > { %v9954_v35 = vpop.permute.xlu1 %3934  ;;  %v9956_v59 = vpop.permute.xlu0 %3552 }
 0x44e   : > { %3440 = vrot.lane.b32.xlu1 %v7056_v51, %s7585_s18  ;;  %4328 = vrot.lane.b32.xlu0 %v9423_v36, %s7592_s25  ;;  %v7183_v36 = vld [vmem:[%s7637_s17 + $0xc9] sm:$0xff] }
 0x450   : > { %v9962_v33 = vpop.permute.xlu1 %3554  ;;  %v9964_v29 = vpop.permute.xlu0 %4060 }
 0x452   : > { %3948 = vrot.lane.b32.xlu1 %v7182_v52, %s7589_s22  ;;  %3822 = vrot.lane.b32.xlu0 %v9581_v16, %s7588_s21  ;;  %v7089_v16 = vld [vmem:[%s7637_s17 + $0xcb] sm:$0xff] }
 0x454   : > { %v9970_v63 = vpop.permute.xlu1 %4062  ;;  %v9972_v40 = vpop.permute.xlu0 %3680 }
 0x456   : > { %3442 = vrot.lane.b32.xlu1 %v7057_v7, %s7585_s18  ;;  %4330 = vrot.lane.b32.xlu0 %v9420_v8, %s7592_s25 }
 0x458   : > { %v9979_v57 = vpop.permute.xlu1 %3682  ;;  %v9981_v3 = vpop.permute.xlu0 %4188 }
 0x45a   : > { %3950 = vrot.lane.b32.xlu1 %v7183_v36, %s7589_s22  ;;  %3568 = vrot.lane.b32.xlu0 %v7088_v13, %s7586_s19  ;;  %v7121_v36 = vld [vmem:[%s7637_s17 + $0xcc] sm:$0xff] }
 0x45c   : > { %v9986_v52 = vpop.permute.xlu1 %4190  ;;  %v9988_v32 = vpop.permute.xlu0 %3808 }
 0x45e   : > { %3570 = vrot.lane.b32.xlu1 %v7089_v16, %s7586_s19  ;;  %4076 = vrot.lane.b32.xlu0 %v7056_v51, %s7590_s23 }
 0x460   : > { %v9992_v8 = vpop.permute.xlu1 %3428  ;;  %v9994_v19 = vpop.permute.xlu0 %4316 }
 0x462   : > { %4078 = vrot.lane.b32.xlu1 %v7057_v7, %s7590_s23  ;;  %3696 = vrot.lane.b32.xlu0 %v9435_v1, %s7587_s20  ;;  %v7058_v1 = vld [vmem:[%s7637_s17 + $0xda] sm:$0xff]  ;;  %v7278_v7 = vld [vmem:[%s7637_s17 + $0xc4] sm:$0xff] }
 0x464   : > { %v10000_v25 = vpop.permute.xlu1 %3936  ;;  %v10002_v5 = vpop.permute.xlu0 %3810 }
 0x466   : > { %3698 = vrot.lane.b32.xlu1 %v7121_v36, %s7587_s20  ;;  %4204 = vrot.lane.b32.xlu0 %v7088_v13, %s7591_s24  ;;  %v7184_v13 = vld [vmem:[%s7637_s17 + $0xd9] sm:$0xff] }
 0x468   : > { %v10006_v51 = vpop.permute.xlu1 %3430  ;;  %v10008_v48 = vpop.permute.xlu0 %4318 }
 0x46a   : > { %4206 = vrot.lane.b32.xlu1 %v7089_v16, %s7591_s24  ;;  %3824 = vrot.lane.b32.xlu0 %v9598_v24, %s7588_s21  ;;  %v7059_v24 = vld [vmem:[%s7637_s17 + $0xe2] sm:$0xff] }
 0x46c   : > { %v10015_v53 = vpop.permute.xlu1 %3938  ;;  %v10017_v41 = vpop.permute.xlu0 %3556 }
 0x46e   : > { %3444 = vrot.lane.b32.xlu1 %v7058_v1, %s7585_s18  ;;  %4332 = vrot.lane.b32.xlu0 %v7278_v7, %s7592_s25  ;;  %v7185_v7 = vld [vmem:[%s7637_s17 + $0xe1] sm:$0xff] }
 0x470   : > { %v10022_v54 = vpop.permute.xlu1 %3558  ;;  %v10024_v16 = vpop.permute.xlu0 %4064 }
 0x472   : > { %3952 = vrot.lane.b32.xlu1 %v7184_v13, %s7589_s22  ;;  %3826 = vrot.lane.b32.xlu0 %v9595_v39, %s7588_s21  ;;  %v7091_v39 = vld [vmem:[%s7637_s17 + $0xe3] sm:$0xff] }
 0x474   : > { %v10030_v50 = vpop.permute.xlu1 %4066  ;;  %v10032_v60 = vpop.permute.xlu0 %3684 }
 0x476   : > { %3446 = vrot.lane.b32.xlu1 %v7059_v24, %s7585_s18  ;;  %4334 = vrot.lane.b32.xlu0 %v7121_v36, %s7592_s25  ;;  %v7122_v36 = vld [vmem:[%s7637_s17 + $0xdc] sm:$0xff] }
 0x478   : > { %v10038_v45 = vpop.permute.xlu1 %3686  ;;  %v10040_v38 = vpop.permute.xlu0 %4192 }
 0x47a   : > { %3954 = vrot.lane.b32.xlu1 %v7185_v7, %s7589_s22  ;;  %3572 = vrot.lane.b32.xlu0 %v7090_v44, %s7586_s19  ;;  %v7123_v7 = vld [vmem:[%s7637_s17 + $0xe4] sm:$0xff] }
 0x47c   : > { %v10045_v13 = vpop.permute.xlu1 %4194  ;;  %v10047_v62 = vpop.permute.xlu0 %3812 }
 0x47e   : > { %3574 = vrot.lane.b32.xlu1 %v7091_v39, %s7586_s19  ;;  %4080 = vrot.lane.b32.xlu0 %v7058_v1, %s7590_s23 }
 0x480   : > { %v10052_v15 = vpop.permute.xlu1 %3432  ;;  %v10054_v11 = vpop.permute.xlu0 %4320 }
 0x482   : > { %4082 = vrot.lane.b32.xlu1 %v7059_v24, %s7590_s23  ;;  %3700 = vrot.lane.b32.xlu0 %v7122_v36, %s7587_s20  ;;  %v7060_v24 = vld [vmem:[%s7637_s17 + $0xf2] sm:$0xff] }
 0x484   : > { %v10059_v27 = vpop.permute.xlu1 %3940  ;;  %v10061_v55 = vpop.permute.xlu0 %3814 }
 0x486   : > { %3702 = vrot.lane.b32.xlu1 %v7123_v7, %s7587_s20  ;;  %4208 = vrot.lane.b32.xlu0 %v7090_v44, %s7591_s24  ;;  %v7186_v44 = vld [vmem:[%s7637_s17 + $0xf1] sm:$0xff] }
 0x488   : > { %v10065_v1 = vpop.permute.xlu1 %3434  ;;  %v10067_v23 = vpop.permute.xlu0 %4322 }
 0x48a   : > { %4210 = vrot.lane.b32.xlu1 %v7091_v39, %s7591_s24  ;;  %3828 = vrot.lane.b32.xlu0 %v9612_v22, %s7588_s21  ;;  %v7061_v22 = vld [vmem:[%s7637_s17 + $0xfa] sm:$0xff] }
 0x48c   : > { %v10073_v17 = vpop.permute.xlu1 %3942  ;;  %v10075_v4 = vpop.permute.xlu0 %3560 }
 0x48e   : > { %3448 = vrot.lane.b32.xlu1 %v7060_v24, %s7585_s18  ;;  %4336 = vrot.lane.b32.xlu0 %v7122_v36, %s7592_s25  ;;  %v7187_v36 = vld [vmem:[%s7637_s17 + $0xf9] sm:$0xff] }
 0x490   : > { %v10080_v6 = vpop.permute.xlu1 %3562  ;;  %v10082_v18 = vpop.permute.xlu0 %4068 }
 0x492   : > { %3956 = vrot.lane.b32.xlu1 %v7186_v44, %s7589_s22  ;;  %3830 = vrot.lane.b32.xlu0 %v9609_v58, %s7588_s21  ;;  %v7093_v58 = vld [vmem:[%s7637_s17 + $0xfb] sm:$0xff] }
 0x494   : > { %v10088_v39 = vpop.permute.xlu1 %4070  ;;  %v10090_v14 = vpop.permute.xlu0 %3688 }
 0x495   : > { %14072 = vst [vmem:[#allocation403_spill] sm:$0xff] %v10088_v39  ;;  %14073 = vst [vmem:[#allocation404_spill] sm:$0xff] %v10090_v14  ;;  %v14222_v14 = vld [vmem:[#allocation4_spill] sm:$0xff] }
 0x496   : > { %3450 = vrot.lane.b32.xlu1 %v7061_v22, %s7585_s18  ;;  %4338 = vrot.lane.b32.xlu0 %v7123_v7, %s7592_s25  ;;  %v7124_v7 = vld [vmem:[%s7637_s17 + $0xf4] sm:$0xff] }
 0x498   : > { %v10096_v37 = vpop.permute.xlu1 %3690  ;;  %v10098_v26 = vpop.permute.xlu0 %4196 }
 0x499   : > { %14074 = vst [vmem:[#allocation405_spill] sm:$0xff] %v10096_v37  ;;  %14075 = vst [vmem:[#allocation406_spill] sm:$0xff] %v10098_v26  ;;  %v7519_v37 = vld [vmem:[%s7637_s17 + $0x20] sm:$0xff] }
 0x49a   : > { %3958 = vrot.lane.b32.xlu1 %v7187_v36, %s7589_s22  ;;  %3576 = vrot.lane.b32.xlu0 %v7092_v49, %s7586_s19  ;;  %v7125_v36 = vld [vmem:[%s7637_s17 + $0xfc] sm:$0xff]  ;;  %v10686_v39 = vsel %vm2893_vm0, %v7519_v37, %v14222_v14 }
 0x49c   : > { %v10103_v44 = vpop.permute.xlu1 %4198  ;;  %v10105_v47 = vpop.permute.xlu0 %3816 }
 0x49d   : > { %14076 = vst [vmem:[#allocation407_spill] sm:$0xff] %v10103_v44  ;;  %14077 = vst [vmem:[#allocation408_spill] sm:$0xff] %v10105_v47  ;;  %v7094_v47 = vld [vmem:[%s7637_s17 + $0x10b] sm:$0xff] }
 0x49e   : > { %3578 = vrot.lane.b32.xlu1 %v7093_v58, %s7586_s19  ;;  %4084 = vrot.lane.b32.xlu0 %v7060_v24, %s7590_s23 }
 0x4a0   : > { %v10110_v61 = vpop.permute.xlu1 %3436  ;;  %v10112_v10 = vpop.permute.xlu0 %4324 }
 0x4a1   : > { %14078 = vst [vmem:[#allocation409_spill] sm:$0xff] %v10110_v61  ;;  %14079 = vst [vmem:[#allocation410_spill] sm:$0xff] %v10112_v10 }
 0x4a2   : > { %4086 = vrot.lane.b32.xlu1 %v7061_v22, %s7590_s23  ;;  %3704 = vrot.lane.b32.xlu0 %v7124_v7, %s7587_s20  ;;  %v7062_v22 = vld [vmem:[%s7637_s17 + $0x10a] sm:$0xff] }
 0x4a4   : > { %v10117_v34 = vpop.permute.xlu1 %3944  ;;  %v10119_v31 = vpop.permute.xlu0 %3818 }
 0x4a5   : > { %14080 = vst [vmem:[#allocation411_spill] sm:$0xff] %v10117_v34  ;;  %14081 = vst [vmem:[#allocation412_spill] sm:$0xff] %v10119_v31  ;;  %v7157_v31 = vld [vmem:[%s7637_s17 + $0x110] sm:$0xff] }
 0x4a6   : > { %3706 = vrot.lane.b32.xlu1 %v7125_v36, %s7587_s20  ;;  %4212 = vrot.lane.b32.xlu0 %v7092_v49, %s7591_s24  ;;  %v7188_v49 = vld [vmem:[%s7637_s17 + $0x109] sm:$0xff] }
 0x4a8   : > { %v10123_v24 = vpop.permute.xlu1 %3438  ;;  %v10125_v61 = vpop.permute.xlu0 %4326 }
 0x4a9   : > { %14082 = vst [vmem:[#allocation413_spill] sm:$0xff] %v10123_v24  ;;  %14083 = vst [vmem:[#allocation414_spill] sm:$0xff] %v10125_v61 }
 0x4aa   : > { %4214 = vrot.lane.b32.xlu1 %v7093_v58, %s7591_s24  ;;  %3832 = vrot.lane.b32.xlu0 %v9624_v42, %s7588_s21  ;;  %v7063_v42 = vld [vmem:[%s7637_s17 + $0x112] sm:$0xff] }
 0x4ac   : > { %v10131_v10 = vpop.permute.xlu1 %3946  ;;  %v10133_v34 = vpop.permute.xlu0 %3564 }
 0x4ad   : > { %14084 = vst [vmem:[#allocation415_spill] sm:$0xff] %v10131_v10  ;;  %14085 = vst [vmem:[#allocation416_spill] sm:$0xff] %v10133_v34 }
 0x4ae   : > { %3452 = vrot.lane.b32.xlu1 %v7062_v22, %s7585_s18  ;;  %4340 = vrot.lane.b32.xlu0 %v7124_v7, %s7592_s25  ;;  %v7189_v7 = vld [vmem:[%s7637_s17 + $0x111] sm:$0xff] }
 0x4b0   : > { %v10139_v61 = vpop.permute.xlu1 %3566  ;;  %v10141_v58 = vpop.permute.xlu0 %4072 }
 0x4b1   : > { %14086 = vst [vmem:[#allocation417_spill] sm:$0xff] %v10139_v61  ;;  %14087 = vst [vmem:[#allocation418_spill] sm:$0xff] %v10141_v58 }
 0x4b2   : > { %3960 = vrot.lane.b32.xlu1 %v7188_v49, %s7589_s22  ;;  %3834 = vrot.lane.b32.xlu0 %v7157_v31, %s7588_s21  ;;  %v7095_v31 = vld [vmem:[%s7637_s17 + $0x113] sm:$0xff] }
 0x4b4   : > { %v10146_v10 = vpop.permute.xlu1 %4074  ;;  %v10148_v34 = vpop.permute.xlu0 %3692 }
 0x4b5   : > { %14088 = vst [vmem:[#allocation419_spill] sm:$0xff] %v10146_v10  ;;  %14089 = vst [vmem:[#allocation420_spill] sm:$0xff] %v10148_v34 }
 0x4b6   : > { %3454 = vrot.lane.b32.xlu1 %v7063_v42, %s7585_s18  ;;  %4342 = vrot.lane.b32.xlu0 %v7125_v36, %s7592_s25  ;;  %v7126_v36 = vld [vmem:[%s7637_s17 + $0x10c] sm:$0xff] }
 0x4b8   : > { %v10154_v61 = vpop.permute.xlu1 %3694  ;;  %v10156_v58 = vpop.permute.xlu0 %4200 }
 0x4b9   : > { %14090 = vst [vmem:[#allocation421_spill] sm:$0xff] %v10154_v61  ;;  %14091 = vst [vmem:[#allocation422_spill] sm:$0xff] %v10156_v58 }
 0x4ba   : > { %3962 = vrot.lane.b32.xlu1 %v7189_v7, %s7589_s22  ;;  %3580 = vrot.lane.b32.xlu0 %v7094_v47, %s7586_s19  ;;  %v7127_v7 = vld [vmem:[%s7637_s17 + $0x114] sm:$0xff] }
 0x4bc   : > { %v10161_v49 = vpop.permute.xlu1 %4202  ;;  %v10163_v34 = vpop.permute.xlu0 %3820 }
 0x4bd   : > { %14092 = vst [vmem:[#allocation423_spill] sm:$0xff] %v10161_v49  ;;  %14093 = vst [vmem:[#allocation424_spill] sm:$0xff] %v10163_v34 }
 0x4be   : > { %3582 = vrot.lane.b32.xlu1 %v7095_v31, %s7586_s19  ;;  %4088 = vrot.lane.b32.xlu0 %v7062_v22, %s7590_s23  ;;  %v7158_v22 = vld [vmem:[%s7637_s17 + $0x120] sm:$0xff] }
 0x4c0   : > { %v10168_v10 = vpop.permute.xlu1 %3440  ;;  %v10170_v61 = vpop.permute.xlu0 %4328 }
 0x4c1   : > { %14094 = vst [vmem:[#allocation425_spill] sm:$0xff] %v10168_v10  ;;  %14095 = vst [vmem:[#allocation426_spill] sm:$0xff] %v10170_v61 }
 0x4c2   : > { %4090 = vrot.lane.b32.xlu1 %v7063_v42, %s7590_s23  ;;  %3708 = vrot.lane.b32.xlu0 %v7126_v36, %s7587_s20  ;;  %v7064_v42 = vld [vmem:[%s7637_s17 + $0x122] sm:$0xff] }
 0x4c4   : > { %v10175_v49 = vpop.permute.xlu1 %3948  ;;  %v10177_v34 = vpop.permute.xlu0 %3822 }
 0x4c5   : > { %14096 = vst [vmem:[#allocation427_spill] sm:$0xff] %v10175_v49  ;;  %14097 = vst [vmem:[#allocation428_spill] sm:$0xff] %v10177_v34  ;;  %v7159_v49 = vld [vmem:[%s7637_s17 + $0x128] sm:$0xff] }
 0x4c6   : > { %3710 = vrot.lane.b32.xlu1 %v7127_v7, %s7587_s20  ;;  %4216 = vrot.lane.b32.xlu0 %v7094_v47, %s7591_s24  ;;  %v7190_v47 = vld [vmem:[%s7637_s17 + $0x121] sm:$0xff] }
 0x4c8   : > { %v10182_v10 = vpop.permute.xlu1 %3442  ;;  %v10184_v61 = vpop.permute.xlu0 %4330 }
 0x4c9   : > { %14098 = vst [vmem:[#allocation429_spill] sm:$0xff] %v10182_v10  ;;  %14099 = vst [vmem:[#allocation430_spill] sm:$0xff] %v10184_v61 }
 0x4ca   : > { %4218 = vrot.lane.b32.xlu1 %v7095_v31, %s7591_s24  ;;  %3836 = vrot.lane.b32.xlu0 %v7158_v22, %s7588_s21  ;;  %v7065_v31 = vld [vmem:[%s7637_s17 + $0x12a] sm:$0xff] }
 0x4cc   : > { %v10189_v58 = vpop.permute.xlu1 %3950  ;;  %v10191_v34 = vpop.permute.xlu0 %3568 }
 0x4cd   : > { %14100 = vst [vmem:[#allocation431_spill] sm:$0xff] %v10189_v58  ;;  %14101 = vst [vmem:[#allocation432_spill] sm:$0xff] %v10191_v34  ;;  %v7096_v58 = vld [vmem:[%s7637_s17 + $0x123] sm:$0xff] }
 0x4ce   : > { %3456 = vrot.lane.b32.xlu1 %v7064_v42, %s7585_s18  ;;  %4344 = vrot.lane.b32.xlu0 %v7126_v36, %s7592_s25  ;;  %v7191_v36 = vld [vmem:[%s7637_s17 + $0x129] sm:$0xff] }
 0x4d0   : > { %v10197_v10 = vpop.permute.xlu1 %3570  ;;  %v10199_v61 = vpop.permute.xlu0 %4076 }
 0x4d1   : > { %14102 = vst [vmem:[#allocation433_spill] sm:$0xff] %v10197_v10  ;;  %14103 = vst [vmem:[#allocation434_spill] sm:$0xff] %v10199_v61 }
 0x4d2   : > { %3964 = vrot.lane.b32.xlu1 %v7190_v47, %s7589_s22  ;;  %3838 = vrot.lane.b32.xlu0 %v7159_v49, %s7588_s21  ;;  %v7097_v49 = vld [vmem:[%s7637_s17 + $0x12b] sm:$0xff] }
 0x4d4   : > { %v10204_v22 = vpop.permute.xlu1 %4078  ;;  %v10206_v34 = vpop.permute.xlu0 %3696 }
 0x4d5   : > { %14104 = vst [vmem:[#allocation435_spill] sm:$0xff] %v10204_v22  ;;  %14105 = vst [vmem:[#allocation436_spill] sm:$0xff] %v10206_v34 }
 0x4d6   : > { %3458 = vrot.lane.b32.xlu1 %v7065_v31, %s7585_s18  ;;  %4346 = vrot.lane.b32.xlu0 %v7127_v7, %s7592_s25  ;;  %v7128_v7 = vld [vmem:[%s7637_s17 + $0x124] sm:$0xff] }
 0x4d8   : > { %v10212_v10 = vpop.permute.xlu1 %3698  ;;  %v10214_v61 = vpop.permute.xlu0 %4204 }
 0x4d9   : > { %14106 = vst [vmem:[#allocation437_spill] sm:$0xff] %v10212_v10  ;;  %14107 = vst [vmem:[#allocation438_spill] sm:$0xff] %v10214_v61 }
 0x4da   : > { %3966 = vrot.lane.b32.xlu1 %v7191_v36, %s7589_s22  ;;  %3584 = vrot.lane.b32.xlu0 %v7096_v58, %s7586_s19  ;;  %v7129_v36 = vld [vmem:[%s7637_s17 + $0x12c] sm:$0xff] }
 0x4dc   : > { %v10219_v47 = vpop.permute.xlu1 %4206  ;;  %v10221_v34 = vpop.permute.xlu0 %3824 }
 0x4dd   : > { %14108 = vst [vmem:[#allocation439_spill] sm:$0xff] %v10219_v47  ;;  %14109 = vst [vmem:[#allocation440_spill] sm:$0xff] %v10221_v34 }
 0x4de   : > { %3586 = vrot.lane.b32.xlu1 %v7097_v49, %s7586_s19  ;;  %4092 = vrot.lane.b32.xlu0 %v7064_v42, %s7590_s23  ;;  %v7160_v42 = vld [vmem:[%s7637_s17 + $0x138] sm:$0xff] }
 0x4e0   : > { %v10226_v22 = vpop.permute.xlu1 %3444  ;;  %v10228_v10 = vpop.permute.xlu0 %4332 }
 0x4e1   : > { %14110 = vst [vmem:[#allocation441_spill] sm:$0xff] %v10226_v22  ;;  %14111 = vst [vmem:[#allocation442_spill] sm:$0xff] %v10228_v10 }
 0x4e2   : > { %4094 = vrot.lane.b32.xlu1 %v7065_v31, %s7590_s23  ;;  %3712 = vrot.lane.b32.xlu0 %v7128_v7, %s7587_s20  ;;  %v7066_v31 = vld [vmem:[%s7637_s17 + $0x13a] sm:$0xff] }
 0x4e4   : > { %v10233_v47 = vpop.permute.xlu1 %3952  ;;  %v10235_v34 = vpop.permute.xlu0 %3826 }
 0x4e5   : > { %14112 = vst [vmem:[#allocation443_spill] sm:$0xff] %v10233_v47  ;;  %14113 = vst [vmem:[#allocation444_spill] sm:$0xff] %v10235_v34  ;;  %v7161_v47 = vld [vmem:[%s7637_s17 + $0x140] sm:$0xff] }
 0x4e6   : > { %3714 = vrot.lane.b32.xlu1 %v7129_v36, %s7587_s20  ;;  %4220 = vrot.lane.b32.xlu0 %v7096_v58, %s7591_s24  ;;  %v7192_v58 = vld [vmem:[%s7637_s17 + $0x139] sm:$0xff] }
 0x4e8   : > { %v10240_v22 = vpop.permute.xlu1 %3446  ;;  %v10242_v10 = vpop.permute.xlu0 %4334 }
 0x4e9   : > { %14114 = vst [vmem:[#allocation445_spill] sm:$0xff] %v10240_v22  ;;  %14115 = vst [vmem:[#allocation446_spill] sm:$0xff] %v10242_v10 }
 0x4ea   : > { %4222 = vrot.lane.b32.xlu1 %v7097_v49, %s7591_s24  ;;  %3840 = vrot.lane.b32.xlu0 %v7160_v42, %s7588_s21  ;;  %v7067_v49 = vld [vmem:[%s7637_s17 + $0x142] sm:$0xff] }
 0x4ec   : > { %v10247_v61 = vpop.permute.xlu1 %3954  ;;  %v10249_v34 = vpop.permute.xlu0 %3572 }
 0x4ed   : > { %14116 = vst [vmem:[#allocation447_spill] sm:$0xff] %v10247_v61  ;;  %14117 = vst [vmem:[#allocation448_spill] sm:$0xff] %v10249_v34  ;;  %v7098_v61 = vld [vmem:[%s7637_s17 + $0x13b] sm:$0xff] }
 0x4ee   : > { %3460 = vrot.lane.b32.xlu1 %v7066_v31, %s7585_s18  ;;  %4348 = vrot.lane.b32.xlu0 %v7128_v7, %s7592_s25  ;;  %v7193_v7 = vld [vmem:[%s7637_s17 + $0x141] sm:$0xff] }
 0x4f0   : > { %v10255_v22 = vpop.permute.xlu1 %3574  ;;  %v10257_v10 = vpop.permute.xlu0 %4080 }
 0x4f1   : > { %14118 = vst [vmem:[#allocation449_spill] sm:$0xff] %v10255_v22  ;;  %14119 = vst [vmem:[#allocation450_spill] sm:$0xff] %v10257_v10 }
 0x4f2   : > { %3968 = vrot.lane.b32.xlu1 %v7192_v58, %s7589_s22  ;;  %3842 = vrot.lane.b32.xlu0 %v7161_v47, %s7588_s21  ;;  %v7099_v47 = vld [vmem:[%s7637_s17 + $0x143] sm:$0xff] }
 0x4f4   : > { %v10262_v42 = vpop.permute.xlu1 %4082  ;;  %v10264_v34 = vpop.permute.xlu0 %3700 }
 0x4f5   : > { %14120 = vst [vmem:[#allocation451_spill] sm:$0xff] %v10262_v42  ;;  %14121 = vst [vmem:[#allocation452_spill] sm:$0xff] %v10264_v34 }
 0x4f6   : > { %3462 = vrot.lane.b32.xlu1 %v7067_v49, %s7585_s18  ;;  %4350 = vrot.lane.b32.xlu0 %v7129_v36, %s7592_s25  ;;  %v7130_v36 = vld [vmem:[%s7637_s17 + $0x13c] sm:$0xff] }
 0x4f8   : > { %v10270_v22 = vpop.permute.xlu1 %3702  ;;  %v10272_v10 = vpop.permute.xlu0 %4208 }
 0x4f9   : > { %14122 = vst [vmem:[#allocation453_spill] sm:$0xff] %v10270_v22  ;;  %14123 = vst [vmem:[#allocation454_spill] sm:$0xff] %v10272_v10 }
 0x4fa   : > { %3970 = vrot.lane.b32.xlu1 %v7193_v7, %s7589_s22  ;;  %3588 = vrot.lane.b32.xlu0 %v7098_v61, %s7586_s19  ;;  %v7131_v7 = vld [vmem:[%s7637_s17 + $0x144] sm:$0xff] }
 0x4fc   : > { %v10277_v58 = vpop.permute.xlu1 %4210  ;;  %v10279_v34 = vpop.permute.xlu0 %3828 }
 0x4fd   : > { %14124 = vst [vmem:[#allocation455_spill] sm:$0xff] %v10277_v58  ;;  %14125 = vst [vmem:[#allocation456_spill] sm:$0xff] %v10279_v34 }
 0x4fe   : > { %3590 = vrot.lane.b32.xlu1 %v7099_v47, %s7586_s19  ;;  %4096 = vrot.lane.b32.xlu0 %v7066_v31, %s7590_s23  ;;  %v7162_v31 = vld [vmem:[%s7637_s17 + $0x150] sm:$0xff] }
 0x500   : > { %v10284_v42 = vpop.permute.xlu1 %3448  ;;  %v10286_v22 = vpop.permute.xlu0 %4336 }
 0x501   : > { %14126 = vst [vmem:[#allocation457_spill] sm:$0xff] %v10284_v42  ;;  %14127 = vst [vmem:[#allocation458_spill] sm:$0xff] %v10286_v22 }
 0x502   : > { %4098 = vrot.lane.b32.xlu1 %v7067_v49, %s7590_s23  ;;  %3716 = vrot.lane.b32.xlu0 %v7130_v36, %s7587_s20  ;;  %v7068_v49 = vld [vmem:[%s7637_s17 + $0x152] sm:$0xff] }
 0x504   : > { %v10291_v58 = vpop.permute.xlu1 %3956  ;;  %v10293_v34 = vpop.permute.xlu0 %3830 }
 0x505   : > { %14128 = vst [vmem:[#allocation459_spill] sm:$0xff] %v10291_v58  ;;  %14129 = vst [vmem:[#allocation460_spill] sm:$0xff] %v10293_v34  ;;  %v7163_v58 = vld [vmem:[%s7637_s17 + $0x158] sm:$0xff] }
 0x506   : > { %3718 = vrot.lane.b32.xlu1 %v7131_v7, %s7587_s20  ;;  %4224 = vrot.lane.b32.xlu0 %v7098_v61, %s7591_s24  ;;  %v7194_v61 = vld [vmem:[%s7637_s17 + $0x151] sm:$0xff] }
 0x508   : > { %v10298_v42 = vpop.permute.xlu1 %3450  ;;  %v10300_v22 = vpop.permute.xlu0 %4338 }
 0x509   : > { %14130 = vst [vmem:[#allocation461_spill] sm:$0xff] %v10298_v42  ;;  %14131 = vst [vmem:[#allocation462_spill] sm:$0xff] %v10300_v22 }
 0x50a   : > { %4226 = vrot.lane.b32.xlu1 %v7099_v47, %s7591_s24  ;;  %3844 = vrot.lane.b32.xlu0 %v7162_v31, %s7588_s21  ;;  %v7069_v47 = vld [vmem:[%s7637_s17 + $0x15a] sm:$0xff] }
 0x50c   : > { %v10305_v10 = vpop.permute.xlu1 %3958  ;;  %v10307_v34 = vpop.permute.xlu0 %3576 }
 0x50d   : > { %14132 = vst [vmem:[#allocation463_spill] sm:$0xff] %v10305_v10  ;;  %14133 = vst [vmem:[#allocation464_spill] sm:$0xff] %v10307_v34  ;;  %v7100_v34 = vld [vmem:[%s7637_s17 + $0x153] sm:$0xff] }
 0x50e   : > { %3464 = vrot.lane.b32.xlu1 %v7068_v49, %s7585_s18  ;;  %4352 = vrot.lane.b32.xlu0 %v7130_v36, %s7592_s25  ;;  %v7195_v36 = vld [vmem:[%s7637_s17 + $0x159] sm:$0xff] }
 0x510   : > { %v10313_v42 = vpop.permute.xlu1 %3578  ;;  %v10315_v22 = vpop.permute.xlu0 %4084 }
 0x511   : > { %14134 = vst [vmem:[#allocation465_spill] sm:$0xff] %v10313_v42  ;;  %14135 = vst [vmem:[#allocation466_spill] sm:$0xff] %v10315_v22 }
 0x512   : > { %3972 = vrot.lane.b32.xlu1 %v7194_v61, %s7589_s22  ;;  %3846 = vrot.lane.b32.xlu0 %v7163_v58, %s7588_s21  ;;  %v7101_v58 = vld [vmem:[%s7637_s17 + $0x15b] sm:$0xff] }
 0x514   : > { %v10320_v31 = vpop.permute.xlu1 %4086  ;;  %v10322_v10 = vpop.permute.xlu0 %3704 }
 0x515   : > { %14136 = vst [vmem:[#allocation467_spill] sm:$0xff] %v10320_v31  ;;  %14137 = vst [vmem:[#allocation468_spill] sm:$0xff] %v10322_v10 }
 0x516   : > { %3466 = vrot.lane.b32.xlu1 %v7069_v47, %s7585_s18  ;;  %4354 = vrot.lane.b32.xlu0 %v7131_v7, %s7592_s25  ;;  %v7132_v7 = vld [vmem:[%s7637_s17 + $0x154] sm:$0xff] }
 0x518   : > { %v10328_v42 = vpop.permute.xlu1 %3706  ;;  %v10330_v22 = vpop.permute.xlu0 %4212 }
 0x519   : > { %14138 = vst [vmem:[#allocation469_spill] sm:$0xff] %v10328_v42  ;;  %14139 = vst [vmem:[#allocation470_spill] sm:$0xff] %v10330_v22 }
 0x51a   : > { %3974 = vrot.lane.b32.xlu1 %v7195_v36, %s7589_s22  ;;  %3592 = vrot.lane.b32.xlu0 %v7100_v34, %s7586_s19  ;;  %v7133_v36 = vld [vmem:[%s7637_s17 + $0x15c] sm:$0xff] }
 0x51c   : > { %v10335_v61 = vpop.permute.xlu1 %4214  ;;  %v10337_v31 = vpop.permute.xlu0 %3832 }
 0x51d   : > { %14140 = vst [vmem:[#allocation471_spill] sm:$0xff] %v10335_v61  ;;  %14141 = vst [vmem:[#allocation472_spill] sm:$0xff] %v10337_v31 }
 0x51e   : > { %3594 = vrot.lane.b32.xlu1 %v7101_v58, %s7586_s19  ;;  %4100 = vrot.lane.b32.xlu0 %v7068_v49, %s7590_s23  ;;  %v7164_v49 = vld [vmem:[%s7637_s17 + $0x168] sm:$0xff] }
 0x520   : > { %v10342_v10 = vpop.permute.xlu1 %3452  ;;  %v10344_v42 = vpop.permute.xlu0 %4340 }
 0x521   : > { %14142 = vst [vmem:[#allocation473_spill] sm:$0xff] %v10342_v10  ;;  %14143 = vst [vmem:[#allocation474_spill] sm:$0xff] %v10344_v42 }
 0x522   : > { %4102 = vrot.lane.b32.xlu1 %v7069_v47, %s7590_s23  ;;  %3720 = vrot.lane.b32.xlu0 %v7132_v7, %s7587_s20  ;;  %v7070_v47 = vld [vmem:[%s7637_s17 + $0x16a] sm:$0xff] }
 0x524   : > { %v10349_v61 = vpop.permute.xlu1 %3960  ;;  %v10351_v31 = vpop.permute.xlu0 %3834 }
 0x525   : > { %14144 = vst [vmem:[#allocation475_spill] sm:$0xff] %v10349_v61  ;;  %14145 = vst [vmem:[#allocation476_spill] sm:$0xff] %v10351_v31 }
 0x526   : > { %3722 = vrot.lane.b32.xlu1 %v7133_v36, %s7587_s20  ;;  %4228 = vrot.lane.b32.xlu0 %v7100_v34, %s7591_s24  ;;  %v10370_v34 = vld [vmem:[%s7637_s17 + $0x169] sm:$0xff] }
 0x527   : > { %14150 = vst [vmem:[#allocation481_spill] sm:$0xff] %v10370_v34 }
 0x528   : > { %v10356_v10 = vpop.permute.xlu1 %3454  ;;  %v10358_v42 = vpop.permute.xlu0 %4342 }
 0x529   : > { %14146 = vst [vmem:[#allocation477_spill] sm:$0xff] %v10356_v10  ;;  %14147 = vst [vmem:[#allocation478_spill] sm:$0xff] %v10358_v42  ;;  %v7165_v10 = vld [vmem:[%s7637_s17 + $0x170] sm:$0xff] }
 0x52a   : > { %4230 = vrot.lane.b32.xlu1 %v7101_v58, %s7591_s24  ;;  %3848 = vrot.lane.b32.xlu0 %v7164_v49, %s7588_s21  ;;  %v7071_v49 = vld [vmem:[%s7637_s17 + $0x172] sm:$0xff] }
 0x52c   : > { %v10363_v22 = vpop.permute.xlu1 %3962  ;;  %v10365_v31 = vpop.permute.xlu0 %3580 }
 0x52d   : > { %14148 = vst [vmem:[#allocation479_spill] sm:$0xff] %v10363_v22  ;;  %14149 = vst [vmem:[#allocation480_spill] sm:$0xff] %v10365_v31 }
 0x52e   : > { %3468 = vrot.lane.b32.xlu1 %v7070_v47, %s7585_s18  ;;  %4356 = vrot.lane.b32.xlu0 %v7132_v7, %s7592_s25  ;;  %v10388_v7 = vld [vmem:[%s7637_s17 + $0x171] sm:$0xff] }
 0x52f   : > { %14155 = vst [vmem:[#allocation486_spill] sm:$0xff] %v10388_v7 }
 0x530   : > { %v10373_v42 = vpop.permute.xlu1 %3582  ;;  %v10375_v58 = vpop.permute.xlu0 %4088 }
 0x531   : > { %14151 = vst [vmem:[#allocation482_spill] sm:$0xff] %v10373_v42  ;;  %14152 = vst [vmem:[#allocation483_spill] sm:$0xff] %v10375_v58  ;;  %v7102_v42 = vld [vmem:[%s7637_s17 + $0x16b] sm:$0xff] }
 0x532   : > { %3976 = vrot.lane.b32.xlu1 %v10370_v34, %s7589_s22  ;;  %3850 = vrot.lane.b32.xlu0 %v7165_v10, %s7588_s21  ;;  %v7103_v10 = vld [vmem:[%s7637_s17 + $0x173] sm:$0xff] }
 0x534   : > { %v10381_v22 = vpop.permute.xlu1 %4090  ;;  %v10383_v31 = vpop.permute.xlu0 %3708 }
 0x535   : > { %14153 = vst [vmem:[#allocation484_spill] sm:$0xff] %v10381_v22  ;;  %14154 = vst [vmem:[#allocation485_spill] sm:$0xff] %v10383_v31 }
 0x536   : > { %3470 = vrot.lane.b32.xlu1 %v7071_v49, %s7585_s18  ;;  %4358 = vrot.lane.b32.xlu0 %v7133_v36, %s7592_s25  ;;  %v7134_v36 = vld [vmem:[%s7637_s17 + $0x16c] sm:$0xff] }
 0x538   : > { %v10391_v58 = vpop.permute.xlu1 %3710  ;;  %v10393_v61 = vpop.permute.xlu0 %4216 }
 0x539   : > { %14156 = vst [vmem:[#allocation487_spill] sm:$0xff] %v10391_v58  ;;  %14157 = vst [vmem:[#allocation488_spill] sm:$0xff] %v10393_v61 }
 0x53a   : > { %3978 = vrot.lane.b32.xlu1 %v10388_v7, %s7589_s22  ;;  %3596 = vrot.lane.b32.xlu0 %v7102_v42, %s7586_s19  ;;  %v7135_v7 = vld [vmem:[%s7637_s17 + $0x174] sm:$0xff] }
 0x53c   : > { %v10399_v34 = vpop.permute.xlu1 %4218  ;;  %v10401_v22 = vpop.permute.xlu0 %3836 }
 0x53d   : > { %14158 = vst [vmem:[#allocation489_spill] sm:$0xff] %v10399_v34  ;;  %14159 = vst [vmem:[#allocation490_spill] sm:$0xff] %v10401_v22 }
 0x53e   : > { %3598 = vrot.lane.b32.xlu1 %v7103_v10, %s7586_s19  ;;  %4104 = vrot.lane.b32.xlu0 %v7070_v47, %s7590_s23  ;;  %v7166_v47 = vld [vmem:[%s7637_s17 + $0x180] sm:$0xff] }
 0x540   : > { %v10406_v58 = vpop.permute.xlu1 %3456  ;;  %v10408_v61 = vpop.permute.xlu0 %4344 }
 0x541   : > { %14160 = vst [vmem:[#allocation491_spill] sm:$0xff] %v10406_v58  ;;  %14161 = vst [vmem:[#allocation492_spill] sm:$0xff] %v10408_v61 }
 0x542   : > { %4106 = vrot.lane.b32.xlu1 %v7071_v49, %s7590_s23  ;;  %3724 = vrot.lane.b32.xlu0 %v7134_v36, %s7587_s20  ;;  %v7072_v49 = vld [vmem:[%s7637_s17 + $0x182] sm:$0xff] }
 0x544   : > { %v10413_v34 = vpop.permute.xlu1 %3964  ;;  %v10415_v22 = vpop.permute.xlu0 %3838 }
 0x545   : > { %14162 = vst [vmem:[#allocation493_spill] sm:$0xff] %v10413_v34  ;;  %14163 = vst [vmem:[#allocation494_spill] sm:$0xff] %v10415_v22  ;;  %v7167_v34 = vld [vmem:[%s7637_s17 + $0x188] sm:$0xff] }
 0x546   : > { %3726 = vrot.lane.b32.xlu1 %v7135_v7, %s7587_s20  ;;  %4232 = vrot.lane.b32.xlu0 %v7102_v42, %s7591_s24  ;;  %v7198_v42 = vld [vmem:[%s7637_s17 + $0x181] sm:$0xff] }
 0x548   : > { %v10420_v58 = vpop.permute.xlu1 %3458  ;;  %v10422_v61 = vpop.permute.xlu0 %4346 }
 0x549   : > { %14164 = vst [vmem:[#allocation495_spill] sm:$0xff] %v10420_v58  ;;  %14165 = vst [vmem:[#allocation496_spill] sm:$0xff] %v10422_v61 }
 0x54a   : > { %4234 = vrot.lane.b32.xlu1 %v7103_v10, %s7591_s24  ;;  %3852 = vrot.lane.b32.xlu0 %v7166_v47, %s7588_s21  ;;  %v7073_v10 = vld [vmem:[%s7637_s17 + $0x18a] sm:$0xff] }
 0x54c   : > { %v10427_v31 = vpop.permute.xlu1 %3966  ;;  %v10429_v22 = vpop.permute.xlu0 %3584 }
 0x54d   : > { %14166 = vst [vmem:[#allocation497_spill] sm:$0xff] %v10427_v31  ;;  %14167 = vst [vmem:[#allocation498_spill] sm:$0xff] %v10429_v22  ;;  %v7104_v22 = vld [vmem:[%s7637_s17 + $0x183] sm:$0xff] }
 0x54e   : > { %3472 = vrot.lane.b32.xlu1 %v7072_v49, %s7585_s18  ;;  %4360 = vrot.lane.b32.xlu0 %v7134_v36, %s7592_s25  ;;  %v7199_v36 = vld [vmem:[%s7637_s17 + $0x189] sm:$0xff] }
 0x550   : > { %v10435_v58 = vpop.permute.xlu1 %3586  ;;  %v10437_v61 = vpop.permute.xlu0 %4092 }
 0x551   : > { %14168 = vst [vmem:[#allocation499_spill] sm:$0xff] %v10435_v58  ;;  %14169 = vst [vmem:[#allocation500_spill] sm:$0xff] %v10437_v61 }
 0x552   : > { %3980 = vrot.lane.b32.xlu1 %v7198_v42, %s7589_s22  ;;  %3854 = vrot.lane.b32.xlu0 %v7167_v34, %s7588_s21  ;;  %v7105_v34 = vld [vmem:[%s7637_s17 + $0x18b] sm:$0xff] }
 0x554   : > { %v10442_v47 = vpop.permute.xlu1 %4094  ;;  %v10444_v31 = vpop.permute.xlu0 %3712 }
 0x555   : > { %14170 = vst [vmem:[#allocation501_spill] sm:$0xff] %v10442_v47  ;;  %14171 = vst [vmem:[#allocation502_spill] sm:$0xff] %v10444_v31 }
 0x556   : > { %3474 = vrot.lane.b32.xlu1 %v7073_v10, %s7585_s18  ;;  %4362 = vrot.lane.b32.xlu0 %v7135_v7, %s7592_s25  ;;  %v7136_v7 = vld [vmem:[%s7637_s17 + $0x184] sm:$0xff] }
 0x558   : > { %v10450_v58 = vpop.permute.xlu1 %3714  ;;  %v10452_v61 = vpop.permute.xlu0 %4220 }
 0x559   : > { %14172 = vst [vmem:[#allocation503_spill] sm:$0xff] %v10450_v58  ;;  %14173 = vst [vmem:[#allocation504_spill] sm:$0xff] %v10452_v61 }
 0x55a   : > { %3982 = vrot.lane.b32.xlu1 %v7199_v36, %s7589_s22  ;;  %3600 = vrot.lane.b32.xlu0 %v7104_v22, %s7586_s19  ;;  %v7137_v36 = vld [vmem:[%s7637_s17 + $0x18c] sm:$0xff] }
 0x55c   : > { %v10457_v42 = vpop.permute.xlu1 %4222  ;;  %v10459_v47 = vpop.permute.xlu0 %3840 }
 0x55d   : > { %14174 = vst [vmem:[#allocation505_spill] sm:$0xff] %v10457_v42  ;;  %14175 = vst [vmem:[#allocation506_spill] sm:$0xff] %v10459_v47 }
 0x55e   : > { %3602 = vrot.lane.b32.xlu1 %v7105_v34, %s7586_s19  ;;  %4108 = vrot.lane.b32.xlu0 %v7072_v49, %s7590_s23  ;;  %v7168_v49 = vld [vmem:[%s7637_s17 + $0x198] sm:$0xff] }
 0x560   : > { %v10464_v31 = vpop.permute.xlu1 %3460  ;;  %v10466_v58 = vpop.permute.xlu0 %4348 }
 0x561   : > { %14176 = vst [vmem:[#allocation507_spill] sm:$0xff] %v10464_v31  ;;  %14177 = vst [vmem:[#allocation508_spill] sm:$0xff] %v10466_v58 }
 0x562   : > { %4110 = vrot.lane.b32.xlu1 %v7073_v10, %s7590_s23  ;;  %3728 = vrot.lane.b32.xlu0 %v7136_v7, %s7587_s20  ;;  %v7074_v10 = vld [vmem:[%s7637_s17 + $0x19a] sm:$0xff] }
 0x564   : > { %v10471_v42 = vpop.permute.xlu1 %3968  ;;  %v10473_v47 = vpop.permute.xlu0 %3842 }
 0x565   : > { %14178 = vst [vmem:[#allocation509_spill] sm:$0xff] %v10471_v42  ;;  %14179 = vst [vmem:[#allocation510_spill] sm:$0xff] %v10473_v47  ;;  %v7169_v42 = vld [vmem:[%s7637_s17 + $0x1a0] sm:$0xff] }
 0x566   : > { %3730 = vrot.lane.b32.xlu1 %v7137_v36, %s7587_s20  ;;  %4236 = vrot.lane.b32.xlu0 %v7104_v22, %s7591_s24  ;;  %v7200_v22 = vld [vmem:[%s7637_s17 + $0x199] sm:$0xff] }
 0x568   : > { %v10478_v31 = vpop.permute.xlu1 %3462  ;;  %v10480_v58 = vpop.permute.xlu0 %4350 }
 0x569   : > { %14180 = vst [vmem:[#allocation511_spill] sm:$0xff] %v10478_v31  ;;  %14181 = vst [vmem:[#allocation512_spill] sm:$0xff] %v10480_v58 }
 0x56a   : > { %4238 = vrot.lane.b32.xlu1 %v7105_v34, %s7591_s24  ;;  %3856 = vrot.lane.b32.xlu0 %v7168_v49, %s7588_s21  ;;  %v7075_v34 = vld [vmem:[%s7637_s17 + $0x1a2] sm:$0xff] }
 0x56c   : > { %v10485_v61 = vpop.permute.xlu1 %3970  ;;  %v10487_v47 = vpop.permute.xlu0 %3588 }
 0x56d   : > { %14182 = vst [vmem:[#allocation513_spill] sm:$0xff] %v10485_v61  ;;  %14183 = vst [vmem:[#allocation514_spill] sm:$0xff] %v10487_v47  ;;  %v7106_v47 = vld [vmem:[%s7637_s17 + $0x19b] sm:$0xff] }
 0x56e   : > { %3476 = vrot.lane.b32.xlu1 %v7074_v10, %s7585_s18  ;;  %4364 = vrot.lane.b32.xlu0 %v7136_v7, %s7592_s25  ;;  %v7201_v7 = vld [vmem:[%s7637_s17 + $0x1a1] sm:$0xff] }
 0x570   : > { %v10493_v31 = vpop.permute.xlu1 %3590  ;;  %v10495_v58 = vpop.permute.xlu0 %4096 }
 0x571   : > { %14184 = vst [vmem:[#allocation515_spill] sm:$0xff] %v10493_v31  ;;  %14185 = vst [vmem:[#allocation516_spill] sm:$0xff] %v10495_v58 }
 0x572   : > { %3984 = vrot.lane.b32.xlu1 %v7200_v22, %s7589_s22  ;;  %3858 = vrot.lane.b32.xlu0 %v7169_v42, %s7588_s21  ;;  %v7107_v42 = vld [vmem:[%s7637_s17 + $0x1a3] sm:$0xff] }
 0x574   : > { %v10500_v49 = vpop.permute.xlu1 %4098  ;;  %v10502_v61 = vpop.permute.xlu0 %3716 }
 0x575   : > { %14186 = vst [vmem:[#allocation517_spill] sm:$0xff] %v10500_v49  ;;  %14187 = vst [vmem:[#allocation518_spill] sm:$0xff] %v10502_v61 }
 0x576   : > { %3478 = vrot.lane.b32.xlu1 %v7075_v34, %s7585_s18  ;;  %4366 = vrot.lane.b32.xlu0 %v7137_v36, %s7592_s25  ;;  %v7138_v36 = vld [vmem:[%s7637_s17 + $0x19c] sm:$0xff] }
 0x578   : > { %v10508_v31 = vpop.permute.xlu1 %3718  ;;  %v10510_v58 = vpop.permute.xlu0 %4224 }
 0x579   : > { %14188 = vst [vmem:[#allocation519_spill] sm:$0xff] %v10508_v31  ;;  %14189 = vst [vmem:[#allocation520_spill] sm:$0xff] %v10510_v58 }
 0x57a   : > { %3986 = vrot.lane.b32.xlu1 %v7201_v7, %s7589_s22  ;;  %3604 = vrot.lane.b32.xlu0 %v7106_v47, %s7586_s19  ;;  %v7139_v7 = vld [vmem:[%s7637_s17 + $0x1a4] sm:$0xff] }
 0x57c   : > { %v10515_v22 = vpop.permute.xlu1 %4226  ;;  %v10517_v49 = vpop.permute.xlu0 %3844 }
 0x57d   : > { %14190 = vst [vmem:[#allocation521_spill] sm:$0xff] %v10515_v22  ;;  %14191 = vst [vmem:[#allocation522_spill] sm:$0xff] %v10517_v49 }
 0x57e   : > { %3606 = vrot.lane.b32.xlu1 %v7107_v42, %s7586_s19  ;;  %4112 = vrot.lane.b32.xlu0 %v7074_v10, %s7590_s23  ;;  %v7170_v10 = vld [vmem:[%s7637_s17 + $0x1b0] sm:$0xff] }
 0x580   : > { %v10522_v61 = vpop.permute.xlu1 %3464  ;;  %v10524_v31 = vpop.permute.xlu0 %4352 }
 0x581   : > { %14192 = vst [vmem:[#allocation523_spill] sm:$0xff] %v10522_v61  ;;  %14193 = vst [vmem:[#allocation524_spill] sm:$0xff] %v10524_v31 }
 0x582   : > { %4114 = vrot.lane.b32.xlu1 %v7075_v34, %s7590_s23  ;;  %3732 = vrot.lane.b32.xlu0 %v7138_v36, %s7587_s20  ;;  %v7076_v34 = vld [vmem:[%s7637_s17 + $0x1b2] sm:$0xff] }
 0x584   : > { %v10529_v22 = vpop.permute.xlu1 %3972  ;;  %v10531_v49 = vpop.permute.xlu0 %3846 }
 0x585   : > { %14194 = vst [vmem:[#allocation525_spill] sm:$0xff] %v10529_v22  ;;  %14195 = vst [vmem:[#allocation526_spill] sm:$0xff] %v10531_v49  ;;  %v7171_v22 = vld [vmem:[%s7637_s17 + $0x1b8] sm:$0xff] }
 0x586   : > { %3734 = vrot.lane.b32.xlu1 %v7139_v7, %s7587_s20  ;;  %4240 = vrot.lane.b32.xlu0 %v7106_v47, %s7591_s24  ;;  %v7202_v47 = vld [vmem:[%s7637_s17 + $0x1b1] sm:$0xff] }
 0x588   : > { %v10536_v61 = vpop.permute.xlu1 %3466  ;;  %v10538_v31 = vpop.permute.xlu0 %4354 }
 0x589   : > { %14196 = vst [vmem:[#allocation527_spill] sm:$0xff] %v10536_v61  ;;  %14197 = vst [vmem:[#allocation528_spill] sm:$0xff] %v10538_v31 }
 0x58a   : > { %4242 = vrot.lane.b32.xlu1 %v7107_v42, %s7591_s24  ;;  %3860 = vrot.lane.b32.xlu0 %v7170_v10, %s7588_s21  ;;  %v7077_v42 = vld [vmem:[%s7637_s17 + $0x1ba] sm:$0xff] }
 0x58c   : > { %v10543_v58 = vpop.permute.xlu1 %3974  ;;  %v10545_v49 = vpop.permute.xlu0 %3592 }
 0x58d   : > { %14198 = vst [vmem:[#allocation529_spill] sm:$0xff] %v10543_v58  ;;  %14199 = vst [vmem:[#allocation530_spill] sm:$0xff] %v10545_v49  ;;  %v7108_v49 = vld [vmem:[%s7637_s17 + $0x1b3] sm:$0xff] }
 0x58e   : > { %3480 = vrot.lane.b32.xlu1 %v7076_v34, %s7585_s18  ;;  %4368 = vrot.lane.b32.xlu0 %v7138_v36, %s7592_s25  ;;  %v7203_v36 = vld [vmem:[%s7637_s17 + $0x1b9] sm:$0xff] }
 0x590   : > { %v10551_v61 = vpop.permute.xlu1 %3594  ;;  %v10553_v31 = vpop.permute.xlu0 %4100 }
 0x591   : > { %14200 = vst [vmem:[#allocation531_spill] sm:$0xff] %v10551_v61  ;;  %14201 = vst [vmem:[#allocation532_spill] sm:$0xff] %v10553_v31  ;;  %v7518_v31 = vld [vmem:[%s7637_s17 + $0x18] sm:$0xff] }
 0x592   : > { %3988 = vrot.lane.b32.xlu1 %v7202_v47, %s7589_s22  ;;  %3862 = vrot.lane.b32.xlu0 %v7171_v22, %s7588_s21  ;;  %v4841_v22 = vld [vmem:[%s13592_s1 + $0x60] sm:$0xf] }
 0x593   : > { %v7109_v47 = vld [vmem:[%s7637_s17 + $0x1bb] sm:$0xff]  ;;  %7383 = vmatprep.subr.msk.mxu0 %vm4946_vm13, %v4841_v22  ;;  %7457 = vmatprep.subr.msk.mxu1 %vm4946_vm13, %v4841_v22 }
 0x594   : > { %v10558_v10 = vpop.permute.xlu1 %4102  ;;  %v10560_v58 = vpop.permute.xlu0 %3720  ;;  %7384 = vmatpush3.msk.msra.mxu0 %vm4946_vm13, %v4841_v22  ;;  %7470 = vmatpush3.msk.msra.mxu1 %vm4946_vm13, %v4841_v22  ;;  %v4838_v22 = vld [vmem:[%s13592_s1 + $0x48] sm:$0xff]  ;;  %vm4796_vm13 = vcmask 523264  }
 0x595   : > { %14202 = vst [vmem:[#allocation533_spill] sm:$0xff] %v10558_v10  ;;  %14203 = vst [vmem:[#allocation534_spill] sm:$0xff] %v10560_v58 }
 0x596   : > { %3482 = vrot.lane.b32.xlu1 %v7077_v42, %s7585_s18  ;;  %4370 = vrot.lane.b32.xlu0 %v7139_v7, %s7592_s25 }
 0x598   : > { %v10566_v24 = vpop.permute.xlu1 %3722  ;;  %v10568_v61 = vpop.permute.xlu0 %4228 }
 0x599   : > { %14204 = vst [vmem:[#allocation535_spill] sm:$0xff] %v10566_v24  ;;  %14205 = vst [vmem:[#allocation536_spill] sm:$0xff] %v10568_v61  ;;  %v4840_v24 = vld [vmem:[%s13592_s1 + $0x58] sm:$0xff] }
 0x59a   : > { %3990 = vrot.lane.b32.xlu1 %v7203_v36, %s7589_s22  ;;  %3608 = vrot.lane.b32.xlu0 %v7108_v49, %s7586_s19  ;;  %v4839_v36 = vld [vmem:[%s13592_s1 + $0x50] sm:$0xff] }
 0x59b   : > { %v7140_v61 = vld [vmem:[%s7637_s17 + $0x1b4] sm:$0xff]  ;;  %7385 = vmatprep.subr.mxu0 %v4840_v24  ;;  %7458 = vmatprep.subr.mxu1 %v4840_v24 }
 0x59c   : > { %v10576_v7 = vpop.permute.xlu1 %4230  ;;  %v10578_v10 = vpop.permute.xlu0 %3848  ;;  %7386 = vmatpush3.msra.mxu0 %v4840_v24  ;;  %7471 = vmatpush3.msra.mxu1 %v4840_v24  ;;  %v4837_v24 = vld [vmem:[%s13592_s1 + $0x40] sm:$0xff] }
 0x59d   : > { %14206 = vst [vmem:[#allocation537_spill] sm:$0xff] %v10576_v7  ;;  %14207 = vst [vmem:[#allocation538_spill] sm:$0xff] %v10578_v10  ;;  %7387 = vmatprep.subr.mxu0 %v4839_v36  ;;  %7459 = vmatprep.subr.mxu1 %v4839_v36 }
 0x59e   : > { %3610 = vrot.lane.b32.xlu1 %v7109_v47, %s7586_s19  ;;  %4116 = vrot.lane.b32.xlu0 %v7076_v34, %s7590_s23  ;;  %v7141_v34 = vld [vmem:[%s7637_s17 + $0x1bc] sm:$0xff] }
 0x59f   : > { %7388 = vmatpush3.msra.mxu0 %v4839_v36  ;;  %7472 = vmatpush3.msra.mxu1 %v4839_v36  ;;  %v7172_v36 = vld [vmem:[%s7637_s17 + $0x1c8] sm:$0xff] }
 0x5a0   : > { %v10589_v7 = vpop.permute.xlu1 %3468  ;;  %v10591_v10 = vpop.permute.xlu0 %4356  ;;  %7389 = vmatprep.subr.mxu0 %v4838_v22  ;;  %7460 = vmatprep.subr.mxu1 %v4838_v22 }
 0x5a1   : > { %14208 = vst [vmem:[#allocation539_spill] sm:$0xff] %v10589_v7  ;;  %14209 = vst [vmem:[#allocation540_spill] sm:$0xff] %v10591_v10  ;;  %7390 = vmatpush3.msra.mxu0 %v4838_v22  ;;  %7473 = vmatpush3.msra.mxu1 %v4838_v22  ;;  %v4835_v22 = vld [vmem:[%s13592_s1 + $0x30] sm:$0xff] }
 0x5a2   : > { %4118 = vrot.lane.b32.xlu1 %v7077_v42, %s7590_s23  ;;  %3736 = vrot.lane.b32.xlu0 %v7140_v61, %s7587_s20  ;;  %v4836_v42 = vld [vmem:[%s13592_s1 + $0x38] sm:$0xff] }
 0x5a3   : > { %7391 = vmatprep.subr.mxu0 %v4837_v24  ;;  %7461 = vmatprep.subr.mxu1 %v4837_v24  ;;  %v7237_v10 = vld [vmem:[%s7637_s17 + $0x1d2] sm:$0xff] }
 0x5a4   : > { %v10599_v58 = vpop.permute.xlu1 %3976  ;;  %v10601_v7 = vpop.permute.xlu0 %3850  ;;  %7392 = vmatpush3.msra.mxu0 %v4837_v24  ;;  %7474 = vmatpush3.msra.mxu1 %v4837_v24  ;;  %v4834_v24 = vld [vmem:[%s13592_s1 + $0x28] sm:$0xff] }
 0x5a5   : > { %14210 = vst [vmem:[#allocation541_spill] sm:$0xff] %v10599_v58  ;;  %14211 = vst [vmem:[#allocation542_spill] sm:$0xff] %v10601_v7  ;;  %7393 = vmatprep.subr.mxu0 %v4836_v42  ;;  %7462 = vmatprep.subr.mxu1 %v4836_v42 }
 0x5a6   : > { %3738 = vrot.lane.b32.xlu1 %v7141_v34, %s7587_s20  ;;  %4244 = vrot.lane.b32.xlu0 %v7108_v49, %s7591_s24  ;;  %v7173_v49 = vld [vmem:[%s7637_s17 + $0x1d0] sm:$0xff] }
 0x5a7   : > { %7394 = vmatpush3.msra.mxu0 %v4836_v42  ;;  %7475 = vmatpush3.msra.mxu1 %v4836_v42  ;;  %v7014_v42 = vld [vmem:[%s7637_s17 + $0x49] sm:$0xff] }
 0x5a8   : > { %v10612_v7 = vpop.permute.xlu1 %3470  ;;  %v10614_v58 = vpop.permute.xlu0 %4358  ;;  %7395 = vmatprep.subr.mxu0 %v4835_v22  ;;  %7463 = vmatprep.subr.mxu1 %v4835_v22 }
 0x5a9   : > { %14212 = vst [vmem:[#allocation543_spill] sm:$0xff] %v10612_v7  ;;  %14213 = vst [vmem:[#allocation544_spill] sm:$0xff] %v10614_v58  ;;  %7396 = vmatpush3.msra.mxu0 %v4835_v22  ;;  %7476 = vmatpush3.msra.mxu1 %v4835_v22  ;;  %v4412_v22 = vsel %vm2893_vm0, %v7014_v42, %v9910_v12  ;;  %v4831_v12 = vld [vmem:[%s13592_s1 + $0x10] sm:$0xff] }
 0x5aa   : > { %4246 = vrot.lane.b32.xlu1 %v7109_v47, %s7591_s24  ;;  %3864 = vrot.lane.b32.xlu0 %v7172_v36, %s7588_s21  ;;  %v4833_v47 = vld [vmem:[%s13592_s1 + $0x20] sm:$0xff]  ;;  %v7204_v36 = vld [vmem:[%s7637_s17 + $0x1c9] sm:$0xff]  ;;  %v4444_v42 = vsel %vm2926_vm1, %v4412_v22, %v9919_v0 }
 0x5ab   : > { %7397 = vmatprep.subr.mxu0 %v4834_v24  ;;  %7464 = vmatprep.subr.mxu1 %v4834_v24  ;;  %v14220_v0 = vld [vmem:[#allocation2_spill] sm:$0xff]  ;;  %v14221_v22 = vld [vmem:[#allocation3_spill] sm:$0xff] }
 0x5ac   : > { %v10622_v7 = vpop.permute.xlu1 %3978  ;;  %v10624_v58 = vpop.permute.xlu0 %3596  ;;  %7398 = vmatpush3.msra.mxu0 %v4834_v24  ;;  %7477 = vmatpush3.msra.mxu1 %v4834_v24 }
 0x5ad   : > { %14214 = vst [vmem:[#allocation545_spill] sm:$0xff] %v10622_v7  ;;  %14215 = vst [vmem:[#allocation546_spill] sm:$0xff] %v10624_v58  ;;  %7399 = vmatprep.subr.mxu0 %v4833_v47  ;;  %7465 = vmatprep.subr.mxu1 %v4833_v47 }
 0x5ae   : > { %3866 = vrot.lane.b32.xlu1 %v7173_v49, %s7588_s21  ;;  %4372 = vrot.lane.b32.xlu0 %v7140_v61, %s7592_s25  ;;  %v4832_v61 = vld [vmem:[%s13592_s1 + $0x18] sm:$0xff]  ;;  %v7236_v49 = vld [vmem:[%s7637_s17 + $0x1ca] sm:$0xff] }
 0x5af   : > { %7400 = vmatpush3.msra.mxu0 %v4833_v47  ;;  %7478 = vmatpush3.msra.mxu1 %v4833_v47  ;;  %v4830_v47 = vld [vmem:[%s13592_s1 + $0x8] sm:$0xff] }
 0x5b0   : > { %v10636_v58 = vpop.permute.xlu1 %3598  ;;  %v10638_v7 = vpop.permute.xlu0 %4104  ;;  %7401 = vmatprep.subr.mxu0 %v4832_v61  ;;  %7466 = vmatprep.subr.mxu1 %v4832_v61 }
 0x5b1   : > { %14216 = vst [vmem:[#allocation547_spill] sm:$0xff] %v10636_v58  ;;  %14217 = vst [vmem:[#allocation548_spill] sm:$0xff] %v10638_v7  ;;  %v7205_v58 = vld [vmem:[%s7637_s17 + $0x1d1] sm:$0xff]  ;;  %7402 = vmatpush3.msra.mxu0 %v4832_v61  ;;  %7479 = vmatpush3.msra.mxu1 %v4832_v61  ;;  %v10671_v61 = vsel %vm2893_vm0, %v7518_v31, %v14220_v0  ;;  %v14224_v0 = vld [vmem:[#allocation6_spill] sm:$0xff] }
 0x5b2   : > { %4374 = vrot.lane.b32.xlu1 %v7141_v34, %s7592_s25  ;;  %3992 = vrot.lane.b32.xlu0 %v7204_v36, %s7589_s22  ;;  %v169_v34 = vld [vmem:[%s7637_s17] sm:$0xff]  ;;  %v170_v36 = vld [vmem:[%s7637_s17 + $0x8] sm:$0xff]  ;;  %v14223_v31 = vld [vmem:[#allocation5_spill] sm:$0xff] }
 0x5b3   : > { %7403 = vmatprep.subr.mxu0 %v4831_v12  ;;  %7467 = vmatprep.subr.mxu1 %v4831_v12 }
 0x5b4   : > { %v10649_v24 = vpop.permute.xlu1 %4106  ;;  %v10651_v7 = vpop.permute.xlu0 %3724  ;;  %7404 = vmatpush3.msra.mxu0 %v4831_v12  ;;  %7480 = vmatpush3.msra.mxu1 %v4831_v12  ;;  %v7520_v12 = vld [vmem:[%s7637_s17 + $0x38] sm:$0xff] }
 0x5b5   : > { %14218 = vst [vmem:[#allocation549_spill] sm:$0xff] %v10649_v24  ;;  %14219 = vst [vmem:[#allocation550_spill] sm:$0xff] %v10651_v7  ;;  %v7015_v7 = vld [vmem:[%s7637_s17 + $0x51] sm:$0xff]  ;;  %7405 = vmatprep.subr.mxu0 %v4830_v47  ;;  %7468 = vmatprep.subr.mxu1 %v4830_v47  ;;  %v10700_v14 = vsel %vm2893_vm0, %v7520_v12, %v14224_v0 }
 0x5b6   : > { %4120 = vrot.lane.b32.xlu1 %v7236_v49, %s7590_s23  ;;  %3994 = vrot.lane.b32.xlu0 %v7205_v58, %s7589_s22  ;;  %v7268_v24 = vld [vmem:[%s7637_s17 + $0x1cb] sm:$0xff]  ;;  %v10675_v49 = vsel %vm2893_vm0, %v169_v34, %v14221_v22  ;;  %v4476_v58 = vsel %vm2959_vm2, %v4444_v42, %v9926_v43  ;;  %v10690_v34 = vsel %vm2893_vm0, %v170_v36, %v14223_v31  ;;  %v4829_v42 = vld [vmem:[%s13592_s1] sm:$0xff] }
 0x5b7   : > { %v4508_v43 = vsel %vm2992_vm3, %v4476_v58, %v9932_v28  ;;  %v4413_v37 = vsel %vm2893_vm0, %v7015_v7, %v9921_v46  ;;  %v7521_v28 = vld [vmem:[%s7637_s17 + $0x30] sm:$0xff]  ;;  %v14225_v22 = vld [vmem:[#allocation7_spill] sm:$0xff]  ;;  %7406 = vmatpush3.msra.mxu0 %v4830_v47  ;;  %7481 = vmatpush3.msra.mxu1 %v4830_v47 }
 0x5b8   : > { %v10679_v44 = vpop.permute.xlu1 %3726  ;;  %v10681_v26 = vpop.permute.xlu0 %4232  ;;  %v4540_v36 = vsel %vm3025_vm4, %v4508_v43, %v9948_v21  ;;  %v10711_v58 = vsel %vm2893_vm0, %v7521_v28, %v14225_v22  ;;  %v4445_v31 = vsel %vm2926_vm1, %v4413_v37, %v9928_v2  ;;  %v7269_v46 = vld [vmem:[%s7637_s17 + $0x1d3] sm:$0xff]  ;;  %7407 = vmatprep.subr.mxu0 %v4829_v42  ;;  %7469 = vmatprep.subr.mxu1 %v4829_v42  ;;  %v7523_v47 = vld [vmem:[%s7637_s17 + $0x61] sm:$0xff] }
 0x5b9   : > { %v4572_v12 = vsel %vm3058_vm5, %v4540_v36, %v9964_v29  ;;  %v4477_v21 = vsel %vm2959_vm2, %v4445_v31, %v9934_v20  ;;  %v4414_v20 = vsel %vm2893_vm0, %v7523_v47, %v9941_v30  ;;  %7408 = vmatpush3.msra.mxu0 %v4829_v42  ;;  %7482 = vmatpush3.msra.mxu1 %v4829_v42  ;;  %v14226_v0 = vld [vmem:[#allocation8_spill] sm:$0xff]  ;;  %v7525_v28 = vld [vmem:[%s7637_s17 + $0x81] sm:$0xff]  ;;  %v14227_v31 = vld [vmem:[#allocation9_spill] sm:$0xff] }
 0x5ba   : > { %4248 = vrot.lane.b32.xlu1 %v7268_v24, %s7591_s24  ;;  %4122 = vrot.lane.b32.xlu0 %v7237_v10, %s7590_s23  ;;  %v7522_v10 = vld [vmem:[%s7637_s17 + $0x69] sm:$0xff]  ;;  %v4604_v24 = vsel %vm3091_vm6, %v4572_v12, %v9981_v3  ;;  %v4509_v29 = vsel %vm2992_vm3, %v4477_v21, %v9939_v56  ;;  %v4446_v36 = vsel %vm2926_vm1, %v4414_v20, %v9956_v59 }
 0x5bb   : > { %v4415_v7 = vsel %vm2893_vm0, %v7522_v10, %v9946_v9  ;;  %v4636_v9 = vsel %vm13613_vm7, %v4604_v24, %v9994_v19  ;;  %v7524_v3 = vld [vmem:[%s7637_s17 + $0x50] sm:$0xff]  ;;  %v4541_v56 = vsel %vm3025_vm4, %v4509_v29, %v9954_v35  ;;  %v4478_v42 = vsel %vm2959_vm2, %v4446_v36, %v9972_v40  ;;  %v7526_v22 = vld [vmem:[%s7637_s17 + $0x48] sm:$0xff] }
 0x5bc   : > { %v10725_v43 = vpop.permute.xlu1 %4234  ;;  %v10727_v2 = vpop.permute.xlu0 %3852  ;;  %v10739_v37 = vsel %vm2893_vm0, %v7524_v3, %v14226_v0  ;;  %v4447_v19 = vsel %vm2926_vm1, %v4415_v7, %v9962_v33  ;;  %v4573_v30 = vsel %vm3058_vm5, %v4541_v56, %v9970_v63  ;;  %v4417_v35 = vsel %vm2893_vm0, %v7525_v28, %v10006_v51  ;;  %v7300_v59 = vld [vmem:[%s7637_s17 + $0x1cc] sm:$0xff]  ;;  %v7527_v51 = vld [vmem:[%s7637_s17 + $0x79] sm:$0xff] }
 0x5bd   : > { %v10760_v12 = vsel %vm2893_vm0, %v7526_v22, %v14227_v31  ;;  %v4605_v33 = vsel %vm3091_vm6, %v4573_v30, %v9986_v52  ;;  %v4510_v63 = vsel %vm2992_vm3, %v4478_v42, %v9988_v32  ;;  %v4416_v10 = vsel %vm2893_vm0, %v7527_v51, %v9992_v8  ;;  %v14229_v0 = vld [vmem:[#allocation404_spill] sm:$0xff]  ;;  %v14230_v56 = vld [vmem:[#allocation405_spill] sm:$0xff]  ;;  %v14232_v30 = vld [vmem:[#allocation407_spill] sm:$0xff] }
 0x5be   : > { %4250 = vrot.lane.b32.xlu1 %v7269_v46, %s7591_s24  ;;  %4700 = vrot.lane.b32.xlu0 %v4636_v9, %s7600_s28  ;;  %v4479_v46 = vsel %vm2959_vm2, %v4447_v19, %v9979_v57  ;;  %v4542_v7 = vsel %vm3025_vm4, %v4510_v63, %v10000_v25  ;;  %v4637_v52 = vsel %vm13613_vm7, %v4605_v33, %v10008_v48  ;;  %v7529_v9 = vld [vmem:[%s7637_s17 + $0x91] sm:$0xff]  ;;  %v14236_v51 = vld [vmem:[#allocation410_spill] sm:$0xff] }
 0x5bf   : > { %v4511_v57 = vsel %vm2992_vm3, %v4479_v46, %v10002_v5  ;;  %v4448_v24 = vsel %vm2926_vm1, %v4416_v10, %v10017_v41  ;;  %v4449_v8 = vsel %vm2926_vm1, %v4417_v35, %v10022_v54  ;;  %v4574_v5 = vsel %vm3058_vm5, %v4542_v7, %v10024_v16  ;;  %v7301_v41 = vld [vmem:[%s7637_s17 + $0x1d4] sm:$0xff]  ;;  %v7531_v46 = vld [vmem:[%s7637_s17 + $0xa9] sm:$0xff] }
 0x5c0   : > { %v10768_v40 = vpop.permute.xlu1 %3472  ;;  %v10770_v21 = vpop.permute.xlu0 %4360  ;;  %v4543_v32 = vsel %vm3025_vm4, %v4511_v57, %v10015_v53  ;;  %v4480_v53 = vsel %vm2959_vm2, %v4448_v24, %v10032_v60  ;;  %v4481_v48 = vsel %vm2959_vm2, %v4449_v8, %v10038_v45  ;;  %v4606_v54 = vsel %vm3091_vm6, %v4574_v5, %v10040_v38  ;;  %v7528_v16 = vld [vmem:[%s7637_s17 + $0x99] sm:$0xff]  ;;  %v7530_v28 = vld [vmem:[%s7637_s17 + $0xb1] sm:$0xff]  ;;  %v14240_v5 = vld [vmem:[#allocation415_spill] sm:$0xff] }
 0x5c1   : > { %v4575_v25 = vsel %vm3058_vm5, %v4543_v32, %v10030_v50  ;;  %v4512_v47 = vsel %vm2992_vm3, %v4480_v53, %v10047_v62  ;;  %v4419_v50 = vsel %vm2893_vm0, %v7528_v16, %v10065_v1  ;;  %v4418_v45 = vsel %vm2893_vm0, %v7529_v9, %v10052_v15  ;;  %v14234_v22 = vld [vmem:[#allocation408_spill] sm:$0xff]  ;;  %v14235_v33 = vld [vmem:[#allocation409_spill] sm:$0xff]  ;;  %v14239_v24 = vld [vmem:[#allocation414_spill] sm:$0xff] }
 0x5c2   : > { %4702 = vrot.lane.b32.xlu1 %v4637_v52, %s7600_s28  ;;  %4376 = vrot.lane.b32.xlu0 %v7300_v59, %s7592_s25  ;;  %v4607_v29 = vsel %vm3091_vm6, %v4575_v25, %v10045_v13  ;;  %v4638_v38 = vsel %vm13613_vm7, %v4606_v54, %v10054_v11  ;;  %v4544_v13 = vsel %vm3025_vm4, %v4512_v47, %v10059_v27  ;;  %v14228_v11 = vld [vmem:[#allocation403_spill] sm:$0xff]  ;;  %v14237_v7 = vld [vmem:[#allocation412_spill] sm:$0xff] }
 0x5c3   : > { %v4513_v62 = vsel %vm2992_vm3, %v4481_v48, %v10061_v55  ;;  %v4639_v1 = vsel %vm13613_vm7, %v4607_v29, %v10067_v23  ;;  %v4450_v15 = vsel %vm2926_vm1, %v4418_v45, %v10075_v4  ;;  %v4451_v27 = vsel %vm2926_vm1, %v4419_v50, %v10080_v6  ;;  %v14231_v4 = vld [vmem:[#allocation406_spill] sm:$0xff]  ;;  %v14233_v6 = vld [vmem:[#allocation413_spill] sm:$0xff]  ;;  %v14238_v52 = vld [vmem:[#allocation411_spill] sm:$0xff] }
 0x5c4   : > { %v10807_v20 = vpop.permute.xlu1 %3980  ;;  %v10809_v60 = vpop.permute.xlu0 %3854  ;;  %v4545_v3 = vsel %vm3025_vm4, %v4513_v62, %v10073_v17  ;;  %v4576_v55 = vsel %vm3058_vm5, %v4544_v13, %v10082_v18  ;;  %v4482_v17 = vsel %vm2959_vm2, %v4450_v15, %v14229_v0  ;;  %v4483_v36 = vsel %vm2959_vm2, %v4451_v27, %v14230_v56  ;;  %v14241_v53 = vld [vmem:[#allocation416_spill] sm:$0xff]  ;;  %v14243_v29 = vld [vmem:[#allocation418_spill] sm:$0xff]  ;;  %v14244_v16 = vld [vmem:[#allocation419_spill] sm:$0xff] }
 0x5c5   : > { %v4577_v23 = vsel %vm3058_vm5, %v4545_v3, %v14228_v11  ;;  %v4608_v19 = vsel %vm3091_vm6, %v4576_v55, %v14231_v4  ;;  %v4421_v35 = vsel %vm2893_vm0, %v7530_v28, %v14233_v6  ;;  %v4514_v31 = vsel %vm2992_vm3, %v4482_v17, %v14234_v22  ;;  %v14245_v9 = vld [vmem:[#allocation420_spill] sm:$0xff]  ;;  %v14247_v62 = vld [vmem:[#allocation422_spill] sm:$0xff]  ;;  %v14248_v15 = vld [vmem:[#allocation429_spill] sm:$0xff] }
 0x5c6   : > { %4704 = vrot.lane.b32.xlu1 %v4638_v38, %s7600_s28  ;;  %4378 = vrot.lane.b32.xlu0 %v7301_v41, %s7592_s25  ;;  %v4609_v42 = vsel %vm3091_vm6, %v4577_v23, %v14232_v30  ;;  %v4420_v63 = vsel %vm2893_vm0, %v7531_v46, %v14235_v33  ;;  %v4640_v10 = vsel %vm13613_vm7, %v4608_v19, %v14236_v51  ;;  %v14242_v41 = vld [vmem:[#allocation417_spill] sm:$0xff]  ;;  %v7532_v3 = vld [vmem:[%s7637_s17 + $0xc9] sm:$0xff]  ;;  %v14252_v30 = vld [vmem:[#allocation426_spill] sm:$0xff] }
 0x5c7   : > { %v4515_v57 = vsel %vm2992_vm3, %v4483_v36, %v14237_v7  ;;  %v4546_v32 = vsel %vm3025_vm4, %v4514_v31, %v14238_v52  ;;  %v4641_v8 = vsel %vm13613_vm7, %v4609_v42, %v14239_v24  ;;  %v4452_v48 = vsel %vm2926_vm1, %v4420_v63, %v14241_v53  ;;  %v14246_v38 = vld [vmem:[#allocation421_spill] sm:$0xff]  ;;  %v14249_v23 = vld [vmem:[#allocation423_spill] sm:$0xff]  ;;  %v14250_v17 = vld [vmem:[#allocation424_spill] sm:$0xff] }
 0x5c8   : > { %v10845_v18 = vpop.permute.xlu1 %3474  ;;  %v10847_v59 = vpop.permute.xlu0 %4362  ;;  %v4547_v25 = vsel %vm3025_vm4, %v4515_v57, %v14240_v5  ;;  %v4453_v54 = vsel %vm2926_vm1, %v4421_v35, %v14242_v41  ;;  %v4578_v47 = vsel %vm3058_vm5, %v4546_v32, %v14243_v29  ;;  %v4484_v45 = vsel %vm2959_vm2, %v4452_v48, %v14245_v9  ;;  %v7533_v36 = vld [vmem:[%s7637_s17 + $0xc1] sm:$0xff]  ;;  %v14251_v4 = vld [vmem:[#allocation425_spill] sm:$0xff]  ;;  %v14254_v35 = vld [vmem:[#allocation428_spill] sm:$0xff] }
 0x5c9   : > { %v4579_v50 = vsel %vm3058_vm5, %v4547_v25, %v14244_v16  ;;  %v4485_v13 = vsel %vm2959_vm2, %v4453_v54, %v14246_v38  ;;  %v4423_v27 = vsel %vm2893_vm0, %v7532_v3, %v14248_v15  ;;  %v4516_v56 = vsel %vm2992_vm3, %v4484_v45, %v14250_v17  ;;  %v14253_v28 = vld [vmem:[#allocation427_spill] sm:$0xff]  ;;  %v14255_v31 = vld [vmem:[#allocation430_spill] sm:$0xff]  ;;  %v14257_v51 = vld [vmem:[#allocation432_spill] sm:$0xff] }
 0x5ca   : > { %4708 = vrot.lane.b32.xlu1 %v4640_v10, %s7600_s28  ;;  %4706 = vrot.lane.b32.xlu0 %v4639_v1, %s7600_s28  ;;  %v4610_v1 = vsel %vm3091_vm6, %v4578_v47, %v14247_v62  ;;  %v4611_v0 = vsel %vm3091_vm6, %v4579_v50, %v14249_v23  ;;  %v4422_v19 = vsel %vm2893_vm0, %v7533_v36, %v14251_v4  ;;  %v14256_v33 = vld [vmem:[#allocation431_spill] sm:$0xff]  ;;  %v14258_v7 = vld [vmem:[#allocation433_spill] sm:$0xff]  ;;  %v14259_v52 = vld [vmem:[#allocation434_spill] sm:$0xff] }
 0x5cb   : > { %v4642_v42 = vsel %vm13613_vm7, %v4610_v1, %v14252_v30  ;;  %v4548_v6 = vsel %vm3025_vm4, %v4516_v56, %v14253_v28  ;;  %v4517_v22 = vsel %vm2992_vm3, %v4485_v13, %v14254_v35  ;;  %v4643_v46 = vsel %vm13613_vm7, %v4611_v0, %v14255_v31  ;;  %v14260_v24 = vld [vmem:[#allocation435_spill] sm:$0xff]  ;;  %v14261_v25 = vld [vmem:[#allocation436_spill] sm:$0xff]  ;;  %v14263_v41 = vld [vmem:[#allocation438_spill] sm:$0xff] }
 0x5cc   : > { %v10883_v55 = vpop.permute.xlu1 %3982  ;;  %v10885_v11 = vpop.permute.xlu0 %3600  ;;  %v4549_v63 = vsel %vm3025_vm4, %v4517_v22, %v14256_v33  ;;  %v4454_v10 = vsel %vm2926_vm1, %v4422_v19, %v14257_v51  ;;  %v4455_v57 = vsel %vm2926_vm1, %v4423_v27, %v14258_v7  ;;  %v4580_v32 = vsel %vm3058_vm5, %v4548_v6, %v14259_v52  ;;  %v14264_v16 = vld [vmem:[#allocation439_spill] sm:$0xff]  ;;  %v14265_v9 = vld [vmem:[#allocation440_spill] sm:$0xff]  ;;  %v14266_v38 = vld [vmem:[#allocation442_spill] sm:$0xff] }
 0x5cd   : > { %v4581_v5 = vsel %vm3058_vm5, %v4549_v63, %v14260_v24  ;;  %v4486_v53 = vsel %vm2959_vm2, %v4454_v10, %v14261_v25  ;;  %v4612_v54 = vsel %vm3091_vm6, %v4580_v32, %v14263_v41  ;;  %v7534_v62 = vld [vmem:[%s7637_s17 + $0xe1] sm:$0xff]  ;;  %v14267_v1 = vld [vmem:[#allocation445_spill] sm:$0xff]  ;;  %v14270_v56 = vld [vmem:[#allocation444_spill] sm:$0xff] }
 0x5ce   : > { %4712 = vrot.lane.b32.xlu1 %v4642_v42, %s7600_s28  ;;  %4710 = vrot.lane.b32.xlu0 %v4641_v8, %s7600_s28  ;;  %v14262_v8 = vld [vmem:[#allocation437_spill] sm:$0xff]  ;;  %v4613_v50 = vsel %vm3091_vm6, %v4581_v5, %v14264_v16  ;;  %v4518_v45 = vsel %vm2992_vm3, %v4486_v53, %v14265_v9  ;;  %v4644_v13 = vsel %vm13613_vm7, %v4612_v54, %v14266_v38  ;;  %v14269_v0 = vld [vmem:[#allocation443_spill] sm:$0xff]  ;;  %v14271_v4 = vld [vmem:[#allocation446_spill] sm:$0xff] }
 0x5cf   : > { %v4487_v48 = vsel %vm2959_vm2, %v4455_v57, %v14262_v8  ;;  %v4425_v3 = vsel %vm2893_vm0, %v7534_v62, %v14267_v1  ;;  %v7535_v15 = vld [vmem:[%s7637_s17 + $0xd9] sm:$0xff]  ;;  %v4550_v17 = vsel %vm3025_vm4, %v4518_v45, %v14269_v0  ;;  %v4645_v19 = vsel %vm13613_vm7, %v4613_v50, %v14271_v4  ;;  %v14272_v30 = vld [vmem:[#allocation447_spill] sm:$0xff]  ;;  %v14273_v28 = vld [vmem:[#allocation448_spill] sm:$0xff] }
 0x5d0   : > { %v10920_v29 = vpop.permute.xlu1 %3602  ;;  %v10922_v47 = vpop.permute.xlu0 %4108  ;;  %v14268_v27 = vld [vmem:[#allocation441_spill] sm:$0xff]  ;;  %v4519_v36 = vsel %vm2992_vm3, %v4487_v48, %v14270_v56  ;;  %v14274_v35 = vld [vmem:[#allocation450_spill] sm:$0xff]  ;;  %v14276_v63 = vld [vmem:[#allocation451_spill] sm:$0xff] }
 0x5d1   : > { %v4424_v23 = vsel %vm2893_vm0, %v7535_v15, %v14268_v27  ;;  %v4551_v42 = vsel %vm3025_vm4, %v4519_v36, %v14272_v30  ;;  %v4582_v22 = vsel %vm3058_vm5, %v4550_v17, %v14274_v35  ;;  %v14275_v31 = vld [vmem:[#allocation449_spill] sm:$0xff]  ;;  %v14278_v7 = vld [vmem:[#allocation454_spill] sm:$0xff]  ;;  %v14280_v25 = vld [vmem:[#allocation456_spill] sm:$0xff] }
 0x5d2   : > { %4716 = vrot.lane.b32.xlu1 %v4644_v13, %s7600_s28  ;;  %4714 = vrot.lane.b32.xlu0 %v4643_v46, %s7600_s28  ;;  %v4456_v6 = vsel %vm2926_vm1, %v4424_v23, %v14273_v28  ;;  %v4457_v33 = vsel %vm2926_vm1, %v4425_v3, %v14275_v31  ;;  %v4583_v51 = vsel %vm3058_vm5, %v4551_v42, %v14276_v63  ;;  %v14277_v46 = vld [vmem:[#allocation452_spill] sm:$0xff]  ;;  %v14279_v24 = vld [vmem:[#allocation453_spill] sm:$0xff]  ;;  %v14281_v8 = vld [vmem:[#allocation458_spill] sm:$0xff] }
 0x5d3   : > { %v4488_v10 = vsel %vm2959_vm2, %v4456_v6, %v14277_v46  ;;  %v4614_v57 = vsel %vm3091_vm6, %v4582_v22, %v14278_v7  ;;  %v4489_v5 = vsel %vm2959_vm2, %v4457_v33, %v14279_v24  ;;  %v7536_v41 = vld [vmem:[%s7637_s17 + $0xf9] sm:$0xff]  ;;  %v14283_v50 = vld [vmem:[#allocation455_spill] sm:$0xff]  ;;  %v7537_v45 = vld [vmem:[%s7637_s17 + $0xf1] sm:$0xff] }
 0x5d4   : > { %v10958_v52 = vpop.permute.xlu1 %4110  ;;  %v10960_v32 = vpop.permute.xlu0 %3728  ;;  %v4520_v53 = vsel %vm2992_vm3, %v4488_v10, %v14280_v25  ;;  %v4646_v48 = vsel %vm13613_vm7, %v4614_v57, %v14281_v8  ;;  %v14282_v54 = vld [vmem:[#allocation461_spill] sm:$0xff]  ;;  %v4615_v9 = vsel %vm3091_vm6, %v4583_v51, %v14283_v50  ;;  %v14285_v62 = vld [vmem:[#allocation459_spill] sm:$0xff]  ;;  %v14286_v3 = vld [vmem:[#allocation460_spill] sm:$0xff] }
 0x5d5   : > { %v4427_v16 = vsel %vm2893_vm0, %v7536_v41, %v14282_v54  ;;  %v14284_v38 = vld [vmem:[#allocation457_spill] sm:$0xff]  ;;  %v4552_v1 = vsel %vm3025_vm4, %v4520_v53, %v14285_v62  ;;  %v4521_v15 = vsel %vm2992_vm3, %v4489_v5, %v14286_v3  ;;  %v14287_v27 = vld [vmem:[#allocation462_spill] sm:$0xff]  ;;  %v14288_v0 = vld [vmem:[#allocation464_spill] sm:$0xff] }
 0x5d6   : > { %v4426_v13 = vsel %vm2893_vm0, %v7537_v45, %v14284_v38  ;;  %4720 = vrot.lane.b32.xlu1 %v4646_v48, %s7600_s28  ;;  %4718 = vrot.lane.b32.xlu0 %v4645_v19, %s7600_s28  ;;  %v4647_v23 = vsel %vm13613_vm7, %v4615_v9, %v14287_v27  ;;  %v14289_v56 = vld [vmem:[#allocation466_spill] sm:$0xff]  ;;  %v14290_v4 = vld [vmem:[#allocation463_spill] sm:$0xff]  ;;  %v14291_v42 = vld [vmem:[#allocation465_spill] sm:$0xff] }
 0x5d7   : > { %v4458_v17 = vsel %vm2926_vm1, %v4426_v13, %v14288_v0  ;;  %v4584_v36 = vsel %vm3058_vm5, %v4552_v1, %v14289_v56  ;;  %v4553_v30 = vsel %vm3025_vm4, %v4521_v15, %v14290_v4  ;;  %v4459_v28 = vsel %vm2926_vm1, %v4427_v16, %v14291_v42  ;;  %v14292_v19 = vld [vmem:[#allocation468_spill] sm:$0xff]  ;;  %v14293_v35 = vld [vmem:[#allocation470_spill] sm:$0xff]  ;;  %v14294_v63 = vld [vmem:[#allocation467_spill] sm:$0xff] }
 0x5d8   : > { %v4490_v6 = vsel %vm2959_vm2, %v4458_v17, %v14292_v19  ;;  %v4616_v22 = vsel %vm3091_vm6, %v4584_v36, %v14293_v35  ;;  %v10996_v31 = vpop.permute.xlu1 %3730  ;;  %v10998_v33 = vpop.permute.xlu0 %4236  ;;  %v4585_v51 = vsel %vm3058_vm5, %v4553_v30, %v14294_v63  ;;  %v14295_v46 = vld [vmem:[#allocation469_spill] sm:$0xff]  ;;  %v14296_v7 = vld [vmem:[#allocation472_spill] sm:$0xff]  ;;  %v14297_v24 = vld [vmem:[#allocation474_spill] sm:$0xff] }
 0x5d9   : > { %v4491_v10 = vsel %vm2959_vm2, %v4459_v28, %v14295_v46  ;;  %v4522_v57 = vsel %vm2992_vm3, %v4490_v6, %v14296_v7  ;;  %v4648_v5 = vsel %vm13613_vm7, %v4616_v22, %v14297_v24  ;;  %v7538_v25 = vld [vmem:[%s7637_s17 + $0x109] sm:$0xff]  ;;  %v14298_v53 = vld [vmem:[#allocation473_spill] sm:$0xff]  ;;  %v14305_v27 = vld [vmem:[#allocation478_spill] sm:$0xff] }
 0x5da   : > { %v4428_v8 = vsel %vm2893_vm0, %v7538_v25, %v14298_v53  ;;  %v14299_v48 = vld [vmem:[#allocation475_spill] sm:$0xff]  ;;  %v7539_v54 = vld [vmem:[%s7637_s17 + $0x111] sm:$0xff]  ;;  %4724 = vrot.lane.b32.xlu1 %v4648_v5, %s7600_s28  ;;  %4722 = vrot.lane.b32.xlu0 %v4647_v23, %s7600_s28  ;;  %v14309_v19 = vld [vmem:[#allocation482_spill] sm:$0xff] }
 0x5db   : > { %v4554_v41 = vsel %vm3025_vm4, %v4522_v57, %v14299_v48  ;;  %v14300_v16 = vld [vmem:[#allocation477_spill] sm:$0xff]  ;;  %v14301_v9 = vld [vmem:[#allocation471_spill] sm:$0xff]  ;;  %v14302_v38 = vld [vmem:[#allocation476_spill] sm:$0xff] }
 0x5dc   : > { %v4429_v50 = vsel %vm2893_vm0, %v7539_v54, %v14300_v16  ;;  %v4617_v45 = vsel %vm3091_vm6, %v4585_v51, %v14301_v9  ;;  %v4523_v13 = vsel %vm2992_vm3, %v4491_v10, %v14302_v38  ;;  %v14303_v62 = vld [vmem:[#allocation480_spill] sm:$0xff]  ;;  %v14304_v3 = vld [vmem:[#allocation483_spill] sm:$0xff]  ;;  %v14307_v23 = vld [vmem:[#allocation485_spill] sm:$0xff]  ;;  %v11034_v42 = vpop.permute.xlu1 %4238  ;;  %v11036_v28 = vpop.permute.xlu0 %3856 }
 0x5dd   : > { %v4460_v1 = vsel %vm2926_vm1, %v4428_v8, %v14303_v62  ;;  %v4586_v15 = vsel %vm3058_vm5, %v4554_v41, %v14304_v3  ;;  %v4649_v0 = vsel %vm13613_vm7, %v4617_v45, %v14305_v27  ;;  %v14306_v17 = vld [vmem:[#allocation479_spill] sm:$0xff]  ;;  %v14308_v4 = vld [vmem:[#allocation488_spill] sm:$0xff]  ;;  %v4461_v6 = vsel %vm2926_vm1, %v4429_v50, %v14309_v19  ;;  %v14311_v63 = vld [vmem:[#allocation490_spill] sm:$0xff] }
 0x5de   : > { %v4555_v56 = vsel %vm3025_vm4, %v4523_v13, %v14306_v17  ;;  %v4492_v36 = vsel %vm2959_vm2, %v4460_v1, %v14307_v23  ;;  %v4618_v30 = vsel %vm3091_vm6, %v4586_v15, %v14308_v4  ;;  %v14310_v35 = vld [vmem:[#allocation484_spill] sm:$0xff]  ;;  %v7540_v7 = vld [vmem:[%s7637_s17 + $0x121] sm:$0xff]  ;;  %v14314_v5 = vld [vmem:[#allocation493_spill] sm:$0xff]  ;;  %4726 = vrot.lane.b32.xlu0 %v4649_v0, %s7600_s28 }
 0x5df   : > { %v4587_v22 = vsel %vm3058_vm5, %v4555_v56, %v14310_v35  ;;  %v4524_v51 = vsel %vm2992_vm3, %v4492_v36, %v14311_v63  ;;  %v14312_v46 = vld [vmem:[#allocation492_spill] sm:$0xff]  ;;  %v14313_v57 = vld [vmem:[#allocation491_spill] sm:$0xff]  ;;  %v14317_v16 = vld [vmem:[#allocation489_spill] sm:$0xff] }
 0x5e0   : > { %v4650_v10 = vsel %vm13613_vm7, %v4618_v30, %v14312_v46  ;;  %v4430_v24 = vsel %vm2893_vm0, %v7540_v7, %v14313_v57  ;;  %v4556_v25 = vsel %vm3025_vm4, %v4524_v51, %v14314_v5  ;;  %v7541_v53 = vld [vmem:[%s7637_s17 + $0x129] sm:$0xff]  ;;  %v4619_v50 = vsel %vm3091_vm6, %v4587_v22, %v14317_v16  ;;  %v14318_v9 = vld [vmem:[#allocation498_spill] sm:$0xff]  ;;  %v11072_v23 = vpop.permute.xlu1 %3476  ;;  %v11074_v36 = vpop.permute.xlu0 %4364  ;;  %v14324_v4 = vld [vmem:[#allocation497_spill] sm:$0xff] }
 0x5e1   : > { %v14315_v8 = vld [vmem:[#allocation495_spill] sm:$0xff]  ;;  %4728 = vrot.lane.b32.xlu1 %v4650_v10, %s7600_s28  ;;  %v4462_v45 = vsel %vm2926_vm1, %v4430_v24, %v14318_v9  ;;  %v14319_v38 = vld [vmem:[#allocation500_spill] sm:$0xff]  ;;  %v14320_v62 = vld [vmem:[#allocation494_spill] sm:$0xff] }
 0x5e2   : > { %v4431_v48 = vsel %vm2893_vm0, %v7541_v53, %v14315_v8  ;;  %v14316_v41 = vld [vmem:[#allocation487_spill] sm:$0xff]  ;;  %v4588_v13 = vsel %vm3058_vm5, %v4556_v25, %v14319_v38  ;;  %v14321_v3 = vld [vmem:[#allocation496_spill] sm:$0xff]  ;;  %v14322_v27 = vld [vmem:[#allocation502_spill] sm:$0xff] }
 0x5e3   : > { %v4493_v54 = vsel %vm2959_vm2, %v4461_v6, %v14316_v41  ;;  %v4651_v15 = vsel %vm13613_vm7, %v4619_v50, %v14321_v3  ;;  %v4494_v0 = vsel %vm2959_vm2, %v4462_v45, %v14322_v27  ;;  %v14323_v17 = vld [vmem:[#allocation504_spill] sm:$0xff]  ;;  %v14325_v19 = vld [vmem:[#allocation499_spill] sm:$0xff]  ;;  %v14326_v35 = vld [vmem:[#allocation506_spill] sm:$0xff] }
 0x5e4   : > { %v4525_v1 = vsel %vm2992_vm3, %v4493_v54, %v14320_v62  ;;  %v4620_v56 = vsel %vm3091_vm6, %v4588_v13, %v14323_v17  ;;  %v4463_v6 = vsel %vm2926_vm1, %v4431_v48, %v14325_v19  ;;  %v4526_v22 = vsel %vm2992_vm3, %v4494_v0, %v14326_v35  ;;  %v14327_v63 = vld [vmem:[#allocation508_spill] sm:$0xff]  ;;  %v14328_v46 = vld [vmem:[#allocation501_spill] sm:$0xff]  ;;  %v14329_v57 = vld [vmem:[#allocation507_spill] sm:$0xff]  ;;  %4730 = vrot.lane.b32.xlu0 %v4651_v15, %s7600_s28  ;;  %v11110_v17 = vpop.permute.xlu1 %3984 }
 0x5e5   : > { %v4557_v30 = vsel %vm3025_vm4, %v4525_v1, %v14324_v4  ;;  %v4652_v51 = vsel %vm13613_vm7, %v4620_v56, %v14327_v63  ;;  %v7542_v7 = vld [vmem:[%s7637_s17 + $0x139] sm:$0xff]  ;;  %v14331_v53 = vld [vmem:[#allocation503_spill] sm:$0xff]  ;;  %v14334_v9 = vld [vmem:[#allocation516_spill] sm:$0xff]  ;;  %v11112_v56 = vpop.permute.xlu0 %3858 }
 0x5e6   : > { %v4589_v10 = vsel %vm3058_vm5, %v4557_v30, %v14328_v46  ;;  %v4432_v24 = vsel %vm2893_vm0, %v7542_v7, %v14329_v57  ;;  %v14330_v5 = vld [vmem:[#allocation509_spill] sm:$0xff]  ;;  %4732 = vrot.lane.b32.xlu1 %v4652_v51, %s7600_s28  ;;  %v4495_v8 = vsel %vm2959_vm2, %v4463_v6, %v14331_v53  ;;  %v7543_v48 = vld [vmem:[%s7637_s17 + $0x141] sm:$0xff]  ;;  %v14338_v27 = vld [vmem:[#allocation520_spill] sm:$0xff] }
 0x5e7   : > { %v4558_v25 = vsel %vm3025_vm4, %v4526_v22, %v14330_v5  ;;  %v14332_v41 = vld [vmem:[#allocation511_spill] sm:$0xff]  ;;  %v14333_v16 = vld [vmem:[#allocation514_spill] sm:$0xff]  ;;  %v14335_v38 = vld [vmem:[#allocation505_spill] sm:$0xff] }
 0x5e8   : > { %v4433_v54 = vsel %vm2893_vm0, %v7543_v48, %v14332_v41  ;;  %v4464_v50 = vsel %vm2926_vm1, %v4432_v24, %v14333_v16  ;;  %v4590_v45 = vsel %vm3058_vm5, %v4558_v25, %v14334_v9  ;;  %v4621_v13 = vsel %vm3091_vm6, %v4589_v10, %v14335_v38  ;;  %v14336_v62 = vld [vmem:[#allocation510_spill] sm:$0xff]  ;;  %v14339_v4 = vld [vmem:[#allocation512_spill] sm:$0xff]  ;;  %v14340_v19 = vld [vmem:[#allocation513_spill] sm:$0xff] }
 0x5e9   : > { %v4527_v1 = vsel %vm2992_vm3, %v4495_v8, %v14336_v62  ;;  %v14337_v3 = vld [vmem:[#allocation518_spill] sm:$0xff]  ;;  %v4622_v0 = vsel %vm3091_vm6, %v4590_v45, %v14338_v27  ;;  %v4653_v30 = vsel %vm13613_vm7, %v4621_v13, %v14339_v4  ;;  %v14342_v63 = vld [vmem:[#allocation524_spill] sm:$0xff]  ;;  %v14343_v46 = vld [vmem:[#allocation515_spill] sm:$0xff]  ;;  %v11148_v4 = vpop.permute.xlu1 %3478 }
 0x5ea   : > { %v4496_v15 = vsel %vm2959_vm2, %v4464_v50, %v14337_v3  ;;  %v4559_v6 = vsel %vm3025_vm4, %v4527_v1, %v14340_v19  ;;  %v14341_v35 = vld [vmem:[#allocation522_spill] sm:$0xff]  ;;  %v4654_v51 = vsel %vm13613_vm7, %v4622_v0, %v14342_v63  ;;  %v4465_v10 = vsel %vm2926_vm1, %v4433_v54, %v14343_v46  ;;  %v7544_v7 = vld [vmem:[%s7637_s17 + $0x151] sm:$0xff]  ;;  %v14344_v57 = vld [vmem:[#allocation523_spill] sm:$0xff]  ;;  %4734 = vrot.lane.b32.xlu0 %v4653_v30, %s7600_s28  ;;  %v11150_v30 = vpop.permute.xlu0 %4366 }
 0x5eb   : > { %v4528_v22 = vsel %vm2992_vm3, %v4496_v15, %v14341_v35  ;;  %v4434_v24 = vsel %vm2893_vm0, %v7544_v7, %v14344_v57  ;;  %v14345_v5 = vld [vmem:[#allocation525_spill] sm:$0xff]  ;;  %4736 = vrot.lane.b32.xlu1 %v4654_v51, %s7600_s28  ;;  %v14347_v48 = vld [vmem:[#allocation519_spill] sm:$0xff]  ;;  %v14348_v16 = vld [vmem:[#allocation530_spill] sm:$0xff] }
 0x5ec   : > { %v4560_v25 = vsel %vm3025_vm4, %v4528_v22, %v14345_v5  ;;  %v14346_v53 = vld [vmem:[#allocation517_spill] sm:$0xff]  ;;  %v4497_v41 = vsel %vm2959_vm2, %v4465_v10, %v14347_v48  ;;  %v4466_v54 = vsel %vm2926_vm1, %v4434_v24, %v14348_v16  ;;  %v14349_v50 = vld [vmem:[#allocation532_spill] sm:$0xff]  ;;  %v14351_v62 = vld [vmem:[#allocation527_spill] sm:$0xff] }
 0x5ed   : > { %v4591_v8 = vsel %vm3058_vm5, %v4559_v6, %v14346_v53  ;;  %v4592_v9 = vsel %vm3058_vm5, %v4560_v25, %v14349_v50  ;;  %v14350_v45 = vld [vmem:[#allocation521_spill] sm:$0xff]  ;;  %v14352_v3 = vld [vmem:[#allocation534_spill] sm:$0xff]  ;;  %v14353_v27 = vld [vmem:[#allocation536_spill] sm:$0xff] }
 0x5ee   : > { %v4623_v38 = vsel %vm3091_vm6, %v4591_v8, %v14350_v45  ;;  %v7545_v13 = vld [vmem:[%s7637_s17 + $0x159] sm:$0xff]  ;;  %v4498_v15 = vsel %vm2959_vm2, %v4466_v54, %v14352_v3  ;;  %v4624_v0 = vsel %vm3091_vm6, %v4592_v9, %v14353_v27  ;;  %v14355_v35 = vld [vmem:[#allocation528_spill] sm:$0xff]  ;;  %v7546_v7 = vld [vmem:[%s7637_s17 + $0x68] sm:$0xff] }
 0x5ef   : > { %v4435_v1 = vsel %vm2893_vm0, %v7545_v13, %v14351_v62  ;;  %v14354_v19 = vld [vmem:[#allocation526_spill] sm:$0xff]  ;;  %v4655_v22 = vsel %vm13613_vm7, %v4623_v38, %v14355_v35  ;;  %v14357_v46 = vld [vmem:[#allocation540_spill] sm:$0xff]  ;;  %v14359_v5 = vld [vmem:[#allocation529_spill] sm:$0xff]  ;;  %v11191_v35 = vpop.permute.xlu1 %3986 }
 0x5f0   : > { %v4529_v6 = vsel %vm2992_vm3, %v4497_v41, %v14354_v19  ;;  %v14356_v63 = vld [vmem:[#allocation538_spill] sm:$0xff]  ;;  %v4656_v10 = vsel %vm13613_vm7, %v4624_v0, %v14357_v46  ;;  %v14360_v53 = vld [vmem:[#allocation541_spill] sm:$0xff]  ;;  %4738 = vrot.lane.b32.xlu0 %v4655_v22, %s7600_s28  ;;  %v14361_v41 = vld [vmem:[#allocation11_spill] sm:$0xff]  ;;  %v11193_v22 = vpop.permute.xlu0 %3604 }
 0x5f1   : > { %v4530_v51 = vsel %vm2992_vm3, %v4498_v15, %v14356_v63  ;;  %v14358_v57 = vld [vmem:[#allocation10_spill] sm:$0xff]  ;;  %v4561_v25 = vsel %vm3025_vm4, %v4529_v6, %v14359_v5  ;;  %4740 = vrot.lane.b32.xlu1 %v4656_v10, %s7600_s28  ;;  %v14362_v54 = vld [vmem:[#allocation531_spill] sm:$0xff]  ;;  %v14363_v9 = vld [vmem:[#allocation533_spill] sm:$0xff] }
 0x5f2   : > { %v11163_v24 = vsel %vm2893_vm0, %v7546_v7, %v14358_v57  ;;  %v4562_v8 = vsel %vm3025_vm4, %v4530_v51, %v14360_v53  ;;  %v7547_v48 = vld [vmem:[%s7637_s17 + $0x60] sm:$0xff]  ;;  %v4467_v50 = vsel %vm2926_vm1, %v4435_v1, %v14362_v54  ;;  %v4593_v45 = vsel %vm3058_vm5, %v4561_v25, %v14363_v9  ;;  %v14364_v38 = vld [vmem:[#allocation548_spill] sm:$0xff]  ;;  %v14365_v62 = vld [vmem:[#allocation535_spill] sm:$0xff] }
 0x5f3   : > { %v11174_v16 = vsel %vm2893_vm0, %v7547_v48, %v14361_v41  ;;  %v4594_v13 = vsel %vm3058_vm5, %v4562_v8, %v14364_v38  ;;  %v4499_v3 = vsel %vm2959_vm2, %v4467_v50, %v14365_v62  ;;  %v14366_v15 = vld [vmem:[#allocation537_spill] sm:$0xff]  ;;  %v14367_v0 = vld [vmem:[#allocation543_spill] sm:$0xff]  ;;  %v14368_v19 = vld [vmem:[#allocation486_spill] sm:$0xff] }
 0x5f4   : > { %v4625_v27 = vsel %vm3091_vm6, %v4593_v45, %v14366_v15  ;;  %v4437_v6 = vsel %vm2893_vm0, %v14368_v19, %v14367_v0  ;;  %v4626_v1 = vsel %vm3091_vm6, %v4594_v13, %v10681_v26  ;;  %v7548_v63 = vld [vmem:[%s7637_s17 + $0x80] sm:$0xff]  ;;  %v14369_v51 = vld [vmem:[#allocation12_spill] sm:$0xff]  ;;  %v7549_v26 = vld [vmem:[%s7637_s17 + $0x78] sm:$0xff] }
 0x5f5   : > { %v11198_v46 = vsel %vm2893_vm0, %v7548_v63, %v14369_v51  ;;  %v14370_v10 = vld [vmem:[#allocation542_spill] sm:$0xff]  ;;  %v14371_v57 = vld [vmem:[#allocation544_spill] sm:$0xff]  ;;  %v4658_v25 = vsel %vm13613_vm7, %v4626_v1, %v10770_v21  ;;  %v14372_v53 = vld [vmem:[#allocation13_spill] sm:$0xff] }
 0x5f6   : > { %v4531_v7 = vsel %vm2992_vm3, %v4499_v3, %v14370_v10  ;;  %v4657_v5 = vsel %vm13613_vm7, %v4625_v27, %v14371_v57  ;;  %v11209_v8 = vsel %vm2893_vm0, %v7549_v26, %v14372_v53  ;;  %v14373_v48 = vld [vmem:[#allocation539_spill] sm:$0xff]  ;;  %v14374_v41 = vld [vmem:[#allocation481_spill] sm:$0xff]  ;;  %4744 = vrot.lane.b32.xlu1 %v4658_v25, %s7600_s28  ;;  %v14376_v38 = vld [vmem:[#allocation14_spill] sm:$0xff] }
 0x5f7   : > { %v4436_v54 = vsel %vm2893_vm0, %v14374_v41, %v14373_v48  ;;  %v14375_v50 = vld [vmem:[#allocation545_spill] sm:$0xff]  ;;  %4742 = vrot.lane.b32.xlu0 %v4657_v5, %s7600_s28  ;;  %v14377_v13 = vld [vmem:[#allocation546_spill] sm:$0xff]  ;;  %v14378_v3 = vld [vmem:[#allocation547_spill] sm:$0xff]  ;;  %v11242_v5 = vpop.permute.xlu0 %4112 }
 0x5f8   : > { %v4563_v9 = vsel %vm3025_vm4, %v4531_v7, %v14375_v50  ;;  %v7550_v45 = vld [vmem:[%s7637_s17 + $0x98] sm:$0xff]  ;;  %v4468_v62 = vsel %vm2926_vm1, %v4436_v54, %v14377_v13  ;;  %v4469_v15 = vsel %vm2926_vm1, %v4437_v6, %v14378_v3  ;;  %v7551_v19 = vld [vmem:[%s7637_s17 + $0x90] sm:$0xff]  ;;  %v14380_v1 = vld [vmem:[#allocation15_spill] sm:$0xff]  ;;  %v11240_v6 = vpop.permute.xlu1 %3606 }
 0x5f9   : > { %v11221_v21 = vsel %vm2893_vm0, %v7550_v45, %v14376_v38  ;;  %v14379_v27 = vld [vmem:[#allocation549_spill] sm:$0xff]  ;;  %v11232_v63 = vsel %vm2893_vm0, %v7551_v19, %v14380_v1  ;;  %v14381_v51 = vld [vmem:[#allocation550_spill] sm:$0xff]  ;;  %v4501_v7 = vsel %vm2959_vm2, %v4469_v15, %v10679_v44  ;;  %v7552_v25 = vld [vmem:[%s7637_s17 + $0xb0] sm:$0xff] }
 0x5fa   : > { %v4595_v0 = vsel %vm3058_vm5, %v4563_v9, %v14379_v27  ;;  %v4500_v10 = vsel %vm2959_vm2, %v4468_v62, %v14381_v51  ;;  %v14382_v26 = vld [vmem:[#allocation16_spill] sm:$0xff]  ;;  %v4533_v44 = vsel %vm2992_vm3, %v4501_v7, %v10809_v60  ;;  %v7553_v41 = vld [vmem:[%s7637_s17 + $0xa8] sm:$0xff]  ;;  %v14383_v54 = vld [vmem:[#allocation17_spill] sm:$0xff] }
 0x5fb   : > { %v4627_v57 = vsel %vm3091_vm6, %v4595_v0, %v10725_v43  ;;  %v11247_v53 = vsel %vm2893_vm0, %v7552_v25, %v14382_v26  ;;  %v4532_v48 = vsel %vm2992_vm3, %v4500_v10, %v10727_v2  ;;  %v2908_v50 = vsel %vm2893_vm0, %v7553_v41, %v14383_v54  ;;  %v7554_v38 = vld [vmem:[%s7637_s17 + $0x170] sm:$0xff]  ;;  %v7555_v2 = vld [vmem:[%s7637_s17 + $0xc8] sm:$0xff]  ;;  %v14384_v60 = vld [vmem:[#allocation18_spill] sm:$0xff] }
 0x5fc   : > { %v4659_v43 = vsel %vm13613_vm7, %v4627_v57, %v10847_v59  ;;  %v4564_v9 = vsel %vm3025_vm4, %v4532_v48, %v10807_v20  ;;  %v4565_v45 = vsel %vm3025_vm4, %v4533_v44, %v10883_v55  ;;  %2847 = vrot.lane.b32.xlu1 %v7554_v38, %s7599_s5  ;;  %v2911_v59 = vsel %vm2893_vm0, %v7555_v2, %v14384_v60  ;;  %v7556_v13 = vld [vmem:[%s7637_s17 + $0xc0] sm:$0xff]  ;;  %v14385_v62 = vld [vmem:[#allocation19_spill] sm:$0xff]  ;;  %v14386_v27 = vld [vmem:[#allocation20_spill] sm:$0xff]  ;;  %v11285_v7 = vpop.permute.xlu1 %4114 }
 0x5fd   : > { %4746 = vrot.lane.b32.xlu0 %v4659_v43, %s7600_s28  ;;  %v2910_v3 = vsel %vm2893_vm0, %v7556_v13, %v14385_v62  ;;  %v4596_v20 = vsel %vm3058_vm5, %v4564_v9, %v10922_v47  ;;  %v4597_v55 = vsel %vm3058_vm5, %v4565_v45, %v10958_v52  ;;  %v7557_v15 = vld [vmem:[%s7637_s17 + $0xe0] sm:$0xff]  ;;  %v7558_v19 = vld [vmem:[%s7637_s17 + $0xd8] sm:$0xff]  ;;  %v11287_v52 = vpop.permute.xlu0 %3732  ;;  %v7560_v48 = vld [vmem:[%s7637_s17 + $0xf0] sm:$0xff] }
 0x5fe   : > { %v2913_v0 = vsel %vm2893_vm0, %v7557_v15, %v14386_v27  ;;  %v14387_v1 = vld [vmem:[#allocation21_spill] sm:$0xff]  ;;  %v4628_v10 = vsel %vm3091_vm6, %v4596_v20, %v10998_v33  ;;  %v4629_v47 = vsel %vm3091_vm6, %v4597_v55, %v11034_v42  ;;  %v14388_v25 = vld [vmem:[#allocation22_spill] sm:$0xff]  ;;  %v14389_v44 = vld [vmem:[#allocation23_spill] sm:$0xff] }
 0x5ff   : > { %v2912_v51 = vsel %vm2893_vm0, %v7558_v19, %v14387_v1  ;;  %v7559_v57 = vld [vmem:[%s7637_s17 + $0xf8] sm:$0xff]  ;;  %v2914_v43 = vsel %vm2893_vm0, %v7560_v48, %v14389_v44  ;;  %v4660_v41 = vsel %vm13613_vm7, %v4628_v10, %v11074_v36  ;;  %v4661_v33 = vsel %vm13613_vm7, %v4629_v47, %v11150_v30  ;;  %v7561_v42 = vld [vmem:[%s7637_s17 + $0x110] sm:$0xff]  ;;  %v7562_v45 = vld [vmem:[%s7637_s17 + $0x108] sm:$0xff] }
 0x600   : > { %v2915_v26 = vsel %vm2893_vm0, %v7559_v57, %v14388_v25  ;;  %v14390_v54 = vld [vmem:[#allocation24_spill] sm:$0xff]  ;;  %v14391_v38 = vld [vmem:[#allocation25_spill] sm:$0xff]  ;;  %v7563_v60 = vld [vmem:[%s7637_s17 + $0x128] sm:$0xff]  ;;  %4750 = vrot.lane.b32.xlu1 %v4661_v33, %s7600_s28  ;;  %v11334_v33 = vpop.permute.xlu1 %3734 }
 0x601   : > { %v2917_v9 = vsel %vm2893_vm0, %v7561_v42, %v14390_v54  ;;  %v2916_v2 = vsel %vm2893_vm0, %v7562_v45, %v14391_v38  ;;  %v14392_v13 = vld [vmem:[#allocation26_spill] sm:$0xff]  ;;  %4748 = vrot.lane.b32.xlu0 %v4660_v41, %s7600_s28  ;;  %v14393_v20 = vld [vmem:[#allocation27_spill] sm:$0xff]  ;;  %v14394_v55 = vld [vmem:[#allocation28_spill] sm:$0xff] }
 0x602   : > { %v2919_v62 = vsel %vm2893_vm0, %v7563_v60, %v14392_v13  ;;  %v7564_v36 = vld [vmem:[%s7637_s17 + $0x120] sm:$0xff]  ;;  %v2928_v15 = vsel %vm2926_vm1, %v10690_v34, %v14394_v55  ;;  %v14395_v27 = vld [vmem:[#allocation29_spill] sm:$0xff]  ;;  %v14397_v47 = vld [vmem:[#allocation31_spill] sm:$0xff] }
 0x603   : > { %v2918_v30 = vsel %vm2893_vm0, %v7564_v36, %v14393_v20  ;;  %v2927_v19 = vsel %vm2926_vm1, %v10675_v49, %v14395_v27  ;;  %v14396_v1 = vld [vmem:[#allocation30_spill] sm:$0xff]  ;;  %v2929_v57 = vsel %vm2926_vm1, %v10671_v61, %v14397_v47  ;;  %v14398_v25 = vld [vmem:[#allocation32_spill] sm:$0xff]  ;;  %v14399_v44 = vld [vmem:[#allocation33_spill] sm:$0xff] }
 0x604   : > { %v2930_v10 = vsel %vm2926_vm1, %v10686_v39, %v14396_v1  ;;  %v2932_v48 = vsel %vm2926_vm1, %v10700_v14, %v14398_v25  ;;  %v2931_v34 = vsel %vm2926_vm1, %v10711_v58, %v14399_v44  ;;  %v14400_v41 = vld [vmem:[#allocation34_spill] sm:$0xff]  ;;  %v4241_v39 = vpop.permute.xlu0 %4240  ;;  %v14401_v42 = vld [vmem:[#allocation35_spill] sm:$0xff]  ;;  %v14402_v54 = vld [vmem:[#allocation36_spill] sm:$0xff] }
 0x605   : > { %v2934_v49 = vsel %vm2926_vm1, %v10739_v37, %v14400_v41  ;;  %v2933_v61 = vsel %vm2926_vm1, %v10760_v12, %v14401_v42  ;;  %v2936_v45 = vsel %vm2926_vm1, %v11163_v24, %v14402_v54  ;;  %v14403_v14 = vld [vmem:[#allocation37_spill] sm:$0xff]  ;;  %v14404_v58 = vld [vmem:[#allocation38_spill] sm:$0xff]  ;;  %v14405_v37 = vld [vmem:[#allocation39_spill] sm:$0xff] }
 0x606   : > { %v2935_v38 = vsel %vm2926_vm1, %v11174_v16, %v14403_v14  ;;  %v2938_v60 = vsel %vm2926_vm1, %v11198_v46, %v14404_v58  ;;  %v2937_v13 = vsel %vm2926_vm1, %v11209_v8, %v14405_v37  ;;  %v14406_v36 = vld [vmem:[#allocation40_spill] sm:$0xff]  ;;  %v7565_v20 = vld [vmem:[%s7637_s17 + $0x181] sm:$0xff]  ;;  %v14407_v27 = vld [vmem:[#allocation41_spill] sm:$0xff]  ;;  %v4243_v58 = vpop.permute.xlu1 %4242 }
 0x607   : > { %v2940_v12 = vsel %vm2926_vm1, %v11221_v21, %v14406_v36  ;;  %v4438_v24 = vsel %vm2893_vm0, %v7565_v20, %v10768_v40  ;;  %v7566_v55 = vld [vmem:[%s7637_s17 + $0x180] sm:$0xff]  ;;  %v7567_v16 = vld [vmem:[%s7637_s17 + $0x188] sm:$0xff]  ;;  %v2939_v46 = vsel %vm2926_vm1, %v11232_v63, %v14407_v27  ;;  %v14410_v25 = vld [vmem:[#allocation44_spill] sm:$0xff] }
 0x608   : > { %2849 = vrot.lane.b32.xlu0 %v7566_v55, %s7599_s5  ;;  %2851 = vrot.lane.b32.xlu1 %v7567_v16, %s7599_s5  ;;  %v14408_v1 = vld [vmem:[#allocation42_spill] sm:$0xff]  ;;  %v14409_v47 = vld [vmem:[#allocation43_spill] sm:$0xff]  ;;  %v4470_v40 = vsel %vm2926_vm1, %v4438_v24, %v10885_v11  ;;  %v2944_v44 = vsel %vm2926_vm1, %v2911_v59, %v14410_v25  ;;  %v14411_v41 = vld [vmem:[#allocation45_spill] sm:$0xff] }
 0x609   : > { %v2942_v8 = vsel %vm2926_vm1, %v11247_v53, %v14408_v1  ;;  %v2941_v21 = vsel %vm2926_vm1, %v2908_v50, %v14409_v47  ;;  %v2943_v42 = vsel %vm2926_vm1, %v2910_v3, %v14411_v41  ;;  %v14412_v54 = vld [vmem:[#allocation46_spill] sm:$0xff]  ;;  %v4502_v63 = vsel %vm2959_vm2, %v4470_v40, %v10960_v32  ;;  %v11379_v53 = vpop.permute.xlu0 %3860  ;;  %v14413_v50 = vld [vmem:[#allocation47_spill] sm:$0xff]  ;;  %v14414_v11 = vld [vmem:[#allocation48_spill] sm:$0xff] }
 0x60a   : > { %v2946_v14 = vsel %vm2926_vm1, %v2913_v0, %v14412_v54  ;;  %v2945_v37 = vsel %vm2926_vm1, %v2912_v51, %v14413_v50  ;;  %v2948_v36 = vsel %vm2926_vm1, %v2915_v26, %v14414_v11  ;;  %v14415_v59 = vld [vmem:[#allocation49_spill] sm:$0xff]  ;;  %v4534_v3 = vsel %vm2992_vm3, %v4502_v63, %v11036_v28  ;;  %v14416_v0 = vld [vmem:[#allocation50_spill] sm:$0xff]  ;;  %v14417_v32 = vld [vmem:[#allocation51_spill] sm:$0xff]  ;;  %v11413_v63 = vpop.permute.xlu1 %3480 }
 0x60b   : > { %v2947_v20 = vsel %vm2926_vm1, %v2914_v43, %v14415_v59  ;;  %v2950_v24 = vsel %vm2926_vm1, %v2917_v9, %v14416_v0  ;;  %v2949_v55 = vsel %vm2926_vm1, %v2916_v2, %v14417_v32  ;;  %v14418_v16 = vld [vmem:[#allocation52_spill] sm:$0xff]  ;;  %v4566_v51 = vsel %vm3025_vm4, %v4534_v3, %v11110_v17  ;;  %v14419_v1 = vld [vmem:[#allocation53_spill] sm:$0xff]  ;;  %v14420_v47 = vld [vmem:[#allocation54_spill] sm:$0xff] }
 0x60c   : > { %v2952_v27 = vsel %vm2926_vm1, %v2919_v62, %v14418_v16  ;;  %v2951_v26 = vsel %vm2926_vm1, %v2918_v30, %v14419_v1  ;;  %v2961_v43 = vsel %vm2959_vm2, %v2928_v15, %v14420_v47  ;;  %v14421_v40 = vld [vmem:[#allocation55_spill] sm:$0xff]  ;;  %v4598_v9 = vsel %vm3058_vm5, %v4566_v51, %v11242_v5  ;;  %v14422_v25 = vld [vmem:[#allocation56_spill] sm:$0xff]  ;;  %v14423_v41 = vld [vmem:[#allocation57_spill] sm:$0xff] }
 0x60d   : > { %v2960_v28 = vsel %vm2959_vm2, %v2927_v19, %v14421_v40  ;;  %v2963_v2 = vsel %vm2959_vm2, %v2930_v10, %v14422_v25  ;;  %v2962_v62 = vsel %vm2959_vm2, %v2929_v57, %v14423_v41  ;;  %v7568_v54 = vld [vmem:[%s7637_s17 + $0x189] sm:$0xff]  ;;  %v4630_v30 = vsel %vm3091_vm6, %v4598_v9, %v4241_v39  ;;  %v4369_v15 = vpop.permute.xlu0 %4368  ;;  %v14424_v50 = vld [vmem:[#allocation58_spill] sm:$0xff]  ;;  %v14427_v3 = vld [vmem:[#allocation61_spill] sm:$0xff] }
 0x60e   : > { %v4439_v17 = vsel %vm2893_vm0, %v7568_v54, %v10845_v18  ;;  %v2965_v19 = vsel %vm2959_vm2, %v2932_v48, %v14424_v50  ;;  %v14425_v11 = vld [vmem:[#allocation59_spill] sm:$0xff]  ;;  %v14426_v59 = vld [vmem:[#allocation60_spill] sm:$0xff]  ;;  %v4662_v57 = vsel %vm13613_vm7, %v4630_v30, %v4369_v15  ;;  %v2966_v0 = vsel %vm2959_vm2, %v2933_v61, %v14427_v3  ;;  %v14428_v18 = vld [vmem:[#allocation62_spill] sm:$0xff] }
 0x60f   : > { %v2964_v5 = vsel %vm2959_vm2, %v2931_v34, %v14425_v11  ;;  %v2967_v10 = vsel %vm2959_vm2, %v2934_v49, %v14426_v59  ;;  %v2969_v39 = vsel %vm2959_vm2, %v2936_v45, %v14428_v18  ;;  %v14429_v32 = vld [vmem:[#allocation63_spill] sm:$0xff]  ;;  %v14430_v51 = vld [vmem:[#allocation64_spill] sm:$0xff]  ;;  %4752 = vrot.lane.b32.xlu0 %v4662_v57, %s7600_s28  ;;  %v14431_v34 = vld [vmem:[#allocation65_spill] sm:$0xff]  ;;  %v4471_v45 = vsel %vm2926_vm1, %v4439_v17, %v10920_v29 }
 0x610   : > { %v2968_v16 = vsel %vm2959_vm2, %v2935_v38, %v14429_v32  ;;  %v2971_v48 = vsel %vm2959_vm2, %v2938_v60, %v14430_v51  ;;  %v2970_v1 = vsel %vm2959_vm2, %v2937_v13, %v14431_v34  ;;  %v14432_v49 = vld [vmem:[#allocation66_spill] sm:$0xff]  ;;  %v14433_v40 = vld [vmem:[#allocation67_spill] sm:$0xff]  ;;  %v14434_v9 = vld [vmem:[#allocation68_spill] sm:$0xff]  ;;  %v4503_v13 = vsel %vm2959_vm2, %v4471_v45, %v10996_v31 }
 0x611   : > { %v2973_v47 = vsel %vm2959_vm2, %v2940_v12, %v14432_v49  ;;  %v2972_v61 = vsel %vm2959_vm2, %v2939_v46, %v14433_v40  ;;  %v2975_v38 = vsel %vm2959_vm2, %v2942_v8, %v14434_v9  ;;  %v14435_v25 = vld [vmem:[#allocation69_spill] sm:$0xff]  ;;  %v14436_v41 = vld [vmem:[#allocation70_spill] sm:$0xff]  ;;  %v11447_v12 = vpop.permute.xlu1 %3988  ;;  %v11449_v30 = vpop.permute.xlu0 %3862  ;;  %v14437_v46 = vld [vmem:[#allocation71_spill] sm:$0xff] }
 0x612   : > { %v2974_v60 = vsel %vm2959_vm2, %v2941_v21, %v14435_v25  ;;  %v2977_v54 = vsel %vm2959_vm2, %v2944_v44, %v14436_v41  ;;  %v2976_v15 = vsel %vm2959_vm2, %v2943_v42, %v14437_v46  ;;  %v14438_v29 = vld [vmem:[#allocation72_spill] sm:$0xff]  ;;  %v14439_v8 = vld [vmem:[#allocation73_spill] sm:$0xff]  ;;  %v4535_v21 = vsel %vm2992_vm3, %v4503_v13, %v11112_v56  ;;  %v14440_v44 = vld [vmem:[#allocation74_spill] sm:$0xff] }
 0x613   : > { %v2979_v17 = vsel %vm2959_vm2, %v2946_v14, %v14438_v29  ;;  %v2978_v50 = vsel %vm2959_vm2, %v2945_v37, %v14439_v8  ;;  %v2981_v11 = vsel %vm2959_vm2, %v2948_v36, %v14440_v44  ;;  %v14441_v31 = vld [vmem:[#allocation75_spill] sm:$0xff]  ;;  %v14442_v57 = vld [vmem:[#allocation76_spill] sm:$0xff]  ;;  %v4567_v42 = vsel %vm3025_vm4, %v4535_v21, %v11191_v35  ;;  %v7569_v18 = vld [vmem:[%s7637_s17 + $0x198] sm:$0xff] }
 0x614   : > { %v2980_v59 = vsel %vm2959_vm2, %v2947_v20, %v14441_v31  ;;  %v2983_v3 = vsel %vm2959_vm2, %v2950_v24, %v14442_v57  ;;  %2853 = vrot.lane.b32.xlu0 %v7569_v18, %s7599_s5  ;;  %v14443_v14 = vld [vmem:[#allocation77_spill] sm:$0xff]  ;;  %v14444_v32 = vld [vmem:[#allocation78_spill] sm:$0xff]  ;;  %v14445_v51 = vld [vmem:[#allocation79_spill] sm:$0xff]  ;;  %v4599_v20 = vsel %vm3058_vm5, %v4567_v42, %v11285_v7 }
 0x615   : > { %v2982_v37 = vsel %vm2959_vm2, %v2949_v55, %v14443_v14  ;;  %v2985_v56 = vsel %vm2959_vm2, %v2952_v27, %v14444_v32  ;;  %v2984_v36 = vsel %vm2959_vm2, %v2951_v26, %v14445_v51  ;;  %v14446_v34 = vld [vmem:[#allocation80_spill] sm:$0xff]  ;;  %v14447_v49 = vld [vmem:[#allocation81_spill] sm:$0xff]  ;;  %v14448_v40 = vld [vmem:[#allocation82_spill] sm:$0xff]  ;;  %v4631_v55 = vsel %vm3091_vm6, %v4599_v20, %v4243_v58  ;;  %v11484_v9 = vpop.permute.xlu1 %3482  ;;  %v4371_v27 = vpop.permute.xlu0 %4370 }
 0x616   : > { %v2994_v24 = vsel %vm2992_vm3, %v2961_v43, %v14446_v34  ;;  %v2993_v35 = vsel %vm2992_vm3, %v2960_v28, %v14447_v49  ;;  %v2996_v45 = vsel %vm2992_vm3, %v2963_v2, %v14448_v40  ;;  %v14449_v25 = vld [vmem:[#allocation83_spill] sm:$0xff]  ;;  %v14450_v41 = vld [vmem:[#allocation84_spill] sm:$0xff]  ;;  %v14451_v13 = vld [vmem:[#allocation85_spill] sm:$0xff]  ;;  %v4663_v46 = vsel %vm13613_vm7, %v4631_v55, %v4371_v27 }
 0x617   : > { %v2995_v26 = vsel %vm2992_vm3, %v2962_v62, %v14449_v25  ;;  %v2998_v7 = vsel %vm2992_vm3, %v2965_v19, %v14450_v41  ;;  %v2997_v43 = vsel %vm2992_vm3, %v2964_v5, %v14451_v13  ;;  %v14452_v28 = vld [vmem:[#allocation86_spill] sm:$0xff]  ;;  %v14453_v2 = vld [vmem:[#allocation87_spill] sm:$0xff]  ;;  %v14454_v8 = vld [vmem:[#allocation88_spill] sm:$0xff]  ;;  %4754 = vrot.lane.b32.xlu1 %v4663_v46, %s7600_s28 }
 0x618   : > { %v3000_v29 = vsel %vm2992_vm3, %v2967_v10, %v14452_v28  ;;  %v2999_v58 = vsel %vm2992_vm3, %v2966_v0, %v14453_v2  ;;  %v3002_v21 = vsel %vm2992_vm3, %v2969_v39, %v14454_v8  ;;  %v14455_v44 = vld [vmem:[#allocation89_spill] sm:$0xff]  ;;  %v14456_v19 = vld [vmem:[#allocation90_spill] sm:$0xff]  ;;  %v14457_v5 = vld [vmem:[#allocation91_spill] sm:$0xff] }
 0x619   : > { %v3001_v62 = vsel %vm2992_vm3, %v2968_v16, %v14455_v44  ;;  %v3004_v31 = vsel %vm2992_vm3, %v2971_v48, %v14456_v19  ;;  %v3003_v57 = vsel %vm2992_vm3, %v2970_v1, %v14457_v5  ;;  %v14458_v42 = vld [vmem:[#allocation92_spill] sm:$0xff]  ;;  %v14459_v18 = vld [vmem:[#allocation93_spill] sm:$0xff]  ;;  %v14460_v14 = vld [vmem:[#allocation94_spill] sm:$0xff]  ;;  %v11518_v1 = vpop.permute.xlu1 %3990  ;;  %v11520_v49 = vpop.permute.xlu0 %3608 }
 0x61a   : > { %v3006_v10 = vsel %vm2992_vm3, %v2973_v47, %v14458_v42  ;;  %v3005_v0 = vsel %vm2992_vm3, %v2972_v61, %v14459_v18  ;;  %v3008_v39 = vsel %vm2992_vm3, %v2975_v38, %v14460_v14  ;;  %v14461_v32 = vld [vmem:[#allocation95_spill] sm:$0xff]  ;;  %v14462_v51 = vld [vmem:[#allocation96_spill] sm:$0xff]  ;;  %v14463_v48 = vld [vmem:[#allocation97_spill] sm:$0xff] }
 0x61b   : > { %v3007_v16 = vsel %vm2992_vm3, %v2974_v60, %v14461_v32  ;;  %v3010_v20 = vsel %vm2992_vm3, %v2977_v54, %v14462_v51  ;;  %v3009_v34 = vsel %vm2992_vm3, %v2976_v15, %v14463_v48  ;;  %v14464_v47 = vld [vmem:[#allocation98_spill] sm:$0xff]  ;;  %v14465_v61 = vld [vmem:[#allocation99_spill] sm:$0xff]  ;;  %v14466_v38 = vld [vmem:[#allocation100_spill] sm:$0xff] }
 0x61c   : > { %v3012_v40 = vsel %vm2992_vm3, %v2979_v17, %v14464_v47  ;;  %v3011_v55 = vsel %vm2992_vm3, %v2978_v50, %v14465_v61  ;;  %v3014_v27 = vsel %vm2992_vm3, %v2981_v11, %v14466_v38  ;;  %v14467_v60 = vld [vmem:[#allocation101_spill] sm:$0xff]  ;;  %v14468_v54 = vld [vmem:[#allocation102_spill] sm:$0xff]  ;;  %v14469_v15 = vld [vmem:[#allocation103_spill] sm:$0xff] }
 0x61d   : > { %v3013_v25 = vsel %vm2992_vm3, %v2980_v59, %v14467_v60  ;;  %v3016_v41 = vsel %vm2992_vm3, %v2983_v3, %v14468_v54  ;;  %v3015_v13 = vsel %vm2992_vm3, %v2982_v37, %v14469_v15  ;;  %v14470_v46 = vld [vmem:[#allocation104_spill] sm:$0xff]  ;;  %v14471_v2 = vld [vmem:[#allocation105_spill] sm:$0xff]  ;;  %v7570_v8 = vld [vmem:[%s7637_s17 + $0x1a0] sm:$0xff]  ;;  %v11556_v48 = vpop.permute.xlu1 %3610 }
 0x61e   : > { %v3018_v28 = vsel %vm2992_vm3, %v2985_v56, %v14470_v46  ;;  %v3017_v17 = vsel %vm2992_vm3, %v2984_v36, %v14471_v2  ;;  %2855 = vrot.lane.b32.xlu1 %v7570_v8, %s7599_s5  ;;  %v14472_v50 = vld [vmem:[#allocation106_spill] sm:$0xff]  ;;  %v14473_v44 = vld [vmem:[#allocation107_spill] sm:$0xff]  ;;  %v14474_v19 = vld [vmem:[#allocation108_spill] sm:$0xff] }
 0x61f   : > { %v3027_v11 = vsel %vm3025_vm4, %v2994_v24, %v14472_v50  ;;  %v3026_v59 = vsel %vm3025_vm4, %v2993_v35, %v14473_v44  ;;  %v3029_v3 = vsel %vm3025_vm4, %v2996_v45, %v14474_v19  ;;  %v14475_v5 = vld [vmem:[#allocation109_spill] sm:$0xff]  ;;  %v14476_v42 = vld [vmem:[#allocation110_spill] sm:$0xff]  ;;  %v14477_v18 = vld [vmem:[#allocation111_spill] sm:$0xff]  ;;  %v11558_v35 = vpop.permute.xlu0 %4116 }
 0x620   : > { %v3028_v37 = vsel %vm3025_vm4, %v2995_v26, %v14475_v5  ;;  %v3031_v56 = vsel %vm3025_vm4, %v2998_v7, %v14476_v42  ;;  %v3030_v36 = vsel %vm3025_vm4, %v2997_v43, %v14477_v18  ;;  %v14478_v14 = vld [vmem:[#allocation112_spill] sm:$0xff]  ;;  %v14479_v51 = vld [vmem:[#allocation113_spill] sm:$0xff]  ;;  %v14480_v45 = vld [vmem:[#allocation114_spill] sm:$0xff] }
 0x621   : > { %v3033_v32 = vsel %vm3025_vm4, %v3000_v29, %v14478_v14  ;;  %v3032_v24 = vsel %vm3025_vm4, %v2999_v58, %v14479_v51  ;;  %v3035_v47 = vsel %vm3025_vm4, %v3002_v21, %v14480_v45  ;;  %v14481_v26 = vld [vmem:[#allocation115_spill] sm:$0xff]  ;;  %v14482_v7 = vld [vmem:[#allocation116_spill] sm:$0xff]  ;;  %v14483_v43 = vld [vmem:[#allocation117_spill] sm:$0xff]  ;;  %v11592_v45 = vpop.permute.xlu1 %4118 }
 0x622   : > { %v3034_v61 = vsel %vm3025_vm4, %v3001_v62, %v14481_v26  ;;  %v3037_v38 = vsel %vm3025_vm4, %v3004_v31, %v14482_v7  ;;  %v3036_v60 = vsel %vm3025_vm4, %v3003_v57, %v14483_v43  ;;  %v14484_v29 = vld [vmem:[#allocation118_spill] sm:$0xff]  ;;  %v14485_v58 = vld [vmem:[#allocation119_spill] sm:$0xff]  ;;  %v14486_v46 = vld [vmem:[#allocation120_spill] sm:$0xff] }
 0x623   : > { %v3039_v54 = vsel %vm3025_vm4, %v3006_v10, %v14484_v29  ;;  %v3038_v15 = vsel %vm3025_vm4, %v3005_v0, %v14485_v58  ;;  %v3041_v2 = vsel %vm3025_vm4, %v3008_v39, %v14486_v46  ;;  %v14487_v8 = vld [vmem:[#allocation121_spill] sm:$0xff]  ;;  %v14488_v50 = vld [vmem:[#allocation122_spill] sm:$0xff]  ;;  %v14489_v44 = vld [vmem:[#allocation123_spill] sm:$0xff] }
 0x624   : > { %v3040_v21 = vsel %vm3025_vm4, %v3007_v16, %v14487_v8  ;;  %v3043_v62 = vsel %vm3025_vm4, %v3010_v20, %v14488_v50  ;;  %v3042_v31 = vsel %vm3025_vm4, %v3009_v34, %v14489_v44  ;;  %v14490_v19 = vld [vmem:[#allocation124_spill] sm:$0xff]  ;;  %v14491_v5 = vld [vmem:[#allocation125_spill] sm:$0xff]  ;;  %v14492_v42 = vld [vmem:[#allocation126_spill] sm:$0xff]  ;;  %v11594_v34 = vpop.permute.xlu0 %3736 }
 0x625   : > { %v3045_v57 = vsel %vm3025_vm4, %v3012_v40, %v14490_v19  ;;  %v3044_v10 = vsel %vm3025_vm4, %v3011_v55, %v14491_v5  ;;  %v3047_v0 = vsel %vm3025_vm4, %v3014_v27, %v14492_v42  ;;  %v14493_v18 = vld [vmem:[#allocation127_spill] sm:$0xff]  ;;  %v14494_v14 = vld [vmem:[#allocation128_spill] sm:$0xff]  ;;  %v14495_v51 = vld [vmem:[#allocation129_spill] sm:$0xff] }
 0x626   : > { %v3046_v39 = vsel %vm3025_vm4, %v3013_v25, %v14493_v18  ;;  %v3049_v16 = vsel %vm3025_vm4, %v3016_v41, %v14494_v14  ;;  %v3048_v20 = vsel %vm3025_vm4, %v3015_v13, %v14495_v51  ;;  %v14496_v40 = vld [vmem:[#allocation130_spill] sm:$0xff]  ;;  %v14497_v55 = vld [vmem:[#allocation131_spill] sm:$0xff]  ;;  %v14498_v27 = vld [vmem:[#allocation132_spill] sm:$0xff] }
 0x627   : > { %v3051_v26 = vsel %vm3025_vm4, %v3018_v28, %v14496_v40  ;;  %v3050_v7 = vsel %vm3025_vm4, %v3017_v17, %v14497_v55  ;;  %v3060_v43 = vsel %vm3058_vm5, %v3027_v11, %v14498_v27  ;;  %v14499_v25 = vld [vmem:[#allocation133_spill] sm:$0xff]  ;;  %v14500_v41 = vld [vmem:[#allocation134_spill] sm:$0xff]  ;;  %v14501_v13 = vld [vmem:[#allocation135_spill] sm:$0xff] }
 0x628   : > { %v3059_v29 = vsel %vm3058_vm5, %v3026_v59, %v14499_v25  ;;  %v3062_v58 = vsel %vm3058_vm5, %v3029_v3, %v14500_v41  ;;  %v3061_v46 = vsel %vm3058_vm5, %v3028_v37, %v14501_v13  ;;  %v14502_v8 = vld [vmem:[#allocation136_spill] sm:$0xff]  ;;  %v14503_v44 = vld [vmem:[#allocation137_spill] sm:$0xff]  ;;  %v14504_v19 = vld [vmem:[#allocation138_spill] sm:$0xff]  ;;  %v4245_v27 = vpop.permute.xlu0 %4244 }
 0x629   : > { %v3064_v50 = vsel %vm3058_vm5, %v3031_v56, %v14502_v8  ;;  %v3063_v28 = vsel %vm3058_vm5, %v3030_v36, %v14503_v44  ;;  %v3066_v17 = vsel %vm3058_vm5, %v3033_v32, %v14504_v19  ;;  %v14505_v5 = vld [vmem:[#allocation139_spill] sm:$0xff]  ;;  %v14506_v42 = vld [vmem:[#allocation140_spill] sm:$0xff]  ;;  %v14507_v3 = vld [vmem:[#allocation141_spill] sm:$0xff] }
 0x62a   : > { %v3065_v11 = vsel %vm3058_vm5, %v3032_v24, %v14505_v5  ;;  %v3068_v59 = vsel %vm3058_vm5, %v3035_v47, %v14506_v42  ;;  %v3067_v18 = vsel %vm3058_vm5, %v3034_v61, %v14507_v3  ;;  %v14508_v37 = vld [vmem:[#allocation142_spill] sm:$0xff]  ;;  %v14509_v56 = vld [vmem:[#allocation143_spill] sm:$0xff]  ;;  %v14510_v36 = vld [vmem:[#allocation144_spill] sm:$0xff]  ;;  %v11628_v24 = vpop.permute.xlu1 %3738 }
 0x62b   : > { %v3070_v14 = vsel %vm3058_vm5, %v3037_v38, %v14508_v37  ;;  %v3069_v51 = vsel %vm3058_vm5, %v3036_v60, %v14509_v56  ;;  %v3072_v40 = vsel %vm3058_vm5, %v3039_v54, %v14510_v36  ;;  %v14511_v32 = vld [vmem:[#allocation145_spill] sm:$0xff]  ;;  %v14512_v25 = vld [vmem:[#allocation146_spill] sm:$0xff]  ;;  %v14513_v61 = vld [vmem:[#allocation147_spill] sm:$0xff] }
 0x62c   : > { %v3071_v55 = vsel %vm3058_vm5, %v3038_v15, %v14511_v32  ;;  %v3074_v47 = vsel %vm3058_vm5, %v3041_v2, %v14512_v25  ;;  %v3073_v41 = vsel %vm3058_vm5, %v3040_v21, %v14513_v61  ;;  %v14514_v38 = vld [vmem:[#allocation148_spill] sm:$0xff]  ;;  %v14515_v60 = vld [vmem:[#allocation149_spill] sm:$0xff]  ;;  %v14516_v54 = vld [vmem:[#allocation150_spill] sm:$0xff] }
 0x62d   : > { %v3076_v13 = vsel %vm3058_vm5, %v3043_v62, %v14514_v38  ;;  %v3075_v8 = vsel %vm3058_vm5, %v3042_v31, %v14515_v60  ;;  %v3078_v44 = vsel %vm3058_vm5, %v3045_v57, %v14516_v54  ;;  %v14517_v15 = vld [vmem:[#allocation151_spill] sm:$0xff]  ;;  %v14518_v5 = vld [vmem:[#allocation152_spill] sm:$0xff]  ;;  %v7571_v3 = vld [vmem:[%s7637_s17 + $0x199] sm:$0xff] }
 0x62e   : > { %v3077_v19 = vsel %vm3058_vm5, %v3044_v10, %v14517_v15  ;;  %v3080_v42 = vsel %vm3058_vm5, %v3047_v0, %v14518_v5  ;;  %v4440_v2 = vsel %vm2893_vm0, %v7571_v3, %v11072_v23  ;;  %v14519_v21 = vld [vmem:[#allocation153_spill] sm:$0xff]  ;;  %v14520_v62 = vld [vmem:[#allocation154_spill] sm:$0xff]  ;;  %v14521_v31 = vld [vmem:[#allocation155_spill] sm:$0xff]  ;;  %v4247_v61 = vpop.permute.xlu1 %4246 }
 0x62f   : > { %v3079_v37 = vsel %vm3058_vm5, %v3046_v39, %v14519_v21  ;;  %v3082_v56 = vsel %vm3058_vm5, %v3049_v16, %v14520_v62  ;;  %v3081_v36 = vsel %vm3058_vm5, %v3048_v20, %v14521_v31  ;;  %v4472_v57 = vsel %vm2926_vm1, %v4440_v2, %v11193_v22  ;;  %v14522_v10 = vld [vmem:[#allocation156_spill] sm:$0xff]  ;;  %v14523_v0 = vld [vmem:[#allocation157_spill] sm:$0xff]  ;;  %v7572_v23 = vld [vmem:[%s7637_s17 + $0x1a1] sm:$0xff]  ;;  %v11668_v20 = vpop.permute.xlu0 %3864 }
 0x630   : > { %v11657_v32 = vsel %vm3058_vm5, %v3051_v26, %v14522_v10  ;;  %v11661_v25 = vsel %vm3058_vm5, %v3050_v7, %v14523_v0  ;;  %v4441_v39 = vsel %vm2893_vm0, %v7572_v23, %v11148_v4  ;;  %v4504_v16 = vsel %vm2959_vm2, %v4472_v57, %v11287_v52  ;;  %v14524_v38 = vld [vmem:[#allocation158_spill] sm:$0xff]  ;;  %v14525_v60 = vld [vmem:[#allocation159_spill] sm:$0xff]  ;;  %v14526_v54 = vld [vmem:[#allocation160_spill] sm:$0xff] }
 0x631   : > { %v3093_v22 = vsel %vm3091_vm6, %v3060_v43, %v14524_v38  ;;  %v3092_v26 = vsel %vm3091_vm6, %v3059_v29, %v14525_v60  ;;  %v3095_v7 = vsel %vm3091_vm6, %v3062_v58, %v14526_v54  ;;  %v4536_v15 = vsel %vm2992_vm3, %v4504_v16, %v11379_v53  ;;  %v14527_v5 = vld [vmem:[#allocation161_spill] sm:$0xff]  ;;  %v14528_v3 = vld [vmem:[#allocation162_spill] sm:$0xff]  ;;  %v14529_v2 = vld [vmem:[#allocation163_spill] sm:$0xff] }
 0x632   : > { %v3094_v4 = vsel %vm3091_vm6, %v3061_v46, %v14527_v5  ;;  %v3097_v52 = vsel %vm3091_vm6, %v3064_v50, %v14528_v3  ;;  %v3096_v21 = vsel %vm3091_vm6, %v3063_v28, %v14529_v2  ;;  %v4568_v43 = vsel %vm3025_vm4, %v4536_v15, %v11447_v12  ;;  %v14530_v62 = vld [vmem:[#allocation164_spill] sm:$0xff]  ;;  %v14531_v31 = vld [vmem:[#allocation165_spill] sm:$0xff]  ;;  %v14532_v57 = vld [vmem:[#allocation166_spill] sm:$0xff]  ;;  %v11701_v0 = vpop.permute.xlu1 %3866 }
 0x633   : > { %v3099_v29 = vsel %vm3091_vm6, %v3066_v17, %v14530_v62  ;;  %v3098_v58 = vsel %vm3091_vm6, %v3065_v11, %v14531_v31  ;;  %v4473_v53 = vsel %vm2926_vm1, %v4441_v39, %v11240_v6  ;;  %v4600_v46 = vsel %vm3058_vm5, %v4568_v43, %v11558_v35  ;;  %v14533_v10 = vld [vmem:[#allocation167_spill] sm:$0xff]  ;;  %v4373_v11 = vpop.permute.xlu0 %4372  ;;  %v14534_v23 = vld [vmem:[#allocation168_spill] sm:$0xff]  ;;  %v14535_v39 = vld [vmem:[#allocation169_spill] sm:$0xff] }
 0x634   : > { %v3101_v50 = vsel %vm3091_vm6, %v3068_v59, %v14532_v57  ;;  %v3100_v28 = vsel %vm3091_vm6, %v3067_v18, %v14533_v10  ;;  %v4505_v12 = vsel %vm2959_vm2, %v4473_v53, %v11334_v33  ;;  %v4632_v17 = vsel %vm3091_vm6, %v4600_v46, %v4245_v27  ;;  %v14536_v18 = vld [vmem:[#allocation170_spill] sm:$0xff]  ;;  %v14537_v33 = vld [vmem:[#allocation171_spill] sm:$0xff]  ;;  %v14538_v60 = vld [vmem:[#allocation172_spill] sm:$0xff] }
 0x635   : > { %v3103_v6 = vsel %vm3091_vm6, %v3070_v14, %v14534_v23  ;;  %v3102_v35 = vsel %vm3091_vm6, %v3069_v51, %v14535_v39  ;;  %v4537_v59 = vsel %vm2992_vm3, %v4505_v12, %v11449_v30  ;;  %v4664_v16 = vsel %vm13613_vm7, %v4632_v17, %v4373_v11  ;;  %v14539_v51 = vld [vmem:[#allocation173_spill] sm:$0xff]  ;;  %v14540_v30 = vld [vmem:[#allocation174_spill] sm:$0xff]  ;;  %v14541_v3 = vld [vmem:[#allocation175_spill] sm:$0xff] }
 0x636   : > { %v3105_v38 = vsel %vm3091_vm6, %v3072_v40, %v14536_v18  ;;  %v3104_v27 = vsel %vm3091_vm6, %v3071_v55, %v14537_v33  ;;  %v3107_v54 = vsel %vm3091_vm6, %v3074_v47, %v14538_v60  ;;  %v4569_v14 = vsel %vm3025_vm4, %v4537_v59, %v11518_v1  ;;  %4756 = vrot.lane.b32.xlu0 %v4664_v16, %s7600_s28  ;;  %v14542_v2 = vld [vmem:[#allocation176_spill] sm:$0xff]  ;;  %v14543_v43 = vld [vmem:[#allocation177_spill] sm:$0xff]  ;;  %v14544_v62 = vld [vmem:[#allocation178_spill] sm:$0xff]  ;;  %v4375_v53 = vpop.permute.xlu1 %4374 }
 0x637   : > { %v3106_v15 = vsel %vm3091_vm6, %v3073_v41, %v14539_v51  ;;  %v3109_v5 = vsel %vm3091_vm6, %v3076_v13, %v14540_v30  ;;  %v3108_v40 = vsel %vm3091_vm6, %v3075_v8, %v14541_v3  ;;  %v4601_v55 = vsel %vm3058_vm5, %v4569_v14, %v11592_v45  ;;  %v11734_v13 = vpop.permute.xlu0 %3992  ;;  %v14545_v46 = vld [vmem:[#allocation179_spill] sm:$0xff]  ;;  %v14546_v57 = vld [vmem:[#allocation180_spill] sm:$0xff]  ;;  %v14547_v10 = vld [vmem:[#allocation181_spill] sm:$0xff] }
 0x638   : > { %v3111_v47 = vsel %vm3091_vm6, %v3078_v44, %v14542_v2  ;;  %v3110_v1 = vsel %vm3091_vm6, %v3077_v19, %v14543_v43  ;;  %v3113_v31 = vsel %vm3091_vm6, %v3080_v42, %v14544_v62  ;;  %v4633_v41 = vsel %vm3091_vm6, %v4601_v55, %v4247_v61  ;;  %v14548_v19 = vld [vmem:[#allocation186_spill] sm:$0xff]  ;;  %v14549_v42 = vld [vmem:[#allocation187_spill] sm:$0xff]  ;;  %v14550_v11 = vld [vmem:[#allocation188_spill] sm:$0xff] }
 0x639   : > { %v3112_v8 = vsel %vm3091_vm6, %v3079_v37, %v14545_v46  ;;  %v3115_v45 = vsel %vm3091_vm6, %v3082_v56, %v14546_v57  ;;  %v3114_v44 = vsel %vm3091_vm6, %v3081_v36, %v14547_v10  ;;  %v4665_v12 = vsel %vm13613_vm7, %v4633_v41, %v4375_v53  ;;  %v7573_v37 = vld [vmem:[%s7637_s17 + $0x1b0] sm:$0xff]  ;;  %v14551_v56 = vld [vmem:[#allocation189_spill] sm:$0xff]  ;;  %v14552_v36 = vld [vmem:[#allocation190_spill] sm:$0xff] }
 0x63a   : > { %v3126_v17 = vsel %vm13613_vm7, %v3093_v22, %v14548_v19  ;;  %v3125_v61 = vsel %vm13613_vm7, %v3092_v26, %v14549_v42  ;;  %v3128_v23 = vsel %vm13613_vm7, %v3095_v7, %v14550_v11  ;;  %4758 = vrot.lane.b32.xlu1 %v4665_v12, %s7600_s28  ;;  %2857 = vrot.lane.b32.xlu0 %v7573_v37, %s7599_s5  ;;  %v14553_v16 = vld [vmem:[#allocation191_spill] sm:$0xff]  ;;  %v14554_v18 = vld [vmem:[#allocation192_spill] sm:$0xff]  ;;  %v14555_v7 = vld [vmem:[#allocation193_spill] sm:$0xff]  ;;  %v4121_v30 = vpop.permute.xlu1 %4120 }
 0x63b   : > { %v3127_v39 = vsel %vm13613_vm7, %v3094_v4, %v14551_v56  ;;  %v3130_v59 = vsel %vm13613_vm7, %v3097_v52, %v14552_v36  ;;  %v3129_v22 = vsel %vm13613_vm7, %v3096_v21, %v14553_v16  ;;  %v11760_v26 = vsel %vm13613_vm7, %v3099_v29, %v14554_v18  ;;  %v14556_v60 = vld [vmem:[#allocation194_spill] sm:$0xff]  ;;  %v14557_v4 = vld [vmem:[#allocation195_spill] sm:$0xff]  ;;  %v14558_v52 = vld [vmem:[#allocation196_spill] sm:$0xff]  ;;  %v11778_v3 = vpop.permute.xlu0 %3994 }
 0x63c   : > { %v11764_v33 = vsel %vm13613_vm7, %v3098_v58, %v14555_v7  ;;  %v11768_v14 = vsel %vm13613_vm7, %v3101_v50, %v14556_v60  ;;  %v11772_v51 = vsel %vm13613_vm7, %v3100_v28, %v14557_v4  ;;  %v11776_v21 = vsel %vm13613_vm7, %v3103_v6, %v14558_v52  ;;  %v14559_v29 = vld [vmem:[#allocation197_spill] sm:$0xff]  ;;  %v14560_v58 = vld [vmem:[#allocation198_spill] sm:$0xff]  ;;  %v14561_v50 = vld [vmem:[#allocation199_spill] sm:$0xff] }
 0x63d   : > { %v11782_v55 = vsel %vm13613_vm7, %v3102_v35, %v14559_v29  ;;  %v11786_v2 = vsel %vm13613_vm7, %v3105_v38, %v14560_v58  ;;  %v11790_v43 = vsel %vm13613_vm7, %v3104_v27, %v14561_v50  ;;  %v14562_v28 = vld [vmem:[#allocation200_spill] sm:$0xff]  ;;  %v14563_v6 = vld [vmem:[#allocation201_spill] sm:$0xff]  ;;  %v14564_v53 = vld [vmem:[#allocation202_spill] sm:$0xff] }
 0x63e   : > { %v11794_v62 = vsel %vm13613_vm7, %v3107_v54, %v14562_v28  ;;  %v11798_v41 = vsel %vm13613_vm7, %v3106_v15, %v14563_v6  ;;  %v11802_v35 = vsel %vm13613_vm7, %v3109_v5, %v14564_v53  ;;  %v14565_v46 = vld [vmem:[#allocation203_spill] sm:$0xff]  ;;  %v7574_v10 = vld [vmem:[%s7637_s17 + $0x1b8] sm:$0xff]  ;;  %v14567_v54 = vld [vmem:[#allocation204_spill] sm:$0xff] }
 0x63f   : > { %v11806_v38 = vsel %vm13613_vm7, %v3108_v40, %v14565_v46  ;;  %v14566_v57 = vld [vmem:[#allocation215_spill] sm:$0xff]  ;;  %2859 = vrot.lane.b32.xlu1 %v7574_v10, %s7599_s5  ;;  %v11814_v12 = vsel %vm13613_vm7, %v3111_v47, %v14567_v54  ;;  %v14568_v15 = vld [vmem:[#allocation205_spill] sm:$0xff]  ;;  %v14569_v5 = vld [vmem:[#allocation206_spill] sm:$0xff]  ;;  %v4123_v18 = vpop.permute.xlu0 %4122 }
 0x640   : > { %v3158_v27 = vsel %vm3157_vm8, %v3125_v61, %v14566_v57  ;;  %v11818_v19 = vsel %vm13613_vm7, %v3110_v1, %v14568_v15  ;;  %v11822_v42 = vsel %vm13613_vm7, %v3113_v31, %v14569_v5  ;;  %v14570_v40 = vld [vmem:[#allocation243_spill] sm:$0xff]  ;;  %v14572_v56 = vld [vmem:[#allocation208_spill] sm:$0xff]  ;;  %v4249_v1 = vpop.permute.xlu1 %4248  ;;  %v14574_v7 = vld [vmem:[#allocation209_spill] sm:$0xff] }
 0x641   : > { %v3191_v11 = vsel %vm3190_vm9, %v3158_v27, %v14570_v40  ;;  %v14571_v61 = vld [vmem:[#allocation207_spill] sm:$0xff]  ;;  %v11832_v47 = vsel %vm13613_vm7, %v3115_v45, %v14572_v56  ;;  %v11838_v31 = vsel %vm13613_vm7, %v3114_v44, %v14574_v7  ;;  %v14575_v60 = vld [vmem:[#allocation214_spill] sm:$0xff]  ;;  %v14577_v45 = vld [vmem:[#allocation216_spill] sm:$0xff] }
 0x642   : > { %v11828_v37 = vsel %vm13613_vm7, %v3112_v8, %v14571_v61  ;;  %v14573_v36 = vld [vmem:[#allocation275_spill] sm:$0xff]  ;;  %v3159_v4 = vsel %vm3157_vm8, %v3126_v17, %v14575_v60  ;;  %v14576_v8 = vld [vmem:[#allocation185_spill] sm:$0xff]  ;;  %v3161_v29 = vsel %vm3157_vm8, %v3128_v23, %v14577_v45  ;;  %v14579_v44 = vld [vmem:[#allocation242_spill] sm:$0xff]  ;;  %vm4849_vm7 = vcmask 818176  }
 0x643   : > { %v3224_v16 = vsel %vm3223_vm10, %v3191_v11, %v14573_v36  ;;  %v14578_v58 = vld [vmem:[#allocation327_spill] sm:$0xff]  ;;  %v7575_v28 = vld [vmem:[%s7637_s17 + $0x1b1] sm:$0xff]  ;;  %v3192_v53 = vsel %vm3190_vm9, %v3159_v4, %v14579_v44  ;;  %v14580_v46 = vld [vmem:[#allocation358_spill] sm:$0xff]  ;;  %v4701_v11 = vpop.permute.xlu0 %4700 }
 0x644   : > { %v3257_v52 = vsel %vm3256_vm11, %v3224_v16, %v14576_v8  ;;  %v4442_v6 = vsel %vm2893_vm0, %v7575_v28, %v11413_v63  ;;  %v14581_v27 = vld [vmem:[#allocation274_spill] sm:$0xff]  ;;  %v14582_v10 = vld [vmem:[#allocation381_spill] sm:$0xff]  ;;  %v4251_v40 = vpop.permute.xlu1 %4250  ;;  %v14591_v44 = vld [vmem:[#allocation380_spill] sm:$0xff] }
 0x645   : > { %v3290_v50 = vsel %vm3289_vm12, %v3257_v52, %v14578_v58  ;;  %v4474_v57 = vsel %vm2926_vm1, %v4442_v6, %v11520_v49  ;;  %v3225_v23 = vsel %vm3223_vm10, %v3192_v53, %v14581_v27  ;;  %v7576_v15 = vld [vmem:[%s7637_s17 + $0x1b9] sm:$0xff]  ;;  %v14584_v49 = vld [vmem:[#allocation184_spill] sm:$0xff] }
 0x646   : > { %v3323_v17 = vsel %vm3322_vm14, %v3290_v50, %v14580_v46  ;;  %v4443_v63 = vsel %vm2893_vm0, %v7576_v15, %v11484_v9  ;;  %v4506_v5 = vsel %vm2959_vm2, %v4474_v57, %v11594_v34  ;;  %v14583_v61 = vld [vmem:[#allocation217_spill] sm:$0xff]  ;;  %v3258_v36 = vsel %vm3256_vm11, %v3225_v23, %v14584_v49  ;;  %v14585_v60 = vld [vmem:[#allocation218_spill] sm:$0xff]  ;;  %v14586_v9 = vld [vmem:[#allocation219_spill] sm:$0xff] }
 0x647   : > { %v3356_v54 = vsel %vm3355_vm15, %v3323_v17, %v14582_v10  ;;  %v3160_v56 = vsel %vm3157_vm8, %v3127_v39, %v14583_v61  ;;  %v4538_v16 = vsel %vm2992_vm3, %v4506_v5, %v11668_v20  ;;  %v3163_v4 = vsel %vm3157_vm8, %v3130_v59, %v14585_v60  ;;  %v14587_v34 = vld [vmem:[#allocation326_spill] sm:$0xff]  ;;  %v14588_v45 = vld [vmem:[#allocation245_spill] sm:$0xff]  ;;  %v14589_v20 = vld [vmem:[#allocation251_spill] sm:$0xff]  ;;  %v4377_v57 = vpop.permute.xlu0 %4376 }
 0x648   : > { %v4797_v7 = vsel %vm4796_vm13, %v3356_v54, %v4701_v11  ;;  %v3162_v8 = vsel %vm3157_vm8, %v3129_v22, %v14586_v9  ;;  %v3291_v52 = vsel %vm3289_vm12, %v3258_v36, %v14587_v34  ;;  %v4570_v39 = vsel %vm3025_vm4, %v4538_v16, %v11734_v13  ;;  %v14590_v22 = vld [vmem:[#allocation277_spill] sm:$0xff]  ;;  %v4703_v17 = vpop.permute.xlu1 %4702  ;;  %v14594_v54 = vld [vmem:[#allocation220_spill] sm:$0xff]  ;;  %v14597_v11 = vld [vmem:[#allocation247_spill] sm:$0xff] }
 0x649   : > { %7409 = vmatprep.mubr.msk.f32.mxu0 %vm4849_vm7, %v4797_v7  ;;  %v3193_v58 = vsel %vm3190_vm9, %v3160_v56, %v14588_v45  ;;  %v3324_v50 = vsel %vm3322_vm14, %v3291_v52, %v14589_v20  ;;  %v4475_v59 = vsel %vm2926_vm1, %v4443_v63, %v11556_v48  ;;  %v4602_v28 = vsel %vm3058_vm5, %v4570_v39, %v4121_v30  ;;  %v14592_v27 = vld [vmem:[#allocation213_spill] sm:$0xff]  ;;  %v14596_v5 = vld [vmem:[#allocation244_spill] sm:$0xff]  ;;  %v14598_v56 = vld [vmem:[#allocation250_spill] sm:$0xff] }
 0x64a   : > { %v3226_v6 = vsel %vm3223_vm10, %v3193_v58, %v14590_v22  ;;  %v3357_v53 = vsel %vm3355_vm15, %v3324_v50, %v14591_v44  ;;  %v4507_v13 = vsel %vm2959_vm2, %v4475_v59, %v11628_v24  ;;  %v4634_v46 = vsel %vm3091_vm6, %v4602_v28, %v4249_v1  ;;  %v14595_v63 = vld [vmem:[#allocation329_spill] sm:$0xff]  ;;  %v14599_v36 = vld [vmem:[#allocation276_spill] sm:$0xff]  ;;  %v14600_v7 = vld [vmem:[#allocation279_spill] sm:$0xff] }
 0x64b   : > { %v3259_v23 = vsel %vm3256_vm11, %v3226_v6, %v14592_v27  ;;  %v4539_v48 = vsel %vm2992_vm3, %v4507_v13, %v11701_v0  ;;  %v4798_v30 = vsel %vm4796_vm13, %v3357_v53, %v4703_v17  ;;  %vm14593_vm0 = vcmask 261120   ;;  %v14601_v60 = vld [vmem:[#allocation383_spill] sm:$0xff]  ;;  %v4379_v52 = vpop.permute.xlu0 %4378  ;;  %v14602_v39 = vld [vmem:[#allocation212_spill] sm:$0xff]  ;;  %v14603_v45 = vld [vmem:[#allocation241_spill] sm:$0xff] }
 0x64c   : > { %v4666_v10 = vsel %vm14593_vm0, %v4634_v46, %v4377_v57  ;;  %v3165_v15 = vsel %vm3157_vm8, %v11760_v26, %v14594_v54  ;;  %v3292_v24 = vsel %vm3289_vm12, %v3259_v23, %v14595_v63  ;;  %v4571_v1 = vsel %vm3025_vm4, %v4539_v48, %v11778_v3  ;;  %7410 = vmatmul.mubr.msk.f32.vlgmr.msra.gmra.mxu0 %vm4849_vm7, %v4798_v30  ;;  %vm14604_vm2 = vmmov %vm14593_vm0  ;;  %v14605_v50 = vld [vmem:[#allocation221_spill] sm:$0xff]  ;;  %v14606_v28 = vld [vmem:[#allocation328_spill] sm:$0xff] }
 0x64d   : > { %4760 = vrot.lane.b32.xlu0 %v4666_v10, %s7600_s28  ;;  %v3194_v0 = vsel %vm3190_vm9, %v3161_v29, %v14596_v5  ;;  %v3195_v61 = vsel %vm3190_vm9, %v3162_v8, %v14597_v11  ;;  %v3325_v49 = vsel %vm3322_vm14, %v3292_v24, %v14598_v56  ;;  %v4603_v26 = vsel %vm3058_vm5, %v4571_v1, %v4123_v18  ;;  %v4705_v29 = vpop.permute.xlu1 %4704  ;;  %v14608_v44 = vld [vmem:[#allocation246_spill] sm:$0xff]  ;;  %v14609_v13 = vld [vmem:[#allocation249_spill] sm:$0xff]  ;;  %v14610_v17 = vld [vmem:[#allocation283_spill] sm:$0xff] }
 0x64e   : > { %v3227_v16 = vsel %vm3223_vm10, %v3194_v0, %v14599_v36  ;;  %v3228_v3 = vsel %vm3223_vm10, %v3195_v61, %v14600_v7  ;;  %v3358_v9 = vsel %vm3355_vm15, %v3325_v49, %v14601_v60  ;;  %v4635_v34 = vsel %vm3091_vm6, %v4603_v26, %v4251_v40  ;;  %v14607_v40 = vld [vmem:[#allocation331_spill] sm:$0xff]  ;;  %v14612_v23 = vld [vmem:[#allocation278_spill] sm:$0xff]  ;;  %v14613_v30 = vld [vmem:[#allocation281_spill] sm:$0xff] }
 0x64f   : > { %v3260_v8 = vsel %vm3256_vm11, %v3227_v16, %v14602_v39  ;;  %v3261_v58 = vsel %vm3256_vm11, %v3228_v3, %v14603_v45  ;;  %v4799_v18 = vsel %vm4796_vm13, %v3358_v9, %v4705_v29  ;;  %v4667_v20 = vsel %vm14604_vm2, %v4635_v34, %v4379_v52  ;;  %v14614_v54 = vld [vmem:[#allocation382_spill] sm:$0xff]  ;;  %v14615_v24 = vld [vmem:[#allocation385_spill] sm:$0xff]  ;;  %v4707_v5 = vpop.permute.xlu0 %4706  ;;  %v14616_v0 = vld [vmem:[#allocation240_spill] sm:$0xff] }
 0x650   : > { %v3164_v59 = vsel %vm3157_vm8, %v11764_v33, %v14605_v50  ;;  %v3293_v22 = vsel %vm3289_vm12, %v3260_v8, %v14606_v28  ;;  %v3294_v6 = vsel %vm3289_vm12, %v3261_v58, %v14607_v40  ;;  %4762 = vrot.lane.b32.xlu1 %v4667_v20, %s7600_s28  ;;  %7412 = vmatprep.mubr.msk.f32.mxu0 %vm4849_vm7, %v4799_v18  ;;  %v14611_v33 = vld [vmem:[#allocation359_spill] sm:$0xff]  ;;  %v14617_v61 = vld [vmem:[#allocation273_spill] sm:$0xff]  ;;  %v14618_v36 = vld [vmem:[#allocation222_spill] sm:$0xff]  ;;  %vm6369_vm2 = vcmask 1046534  }
 0x651   : > { %v3196_v53 = vsel %vm3190_vm9, %v3163_v4, %v14608_v44  ;;  %v3197_v46 = vsel %vm3190_vm9, %v3164_v59, %v14609_v13  ;;  %v3326_v57 = vsel %vm3322_vm14, %v3293_v22, %v14610_v17  ;;  %v3327_v27 = vsel %vm3322_vm14, %v3294_v6, %v14611_v33  ;;  %v4709_v1 = vpop.permute.xlu1 %4708  ;;  %v14619_v7 = vld [vmem:[#allocation223_spill] sm:$0xff]  ;;  %v14620_v60 = vld [vmem:[#allocation330_spill] sm:$0xff]  ;;  %v14621_v34 = vld [vmem:[#allocation333_spill] sm:$0xff] }
 0x652   : > { %v3229_v48 = vsel %vm3223_vm10, %v3196_v53, %v14612_v23  ;;  %v3230_v10 = vsel %vm3223_vm10, %v3197_v46, %v14613_v30  ;;  %v3359_v63 = vsel %vm3355_vm15, %v3326_v57, %v14614_v54  ;;  %v3360_v4 = vsel %vm3355_vm15, %v3327_v27, %v14615_v24  ;;  %v14622_v52 = vld [vmem:[#allocation248_spill] sm:$0xff]  ;;  %v14623_v8 = vld [vmem:[#allocation253_spill] sm:$0xff]  ;;  %v14624_v58 = vld [vmem:[#allocation282_spill] sm:$0xff] }
 0x653   : > { %v3262_v11 = vsel %vm3256_vm11, %v3229_v48, %v14616_v0  ;;  %v3263_v56 = vsel %vm3256_vm11, %v3230_v10, %v14617_v61  ;;  %v4801_v49 = vsel %vm4796_vm13, %v3360_v4, %v4709_v1  ;;  %v4800_v26 = vsel %vm4796_vm13, %v3359_v63, %v4707_v5  ;;  %v14625_v18 = vld [vmem:[#allocation361_spill] sm:$0xff]  ;;  %v14626_v20 = vld [vmem:[#allocation280_spill] sm:$0xff]  ;;  %v14629_v40 = vld [vmem:[#allocation387_spill] sm:$0xff]  ;;  %v4711_v53 = vpop.permute.xlu0 %4710 }
 0x654   : > { %v3167_v16 = vsel %vm3157_vm8, %v11768_v14, %v14618_v36  ;;  %v3166_v3 = vsel %vm3157_vm8, %v11772_v51, %v14619_v7  ;;  %v3295_v9 = vsel %vm3289_vm12, %v3262_v11, %v14620_v60  ;;  %v3296_v29 = vsel %vm3289_vm12, %v3263_v56, %v14621_v34  ;;  %7413 = vmatmul.mubr.msk.f32.gmra.mxu0 %vm4849_vm7, %v4800_v26  ;;  %v14627_v59 = vld [vmem:[#allocation285_spill] sm:$0xff]  ;;  %v14628_v22 = vld [vmem:[#allocation384_spill] sm:$0xff]  ;;  %v14635_v24 = vld [vmem:[#allocation335_spill] sm:$0xff] }
 0x655   : > { %v3198_v39 = vsel %vm3190_vm9, %v3165_v15, %v14622_v52  ;;  %v3199_v45 = vsel %vm3190_vm9, %v3166_v3, %v14623_v8  ;;  %v3328_v14 = vsel %vm3322_vm14, %v3295_v9, %v14624_v58  ;;  %v3329_v51 = vsel %vm3322_vm14, %v3296_v29, %v14625_v18  ;;  %7415 = vmatprep.mubr.msk.f32.mxu0 %vm4849_vm7, %v4801_v49  ;;  %v4713_v44 = vpop.permute.xlu1 %4712  ;;  %v14630_v13 = vld [vmem:[#allocation272_spill] sm:$0xff]  ;;  %v14631_v17 = vld [vmem:[#allocation309_spill] sm:$0xff]  ;;  %v14639_v56 = vld [vmem:[#allocation362_spill] sm:$0xff] }
 0x656   : > { %v3231_v50 = vsel %vm3223_vm10, %v3198_v39, %v14626_v20  ;;  %v3232_v28 = vsel %vm3223_vm10, %v3199_v45, %v14627_v59  ;;  %v3361_v15 = vsel %vm3355_vm15, %v3328_v14, %v14628_v22  ;;  %v3362_v6 = vsel %vm3355_vm15, %v3329_v51, %v14629_v40  ;;  %v14632_v23 = vld [vmem:[#allocation224_spill] sm:$0xff]  ;;  %v14633_v30 = vld [vmem:[#allocation225_spill] sm:$0xff]  ;;  %v14642_v3 = vld [vmem:[#allocation386_spill] sm:$0xff] }
 0x657   : > { %v3264_v46 = vsel %vm3256_vm11, %v3231_v50, %v14630_v13  ;;  %v3265_v57 = vsel %vm3256_vm11, %v3232_v28, %v14631_v17  ;;  %v4803_v33 = vsel %vm4796_vm13, %v3362_v6, %v4713_v44  ;;  %v4802_v27 = vsel %vm4796_vm13, %v3361_v15, %v4711_v53  ;;  %v14634_v54 = vld [vmem:[#allocation332_spill] sm:$0xff]  ;;  %v14637_v0 = vld [vmem:[#allocation257_spill] sm:$0xff]  ;;  %v4715_v29 = vpop.permute.xlu0 %4714  ;;  %v14645_v8 = vld [vmem:[#allocation311_spill] sm:$0xff] }
 0x658   : > { %v3169_v48 = vsel %vm3157_vm8, %v11776_v21, %v14632_v23  ;;  %v3168_v10 = vsel %vm3157_vm8, %v11782_v55, %v14633_v30  ;;  %v3297_v63 = vsel %vm3289_vm12, %v3264_v46, %v14634_v54  ;;  %v3298_v4 = vsel %vm3289_vm12, %v3265_v57, %v14635_v24  ;;  %7416 = vmatmul.mubr.msk.f32.gmra.mxu0 %vm4849_vm7, %v4802_v27  ;;  %v14636_v1 = vld [vmem:[#allocation252_spill] sm:$0xff]  ;;  %v14641_v36 = vld [vmem:[#allocation289_spill] sm:$0xff]  ;;  %v14646_v18 = vld [vmem:[#allocation226_spill] sm:$0xff] }
 0x659   : > { %v3200_v5 = vsel %vm3190_vm9, %v3167_v16, %v14636_v1  ;;  %v3201_v11 = vsel %vm3190_vm9, %v3168_v10, %v14637_v0  ;;  %v14638_v61 = vld [vmem:[#allocation360_spill] sm:$0xff]  ;;  %v3331_v55 = vsel %vm3322_vm14, %v3298_v4, %v14639_v56  ;;  %7418 = vmatprep.mubr.msk.f32.mxu0 %vm4849_vm7, %v4803_v33  ;;  %v14643_v60 = vld [vmem:[#allocation389_spill] sm:$0xff]  ;;  %v4717_v34 = vpop.permute.xlu1 %4716  ;;  %v3171_v51 = vsel %vm3157_vm8, %v11786_v2, %v14646_v18  ;;  %v14647_v20 = vld [vmem:[#allocation227_spill] sm:$0xff] }
 0x65a   : > { %v3330_v21 = vsel %vm3322_vm14, %v3297_v63, %v14638_v61  ;;  %v14640_v49 = vld [vmem:[#allocation284_spill] sm:$0xff]  ;;  %v3234_v7 = vsel %vm3223_vm10, %v3201_v11, %v14641_v36  ;;  %v3364_v9 = vsel %vm3355_vm15, %v3331_v55, %v14643_v60  ;;  %v3170_v50 = vsel %vm3157_vm8, %v11790_v43, %v14647_v20  ;;  %v14648_v59 = vld [vmem:[#allocation334_spill] sm:$0xff]  ;;  %v14649_v22 = vld [vmem:[#allocation337_spill] sm:$0xff] }
 0x65b   : > { %v3233_v26 = vsel %vm3223_vm10, %v3200_v5, %v14640_v49  ;;  %v3363_v16 = vsel %vm3355_vm15, %v3330_v21, %v14642_v3  ;;  %v14644_v52 = vld [vmem:[#allocation308_spill] sm:$0xff]  ;;  %v3267_v45 = vsel %vm3256_vm11, %v3234_v7, %v14645_v8  ;;  %v4805_v58 = vsel %vm4796_vm13, %v3364_v9, %v4717_v34  ;;  %v14651_v44 = vld [vmem:[#allocation259_spill] sm:$0xff]  ;;  %v14655_v33 = vld [vmem:[#allocation293_spill] sm:$0xff]  ;;  %v4719_v63 = vpop.permute.xlu0 %4718 }
 0x65c   : > { %v3266_v39 = vsel %vm3256_vm11, %v3233_v26, %v14644_v52  ;;  %v4804_v14 = vsel %vm4796_vm13, %v3363_v16, %v4715_v29  ;;  %v3300_v15 = vsel %vm3289_vm12, %v3267_v45, %v14649_v22  ;;  %v14650_v40 = vld [vmem:[#allocation256_spill] sm:$0xff]  ;;  %v3203_v53 = vsel %vm3190_vm9, %v3170_v50, %v14651_v44  ;;  %v14652_v13 = vld [vmem:[#allocation255_spill] sm:$0xff]  ;;  %v14658_v24 = vld [vmem:[#allocation310_spill] sm:$0xff] }
 0x65d   : > { %v3299_v28 = vsel %vm3289_vm12, %v3266_v39, %v14648_v59  ;;  %7419 = vmatmul.mubr.msk.f32.gmra.mxu0 %vm4849_vm7, %v4804_v14  ;;  %v3202_v6 = vsel %vm3190_vm9, %v3169_v48, %v14650_v40  ;;  %v14653_v46 = vld [vmem:[#allocation363_spill] sm:$0xff]  ;;  %v14654_v17 = vld [vmem:[#allocation288_spill] sm:$0xff]  ;;  %v3236_v27 = vsel %vm3223_vm10, %v3203_v53, %v14655_v33  ;;  %v4721_v54 = vpop.permute.xlu1 %4720  ;;  %v14659_v1 = vld [vmem:[#allocation313_spill] sm:$0xff] }
 0x65e   : > { %v3332_v2 = vsel %vm3322_vm14, %v3299_v28, %v14652_v13  ;;  %v3333_v43 = vsel %vm3322_vm14, %v3300_v15, %v14653_v46  ;;  %7421 = vmatprep.mubr.msk.f32.mxu0 %vm4849_vm7, %v4805_v58  ;;  %v3235_v57 = vsel %vm3223_vm10, %v3202_v6, %v14654_v17  ;;  %v14656_v23 = vld [vmem:[#allocation388_spill] sm:$0xff]  ;;  %v14657_v30 = vld [vmem:[#allocation391_spill] sm:$0xff]  ;;  %v3269_v5 = vsel %vm3256_vm11, %v3236_v27, %v14659_v1  ;;  %v14661_v56 = vld [vmem:[#allocation229_spill] sm:$0xff] }
 0x65f   : > { %v3365_v48 = vsel %vm3355_vm15, %v3332_v2, %v14656_v23  ;;  %v3366_v10 = vsel %vm3355_vm15, %v3333_v43, %v14657_v30  ;;  %v3268_v4 = vsel %vm3256_vm11, %v3235_v57, %v14658_v24  ;;  %v14660_v61 = vld [vmem:[#allocation228_spill] sm:$0xff]  ;;  %v3172_v55 = vsel %vm3157_vm8, %v11798_v41, %v14661_v56  ;;  %v14663_v36 = vld [vmem:[#allocation339_spill] sm:$0xff]  ;;  %v14664_v3 = vld [vmem:[#allocation258_spill] sm:$0xff]  ;;  %v4723_v50 = vpop.permute.xlu0 %4722 }
 0x660   : > { %v4807_v0 = vsel %vm4796_vm13, %v3366_v10, %v4721_v54  ;;  %v4806_v11 = vsel %vm4796_vm13, %v3365_v48, %v4719_v63  ;;  %v3173_v21 = vsel %vm3157_vm8, %v11794_v62, %v14660_v61  ;;  %v14662_v49 = vld [vmem:[#allocation336_spill] sm:$0xff]  ;;  %v3302_v7 = vsel %vm3289_vm12, %v3269_v5, %v14663_v36  ;;  %v14665_v60 = vld [vmem:[#allocation261_spill] sm:$0xff]  ;;  %v14666_v34 = vld [vmem:[#allocation254_spill] sm:$0xff] }
 0x661   : > { %v3301_v26 = vsel %vm3289_vm12, %v3268_v4, %v14662_v49  ;;  %7422 = vmatmul.mubr.msk.f32.gmra.mxu0 %vm4849_vm7, %v4806_v11  ;;  %v3204_v16 = vsel %vm3190_vm9, %v3171_v51, %v14664_v3  ;;  %v3205_v9 = vsel %vm3190_vm9, %v3172_v55, %v14665_v60  ;;  %v14667_v29 = vld [vmem:[#allocation364_spill] sm:$0xff]  ;;  %v14669_v8 = vld [vmem:[#allocation297_spill] sm:$0xff]  ;;  %v14670_v58 = vld [vmem:[#allocation390_spill] sm:$0xff]  ;;  %v4725_v20 = vpop.permute.xlu1 %4724 }
 0x662   : > { %v3334_v62 = vsel %vm3322_vm14, %v3301_v26, %v14666_v34  ;;  %v3335_v41 = vsel %vm3322_vm14, %v3302_v7, %v14667_v29  ;;  %7424 = vmatprep.mubr.msk.f32.mxu0 %vm4849_vm7, %v4807_v0  ;;  %v14668_v52 = vld [vmem:[#allocation292_spill] sm:$0xff]  ;;  %v3238_v45 = vsel %vm3223_vm10, %v3205_v9, %v14669_v8  ;;  %v14673_v22 = vld [vmem:[#allocation315_spill] sm:$0xff]  ;;  %v14674_v44 = vld [vmem:[#allocation230_spill] sm:$0xff] }
 0x663   : > { %v3237_v39 = vsel %vm3223_vm10, %v3204_v16, %v14668_v52  ;;  %v3367_v14 = vsel %vm3355_vm15, %v3334_v62, %v14670_v58  ;;  %v14671_v18 = vld [vmem:[#allocation392_spill] sm:$0xff]  ;;  %v3271_v15 = vsel %vm3256_vm11, %v3238_v45, %v14673_v22  ;;  %v3175_v53 = vsel %vm3157_vm8, %v11802_v35, %v14674_v44  ;;  %v14675_v13 = vld [vmem:[#allocation231_spill] sm:$0xff]  ;;  %v14676_v46 = vld [vmem:[#allocation338_spill] sm:$0xff] }
 0x664   : > { %v3368_v51 = vsel %vm3355_vm15, %v3335_v41, %v14671_v18  ;;  %v14672_v59 = vld [vmem:[#allocation312_spill] sm:$0xff]  ;;  %v4808_v6 = vsel %vm4796_vm13, %v3367_v14, %v4723_v50  ;;  %v3174_v2 = vsel %vm3157_vm8, %v11806_v38, %v14675_v13  ;;  %v14677_v17 = vld [vmem:[#allocation341_spill] sm:$0xff]  ;;  %v14679_v23 = vld [vmem:[#allocation263_spill] sm:$0xff] }
 0x665   : > { %v3270_v28 = vsel %vm3256_vm11, %v3237_v39, %v14672_v59  ;;  %v4809_v40 = vsel %vm4796_vm13, %v3368_v51, %v4725_v20  ;;  %v3304_v57 = vsel %vm3289_vm12, %v3271_v15, %v14677_v17  ;;  %7425 = vmatmul.mubr.msk.f32.gmra.mxu0 %vm4849_vm7, %v4808_v6  ;;  %v14678_v33 = vld [vmem:[#allocation260_spill] sm:$0xff]  ;;  %v3207_v48 = vsel %vm3190_vm9, %v3174_v2, %v14679_v23  ;;  %v14680_v30 = vld [vmem:[#allocation287_spill] sm:$0xff]  ;;  %v14681_v10 = vld [vmem:[#allocation365_spill] sm:$0xff]  ;;  %v4729_v61 = vpop.permute.xlu1 %4728 }
 0x666   : > { %v3303_v43 = vsel %vm3289_vm12, %v3270_v28, %v14676_v46  ;;  %v3206_v27 = vsel %vm3190_vm9, %v3173_v21, %v14678_v33  ;;  %v3337_v38 = vsel %vm3322_vm14, %v3304_v57, %v14681_v10  ;;  %7427 = vmatprep.mubr.msk.f32.mxu0 %vm4849_vm7, %v4809_v40  ;;  %v14682_v54 = vld [vmem:[#allocation296_spill] sm:$0xff]  ;;  %v14683_v24 = vld [vmem:[#allocation299_spill] sm:$0xff]  ;;  %v14685_v0 = vld [vmem:[#allocation393_spill] sm:$0xff]  ;;  %v4727_v21 = vpop.permute.xlu0 %4726 }
 0x667   : > { %v3336_v35 = vsel %vm3322_vm14, %v3303_v43, %v14680_v30  ;;  %v3239_v63 = vsel %vm3223_vm10, %v3206_v27, %v14682_v54  ;;  %v3240_v4 = vsel %vm3223_vm10, %v3207_v48, %v14683_v24  ;;  %v14684_v1 = vld [vmem:[#allocation295_spill] sm:$0xff]  ;;  %v3370_v11 = vsel %vm3355_vm15, %v3337_v38, %v14685_v0  ;;  %v14686_v56 = vld [vmem:[#allocation314_spill] sm:$0xff]  ;;  %v14687_v49 = vld [vmem:[#allocation317_spill] sm:$0xff] }
 0x668   : > { %v3369_v5 = vsel %vm3355_vm15, %v3336_v35, %v14684_v1  ;;  %v3272_v55 = vsel %vm3256_vm11, %v3239_v63, %v14686_v56  ;;  %v3273_v26 = vsel %vm3256_vm11, %v3240_v4, %v14687_v49  ;;  %v4811_v36 = vsel %vm4796_vm13, %v3370_v11, %v4729_v61  ;;  %v14688_v3 = vld [vmem:[#allocation232_spill] sm:$0xff]  ;;  %v14689_v60 = vld [vmem:[#allocation233_spill] sm:$0xff]  ;;  %v14691_v29 = vld [vmem:[#allocation343_spill] sm:$0xff] }
 0x669   : > { %v4810_v7 = vsel %vm4796_vm13, %v3369_v5, %v4727_v21  ;;  %v3177_v16 = vsel %vm3157_vm8, %v11814_v12, %v14688_v3  ;;  %v3176_v9 = vsel %vm3157_vm8, %v11818_v19, %v14689_v60  ;;  %v14690_v34 = vld [vmem:[#allocation340_spill] sm:$0xff]  ;;  %v3306_v41 = vsel %vm3289_vm12, %v3273_v26, %v14691_v29  ;;  %v14692_v52 = vld [vmem:[#allocation262_spill] sm:$0xff]  ;;  %v14693_v8 = vld [vmem:[#allocation265_spill] sm:$0xff]  ;;  %v4733_v40 = vpop.permute.xlu1 %4732 }
 0x66a   : > { %v3305_v62 = vsel %vm3289_vm12, %v3272_v55, %v14690_v34  ;;  %7428 = vmatmul.mubr.msk.f32.gmra.mxu0 %vm4849_vm7, %v4810_v7  ;;  %v3208_v39 = vsel %vm3190_vm9, %v3175_v53, %v14692_v52  ;;  %v3209_v45 = vsel %vm3190_vm9, %v3176_v9, %v14693_v8  ;;  %v14694_v58 = vld [vmem:[#allocation286_spill] sm:$0xff]  ;;  %v14695_v14 = vld [vmem:[#allocation367_spill] sm:$0xff]  ;;  %v14697_v20 = vld [vmem:[#allocation301_spill] sm:$0xff]  ;;  %v4731_v6 = vpop.permute.xlu0 %4730 }
 0x66b   : > { %v3338_v12 = vsel %vm3322_vm14, %v3305_v62, %v14694_v58  ;;  %v3339_v19 = vsel %vm3322_vm14, %v3306_v41, %v14695_v14  ;;  %7430 = vmatprep.mubr.msk.f32.mxu0 %vm4849_vm7, %v4811_v36  ;;  %v14696_v18 = vld [vmem:[#allocation298_spill] sm:$0xff]  ;;  %v3242_v50 = vsel %vm3223_vm10, %v3209_v45, %v14697_v20  ;;  %v14699_v22 = vld [vmem:[#allocation395_spill] sm:$0xff]  ;;  %v14700_v44 = vld [vmem:[#allocation316_spill] sm:$0xff] }
 0x66c   : > { %v3241_v51 = vsel %vm3223_vm10, %v3208_v39, %v14696_v18  ;;  %v14698_v59 = vld [vmem:[#allocation294_spill] sm:$0xff]  ;;  %v3372_v15 = vsel %vm3355_vm15, %v3339_v19, %v14699_v22  ;;  %v14701_v13 = vld [vmem:[#allocation319_spill] sm:$0xff]  ;;  %v14704_v23 = vld [vmem:[#allocation345_spill] sm:$0xff] }
 0x66d   : > { %v3371_v28 = vsel %vm3355_vm15, %v3338_v12, %v14698_v59  ;;  %v3274_v53 = vsel %vm3256_vm11, %v3241_v51, %v14700_v44  ;;  %v3275_v2 = vsel %vm3256_vm11, %v3242_v50, %v14701_v13  ;;  %v4813_v43 = vsel %vm4796_vm13, %v3372_v15, %v4733_v40  ;;  %v14702_v17 = vld [vmem:[#allocation235_spill] sm:$0xff]  ;;  %v14703_v33 = vld [vmem:[#allocation342_spill] sm:$0xff]  ;;  %v14705_v30 = vld [vmem:[#allocation264_spill] sm:$0xff]  ;;  %v4737_v55 = vpop.permute.xlu1 %4736 }
 0x66e   : > { %v4812_v46 = vsel %vm4796_vm13, %v3371_v28, %v4731_v6  ;;  %v3178_v57 = vsel %vm3157_vm8, %v11828_v37, %v14702_v17  ;;  %v3307_v27 = vsel %vm3289_vm12, %v3274_v53, %v14703_v33  ;;  %v3308_v48 = vsel %vm3289_vm12, %v3275_v2, %v14704_v23  ;;  %7433 = vmatprep.mubr.msk.f32.mxu1 %vm4849_vm7, %v4813_v43  ;;  %v14706_v10 = vld [vmem:[#allocation267_spill] sm:$0xff]  ;;  %v14707_v54 = vld [vmem:[#allocation366_spill] sm:$0xff]  ;;  %v14708_v37 = vld [vmem:[#allocation369_spill] sm:$0xff]  ;;  %v4735_v49 = vpop.permute.xlu0 %4734 }
 0x66f   : > { %7431 = vmatmul.mubr.msk.f32.gmra.mxu0 %vm4849_vm7, %v4812_v46  ;;  %v3210_v35 = vsel %vm3190_vm9, %v3177_v16, %v14705_v30  ;;  %v3211_v38 = vsel %vm3190_vm9, %v3178_v57, %v14706_v10  ;;  %v3340_v63 = vsel %vm3322_vm14, %v3307_v27, %v14707_v54  ;;  %v3341_v24 = vsel %vm3322_vm14, %v3308_v48, %v14708_v37  ;;  %v14709_v4 = vld [vmem:[#allocation300_spill] sm:$0xff]  ;;  %v14710_v5 = vld [vmem:[#allocation303_spill] sm:$0xff]  ;;  %v14711_v11 = vld [vmem:[#allocation394_spill] sm:$0xff] }
 0x670   : > { %v3243_v1 = vsel %vm3223_vm10, %v3210_v35, %v14709_v4  ;;  %v3244_v0 = vsel %vm3223_vm10, %v3211_v38, %v14710_v5  ;;  %v3373_v61 = vsel %vm3355_vm15, %v3340_v63, %v14711_v11  ;;  %v14712_v21 = vld [vmem:[#allocation397_spill] sm:$0xff]  ;;  %v14713_v26 = vld [vmem:[#allocation318_spill] sm:$0xff]  ;;  %v14717_v41 = vld [vmem:[#allocation344_spill] sm:$0xff] }
 0x671   : > { %v3374_v56 = vsel %vm3355_vm15, %v3341_v24, %v14712_v21  ;;  %v3276_v36 = vsel %vm3256_vm11, %v3243_v1, %v14713_v26  ;;  %v14714_v7 = vld [vmem:[#allocation321_spill] sm:$0xff]  ;;  %v4814_v60 = vsel %vm4796_vm13, %v3373_v61, %v4735_v49  ;;  %v14715_v9 = vld [vmem:[#allocation234_spill] sm:$0xff]  ;;  %v14718_v39 = vld [vmem:[#allocation347_spill] sm:$0xff]  ;;  %v4741_v6 = vpop.permute.xlu1 %4740 }
 0x672   : > { %v3277_v3 = vsel %vm3256_vm11, %v3244_v0, %v14714_v7  ;;  %v4815_v16 = vsel %vm4796_vm13, %v3374_v56, %v4737_v55  ;;  %v3179_v34 = vsel %vm3157_vm8, %v11822_v42, %v14715_v9  ;;  %v14716_v62 = vld [vmem:[#allocation237_spill] sm:$0xff]  ;;  %v3309_v52 = vsel %vm3289_vm12, %v3276_v36, %v14717_v41  ;;  %7434 = vmatmul.mubr.msk.f32.vlgmr.msra.gmra.mxu1 %vm4849_vm7, %v4814_v60  ;;  %v14719_v45 = vld [vmem:[#allocation266_spill] sm:$0xff]  ;;  %v14721_v19 = vld [vmem:[#allocation368_spill] sm:$0xff]  ;;  %v4739_v44 = vpop.permute.xlu0 %4738 }
 0x673   : > { %v3180_v29 = vsel %vm3157_vm8, %v11838_v31, %v14716_v62  ;;  %v3310_v8 = vsel %vm3289_vm12, %v3277_v3, %v14718_v39  ;;  %v3212_v58 = vsel %vm3190_vm9, %v3179_v34, %v14719_v45  ;;  %v14720_v12 = vld [vmem:[#allocation269_spill] sm:$0xff]  ;;  %v3342_v42 = vsel %vm3322_vm14, %v3309_v52, %v14721_v19  ;;  %v14722_v18 = vld [vmem:[#allocation371_spill] sm:$0xff]  ;;  %7436 = vmatprep.mubr.msk.f32.mxu1 %vm4849_vm7, %v4815_v16  ;;  %v14723_v51 = vld [vmem:[#allocation302_spill] sm:$0xff] }
 0x674   : > { %v3213_v14 = vsel %vm3190_vm9, %v3180_v29, %v14720_v12  ;;  %v3343_v31 = vsel %vm3322_vm14, %v3310_v8, %v14722_v18  ;;  %v3245_v20 = vsel %vm3223_vm10, %v3212_v58, %v14723_v51  ;;  %v14724_v50 = vld [vmem:[#allocation305_spill] sm:$0xff]  ;;  %v14725_v28 = vld [vmem:[#allocation396_spill] sm:$0xff]  ;;  %v14726_v15 = vld [vmem:[#allocation399_spill] sm:$0xff] }
 0x675   : > { %v3246_v59 = vsel %vm3223_vm10, %v3213_v14, %v14724_v50  ;;  %v3375_v22 = vsel %vm3355_vm15, %v3342_v42, %v14725_v28  ;;  %v3376_v40 = vsel %vm3355_vm15, %v3343_v31, %v14726_v15  ;;  %v14727_v53 = vld [vmem:[#allocation320_spill] sm:$0xff]  ;;  %v14728_v2 = vld [vmem:[#allocation323_spill] sm:$0xff]  ;;  %v14729_v57 = vld [vmem:[#allocation182_spill] sm:$0xff]  ;;  %v4745_v55 = vpop.permute.xlu1 %4744 }
 0x676   : > { %v3278_v13 = vsel %vm3256_vm11, %v3245_v20, %v14727_v53  ;;  %v3279_v46 = vsel %vm3256_vm11, %v3246_v59, %v14728_v2  ;;  %v4817_v43 = vsel %vm4796_vm13, %v3376_v40, %v4741_v6  ;;  %v4816_v17 = vsel %vm4796_vm13, %v3375_v22, %v4739_v44  ;;  %v14730_v27 = vld [vmem:[#allocation236_spill] sm:$0xff]  ;;  %v14731_v48 = vld [vmem:[#allocation346_spill] sm:$0xff]  ;;  %v14732_v35 = vld [vmem:[#allocation349_spill] sm:$0xff]  ;;  %v4743_v49 = vpop.permute.xlu0 %4742 }
 0x677   : > { %v3117_v33 = vsel %vm3091_vm6, %v11657_v32, %v14729_v57  ;;  %v3181_v23 = vsel %vm3157_vm8, %v11832_v47, %v14730_v27  ;;  %v3311_v30 = vsel %vm3289_vm12, %v3278_v13, %v14731_v48  ;;  %v3312_v10 = vsel %vm3289_vm12, %v3279_v46, %v14732_v35  ;;  %7437 = vmatmul.mubr.msk.f32.gmra.mxu1 %vm4849_vm7, %v4816_v17  ;;  %v14733_v38 = vld [vmem:[#allocation183_spill] sm:$0xff]  ;;  %v14734_v63 = vld [vmem:[#allocation268_spill] sm:$0xff]  ;;  %v14735_v32 = vld [vmem:[#allocation370_spill] sm:$0xff] }
 0x678   : > { %v3116_v54 = vsel %vm3091_vm6, %v11661_v25, %v14733_v38  ;;  %v3214_v37 = vsel %vm3190_vm9, %v3181_v23, %v14734_v63  ;;  %v3344_v24 = vsel %vm3322_vm14, %v3311_v30, %v14735_v32  ;;  %v14736_v4 = vld [vmem:[#allocation373_spill] sm:$0xff]  ;;  %7439 = vmatprep.mubr.msk.f32.mxu1 %vm4849_vm7, %v4817_v43  ;;  %v14737_v1 = vld [vmem:[#allocation210_spill] sm:$0xff]  ;;  %vm14738_vm4 = vmmov %vm14593_vm0 }
 0x679   : > { %v3345_v47 = vsel %vm3322_vm14, %v3312_v10, %v14736_v4  ;;  %v3150_v5 = vsel %vm14738_vm4, %v3117_v33, %v14737_v1  ;;  %v14739_v0 = vld [vmem:[#allocation304_spill] sm:$0xff]  ;;  %v14740_v61 = vld [vmem:[#allocation398_spill] sm:$0xff]  ;;  %v14741_v21 = vld [vmem:[#allocation401_spill] sm:$0xff]  ;;  %v2848_v50 = vpop.permute.xlu1 %2847  ;;  %vm6371_vm4 = vcmask 1047559  }
 0x67a   : > { %v3247_v11 = vsel %vm3223_vm10, %v3214_v37, %v14739_v0  ;;  %v3377_v25 = vsel %vm3355_vm15, %v3344_v24, %v14740_v61  ;;  %v3378_v56 = vsel %vm3355_vm15, %v3345_v47, %v14741_v21  ;;  %v14742_v26 = vld [vmem:[#allocation211_spill] sm:$0xff]  ;;  %vm14743_vm6 = vmmov %vm14593_vm0  ;;  %v14744_v7 = vld [vmem:[#allocation322_spill] sm:$0xff]  ;;  %v4747_v59 = vpop.permute.xlu0 %4746  ;;  %vm6367_vm0 = vcmask 1045509  }
 0x67b   : > { %v3149_v36 = vsel %vm14743_vm6, %v3116_v54, %v14742_v26  ;;  %v3280_v3 = vsel %vm3256_vm11, %v3247_v11, %v14744_v7  ;;  %v4819_v16 = vsel %vm4796_vm13, %v3378_v56, %v4745_v55  ;;  %v4818_v60 = vsel %vm4796_vm13, %v3377_v25, %v4743_v49  ;;  %v14745_v9 = vld [vmem:[#allocation238_spill] sm:$0xff]  ;;  %v14746_v62 = vld [vmem:[#allocation239_spill] sm:$0xff]  ;;  %v14747_v41 = vld [vmem:[#allocation348_spill] sm:$0xff] }
 0x67c   : > { %v3183_v34 = vsel %vm3157_vm8, %v3150_v5, %v14745_v9  ;;  %v3182_v29 = vsel %vm3157_vm8, %v3149_v36, %v14746_v62  ;;  %v3313_v52 = vsel %vm3289_vm12, %v3280_v3, %v14747_v41  ;;  %7440 = vmatmul.mubr.msk.f32.gmra.mxu1 %vm4849_vm7, %v4818_v60  ;;  %v14748_v39 = vld [vmem:[#allocation270_spill] sm:$0xff]  ;;  %v14749_v45 = vld [vmem:[#allocation271_spill] sm:$0xff]  ;;  %v14750_v12 = vld [vmem:[#allocation372_spill] sm:$0xff]  ;;  %vm6359_vm8 = vcmask 1041409  }
 0x67d   : > { %v3216_v8 = vsel %vm3190_vm9, %v3183_v34, %v14748_v39  ;;  %v3215_v58 = vsel %vm3190_vm9, %v3182_v29, %v14749_v45  ;;  %v3346_v14 = vsel %vm3322_vm14, %v3313_v52, %v14750_v12  ;;  %7442 = vmatprep.mubr.msk.f32.mxu1 %vm4849_vm7, %v4819_v16  ;;  %v14751_v19 = vld [vmem:[#allocation306_spill] sm:$0xff]  ;;  %v14752_v18 = vld [vmem:[#allocation307_spill] sm:$0xff]  ;;  %v14753_v51 = vld [vmem:[#allocation400_spill] sm:$0xff]  ;;  %v4751_v48 = vpop.permute.xlu1 %4750 }
 0x67e   : > { %v3249_v42 = vsel %vm3223_vm10, %v3216_v8, %v14751_v19  ;;  %v3248_v31 = vsel %vm3223_vm10, %v3215_v58, %v14752_v18  ;;  %v3379_v20 = vsel %vm3355_vm15, %v3346_v14, %v14753_v51  ;;  %v14754_v28 = vld [vmem:[#allocation324_spill] sm:$0xff]  ;;  %v14755_v15 = vld [vmem:[#allocation325_spill] sm:$0xff]  ;;  %v14756_v44 = vld [vmem:[#allocation350_spill] sm:$0xff]  ;;  %v4749_v30 = vpop.permute.xlu0 %4748  ;;  %vm6361_vm10 = vcmask 1042434  }
 0x67f   : > { %v3282_v22 = vsel %vm3256_vm11, %v3249_v42, %v14754_v28  ;;  %v3281_v40 = vsel %vm3256_vm11, %v3248_v31, %v14755_v15  ;;  %v4820_v6 = vsel %vm4796_vm13, %v3379_v20, %v4747_v59  ;;  %v14757_v13 = vld [vmem:[#allocation351_spill] sm:$0xff]  ;;  %v14758_v46 = vld [vmem:[#allocation374_spill] sm:$0xff]  ;;  %v14761_v54 = vld [vmem:[#allocation377_spill] sm:$0xff] }
 0x680   : > { %v3315_v53 = vsel %vm3289_vm12, %v3282_v22, %v14756_v44  ;;  %v3314_v2 = vsel %vm3289_vm12, %v3281_v40, %v14757_v13  ;;  %7443 = vmatmul.mubr.msk.f32.gmra.mxu1 %vm4849_vm7, %v4820_v6  ;;  %v14759_v17 = vld [vmem:[#allocation375_spill] sm:$0xff]  ;;  %v14760_v33 = vld [vmem:[#allocation402_spill] sm:$0xff]  ;;  %v14762_v63 = vld [vmem:[#allocation353_spill] sm:$0xff]  ;;  %vm6363_vm12 = vcmask 1043459  }
 0x681   : > { %v3348_v43 = vsel %vm3322_vm14, %v3315_v53, %v14758_v46  ;;  %v3347_v57 = vsel %vm3322_vm14, %v3314_v2, %v14759_v17  ;;  %v3349_v37 = vsel %vm3322_vm14, %v14762_v63, %v14761_v54  ;;  %v2852_v47 = vpop.permute.xlu1 %2851  ;;  %v14763_v1 = vld [vmem:[#allocation376_spill] sm:$0xff]  ;;  %v14765_v56 = vld [vmem:[#allocation378_spill] sm:$0xff]  ;;  %v14766_v55 = vld [vmem:[#allocation355_spill] sm:$0xff] }
 0x682   : > { %v3380_v27 = vsel %vm3355_vm15, %v3347_v57, %v14760_v33  ;;  %v3381_v23 = vsel %vm3355_vm15, %v3348_v43, %v2848_v50  ;;  %v2850_v38 = vpop.permute.xlu0 %2849  ;;  %v14764_v5 = vld [vmem:[#allocation352_spill] sm:$0xff]  ;;  %v3351_v49 = vsel %vm3322_vm14, %v14766_v55, %v14765_v56  ;;  %v14767_v16 = vld [vmem:[#allocation291_spill] sm:$0xff]  ;;  %v14768_v60 = vld [vmem:[#allocation354_spill] sm:$0xff] }
 0x683   : > { %v4822_v35 = vsel %vm4796_vm13, %v3381_v23, %v4751_v48  ;;  %v4821_v10 = vsel %vm4796_vm13, %v3380_v27, %v4749_v30  ;;  %v3382_v32 = vsel %vm3355_vm15, %v3349_v37, %v2850_v38  ;;  %v3350_v0 = vsel %vm3322_vm14, %v14764_v5, %v14763_v1  ;;  %v14769_v52 = vld [vmem:[#allocation379_spill] sm:$0xff]  ;;  %v14770_v39 = vld [vmem:[#allocation357_spill] sm:$0xff]  ;;  %v14771_v19 = vld [vmem:[#allocation290_spill] sm:$0xff] }
 0x684   : > { %7445 = vmatprep.mubr.msk.f32.mxu1 %vm4849_vm7, %v4821_v10  ;;  %v3383_v11 = vsel %vm3355_vm15, %v3350_v0, %v2852_v47  ;;  %v3352_v9 = vsel %vm3322_vm14, %v14768_v60, %v14767_v16  ;;  %v3353_v8 = vsel %vm3322_vm14, %v14770_v39, %v14769_v52  ;;  %v14772_v42 = vld [vmem:[#allocation356_spill] sm:$0xff]  ;;  %v12346_v28 = vld [vmem:[%s13593_s2] ss:$0 sm:$0xff] }
 0x685   : > { %7446 = vmatmul.mubr.msk.f32.gmra.mxu1 %vm4849_vm7, %v4822_v35  ;;  %v3354_v18 = vsel %vm3322_vm14, %v14772_v42, %v14771_v19 }
 0x686   : > { %v4753_v24 = vpop.permute.xlu0 %4752 }
 0x687   : > { %v4823_v4 = vsel %vm4796_vm13, %v3382_v32, %v4753_v24 }
 0x688   : > { %7448 = vmatprep.mubr.msk.f32.mxu1 %vm4849_vm7, %v4823_v4 }
 0x689   : > { %v4755_v61 = vpop.permute.xlu1 %4754 }
 0x68a   : > { %v4824_v25 = vsel %vm4796_vm13, %v3383_v11, %v4755_v61  ;;  %v2854_v21 = vpop.permute.xlu0 %2853 }
 0x68b   : > { %7449 = vmatmul.mubr.msk.f32.gmra.mxu1 %vm4849_vm7, %v4824_v25  ;;  %v3384_v26 = vsel %vm3355_vm15, %v3351_v49, %v2854_v21 }
 0x690   : > { %v2856_v36 = vpop.permute.xlu1 %2855 }
 0x691   : > { %v3385_v34 = vsel %vm3355_vm15, %v3352_v9, %v2856_v36 }
 0x6a8   : > { %v4757_v7 = vpop.permute.xlu0 %4756 }
 0x6a9   : > { %v4825_v3 = vsel %vm4796_vm13, %v3384_v26, %v4757_v7 }
 0x6aa   : > { %7451 = vmatprep.mubr.msk.f32.mxu1 %vm4849_vm7, %v4825_v3 }
 0x6ac   : > { %v4759_v62 = vpop.permute.xlu1 %4758  ;;  %v2858_v41 = vpop.permute.xlu0 %2857 }
 0x6ad   : > { %v4826_v29 = vsel %vm4796_vm13, %v3385_v34, %v4759_v62  ;;  %v3386_v45 = vsel %vm3355_vm15, %v3353_v8, %v2858_v41 }
 0x6ae   : > { %7452 = vmatmul.mubr.msk.f32.gmra.mxu1 %vm4849_vm7, %v4826_v29 }
 0x6b1   : > { %v2860_v58 = vpop.permute.xlu1 %2859 }
 0x6b2   : > { %v3387_v31 = vsel %vm3355_vm15, %v3354_v18, %v2860_v58  ;;  %vm6365_vm15 = vcmask 1044484  }
 0x6bf   : > { %v4761_v12 = vpop.permute.xlu0 %4760 }
 0x6c0   : > { %v4827_v14 = vsel %vm4796_vm13, %v3386_v45, %v4761_v12 }
 0x6c1   : > { %7454 = vmatprep.mubr.msk.f32.mxu1 %vm4849_vm7, %v4827_v14 }
 0x6c2   : > { %v4763_v51 = vpop.permute.xlu1 %4762 }
 0x6c3   : > { %v4828_v20 = vsel %vm4796_vm13, %v3387_v31, %v4763_v51 }
 0x6c4   : > { %7455 = vmatmul.mubr.msk.f32.gmra.mxu1 %vm4849_vm7, %v4828_v20  ;;  %vm5846_vm7 = vcmask 58368  }
 0x70c   : > { %v7411_v50 = vpop.f32.mrf.mxu0 }
 0x70d   : > { %v12352_v6 = vadd.f32 %v7411_v50, %v12346_v28 }
 0x70e   : > { %v5016_v59 = vpop.f32.mrf.mxu0 }
 0x70f   : > { %v12349_v15 = vadd.f32 %v12346_v28, %v5016_v59  ;;  %v5176_v2 = vmax.f32 %v12352_v6, 0.0 }
 0x711   : > { %v5175_v13 = vmax.f32 %v12349_v15, 0.0  ;;  %v5208_v33 = vsel %vm2926_vm1, %v5176_v2, 0.0 }
 0x713   : > { %v5207_v17 = vsel %vm2926_vm1, %v5175_v13, 0.0 }
 0x714   : > { %v7414_v22 = vpop.f32.mrf.mxu0  ;;  %v5209_v48 = vadd.f32 %v5208_v33, %v5207_v17 }
 0x715   : > { %v12364_v57 = vadd.f32 %v7414_v22, %v12346_v28 }
 0x716   : > { %v5026_v40 = vpop.f32.mrf.mxu0 }
 0x717   : > { %v12355_v44 = vadd.f32 %v12346_v28, %v5026_v40  ;;  %v5178_v35 = vmax.f32 %v12364_v57, 0.0 }
 0x718   : > { %v7417_v53 = vpop.f32.mrf.mxu0 }
 0x719   : > { %v5177_v46 = vmax.f32 %v12355_v44, 0.0  ;;  %v5212_v63 = vsel %vm2926_vm1, %v5178_v35, 0.0  ;;  %v12381_v37 = vadd.f32 %v7417_v53, %v12346_v28 }
 0x71a   : > { %v5036_v43 = vpop.f32.mrf.mxu0 }
 0x71b   : > { %v5210_v27 = vsel %vm2926_vm1, %v5177_v46, 0.0  ;;  %v12373_v23 = vadd.f32 %v12346_v28, %v5036_v43  ;;  %v5180_v1 = vmax.f32 %v12381_v37, 0.0 }
 0x71c   : > { %v5211_v10 = vadd.f32 %v5210_v27, %v5209_v48 }
 0x71d   : > { %v7420_v30 = vpop.f32.mrf.mxu0  ;;  %v5179_v38 = vmax.f32 %v12373_v23, 0.0  ;;  %v5216_v61 = vsel %vm2926_vm1, %v5180_v1, 0.0 }
 0x71e   : > { %v5213_v32 = vadd.f32 %v5212_v63, %v5211_v10  ;;  %v12395_v25 = vadd.f32 %v7420_v30, %v12346_v28 }
 0x71f   : > { %v5046_v54 = vpop.f32.mrf.mxu0  ;;  %v5214_v24 = vsel %vm2926_vm1, %v5179_v38, 0.0 }
 0x720   : > { %v12387_v4 = vadd.f32 %v12346_v28, %v5046_v54  ;;  %v5215_v5 = vadd.f32 %v5214_v24, %v5213_v32  ;;  %v5182_v26 = vmax.f32 %v12395_v25, 0.0 }
 0x721   : > { %v7423_v47 = vpop.f32.mrf.mxu0 }
 0x722   : > { %v5181_v0 = vmax.f32 %v12387_v4, 0.0  ;;  %v5217_v21 = vadd.f32 %v5216_v61, %v5215_v5  ;;  %v5220_v16 = vsel %vm2926_vm1, %v5182_v26, 0.0  ;;  %v12409_v60 = vadd.f32 %v7423_v47, %v12346_v28 }
 0x723   : > { %v5056_v11 = vpop.f32.mrf.mxu0 }
 0x724   : > { %v5218_v56 = vsel %vm2926_vm1, %v5181_v0, 0.0  ;;  %v12401_v55 = vadd.f32 %v12346_v28, %v5056_v11  ;;  %v5184_v41 = vmax.f32 %v12409_v60, 0.0 }
 0x725   : > { %v7426_v49 = vpop.f32.mrf.mxu0  ;;  %v5219_v36 = vadd.f32 %v5218_v56, %v5217_v21 }
 0x726   : > { %v5183_v7 = vmax.f32 %v12401_v55, 0.0  ;;  %v5224_v45 = vsel %vm2926_vm1, %v5184_v41, 0.0  ;;  %v12423_v58 = vadd.f32 %v7426_v49, %v12346_v28 }
 0x727   : > { %v5066_v3 = vpop.f32.mrf.mxu0  ;;  %v5221_v9 = vadd.f32 %v5220_v16, %v5219_v36 }
 0x728   : > { %v5222_v34 = vsel %vm2926_vm1, %v5183_v7, 0.0  ;;  %v12415_v62 = vadd.f32 %v12346_v28, %v5066_v3  ;;  %v5186_v18 = vmax.f32 %v12423_v58, 0.0 }
 0x729   : > { %v5223_v52 = vadd.f32 %v5222_v34, %v5221_v9 }
 0x72a   : > { %v7429_v29 = vpop.f32.mrf.mxu0  ;;  %v5185_v39 = vmax.f32 %v12415_v62, 0.0  ;;  %v5228_v50 = vsel %vm2926_vm1, %v5186_v18, 0.0 }
 0x72b   : > { %v5225_v12 = vadd.f32 %v5224_v45, %v5223_v52  ;;  %v12437_v59 = vadd.f32 %v7429_v29, %v12346_v28 }
 0x72c   : > { %v5076_v8 = vpop.f32.mrf.mxu0  ;;  %v5226_v14 = vsel %vm2926_vm1, %v5185_v39, 0.0 }
 0x72d   : > { %v12429_v19 = vadd.f32 %v12346_v28, %v5076_v8  ;;  %v5227_v31 = vadd.f32 %v5226_v14, %v5225_v12  ;;  %v5188_v17 = vmax.f32 %v12437_v59, 0.0 }
 0x72f   : > { %v7432_v42 = vpop.f32.mrf.mxu0  ;;  %v5187_v51 = vmax.f32 %v12429_v19, 0.0  ;;  %v5229_v22 = vadd.f32 %v5228_v50, %v5227_v31  ;;  %v5232_v30 = vsel %vm2926_vm1, %v5188_v17, 0.0 }
 0x730   : > { %v12451_v10 = vadd.f32 %v7432_v42, %v12346_v28 }
 0x731   : > { %v5086_v20 = vpop.f32.mrf.mxu0  ;;  %v5230_v40 = vsel %vm2926_vm1, %v5187_v51, 0.0 }
 0x732   : > { %v12443_v53 = vadd.f32 %v12346_v28, %v5086_v20  ;;  %v7435_v43 = vpop.f32.mrf.mxu1  ;;  %v5231_v33 = vadd.f32 %v5230_v40, %v5229_v22  ;;  %v5190_v47 = vmax.f32 %v12451_v10, 0.0 }
 0x733   : > { %v12465_v56 = vadd.f32 %v7435_v43, %v12346_v28 }
 0x734   : > { %v5189_v27 = vmax.f32 %v12443_v53, 0.0  ;;  %v5096_v48 = vpop.f32.mrf.mxu1  ;;  %v5233_v54 = vadd.f32 %v5232_v30, %v5231_v33  ;;  %v5236_v21 = vsel %vm2926_vm1, %v5190_v47, 0.0 }
 0x735   : > { %v12457_v32 = vadd.f32 %v12346_v28, %v5096_v48  ;;  %v13626_v9 = vmax.f32 %v12465_v56, 0.0  ;;  %v14774_v10 = vmax.f32 %v12465_v56, 0.0 }
 0x736   : > { %v5234_v63 = vsel %vm2926_vm1, %v5189_v27, 0.0 }
 0x737   : > { %v7438_v24 = vpop.f32.mrf.mxu1  ;;  %v5235_v5 = vadd.f32 %v5234_v63, %v5233_v54  ;;  %v13627_v11 = vmax.f32 %v12457_v32, 0.0  ;;  %v5240_v8 = vsel %vm2926_vm1, %v13626_v9, 0.0  ;;  %v14773_v53 = vmax.f32 %v12457_v32, 0.0 }
 0x738   : > { %v12479_v45 = vadd.f32 %v7438_v24, %v12346_v28 }
 0x739   : > { %v5106_v61 = vpop.f32.mrf.mxu1  ;;  %v5237_v49 = vadd.f32 %v5236_v21, %v5235_v5  ;;  %v5238_v36 = vsel %vm2926_vm1, %v13627_v11, 0.0 }
 0x73a   : > { %v12471_v3 = vadd.f32 %v12346_v28, %v5106_v61  ;;  %v13623_v20 = vmax.f32 %v12479_v45, 0.0  ;;  %v14776_v56 = vmax.f32 %v12479_v45, 0.0 }
 0x73b   : > { %v5239_v34 = vadd.f32 %v5238_v36, %v5237_v49 }
 0x73c   : > { %v7441_v16 = vpop.f32.mrf.mxu1  ;;  %v13624_v29 = vmax.f32 %v12471_v3, 0.0  ;;  %v5244_v43 = vsel %vm2926_vm1, %v13623_v20, 0.0  ;;  %v14775_v32 = vmax.f32 %v12471_v3, 0.0 }
 0x73d   : > { %v5241_v12 = vadd.f32 %v5240_v8, %v5239_v34  ;;  %v12493_v33 = vadd.f32 %v7441_v16, %v12346_v28 }
 0x73e   : > { %v5116_v52 = vpop.f32.mrf.mxu1  ;;  %v5242_v14 = vsel %vm2926_vm1, %v13624_v29, 0.0 }
 0x73f   : > { %v12485_v42 = vadd.f32 %v12346_v28, %v5116_v52  ;;  %v5243_v50 = vadd.f32 %v5242_v14, %v5241_v12  ;;  %v13615_v24 = vmax.f32 %v12493_v33, 0.0  ;;  %v14778_v45 = vmax.f32 %v12493_v33, 0.0 }
 0x740   : > { %v7444_v31 = vpop.f32.mrf.mxu1 }
 0x741   : > { %v13619_v22 = vmax.f32 %v12485_v42, 0.0  ;;  %v5245_v48 = vadd.f32 %v5244_v43, %v5243_v50  ;;  %v5248_v49 = vsel %vm2926_vm1, %v13615_v24, 0.0  ;;  %v12507_v36 = vadd.f32 %v7444_v31, %v12346_v28 }
 0x742   : > { %v5126_v40 = vpop.f32.mrf.mxu1  ;;  %v14777_v3 = vmax.f32 %v12485_v42, 0.0 }
 0x743   : > { %v5246_v30 = vsel %vm2926_vm1, %v13619_v22, 0.0  ;;  %v12499_v54 = vadd.f32 %v12346_v28, %v5126_v40  ;;  %v13617_v12 = vmax.f32 %v12507_v36, 0.0  ;;  %v14780_v33 = vmax.f32 %v12507_v36, 0.0 }
 0x744   : > { %v5247_v5 = vadd.f32 %v5246_v30, %v5245_v48 }
 0x745   : > { %v7447_v63 = vpop.f32.mrf.mxu1  ;;  %v13614_v61 = vmax.f32 %v12499_v54, 0.0  ;;  %v5252_v31 = vsel %vm2926_vm1, %v13617_v12, 0.0  ;;  %v14779_v42 = vmax.f32 %v12499_v54, 0.0 }
 0x746   : > { %v5249_v16 = vadd.f32 %v5248_v49, %v5247_v5  ;;  %v12521_v48 = vadd.f32 %v7447_v63, %v12346_v28 }
 0x747   : > { %v5136_v21 = vpop.f32.mrf.mxu1  ;;  %v5250_v52 = vsel %vm2926_vm1, %v13614_v61, 0.0 }
 0x748   : > { %v12513_v8 = vadd.f32 %v12346_v28, %v5136_v21  ;;  %v5251_v14 = vadd.f32 %v5250_v52, %v5249_v16  ;;  %v13618_v16 = vmax.f32 %v12521_v48, 0.0  ;;  %v14782_v36 = vmax.f32 %v12521_v48, 0.0 }
 0x74a   : > { %v13616_v40 = vmax.f32 %v12513_v8, 0.0  ;;  %v5253_v5 = vadd.f32 %v5252_v31, %v5251_v14  ;;  %v5256_v14 = vsel %vm2926_vm1, %v13618_v16, 0.0  ;;  %v14781_v54 = vmax.f32 %v12513_v8, 0.0 }
 0x74b   : > { %v7450_v34 = vpop.f32.mrf.mxu1 }
 0x74c   : > { %v5254_v21 = vsel %vm2926_vm1, %v13616_v40, 0.0  ;;  %v12532_v24 = vadd.f32 %v7450_v34, %v12346_v28 }
 0x74d   : > { %v5146_v50 = vpop.f32.mrf.mxu1  ;;  %v5255_v61 = vadd.f32 %v5254_v21, %v5253_v5 }
 0x74e   : > { %v12524_v30 = vadd.f32 %v12346_v28, %v5146_v50  ;;  %v13621_v40 = vmax.f32 %v12532_v24, 0.0  ;;  %v14784_v48 = vmax.f32 %v12532_v24, 0.0 }
 0x74f   : > { %v5257_v31 = vadd.f32 %v5256_v14, %v5255_v61 }
 0x750   : > { %v13620_v52 = vmax.f32 %v12524_v30, 0.0  ;;  %v5260_v21 = vsel %vm2926_vm1, %v13621_v40, 0.0  ;;  %v14783_v8 = vmax.f32 %v12524_v30, 0.0 }
 0x752   : > { %v5258_v50 = vsel %vm2926_vm1, %v13620_v52, 0.0 }
 0x753   : > { %v5259_v5 = vadd.f32 %v5258_v50, %v5257_v31 }
 0x755   : > { %v5261_v16 = vadd.f32 %v5260_v21, %v5259_v5 }
 0x76e   : > { %v7453_v43 = vpop.f32.mrf.mxu1 }
 0x76f   : > { %v12546_v34 = vadd.f32 %v7453_v43, %v12346_v28 }
 0x770   : > { %v5156_v49 = vpop.f32.mrf.mxu1 }
 0x771   : > { %v12535_v63 = vadd.f32 %v12346_v28, %v5156_v49  ;;  %v13625_v61 = vmax.f32 %v12546_v34, 0.0  ;;  %v14786_v24 = vmax.f32 %v12546_v34, 0.0 }
 0x773   : > { %v13622_v12 = vmax.f32 %v12535_v63, 0.0  ;;  %v5264_v31 = vsel %vm2926_vm1, %v13625_v61, 0.0  ;;  %v14785_v30 = vmax.f32 %v12535_v63, 0.0 }
 0x775   : > { %v5262_v49 = vsel %vm2926_vm1, %v13622_v12, 0.0 }
 0x776   : > { %v5263_v52 = vadd.f32 %v5262_v49, %v5261_v16 }
 0x778   : > { %v5265_v5 = vadd.f32 %v5264_v31, %v5263_v52 }
 0x784   : > { %v7456_v22 = vpop.f32.mrf.mxu1 }
 0x785   : > { %v12556_v14 = vadd.f32 %v7456_v22, %v12346_v28 }
 0x786   : > { %v5166_v50 = vpop.f32.mrf.mxu1 }
 0x787   : > { %v12559_v43 = vadd.f32 %v12346_v28, %v5166_v50  ;;  %v5206_v40 = vmax.f32 %v12556_v14, 0.0 }
 0x789   : > { %v5205_v12 = vmax.f32 %v12559_v43, 0.0  ;;  %v5268_v16 = vsel %vm2926_vm1, %v5206_v40, 0.0 }
 0x78b   : > { %v5266_v21 = vsel %vm2926_vm1, %v5205_v12, 0.0 }
 0x78c   : > { %v5267_v22 = vadd.f32 %v5266_v21, %v5265_v5 }
 0x78e   : > { %v5269_v28 = vadd.f32 %v5268_v16, %v5267_v22 }
 0x790   : > { %v5270_v49 = vrot.slane %v5269_v28, 4 }
 0x792   : > { %v5271_v50 = vadd.f32 %v5270_v49, %v5269_v28 }
 0x794   : > { %v5272_v20 = vrot.slane %v5271_v50, 2 }
 0x796   : > { %v5273_v29 = vadd.f32 %v5272_v20, %v5271_v50 }
 0x798   : > { %v5274_v61 = vrot.slane %v5273_v29, 1 }
 0x79a   : > { %v5275_v9 = vadd.f32 %v5274_v61, %v5273_v29 }
 0x79c   : > { %v12572_v11 = vmul.f32 0.00390625, %v5275_v9 }
 0x79e   : > { %v12577_v52 = vsub.f32 %v5175_v13, %v12572_v11  ;;  %v12582_v31 = vsub.f32 %v5176_v2, %v12572_v11  ;;  %v12587_v5 = vsub.f32 %v5177_v46, %v12572_v11  ;;  %v12592_v9 = vsub.f32 %v5178_v35, %v12572_v11 }
 0x79f   : > { %v12601_v6 = vsub.f32 %v5179_v38, %v12572_v11  ;;  %v12608_v2 = vsub.f32 %v5180_v1, %v12572_v11  ;;  %v12617_v23 = vsub.f32 %v5181_v0, %v12572_v11  ;;  %v12625_v20 = vsub.f32 %v5182_v26, %v12572_v11 }
 0x7a0   : > { %v5310_v15 = vmul.f32 %v12577_v52, %v12577_v52  ;;  %v5311_v13 = vmul.f32 %v12582_v31, %v12582_v31  ;;  %v5312_v44 = vmul.f32 %v12587_v5, %v12587_v5  ;;  %v5313_v46 = vmul.f32 %v12592_v9, %v12592_v9 }
 0x7a1   : > { %v5314_v38 = vmul.f32 %v12601_v6, %v12601_v6  ;;  %v5315_v61 = vmul.f32 %v12608_v2, %v12608_v2  ;;  %v12633_v4 = vsub.f32 %v5183_v7, %v12572_v11  ;;  %v5316_v0 = vmul.f32 %v12617_v23, %v12617_v23 }
 0x7a2   : > { %v5342_v57 = vsel %vm2926_vm1, %v5310_v15, 0.0  ;;  %v5343_v35 = vsel %vm2926_vm1, %v5311_v13, 0.0  ;;  %v5345_v37 = vsel %vm2926_vm1, %v5312_v44, 0.0  ;;  %v5347_v21 = vsel %vm2926_vm1, %v5313_v46, 0.0 }
 0x7a3   : > { %v5344_v29 = vadd.f32 %v5343_v35, %v5342_v57  ;;  %v5349_v16 = vsel %vm2926_vm1, %v5314_v38, 0.0  ;;  %v12641_v25 = vsub.f32 %v5184_v41, %v12572_v11  ;;  %v5317_v26 = vmul.f32 %v12625_v20, %v12625_v20 }
 0x7a4   : > { %v5351_v49 = vsel %vm2926_vm1, %v5315_v61, 0.0  ;;  %v12649_v55 = vsub.f32 %v5185_v39, %v12572_v11  ;;  %v5318_v7 = vmul.f32 %v12633_v4, %v12633_v4  ;;  %v5353_v15 = vsel %vm2926_vm1, %v5316_v0, 0.0 }
 0x7a5   : > { %v5346_v1 = vadd.f32 %v5345_v37, %v5344_v29  ;;  %v12657_v60 = vsub.f32 %v5186_v18, %v12572_v11  ;;  %v5319_v41 = vmul.f32 %v12641_v25, %v12641_v25  ;;  %v5355_v44 = vsel %vm2926_vm1, %v5317_v26, 0.0 }
 0x7a6   : > { %v12665_v62 = vsub.f32 %v5187_v51, %v12572_v11  ;;  %v5320_v39 = vmul.f32 %v12649_v55, %v12649_v55  ;;  %v5357_v57 = vsel %vm2926_vm1, %v5318_v7, 0.0  ;;  %v12673_v58 = vsub.f32 %v5188_v17, %v12572_v11 }
 0x7a7   : > { %v5348_v22 = vadd.f32 %v5347_v21, %v5346_v1  ;;  %v5321_v18 = vmul.f32 %v12657_v60, %v12657_v60  ;;  %v5359_v29 = vsel %vm2926_vm1, %v5319_v41, 0.0  ;;  %v12681_v19 = vsub.f32 %v5189_v27, %v12572_v11 }
 0x7a8   : > { %v5322_v51 = vmul.f32 %v12665_v62, %v12665_v62  ;;  %v5361_v37 = vsel %vm2926_vm1, %v5320_v39, 0.0  ;;  %v12689_v59 = vsub.f32 %v5190_v47, %v12572_v11  ;;  %v5323_v17 = vmul.f32 %v12673_v58, %v12673_v58 }
 0x7a9   : > { %v5350_v28 = vadd.f32 %v5349_v16, %v5348_v22  ;;  %v5363_v61 = vsel %vm2926_vm1, %v5321_v18, 0.0  ;;  %v12697_v27 = vsub.f32 %v14773_v53, %v12572_v11  ;;  %v5324_v22 = vmul.f32 %v12681_v19, %v12681_v19 }
 0x7aa   : > { %v5365_v0 = vsel %vm2926_vm1, %v5322_v51, 0.0  ;;  %v12705_v47 = vsub.f32 %v14774_v10, %v12572_v11  ;;  %v5367_v26 = vsel %vm2926_vm1, %v5323_v17, 0.0  ;;  %v12721_v41 = vsub.f32 %v14776_v56, %v12572_v11 }
 0x7ab   : > { %v5352_v50 = vadd.f32 %v5351_v49, %v5350_v28  ;;  %v5325_v28 = vmul.f32 %v12689_v59, %v12689_v59  ;;  %v5326_v7 = vmul.f32 %v12697_v27, %v12697_v27  ;;  %v12745_v17 = vsub.f32 %v14779_v42, %v12572_v11 }
 0x7ac   : > { %v5329_v51 = vmul.f32 %v12721_v41, %v12721_v41  ;;  %v5308_v63 = vsub.f32 %v5205_v12, %v12572_v11  ;;  %v12811_v34 = vsub.f32 %v5206_v40, %v12572_v11 }
 0x7ad   : > { %v5354_v13 = vadd.f32 %v5353_v15, %v5352_v50  ;;  %v12713_v50 = vsub.f32 %v14775_v32, %v12572_v11  ;;  %v5369_v15 = vsel %vm2926_vm1, %v5324_v22, 0.0  ;;  %v5373_v18 = vsel %vm2926_vm1, %v5326_v7, 0.0 }
 0x7ae   : > { %v12753_v22 = vsub.f32 %v14780_v33, %v12572_v11  ;;  %v12769_v7 = vsub.f32 %v14782_v36, %v12572_v11  ;;  %v5341_v12 = vmul.f32 %v12811_v34, %v12811_v34 }
 0x7af   : > { %v5356_v46 = vadd.f32 %v5355_v44, %v5354_v13  ;;  %v5327_v44 = vmul.f32 %v12705_v47, %v12705_v47 }
 0x7b0   : > { %v5403_v40 = vsel %vm2926_vm1, %v5341_v12, 0.0 }
 0x7b1   : > { %v5358_v35 = vadd.f32 %v5357_v57, %v5356_v46  ;;  %v5371_v46 = vsel %vm2926_vm1, %v5325_v28, 0.0  ;;  %v12729_v57 = vsub.f32 %v14777_v3, %v12572_v11  ;;  %v12761_v28 = vsub.f32 %v14781_v54, %v12572_v11 }
 0x7b3   : > { %v5360_v38 = vadd.f32 %v5359_v29, %v5358_v35  ;;  %v5328_v35 = vmul.f32 %v12713_v50, %v12713_v50 }
 0x7b5   : > { %v5362_v1 = vadd.f32 %v5361_v37, %v5360_v38  ;;  %v12737_v38 = vsub.f32 %v14778_v45, %v12572_v11  ;;  %v5375_v37 = vsel %vm2926_vm1, %v5327_v44, 0.0  ;;  %v12777_v44 = vsub.f32 %v14783_v8, %v12572_v11 }
 0x7b7   : > { %v5364_v21 = vadd.f32 %v5363_v61, %v5362_v1  ;;  %v5330_v61 = vmul.f32 %v12729_v57, %v12729_v57 }
 0x7b9   : > { %v5366_v16 = vadd.f32 %v5365_v0, %v5364_v21  ;;  %v5377_v21 = vsel %vm2926_vm1, %v5328_v35, 0.0  ;;  %v5331_v0 = vmul.f32 %v12737_v38, %v12737_v38  ;;  %v12785_v35 = vsub.f32 %v14784_v48, %v12572_v11 }
 0x7bb   : > { %v5368_v49 = vadd.f32 %v5367_v26, %v5366_v16  ;;  %v5379_v16 = vsel %vm2926_vm1, %v5329_v51, 0.0  ;;  %v5332_v26 = vmul.f32 %v12745_v17, %v12745_v17  ;;  %v5306_v51 = vsub.f32 %v14785_v30, %v12572_v11 }
 0x7bc   : > { %v7601_v30 = vmov 1983009808  }
 0x7bd   : > { %v5370_v13 = vadd.f32 %v5369_v15, %v5368_v49  ;;  %v5381_v49 = vsel %vm2926_vm1, %v5330_v61, 0.0  ;;  %v5333_v15 = vmul.f32 %v12753_v22, %v12753_v22  ;;  %v12799_v61 = vsub.f32 %v14786_v24, %v12572_v11 }
 0x7bf   : > { %v5372_v39 = vadd.f32 %v5371_v46, %v5370_v13  ;;  %v5383_v13 = vsel %vm2926_vm1, %v5331_v0, 0.0  ;;  %v5334_v46 = vmul.f32 %v12761_v28, %v12761_v28  ;;  %v5338_v0 = vmul.f32 %v5306_v51, %v5306_v51 }
 0x7c0   : > { %v5339_v54 = vmul.f32 %v12799_v61, %v12799_v61 }
 0x7c1   : > { %v5374_v29 = vadd.f32 %v5373_v18, %v5372_v39  ;;  %v5385_v39 = vsel %vm2926_vm1, %v5332_v26, 0.0  ;;  %v5335_v18 = vmul.f32 %v12769_v7, %v12769_v7  ;;  %v5397_v36 = vsel %vm2926_vm1, %v5338_v0, 0.0 }
 0x7c3   : > { %v5376_v1 = vadd.f32 %v5375_v37, %v5374_v29  ;;  %v5387_v29 = vsel %vm2926_vm1, %v5333_v15, 0.0  ;;  %v5336_v37 = vmul.f32 %v12777_v44, %v12777_v44  ;;  %v5399_v15 = vsel %vm2926_vm1, %v5339_v54, 0.0 }
 0x7c5   : > { %v5378_v53 = vadd.f32 %v5377_v21, %v5376_v1  ;;  %v5389_v1 = vsel %vm2926_vm1, %v5334_v46, 0.0  ;;  %v5337_v21 = vmul.f32 %v12785_v35, %v12785_v35 }
 0x7c7   : > { %v5380_v10 = vadd.f32 %v5379_v16, %v5378_v53  ;;  %v5391_v53 = vsel %vm2926_vm1, %v5335_v18, 0.0  ;;  %v5393_v16 = vsel %vm2926_vm1, %v5336_v37, 0.0  ;;  %v5395_v26 = vsel %vm2926_vm1, %v5337_v21, 0.0 }
 0x7c8   : > { %v5512_v37 = vunpack.c.l.s4 %v7601_v30 }
 0x7c9   : > { %v5382_v32 = vadd.f32 %v5381_v49, %v5380_v10 }
 0x7cb   : > { %v5384_v56 = vadd.f32 %v5383_v13, %v5382_v32  ;;  %v5340_v32 = vmul.f32 %v5308_v63, %v5308_v63 }
 0x7cd   : > { %v5386_v3 = vadd.f32 %v5385_v39, %v5384_v56  ;;  %v5401_v14 = vsel %vm2926_vm1, %v5340_v32, 0.0 }
 0x7cf   : > { %v5388_v45 = vadd.f32 %v5387_v29, %v5386_v3 }
 0x7d1   : > { %v5390_v42 = vadd.f32 %v5389_v1, %v5388_v45  ;;  %v5514_v1 = vlaneseq }
 0x7d3   : > { %v5392_v33 = vadd.f32 %v5391_v53, %v5390_v42  ;;  %v5513_v42 = vunpack.c.0.s8 %v5512_v37  ;;  %v12822_v24 = vshrl.u32 %v5514_v1, 7 }
 0x7d5   : > { %v5394_v10 = vadd.f32 %v5393_v16, %v5392_v33  ;;  %14787 = vst [vmem:[#allocation2_spill] sm:$0xff] %v12822_v24  ;;  %v12825_v53 = vsub.s32 %v5513_v42, %v12822_v24 }
 0x7d7   : > { %v5396_v49 = vadd.f32 %v5395_v26, %v5394_v10  ;;  %14788 = vst [vmem:[#allocation3_spill] sm:$0xff] %v12825_v53 }
 0x7d9   : > { %v5398_v43 = vadd.f32 %v5397_v36, %v5396_v49 }
 0x7db   : > { %v5400_v13 = vadd.f32 %v5399_v15, %v5398_v43 }
 0x7dd   : > { %v5402_v11 = vadd.f32 %v5401_v14, %v5400_v13 }
 0x7df   : > { %v5404_v56 = vadd.f32 %v5403_v40, %v5402_v11 }
 0x7e1   : > { %v5405_v8 = vrot.slane %v5404_v56, 4 }
 0x7e3   : > { %v5406_v46 = vadd.f32 %v5405_v8, %v5404_v56 }
 0x7e5   : > { %v5407_v39 = vrot.slane %v5406_v46, 2 }
 0x7e7   : > { %v5408_v3 = vadd.f32 %v5407_v39, %v5406_v46 }
 0x7e9   : > { %v5409_v48 = vrot.slane %v5408_v3, 1 }
 0x7eb   : > { %v5410_v18 = vadd.f32 %v5409_v48, %v5408_v3 }
 0x7ed   : > { %v5411_v29 = vmul.f32 0.00390625, %v5410_v18 }
 0x7ef   : > { %v5412_v45 = vadd.f32 1e-05, %v5411_v29 }
 0x7f1   : > { %7510 = vrsqrt.f32 %v5412_v45 }
 0x7fe   : > { %v7511_v21 = vpop.eup %7510 }
 0x7ff   : > { %v5442_v33 = vmul.f32 %v7511_v21, %v5306_v51  ;;  %v5444_v0 = vmul.f32 %v7511_v21, %v5308_v63  ;;  %v5414_v16 = vmul.f32 %v7511_v21, %v12577_v52  ;;  %v5415_v10 = vmul.f32 %v7511_v21, %v12582_v31 }
 0x800   : > { %v5416_v54 = vmul.f32 %v7511_v21, %v12587_v5  ;;  %v5417_v26 = vmul.f32 %v7511_v21, %v12592_v9  ;;  %v5418_v49 = vmul.f32 %v7511_v21, %v12601_v6  ;;  %v12833_v32 = vmul.f32 %v7511_v21, %v12608_v2 }
 0x801   : > { %v5488_v36 = vsel %vm2926_vm1, %v5442_v33, -inf  ;;  %v5489_v43 = vsel %vm2926_vm1, %v5444_v0, -inf  ;;  %v5420_v51 = vmul.f32 %v7511_v21, %v12617_v23  ;;  %v5421_v63 = vmul.f32 %v7511_v21, %v12625_v20 }
 0x802   : > { %v5490_v52 = vmax.f32 %v5488_v36, %v5489_v43  ;;  %v5422_v31 = vmul.f32 %v7511_v21, %v12633_v4  ;;  %v12841_v5 = vmul.f32 %v7511_v21, %v12641_v25  ;;  %v12844_v9 = vmul.f32 %v7511_v21, %v12649_v55 }
 0x803   : > { %v12847_v6 = vmul.f32 %v7511_v21, %v12657_v60  ;;  %v12850_v2 = vmul.f32 %v7511_v21, %v12665_v62  ;;  %v12853_v12 = vmul.f32 %v7511_v21, %v12673_v58  ;;  %v12856_v23 = vmul.f32 %v7511_v21, %v12681_v19 }
 0x804   : > { %v5748_v20 = vcombine.high %v5490_v52, %v5490_v52  ;;  %v5755_v4 = vrot.slane %v5490_v52, %v12825_v53  ;;  %v12860_v25 = vmul.f32 %v7511_v21, %v12689_v59  ;;  %v12863_v55 = vmul.f32 %v7511_v21, %v12697_v27 }
 0x805   : > { %v12866_v60 = vmul.f32 %v7511_v21, %v12705_v47  ;;  %v12869_v62 = vmul.f32 %v7511_v21, %v12713_v50  ;;  %v12872_v58 = vmul.f32 %v7511_v21, %v12721_v41  ;;  %v12875_v19 = vmul.f32 %v7511_v21, %v12729_v57 }
 0x806   : > { %v5762_v15 = vrot.slane %v5748_v20, %v12825_v53  ;;  %v5763_v13 = vcombine.high %v5755_v4, %v5755_v4  ;;  %v6239_v59 = vsel %vm5846_vm7, %v5755_v4, -inf  ;;  %v12880_v27 = vmul.f32 %v7511_v21, %v12737_v38 }
 0x807   : > { %v6240_v14 = vrot.slane %v6239_v59, 4  ;;  %v12883_v47 = vmul.f32 %v7511_v21, %v12745_v17  ;;  %v12886_v50 = vmul.f32 %v7511_v21, %v12753_v22  ;;  %v12889_v41 = vmul.f32 %v7511_v21, %v12761_v28 }
 0x808   : > { %v5764_v57 = vcombine.high %v5762_v15, %v5762_v15  ;;  %v6246_v11 = vsel %vm5846_vm7, %v5763_v13, -inf  ;;  %v6253_v40 = vsel %vm5846_vm7, %v5762_v15, -inf  ;;  %v12894_v56 = vmul.f32 %v7511_v21, %v12769_v7 }
 0x809   : > { %v6241_v38 = vmax.f32 %v6239_v59, %v6240_v14  ;;  %v6247_v8 = vrot.slane %v6246_v11, 4  ;;  %v6254_v46 = vrot.slane %v6253_v40, 4  ;;  %v12897_v17 = vmul.f32 %v7511_v21, %v12777_v44 }
 0x80a   : > { %v6260_v22 = vsel %vm5846_vm7, %v5764_v57, -inf  ;;  %v12901_v28 = vmul.f32 %v7511_v21, %v12785_v35  ;;  %v12904_v39 = vmul.f32 %v7511_v21, %v12799_v61  ;;  %v12907_v3 = vmul.f32 %v7511_v21, %v12811_v34 }
 0x80b   : > { %v6242_v7 = vrot.slane %v6241_v38, 2  ;;  %v6248_v48 = vmax.f32 %v6246_v11, %v6247_v8  ;;  %v6255_v18 = vmax.f32 %v6253_v40, %v6254_v46  ;;  %v6261_v29 = vrot.slane %v6260_v22, 4 }
 0x80c   : > { %v5446_v44 = vsel %vm2926_vm1, %v5414_v16, -inf  ;;  %v5447_v45 = vsel %vm2926_vm1, %v5416_v54, -inf  ;;  %v5449_v30 = vsel %vm2926_vm1, %v5415_v10, -inf  ;;  %v5450_v35 = vsel %vm2926_vm1, %v5417_v26, -inf }
 0x80d   : > { %v6243_v37 = vmax.f32 %v6241_v38, %v6242_v7  ;;  %v6249_v1 = vrot.slane %v6248_v48, 2  ;;  %v6256_v61 = vrot.slane %v6255_v18, 2  ;;  %v6262_v42 = vmax.f32 %v6260_v22, %v6261_v29 }
 0x80e   : > { %v5448_v33 = vmax.f32 %v5446_v44, %v5447_v45  ;;  %v12913_v34 = vmax.f32 %v5449_v30, %v5450_v35  ;;  %v5452_v21 = vsel %vm2926_vm1, %v5418_v49, -inf  ;;  %v5453_v0 = vsel %vm2926_vm1, %v5420_v51, -inf }
 0x80f   : > { %v6244_v36 = vrot.slane %v6243_v37, 1  ;;  %v6250_v43 = vmax.f32 %v6248_v48, %v6249_v1  ;;  %v6257_v16 = vmax.f32 %v6255_v18, %v6256_v61  ;;  %v6263_v52 = vrot.slane %v6262_v42, 2 }
 0x810   : > { %v5454_v54 = vmax.f32 %v5452_v21, %v5453_v0  ;;  %v5455_v10 = vsel %vm2926_vm1, %v12833_v32, -inf  ;;  %v5456_v26 = vsel %vm2926_vm1, %v5421_v63, -inf  ;;  %v5458_v20 = vsel %vm2926_vm1, %v5422_v31, -inf }
 0x811   : > { %v6245_v4 = vmax.f32 %v6243_v37, %v6244_v36  ;;  %v6251_v15 = vrot.slane %v6250_v43, 1  ;;  %v6258_v13 = vrot.slane %v6257_v16, 1  ;;  %v6264_v59 = vmax.f32 %v6262_v42, %v6263_v52 }
 0x812   : > { %v5457_v14 = vmax.f32 %v5455_v10, %v5456_v26  ;;  %v5459_v49 = vsel %vm2926_vm1, %v12844_v9, -inf  ;;  %v5461_v51 = vsel %vm2926_vm1, %v12841_v5, -inf  ;;  %v5462_v57 = vsel %vm2926_vm1, %v12847_v6, -inf }
 0x813   : > { %v6252_v11 = vmax.f32 %v6250_v43, %v6251_v15  ;;  %v6259_v32 = vmax.f32 %v6257_v16, %v6258_v13  ;;  %v6265_v40 = vrot.slane %v6264_v59, 1  ;;  %v5460_v63 = vmax.f32 %v5458_v20, %v5459_v49 }
 0x814   : > { %v5463_v38 = vmax.f32 %v5461_v51, %v5462_v57  ;;  %v5464_v31 = vsel %vm2926_vm1, %v12850_v2, -inf  ;;  %v5465_v8 = vsel %vm2926_vm1, %v12856_v23, -inf  ;;  %v5467_v9 = vsel %vm2926_vm1, %v12853_v12, -inf }
 0x815   : > { %v12933_v46 = vmax.f32 %v6264_v59, %v6265_v40  ;;  %v6415_v5 = vsel %vm6359_vm8, %v6252_v11, %v6245_v4  ;;  %v5466_v22 = vmax.f32 %v5464_v31, %v5465_v8  ;;  %v5468_v6 = vsel %vm2926_vm1, %v12860_v25, -inf }
 0x816   : > { %v12939_v7 = vsel %vm6361_vm10, %v6259_v32, %v6415_v5  ;;  %v5469_v48 = vmax.f32 %v5467_v9, %v5468_v6  ;;  %v5470_v2 = vsel %vm2926_vm1, %v12863_v55, -inf  ;;  %v5471_v23 = vsel %vm2926_vm1, %v12869_v62, -inf }
 0x817   : > { %14789 = vst [vmem:[#allocation4_spill] sm:$0xff] %v12933_v46  ;;  %14790 = vst [vmem:[#allocation5_spill] sm:$0xff] %v12939_v7  ;;  %v12945_v18 = vmax.f32 %v5470_v2, %v5471_v23  ;;  %v5473_v12 = vsel %vm2926_vm1, %v12866_v60, -inf  ;;  %v5474_v29 = vsel %vm2926_vm1, %v12872_v58, -inf  ;;  %v5476_v25 = vsel %vm2926_vm1, %v12875_v19, -inf }
 0x818   : > { %v5475_v44 = vmax.f32 %v5473_v12, %v5474_v29  ;;  %v5477_v45 = vsel %vm2926_vm1, %v12883_v47, -inf  ;;  %v5479_v55 = vsel %vm2926_vm1, %v12880_v27, -inf  ;;  %v5480_v62 = vsel %vm2926_vm1, %v12886_v50, -inf }
 0x819   : > { %v12959_v30 = vmax.f32 %v5476_v25, %v5477_v45  ;;  %v12961_v35 = vmax.f32 %v5479_v55, %v5480_v62  ;;  %v5482_v60 = vsel %vm2926_vm1, %v12889_v41, -inf  ;;  %v5483_v58 = vsel %vm2926_vm1, %v12897_v17, -inf }
 0x81a   : > { %v12967_v19 = vmax.f32 %v5482_v60, %v5483_v58  ;;  %v5485_v47 = vsel %vm2926_vm1, %v12894_v56, -inf  ;;  %v5486_v27 = vsel %vm2926_vm1, %v12901_v28, -inf  ;;  %v5491_v50 = vsel %vm2926_vm1, %v12904_v39, -inf }
 0x81b   : > { %v12975_v37 = vmax.f32 %v5485_v47, %v5486_v27  ;;  %v5492_v1 = vsel %vm2926_vm1, %v12907_v3, -inf  ;;  %v5510_v41 = vcombine.high %v5448_v33, %v5448_v33  ;;  %v12980_v61 = vrot.slane %v5448_v33, %v12825_v53 }
 0x81c   : > { %v12982_v17 = vmax.f32 %v5491_v50, %v5492_v1  ;;  %v5527_v56 = vcombine.high %v12913_v34, %v12913_v34  ;;  %v12988_v28 = vrot.slane %v12913_v34, %v12825_v53  ;;  %v5544_v42 = vcombine.high %v5454_v54, %v5454_v54 }
 0x81d   : > { %v12991_v39 = vrot.slane %v5510_v41, %v12825_v53  ;;  %v5525_v3 = vcombine.high %v12980_v61, %v12980_v61  ;;  %v12996_v21 = vrot.slane %v5454_v54, %v12825_v53  ;;  %v5561_v33 = vcombine.high %v5457_v14, %v5457_v14 }
 0x81e   : > { %v12999_v0 = vrot.slane %v5527_v56, %v12825_v53  ;;  %v5542_v36 = vcombine.high %v12988_v28, %v12988_v28  ;;  %v13004_v34 = vrot.slane %v5544_v42, %v12825_v53  ;;  %v13007_v43 = vrot.slane %v5457_v14, %v12825_v53 }
 0x81f   : > { %v5526_v16 = vcombine.high %v12991_v39, %v12991_v39  ;;  %v5559_v52 = vcombine.high %v12996_v21, %v12996_v21  ;;  %v13014_v54 = vrot.slane %v5561_v33, %v12825_v53  ;;  %v5578_v10 = vcombine.high %v5460_v63, %v5460_v63 }
 0x820   : > { %v5543_v26 = vcombine.high %v12999_v0, %v12999_v0  ;;  %v5560_v20 = vcombine.high %v13004_v34, %v13004_v34  ;;  %v5576_v4 = vcombine.high %v13007_v43, %v13007_v43  ;;  %v13023_v15 = vrot.slane %v5460_v63, %v12825_v53 }
 0x821   : > { %v13028_v59 = vrot.slane %v5578_v10, %v12825_v53  ;;  %v5595_v14 = vcombine.high %v5463_v38, %v5463_v38  ;;  %v13031_v49 = vrot.slane %v5463_v38, %v12825_v53  ;;  %v5612_v57 = vcombine.high %v5466_v22, %v5466_v22 }
 0x822   : > { %v13036_v11 = vrot.slane %v5466_v22, %v12825_v53  ;;  %v5629_v32 = vcombine.high %v5469_v48, %v5469_v48  ;;  %v13046_v38 = vrot.slane %v5469_v48, %v12825_v53  ;;  %v5646_v22 = vcombine.high %v12945_v18, %v12945_v18 }
 0x823   : > { %v13041_v63 = vrot.slane %v5595_v14, %v12825_v53  ;;  %v13049_v8 = vrot.slane %v5612_v57, %v12825_v53  ;;  %v13064_v48 = vrot.slane %v12945_v18, %v12825_v53  ;;  %v5663_v23 = vcombine.high %v5475_v44, %v5475_v44 }
 0x824   : > { %v13054_v5 = vrot.slane %v5629_v32, %v12825_v53  ;;  %v13071_v25 = vrot.slane %v5646_v22, %v12825_v53  ;;  %v13074_v45 = vrot.slane %v5475_v44, %v12825_v53  ;;  %v5680_v18 = vcombine.high %v12959_v30, %v12959_v30 }
 0x825   : > { %v13079_v62 = vrot.slane %v5663_v23, %v12825_v53  ;;  %v13085_v60 = vrot.slane %v12959_v30, %v12825_v53  ;;  %v5697_v47 = vcombine.high %v12961_v35, %v12961_v35  ;;  %v13095_v27 = vrot.slane %v12961_v35, %v12825_v53 }
 0x826   : > { %v13100_v1 = vrot.slane %v5680_v18, %v12825_v53  ;;  %v5714_v41 = vcombine.high %v12967_v19, %v12967_v19  ;;  %v13113_v35 = vrot.slane %v12967_v19, %v12825_v53  ;;  %v5731_v33 = vcombine.high %v12975_v37, %v12975_v37 }
 0x827   : > { %v13107_v56 = vrot.slane %v5697_v47, %v12825_v53  ;;  %v13124_v57 = vrot.slane %v12975_v37, %v12825_v53  ;;  %v5765_v32 = vcombine.high %v12982_v17, %v12982_v17  ;;  %v13137_v18 = vrot.slane %v12982_v17, %v12825_v53 }
 0x828   : > { %v13120_v14 = vrot.slane %v5714_v41, %v12825_v53  ;;  %v13133_v23 = vrot.slane %v5731_v33, %v12825_v53  ;;  %v5847_v19 = vsel %vm5846_vm7, %v12980_v61, -inf  ;;  %v5854_v37 = vsel %vm5846_vm7, %v5525_v3, -inf }
 0x829   : > { %v13144_v41 = vrot.slane %v5765_v32, %v12825_v53  ;;  %v5848_v17 = vrot.slane %v5847_v19, 4  ;;  %v5855_v32 = vrot.slane %v5854_v37, 4  ;;  %v5861_v42 = vsel %vm5846_vm7, %v12991_v39, -inf }
 0x82a   : > { %v5868_v33 = vsel %vm5846_vm7, %v5526_v16, -inf  ;;  %v5862_v22 = vrot.slane %v5861_v42, 4  ;;  %v5875_v61 = vsel %vm5846_vm7, %v12988_v28, -inf  ;;  %v5882_v47 = vsel %vm5846_vm7, %v5542_v36, -inf }
 0x82b   : > { %v5849_v10 = vmax.f32 %v5847_v19, %v5848_v17  ;;  %v5869_v30 = vrot.slane %v5868_v33, 4  ;;  %v5856_v50 = vmax.f32 %v5854_v37, %v5855_v32  ;;  %v5876_v3 = vrot.slane %v5875_v61, 4 }
 0x82c   : > { %v5889_v44 = vsel %vm5846_vm7, %v12999_v0, -inf  ;;  %v5863_v39 = vmax.f32 %v5861_v42, %v5862_v22  ;;  %v5883_v16 = vrot.slane %v5882_v47, 4  ;;  %v5896_v37 = vsel %vm5846_vm7, %v5543_v26, -inf }
 0x82d   : > { %v5850_v58 = vrot.slane %v5849_v10, 2  ;;  %v5870_v55 = vmax.f32 %v5868_v33, %v5869_v30  ;;  %v5857_v19 = vrot.slane %v5856_v50, 2  ;;  %v5877_v17 = vmax.f32 %v5875_v61, %v5876_v3 }
 0x82e   : > { %v5890_v29 = vrot.slane %v5889_v44, 4  ;;  %v5864_v2 = vrot.slane %v5863_v39, 2  ;;  %v5884_v12 = vmax.f32 %v5882_v47, %v5883_v16  ;;  %v5897_v31 = vrot.slane %v5896_v37, 4 }
 0x82f   : > { %v5851_v32 = vmax.f32 %v5849_v10, %v5850_v58  ;;  %v5871_v28 = vrot.slane %v5870_v55, 2  ;;  %v5858_v36 = vmax.f32 %v5856_v50, %v5857_v19  ;;  %v5878_v9 = vrot.slane %v5877_v17, 2 }
 0x830   : > { %v5891_v6 = vmax.f32 %v5889_v44, %v5890_v29  ;;  %v5865_v42 = vmax.f32 %v5863_v39, %v5864_v2  ;;  %v5885_v22 = vrot.slane %v5884_v12, 2  ;;  %v5898_v51 = vmax.f32 %v5896_v37, %v5897_v31 }
 0x831   : > { %v5852_v40 = vrot.slane %v5851_v32, 1  ;;  %v5872_v30 = vmax.f32 %v5870_v55, %v5871_v28  ;;  %v5859_v33 = vrot.slane %v5858_v36, 1  ;;  %v5879_v61 = vmax.f32 %v5877_v17, %v5878_v9 }
 0x832   : > { %v5892_v3 = vrot.slane %v5891_v6, 2  ;;  %v5866_v0 = vrot.slane %v5865_v42, 1  ;;  %v5886_v58 = vmax.f32 %v5884_v12, %v5885_v22  ;;  %v5899_v16 = vrot.slane %v5898_v51, 2 }
 0x833   : > { %v13176_v13 = vmax.f32 %v5851_v32, %v5852_v40  ;;  %v5873_v26 = vrot.slane %v5872_v30, 1  ;;  %v13178_v10 = vmax.f32 %v5858_v36, %v5859_v33  ;;  %v5880_v47 = vrot.slane %v5879_v61, 1 }
 0x834   : > { %v5893_v50 = vmax.f32 %v5891_v6, %v5892_v3  ;;  %v13180_v29 = vmax.f32 %v5865_v42, %v5866_v0  ;;  %v5887_v2 = vrot.slane %v5886_v58, 1  ;;  %v5903_v9 = vsel %vm5846_vm7, %v12996_v21, -inf }
 0x835   : > { %v13182_v44 = vmax.f32 %v5872_v30, %v5873_v26  ;;  %v13186_v55 = vmax.f32 %v5879_v61, %v5880_v47  ;;  %v5900_v31 = vmax.f32 %v5898_v51, %v5899_v16  ;;  %v5904_v39 = vrot.slane %v5903_v9, 4 }
 0x836   : > { %v5894_v40 = vrot.slane %v5893_v50, 1  ;;  %v13188_v19 = vmax.f32 %v5886_v58, %v5887_v2  ;;  %v5910_v6 = vsel %vm5846_vm7, %v5559_v52, -inf  ;;  %v5917_v12 = vsel %vm5846_vm7, %v13004_v34, -inf }
 0x837   : > { %v5924_v17 = vsel %vm5846_vm7, %v5560_v20, -inf  ;;  %v5901_v32 = vrot.slane %v5900_v31, 1  ;;  %v5905_v51 = vmax.f32 %v5903_v9, %v5904_v39  ;;  %v5911_v28 = vrot.slane %v5910_v6, 4 }
 0x838   : > { %v13200_v37 = vmax.f32 %v5893_v50, %v5894_v40  ;;  %v5918_v36 = vrot.slane %v5917_v12, 4  ;;  %v5925_v42 = vrot.slane %v5924_v17, 4  ;;  %v5931_v21 = vsel %vm5846_vm7, %v13007_v43, -inf }
 0x839   : > { %v5938_v52 = vsel %vm5846_vm7, %v5576_v4, -inf  ;;  %v13208_v30 = vmax.f32 %v5900_v31, %v5901_v32  ;;  %v5906_v34 = vrot.slane %v5905_v51, 2  ;;  %v5912_v22 = vmax.f32 %v5910_v6, %v5911_v28 }
 0x83a   : > { %v5932_v20 = vrot.slane %v5931_v21, 4  ;;  %v5919_v33 = vmax.f32 %v5917_v12, %v5918_v36  ;;  %v5926_v61 = vmax.f32 %v5924_v17, %v5925_v42  ;;  %v5939_v3 = vrot.slane %v5938_v52, 4 }
 0x83b   : > { %v5945_v0 = vsel %vm5846_vm7, %v13014_v54, -inf  ;;  %v5907_v26 = vmax.f32 %v5905_v51, %v5906_v34  ;;  %v5913_v58 = vrot.slane %v5912_v22, 2  ;;  %v14791_v4 = vcombine.high %v13014_v54, %v13014_v54 }
 0x83c   : > { %v5933_v47 = vmax.f32 %v5931_v21, %v5932_v20  ;;  %v5946_v50 = vrot.slane %v5945_v0, 4  ;;  %v5920_v16 = vrot.slane %v5919_v33, 2  ;;  %v5927_v2 = vrot.slane %v5926_v61, 2 }
 0x83d   : > { %v5940_v43 = vmax.f32 %v5938_v52, %v5939_v3  ;;  %v5952_v9 = vsel %vm5846_vm7, %v14791_v4, -inf  ;;  %v5908_v40 = vrot.slane %v5907_v26, 1  ;;  %v5914_v31 = vmax.f32 %v5912_v22, %v5913_v58 }
 0x83e   : > { %v5934_v39 = vrot.slane %v5933_v47, 2  ;;  %v5947_v6 = vmax.f32 %v5945_v0, %v5946_v50  ;;  %v5921_v12 = vmax.f32 %v5919_v33, %v5920_v16  ;;  %v5928_v17 = vmax.f32 %v5926_v61, %v5927_v2 }
 0x83f   : > { %v5941_v32 = vrot.slane %v5940_v43, 2  ;;  %v5953_v28 = vrot.slane %v5952_v9, 4  ;;  %v13216_v51 = vmax.f32 %v5907_v26, %v5908_v40  ;;  %v5915_v36 = vrot.slane %v5914_v31, 1 }
 0x840   : > { %v5935_v42 = vmax.f32 %v5933_v47, %v5934_v39  ;;  %v5948_v21 = vrot.slane %v5947_v6, 2  ;;  %v5922_v34 = vrot.slane %v5921_v12, 1  ;;  %v5929_v52 = vrot.slane %v5928_v17, 1 }
 0x841   : > { %v5942_v20 = vmax.f32 %v5940_v43, %v5941_v32  ;;  %v5954_v3 = vmax.f32 %v5952_v9, %v5953_v28  ;;  %v13218_v54 = vmax.f32 %v5914_v31, %v5915_v36  ;;  %v5959_v22 = vsel %vm5846_vm7, %v13023_v15, -inf }
 0x842   : > { %v5936_v4 = vrot.slane %v5935_v42, 1  ;;  %v5949_v24 = vmax.f32 %v5947_v6, %v5948_v21  ;;  %v13222_v33 = vmax.f32 %v5921_v12, %v5922_v34  ;;  %v13224_v61 = vmax.f32 %v5928_v17, %v5929_v52 }
 0x843   : > { %v5943_v0 = vrot.slane %v5942_v20, 1  ;;  %v5955_v26 = vrot.slane %v5954_v3, 2  ;;  %v5960_v50 = vrot.slane %v5959_v22, 4  ;;  %v14792_v16 = vcombine.high %v13023_v15, %v13023_v15 }
 0x844   : > { %v13226_v58 = vmax.f32 %v5935_v42, %v5936_v4  ;;  %v5950_v47 = vrot.slane %v5949_v24, 1  ;;  %v5973_v31 = vsel %vm5846_vm7, %v13028_v59, -inf  ;;  %v14793_v17 = vcombine.high %v13028_v59, %v13028_v59 }
 0x845   : > { %v5966_v2 = vsel %vm5846_vm7, %v14792_v16, -inf  ;;  %v13232_v43 = vmax.f32 %v5942_v20, %v5943_v0  ;;  %v5956_v9 = vmax.f32 %v5954_v3, %v5955_v26  ;;  %v5961_v6 = vmax.f32 %v5959_v22, %v5960_v50 }
 0x846   : > { %v5967_v40 = vrot.slane %v5966_v2, 4  ;;  %v13236_v39 = vmax.f32 %v5949_v24, %v5950_v47  ;;  %v5974_v12 = vrot.slane %v5973_v31, 4  ;;  %v5980_v32 = vsel %vm5846_vm7, %v14793_v17, -inf }
 0x847   : > { %v5957_v28 = vrot.slane %v5956_v9, 1  ;;  %v5981_v36 = vrot.slane %v5980_v32, 4  ;;  %v5987_v42 = vsel %vm5846_vm7, %v13031_v49, -inf  ;;  %v5962_v21 = vrot.slane %v5961_v6, 2 }
 0x848   : > { %v5968_v15 = vmax.f32 %v5966_v2, %v5967_v40  ;;  %v5975_v34 = vmax.f32 %v5973_v31, %v5974_v12  ;;  %v5988_v52 = vrot.slane %v5987_v42, 4  ;;  %v14794_v24 = vcombine.high %v13031_v49, %v13031_v49 }
 0x849   : > { %v13248_v3 = vmax.f32 %v5956_v9, %v5957_v28  ;;  %v5982_v59 = vmax.f32 %v5980_v32, %v5981_v36  ;;  %v5963_v0 = vmax.f32 %v5961_v6, %v5962_v21  ;;  %v6001_v50 = vsel %vm5846_vm7, %v13041_v63, -inf }
 0x84a   : > { %v5994_v20 = vsel %vm5846_vm7, %v14794_v24, -inf  ;;  %v5969_v4 = vrot.slane %v5968_v15, 2  ;;  %v5976_v26 = vrot.slane %v5975_v34, 2  ;;  %v5989_v47 = vmax.f32 %v5987_v42, %v5988_v52 }
 0x84b   : > { %14795 = vst [vmem:[#allocation6_spill] sm:$0xff] %v13248_v3  ;;  %v5995_v22 = vrot.slane %v5994_v20, 4  ;;  %v5983_v2 = vrot.slane %v5982_v59, 2  ;;  %v6002_v31 = vrot.slane %v6001_v50, 4  ;;  %v5964_v12 = vrot.slane %v5963_v0, 1 }
 0x84c   : > { %v5970_v16 = vmax.f32 %v5968_v15, %v5969_v4  ;;  %v5977_v17 = vmax.f32 %v5975_v34, %v5976_v26  ;;  %v5990_v49 = vrot.slane %v5989_v47, 2  ;;  %v14796_v9 = vcombine.high %v13041_v63, %v13041_v63 }
 0x84d   : > { %v5996_v40 = vmax.f32 %v5994_v20, %v5995_v22  ;;  %v5984_v36 = vmax.f32 %v5982_v59, %v5983_v2  ;;  %v6003_v21 = vmax.f32 %v6001_v50, %v6002_v31  ;;  %v13256_v42 = vmax.f32 %v5963_v0, %v5964_v12 }
 0x84e   : > { %v6008_v28 = vsel %vm5846_vm7, %v14796_v9, -inf  ;;  %v5971_v32 = vrot.slane %v5970_v16, 1  ;;  %v5978_v52 = vrot.slane %v5977_v17, 1  ;;  %v5991_v24 = vmax.f32 %v5989_v47, %v5990_v49 }
 0x84f   : > { %v5997_v6 = vrot.slane %v5996_v40, 2  ;;  %v6009_v15 = vrot.slane %v6008_v28, 4  ;;  %v5985_v20 = vrot.slane %v5984_v36, 1  ;;  %v6004_v34 = vrot.slane %v6003_v21, 2 }
 0x850   : > { %v13258_v4 = vmax.f32 %v5970_v16, %v5971_v32  ;;  %v13260_v26 = vmax.f32 %v5977_v17, %v5978_v52  ;;  %v5992_v53 = vrot.slane %v5991_v24, 1  ;;  %v6015_v9 = vsel %vm5846_vm7, %v13036_v11, -inf }
 0x851   : > { %v5998_v22 = vmax.f32 %v5996_v40, %v5997_v6  ;;  %v6010_v63 = vmax.f32 %v6008_v28, %v6009_v15  ;;  %v13264_v59 = vmax.f32 %v5984_v36, %v5985_v20  ;;  %v6005_v0 = vmax.f32 %v6003_v21, %v6004_v34 }
 0x852   : > { %v6016_v2 = vrot.slane %v6015_v9, 4  ;;  %v13266_v31 = vmax.f32 %v5991_v24, %v5992_v53  ;;  %v14797_v16 = vcombine.high %v13036_v11, %v13036_v11  ;;  %v6029_v12 = vsel %vm5846_vm7, %v13049_v8, -inf }
 0x853   : > { %v5999_v50 = vrot.slane %v5998_v22, 1  ;;  %v6011_v47 = vrot.slane %v6010_v63, 2  ;;  %v6006_v49 = vrot.slane %v6005_v0, 1  ;;  %v6030_v6 = vrot.slane %v6029_v12, 4 }
 0x854   : > { %v6022_v40 = vsel %vm5846_vm7, %v14797_v16, -inf  ;;  %v6017_v28 = vmax.f32 %v6015_v9, %v6016_v2  ;;  %v14798_v53 = vcombine.high %v13049_v8, %v13049_v8  ;;  %v6043_v11 = vsel %vm5846_vm7, %v13046_v38, -inf }
 0x855   : > { %v13274_v17 = vmax.f32 %v5998_v22, %v5999_v50  ;;  %v6023_v32 = vrot.slane %v6022_v40, 4  ;;  %v6012_v36 = vmax.f32 %v6010_v63, %v6011_v47  ;;  %v13282_v52 = vmax.f32 %v6005_v0, %v6006_v49 }
 0x856   : > { %v6036_v21 = vsel %vm5846_vm7, %v14798_v53, -inf  ;;  %v6018_v24 = vrot.slane %v6017_v28, 2  ;;  %v6031_v34 = vmax.f32 %v6029_v12, %v6030_v6  ;;  %v6044_v50 = vrot.slane %v6043_v11, 4 }
 0x857   : > { %v6024_v15 = vmax.f32 %v6022_v40, %v6023_v32  ;;  %v6037_v20 = vrot.slane %v6036_v21, 4  ;;  %v6013_v22 = vrot.slane %v6012_v36, 1  ;;  %v14799_v63 = vcombine.high %v13046_v38, %v13046_v38 }
 0x858   : > { %v6019_v2 = vmax.f32 %v6017_v28, %v6018_v24  ;;  %v6032_v46 = vrot.slane %v6031_v34, 2  ;;  %v6045_v0 = vmax.f32 %v6043_v11, %v6044_v50  ;;  %v6057_v40 = vsel %vm5846_vm7, %v13054_v5, -inf }
 0x859   : > { %v6050_v9 = vsel %vm5846_vm7, %v14799_v63, -inf  ;;  %v6025_v8 = vrot.slane %v6024_v15, 2  ;;  %v6038_v47 = vmax.f32 %v6036_v21, %v6037_v20  ;;  %v13288_v53 = vmax.f32 %v6012_v36, %v6013_v22 }
 0x85a   : > { %v6051_v16 = vrot.slane %v6050_v9, 4  ;;  %v6020_v49 = vrot.slane %v6019_v2, 1  ;;  %v6033_v7 = vmax.f32 %v6031_v34, %v6032_v46  ;;  %v6046_v3 = vrot.slane %v6045_v0, 2 }
 0x85b   : > { %14800 = vst [vmem:[#allocation7_spill] sm:$0xff] %v13288_v53  ;;  %v6026_v32 = vmax.f32 %v6024_v15, %v6025_v8  ;;  %v6039_v12 = vrot.slane %v6038_v47, 2  ;;  %v6058_v38 = vrot.slane %v6057_v40, 4  ;;  %v14801_v28 = vcombine.high %v13054_v5, %v13054_v5 }
 0x85c   : > { %v6052_v6 = vmax.f32 %v6050_v9, %v6051_v16  ;;  %v13296_v24 = vmax.f32 %v6019_v2, %v6020_v49  ;;  %v6034_v22 = vrot.slane %v6033_v7, 1  ;;  %v6047_v50 = vmax.f32 %v6045_v0, %v6046_v3 }
 0x85d   : > { %v6064_v21 = vsel %vm5846_vm7, %v14801_v28, -inf  ;;  %v6027_v36 = vrot.slane %v6026_v32, 1  ;;  %v6040_v20 = vmax.f32 %v6038_v47, %v6039_v12  ;;  %v6059_v63 = vmax.f32 %v6057_v40, %v6058_v38 }
 0x85e   : > { %v6053_v11 = vrot.slane %v6052_v6, 2  ;;  %v6065_v53 = vrot.slane %v6064_v21, 4  ;;  %v6071_v34 = vsel %vm5846_vm7, %v13064_v48, -inf  ;;  %v13302_v8 = vmax.f32 %v6033_v7, %v6034_v22 }
 0x85f   : > { %v13298_v15 = vmax.f32 %v6026_v32, %v6027_v36  ;;  %v6041_v9 = vrot.slane %v6040_v20, 1  ;;  %v6048_v5 = vrot.slane %v6047_v50, 1  ;;  %v6060_v16 = vrot.slane %v6059_v63, 2 }
 0x860   : > { %v6054_v46 = vmax.f32 %v6052_v6, %v6053_v11  ;;  %v6066_v2 = vmax.f32 %v6064_v21, %v6065_v53  ;;  %v6072_v12 = vrot.slane %v6071_v34, 4  ;;  %v14803_v3 = vcombine.high %v13064_v48, %v13064_v48 }
 0x861   : > { %v13304_v49 = vmax.f32 %v6040_v20, %v6041_v9  ;;  %v13310_v40 = vmax.f32 %v6047_v50, %v6048_v5  ;;  %v6061_v32 = vmax.f32 %v6059_v63, %v6060_v16  ;;  %v6085_v53 = vsel %vm5846_vm7, %v13071_v25, -inf }
 0x862   : > { %v6055_v47 = vrot.slane %v6054_v46, 1  ;;  %v6078_v0 = vsel %vm5846_vm7, %v14803_v3, -inf  ;;  %v6067_v6 = vrot.slane %v6066_v2, 2  ;;  %v6073_v7 = vmax.f32 %v6071_v34, %v6072_v12 }
 0x863   : > { %14802 = vst [vmem:[#allocation8_spill] sm:$0xff] %v13304_v49  ;;  %14804 = vst [vmem:[#allocation9_spill] sm:$0xff] %v13310_v40  ;;  %v6079_v38 = vrot.slane %v6078_v0, 4  ;;  %v14806_v21 = vcombine.high %v13071_v25, %v13071_v25  ;;  %v6062_v20 = vrot.slane %v6061_v32, 1  ;;  %v6086_v22 = vrot.slane %v6085_v53, 4 }
 0x864   : > { %v13312_v28 = vmax.f32 %v6054_v46, %v6055_v47  ;;  %v6068_v48 = vmax.f32 %v6066_v2, %v6067_v6  ;;  %v6074_v50 = vrot.slane %v6073_v7, 2  ;;  %v6099_v63 = vsel %vm5846_vm7, %v13074_v45, -inf }
 0x865   : > { %v6092_v36 = vsel %vm5846_vm7, %v14806_v21, -inf  ;;  %v6080_v11 = vmax.f32 %v6078_v0, %v6079_v38  ;;  %v14807_v46 = vcombine.high %v13074_v45, %v13074_v45  ;;  %v13326_v5 = vmax.f32 %v6061_v32, %v6062_v20 }
 0x866   : > { %14805 = vst [vmem:[#allocation403_spill] sm:$0xff] %v13312_v28  ;;  %v6093_v9 = vrot.slane %v6092_v36, 4  ;;  %v6069_v16 = vrot.slane %v6068_v48, 1  ;;  %v6087_v47 = vmax.f32 %v6085_v53, %v6086_v22  ;;  %v6075_v12 = vmax.f32 %v6073_v7, %v6074_v50 }
 0x867   : > { %v6106_v34 = vsel %vm5846_vm7, %v14807_v46, -inf  ;;  %14808 = vst [vmem:[#allocation404_spill] sm:$0xff] %v13326_v5  ;;  %v6081_v25 = vrot.slane %v6080_v11, 2  ;;  %v6100_v2 = vrot.slane %v6099_v63, 4  ;;  %v6113_v28 = vsel %vm5846_vm7, %v13079_v62, -inf }
 0x868   : > { %v6094_v3 = vmax.f32 %v6092_v36, %v6093_v9  ;;  %v6107_v0 = vrot.slane %v6106_v34, 4  ;;  %v13328_v6 = vmax.f32 %v6068_v48, %v6069_v16  ;;  %v6088_v21 = vrot.slane %v6087_v47, 2 }
 0x869   : > { %v6082_v38 = vmax.f32 %v6080_v11, %v6081_v25  ;;  %v6076_v40 = vrot.slane %v6075_v12, 1  ;;  %v6101_v49 = vmax.f32 %v6099_v63, %v6100_v2  ;;  %v6114_v5 = vrot.slane %v6113_v28, 4 }
 0x86a   : > { %14809 = vst [vmem:[#allocation405_spill] sm:$0xff] %v13328_v6  ;;  %v6095_v45 = vrot.slane %v6094_v3, 2  ;;  %v6108_v46 = vmax.f32 %v6106_v34, %v6107_v0  ;;  %v6089_v20 = vmax.f32 %v6087_v47, %v6088_v21  ;;  %v14810_v7 = vcombine.high %v13079_v62, %v13079_v62 }
 0x86b   : > { %v6083_v32 = vrot.slane %v6082_v38, 1  ;;  %v13336_v36 = vmax.f32 %v6075_v12, %v6076_v40  ;;  %v6102_v11 = vrot.slane %v6101_v49, 2  ;;  %v6115_v16 = vmax.f32 %v6113_v28, %v6114_v5 }
 0x86c   : > { %v6120_v53 = vsel %vm5846_vm7, %v14810_v7, -inf  ;;  %v6096_v48 = vmax.f32 %v6094_v3, %v6095_v45  ;;  %v6109_v22 = vrot.slane %v6108_v46, 2  ;;  %v6090_v9 = vrot.slane %v6089_v20, 1 }
 0x86d   : > { %v13338_v50 = vmax.f32 %v6082_v38, %v6083_v32  ;;  %v6121_v25 = vrot.slane %v6120_v53, 4  ;;  %v6103_v34 = vmax.f32 %v6101_v49, %v6102_v11  ;;  %v6127_v47 = vsel %vm5846_vm7, %v13085_v60, -inf }
 0x86e   : > { %v6097_v63 = vrot.slane %v6096_v48, 1  ;;  %v6110_v2 = vmax.f32 %v6108_v46, %v6109_v22  ;;  %v13342_v0 = vmax.f32 %v6089_v20, %v6090_v9  ;;  %v6116_v62 = vrot.slane %v6115_v16, 2 }
 0x86f   : > { %v6122_v21 = vmax.f32 %v6120_v53, %v6121_v25  ;;  %v6128_v40 = vrot.slane %v6127_v47, 4  ;;  %v6104_v3 = vrot.slane %v6103_v34, 1  ;;  %v14811_v38 = vcombine.high %v13085_v60, %v13085_v60 }
 0x870   : > { %v13344_v12 = vmax.f32 %v6096_v48, %v6097_v63  ;;  %v6111_v45 = vrot.slane %v6110_v2, 1  ;;  %v6117_v5 = vmax.f32 %v6115_v16, %v6116_v62  ;;  %v6141_v53 = vsel %vm5846_vm7, %v13100_v1, -inf }
 0x871   : > { %v6134_v28 = vsel %vm5846_vm7, %v14811_v38, -inf  ;;  %v6123_v49 = vrot.slane %v6122_v21, 2  ;;  %v6129_v46 = vmax.f32 %v6127_v47, %v6128_v40  ;;  %v13350_v7 = vmax.f32 %v6103_v34, %v6104_v3 }
 0x872   : > { %v6135_v32 = vrot.slane %v6134_v28, 4  ;;  %v13352_v20 = vmax.f32 %v6110_v2, %v6111_v45  ;;  %v14814_v48 = vcombine.high %v13100_v1, %v13100_v1  ;;  %v6118_v22 = vrot.slane %v6117_v5, 1 }
 0x873   : > { %14812 = vst [vmem:[#allocation406_spill] sm:$0xff] %v13350_v7  ;;  %v6124_v60 = vmax.f32 %v6122_v21, %v6123_v49  ;;  %v6130_v9 = vrot.slane %v6129_v46, 2  ;;  %v6142_v16 = vrot.slane %v6141_v53, 4  ;;  %v6155_v34 = vsel %vm5846_vm7, %v13095_v27, -inf }
 0x874   : > { %14813 = vst [vmem:[#allocation407_spill] sm:$0xff] %v13352_v20  ;;  %v6148_v11 = vsel %vm5846_vm7, %v14814_v48, -inf  ;;  %v6136_v25 = vmax.f32 %v6134_v28, %v6135_v32  ;;  %v14815_v2 = vcombine.high %v13095_v27, %v13095_v27  ;;  %v13366_v62 = vmax.f32 %v6117_v5, %v6118_v22 }
 0x875   : > { %v6149_v63 = vrot.slane %v6148_v11, 4  ;;  %v6125_v40 = vrot.slane %v6124_v60, 1  ;;  %v6131_v1 = vmax.f32 %v6129_v46, %v6130_v9  ;;  %v6143_v45 = vmax.f32 %v6141_v53, %v6142_v16 }
 0x876   : > { %v6162_v47 = vsel %vm5846_vm7, %v14815_v2, -inf  ;;  %14816 = vst [vmem:[#allocation413_spill] sm:$0xff] %v13366_v62  ;;  %v6137_v3 = vrot.slane %v6136_v25, 2  ;;  %v6156_v21 = vrot.slane %v6155_v34, 4  ;;  %v6169_v6 = vsel %vm5846_vm7, %v13107_v56, -inf }
 0x877   : > { %v6150_v38 = vmax.f32 %v6148_v11, %v6149_v63  ;;  %v6163_v49 = vrot.slane %v6162_v47, 4  ;;  %v13368_v28 = vmax.f32 %v6124_v60, %v6125_v40  ;;  %v6132_v32 = vrot.slane %v6131_v1, 1 }
 0x878   : > { %v6138_v48 = vmax.f32 %v6136_v25, %v6137_v3  ;;  %v6144_v20 = vrot.slane %v6143_v45, 2  ;;  %v6157_v7 = vmax.f32 %v6155_v34, %v6156_v21  ;;  %v6170_v46 = vrot.slane %v6169_v6, 4 }
 0x879   : > { %14817 = vst [vmem:[#allocation408_spill] sm:$0xff] %v13368_v28  ;;  %v6151_v27 = vrot.slane %v6150_v38, 2  ;;  %v6164_v2 = vmax.f32 %v6162_v47, %v6163_v49  ;;  %v13372_v5 = vmax.f32 %v6131_v1, %v6132_v32  ;;  %v14818_v53 = vcombine.high %v13107_v56, %v13107_v56 }
 0x87a   : > { %v6139_v22 = vrot.slane %v6138_v48, 1  ;;  %v6145_v60 = vmax.f32 %v6143_v45, %v6144_v20  ;;  %v6158_v16 = vrot.slane %v6157_v7, 2  ;;  %v6171_v40 = vmax.f32 %v6169_v6, %v6170_v46 }
 0x87b   : > { %v6176_v11 = vsel %vm5846_vm7, %v14818_v53, -inf  ;;  %v6152_v9 = vmax.f32 %v6150_v38, %v6151_v27  ;;  %v6165_v25 = vrot.slane %v6164_v2, 2  ;;  %v6183_v34 = vsel %vm5846_vm7, %v13113_v35, -inf }
 0x87c   : > { %v13378_v63 = vmax.f32 %v6138_v48, %v6139_v22  ;;  %v6177_v3 = vrot.slane %v6176_v11, 4  ;;  %v6146_v47 = vrot.slane %v6145_v60, 1  ;;  %v6159_v21 = vmax.f32 %v6157_v7, %v6158_v16 }
 0x87d   : > { %v6153_v1 = vrot.slane %v6152_v9, 1  ;;  %v6166_v49 = vmax.f32 %v6164_v2, %v6165_v25  ;;  %v6172_v32 = vrot.slane %v6171_v40, 2  ;;  %v6184_v56 = vrot.slane %v6183_v34, 4 }
 0x87e   : > { %v6178_v28 = vmax.f32 %v6176_v11, %v6177_v3  ;;  %v14819_v20 = vcombine.high %v13113_v35, %v13113_v35  ;;  %v13386_v38 = vmax.f32 %v6145_v60, %v6146_v47  ;;  %v6160_v6 = vrot.slane %v6159_v21, 1 }
 0x87f   : > { %v13388_v48 = vmax.f32 %v6152_v9, %v6153_v1  ;;  %v6167_v27 = vrot.slane %v6166_v49, 1  ;;  %v6173_v22 = vmax.f32 %v6171_v40, %v6172_v32  ;;  %v6185_v53 = vmax.f32 %v6183_v34, %v6184_v56 }
 0x880   : > { %v6190_v45 = vsel %vm5846_vm7, %v14819_v20, -inf  ;;  %v6179_v46 = vrot.slane %v6178_v28, 2  ;;  %v13390_v7 = vmax.f32 %v6159_v21, %v6160_v6  ;;  %v6197_v11 = vsel %vm5846_vm7, %v13120_v14, -inf }
 0x881   : > { %v6191_v62 = vrot.slane %v6190_v45, 4  ;;  %v13392_v2 = vmax.f32 %v6166_v49, %v6167_v27  ;;  %v14822_v35 = vcombine.high %v13120_v14, %v13120_v14  ;;  %v6174_v9 = vrot.slane %v6173_v22, 1 }
 0x882   : > { %14820 = vst [vmem:[#allocation409_spill] sm:$0xff] %v13390_v7  ;;  %v6180_v16 = vmax.f32 %v6178_v28, %v6179_v46  ;;  %v6186_v25 = vrot.slane %v6185_v53, 2  ;;  %v6198_v40 = vrot.slane %v6197_v11, 4  ;;  %v6211_v34 = vsel %vm5846_vm7, %v13124_v57, -inf }
 0x883   : > { %14821 = vst [vmem:[#allocation410_spill] sm:$0xff] %v13392_v2  ;;  %v6204_v60 = vsel %vm5846_vm7, %v14822_v35, -inf  ;;  %v6192_v3 = vmax.f32 %v6190_v45, %v6191_v62  ;;  %v14823_v1 = vcombine.high %v13124_v57, %v13124_v57  ;;  %v13406_v49 = vmax.f32 %v6173_v22, %v6174_v9 }
 0x884   : > { %v6205_v47 = vrot.slane %v6204_v60, 4  ;;  %v6181_v32 = vrot.slane %v6180_v16, 1  ;;  %v6187_v14 = vmax.f32 %v6185_v53, %v6186_v25  ;;  %v6199_v20 = vmax.f32 %v6197_v11, %v6198_v40 }
 0x885   : > { %v6218_v21 = vsel %vm5846_vm7, %v14823_v1, -inf  ;;  %14824 = vst [vmem:[#allocation412_spill] sm:$0xff] %v13406_v49  ;;  %v6193_v56 = vrot.slane %v6192_v3, 2  ;;  %v6212_v28 = vrot.slane %v6211_v34, 4  ;;  %v6225_v35 = vsel %vm5846_vm7, %v13133_v23, -inf }
 0x886   : > { %v6206_v6 = vmax.f32 %v6204_v60, %v6205_v47  ;;  %v6219_v27 = vrot.slane %v6218_v21, 4  ;;  %v13408_v62 = vmax.f32 %v6180_v16, %v6181_v32  ;;  %v6188_v45 = vrot.slane %v6187_v14, 1 }
 0x887   : > { %v6194_v46 = vmax.f32 %v6192_v3, %v6193_v56  ;;  %v6200_v2 = vrot.slane %v6199_v20, 2  ;;  %v6213_v7 = vmax.f32 %v6211_v34, %v6212_v28  ;;  %v6226_v53 = vrot.slane %v6225_v35, 4 }
 0x888   : > { %14825 = vst [vmem:[#allocation411_spill] sm:$0xff] %v13408_v62  ;;  %v6207_v57 = vrot.slane %v6206_v6, 2  ;;  %v6220_v1 = vmax.f32 %v6218_v21, %v6219_v27  ;;  %v13412_v22 = vmax.f32 %v6187_v14, %v6188_v45  ;;  %v14826_v11 = vcombine.high %v13133_v23, %v13133_v23 }
 0x889   : > { %v6195_v9 = vrot.slane %v6194_v46, 1  ;;  %v6201_v16 = vmax.f32 %v6199_v20, %v6200_v2  ;;  %v6214_v40 = vrot.slane %v6213_v7, 2  ;;  %v6227_v32 = vmax.f32 %v6225_v35, %v6226_v53 }
 0x88a   : > { %v6232_v60 = vsel %vm5846_vm7, %v14826_v11, -inf  ;;  %v6208_v25 = vmax.f32 %v6206_v6, %v6207_v57  ;;  %v6221_v3 = vrot.slane %v6220_v1, 2  ;;  %v6267_v34 = vsel %vm5846_vm7, %v13137_v18, -inf }
 0x88b   : > { %v13418_v47 = vmax.f32 %v6194_v46, %v6195_v9  ;;  %v6233_v56 = vrot.slane %v6232_v60, 4  ;;  %v6202_v21 = vrot.slane %v6201_v16, 1  ;;  %v6215_v28 = vmax.f32 %v6213_v7, %v6214_v40 }
 0x88c   : > { %v6209_v14 = vrot.slane %v6208_v25, 1  ;;  %v6222_v27 = vmax.f32 %v6220_v1, %v6221_v3  ;;  %v6228_v45 = vrot.slane %v6227_v32, 2  ;;  %v6268_v23 = vrot.slane %v6267_v34, 4 }
 0x88d   : > { %v6234_v62 = vmax.f32 %v6232_v60, %v6233_v56  ;;  %v14827_v2 = vcombine.high %v13137_v18, %v13137_v18  ;;  %v13426_v6 = vmax.f32 %v6201_v16, %v6202_v21  ;;  %v6216_v35 = vrot.slane %v6215_v28, 1 }
 0x88e   : > { %v13428_v46 = vmax.f32 %v6208_v25, %v6209_v14  ;;  %v6223_v57 = vrot.slane %v6222_v27, 1  ;;  %v6229_v9 = vmax.f32 %v6227_v32, %v6228_v45  ;;  %v6269_v11 = vmax.f32 %v6267_v34, %v6268_v23 }
 0x88f   : > { %v6274_v20 = vsel %vm5846_vm7, %v14827_v2, -inf  ;;  %v6235_v53 = vrot.slane %v6234_v62, 2  ;;  %v13430_v7 = vmax.f32 %v6215_v28, %v6216_v35  ;;  %v6281_v60 = vsel %vm5846_vm7, %v13144_v41, -inf }
 0x890   : > { %v6275_v49 = vrot.slane %v6274_v20, 4  ;;  %v13432_v1 = vmax.f32 %v6222_v27, %v6223_v57  ;;  %v14828_v18 = vcombine.high %v13144_v41, %v13144_v41  ;;  %v6230_v25 = vrot.slane %v6229_v9, 1 }
 0x891   : > { %v6236_v40 = vmax.f32 %v6234_v62, %v6235_v53  ;;  %v6270_v3 = vrot.slane %v6269_v11, 2  ;;  %v6282_v32 = vrot.slane %v6281_v60, 4  ;;  %v6360_v34 = vsel %vm6359_vm8, %v13178_v10, %v13176_v13 }
 0x892   : > { %v6288_v16 = vsel %vm5846_vm7, %v14828_v18, -inf  ;;  %v6276_v56 = vmax.f32 %v6274_v20, %v6275_v49  ;;  %v13443_v14 = vmax.f32 %v6229_v9, %v6230_v25  ;;  %v6362_v2 = vsel %vm6361_vm10, %v13180_v29, %v6360_v34  ;;  %v14832_v34 = vld [vmem:[#allocation9_spill] sm:$0xff] }
 0x893   : > { %v6289_v21 = vrot.slane %v6288_v16, 4  ;;  %v6237_v28 = vrot.slane %v6236_v40, 1  ;;  %v6271_v27 = vmax.f32 %v6269_v11, %v6270_v3  ;;  %v6283_v23 = vmax.f32 %v6281_v60, %v6282_v32  ;;  %v14830_v32 = vld [vmem:[#allocation6_spill] sm:$0xff] }
 0x894   : > { %v6277_v45 = vrot.slane %v6276_v56, 2  ;;  %v6364_v35 = vsel %vm6363_vm12, %v13182_v44, %v6362_v2  ;;  %v14836_v2 = vld [vmem:[#allocation404_spill] sm:$0xff] }
 0x895   : > { %v6290_v41 = vmax.f32 %v6288_v16, %v6289_v21  ;;  %v13447_v62 = vmax.f32 %v6236_v40, %v6237_v28  ;;  %v6272_v49 = vrot.slane %v6271_v27, 1  ;;  %v6284_v13 = vrot.slane %v6283_v23, 2  ;;  %v14831_v21 = vld [vmem:[#allocation7_spill] sm:$0xff]  ;;  %v14833_v28 = vld [vmem:[#allocation406_spill] sm:$0xff] }
 0x896   : > { %v6278_v20 = vmax.f32 %v6276_v56, %v6277_v45  ;;  %v6366_v57 = vsel %vm6365_vm15, %v13186_v55, %v6364_v35  ;;  %v6373_v55 = vsel %vm6359_vm8, %v13218_v54, %v13216_v51  ;;  %v6387_v51 = vsel %vm6359_vm8, %v13298_v15, %v13296_v24  ;;  %v14835_v45 = vld [vmem:[#allocation407_spill] sm:$0xff] }
 0x897   : > { %v6291_v10 = vrot.slane %v6290_v41, 2  ;;  %v6273_v9 = vmax.f32 %v6271_v27, %v6272_v49  ;;  %v6368_v11 = vsel %vm6367_vm0, %v13188_v19, %v6366_v57  ;;  %v6285_v29 = vmax.f32 %v6283_v23, %v6284_v13  ;;  %v14834_v27 = vld [vmem:[#allocation403_spill] sm:$0xff]  ;;  %v14838_v57 = vld [vmem:[#allocation405_spill] sm:$0xff] }
 0x898   : > { %v6279_v53 = vrot.slane %v6278_v20, 1  ;;  %v6370_v18 = vsel %vm6369_vm2, %v13200_v37, %v6368_v11  ;;  %v6380_v19 = vsel %vm6359_vm8, %v13258_v4, %v13256_v42  ;;  %v6374_v3 = vsel %vm6361_vm10, %v13222_v33, %v6373_v55  ;;  %v14840_v11 = vld [vmem:[#allocation409_spill] sm:$0xff] }
 0x899   : > { %v6292_v60 = vmax.f32 %v6290_v41, %v6291_v10  ;;  %v13459_v44 = vsel %vm6371_vm4, %v13208_v30, %v6370_v18  ;;  %v6286_v25 = vrot.slane %v6285_v29, 1  ;;  %v6381_v37 = vsel %vm6361_vm10, %v13260_v26, %v6380_v19  ;;  %v14843_v19 = vld [vmem:[#allocation410_spill] sm:$0xff] }
 0x89a   : > { %v6280_v16 = vmax.f32 %v6278_v20, %v6279_v53  ;;  %v6375_v30 = vsel %vm6363_vm12, %v13224_v61, %v6374_v3  ;;  %v6382_v56 = vsel %vm6363_vm12, %v13264_v59, %v6381_v37  ;;  %v6394_v54 = vsel %vm6359_vm8, %v13338_v50, %v13336_v36  ;;  %v14829_v50 = vld [vmem:[#allocation8_spill] sm:$0xff]  ;;  %v14837_v20 = vld [vmem:[#allocation413_spill] sm:$0xff] }
 0x89b   : > { %v6293_v40 = vrot.slane %v6292_v60, 1  ;;  %v6287_v42 = vmax.f32 %v6285_v29, %v6286_v25  ;;  %v6376_v33 = vsel %vm6365_vm15, %v13226_v58, %v6375_v30  ;;  %v6383_v26 = vsel %vm6365_vm15, %v13266_v31, %v6382_v56  ;;  %v14844_v3 = vld [vmem:[#allocation412_spill] sm:$0xff]  ;;  %v14845_v56 = vld [vmem:[#allocation3_spill] sm:$0xff] }
 0x89c   : > { %v6377_v61 = vsel %vm6367_vm0, %v13232_v43, %v6376_v33  ;;  %v6384_v59 = vsel %vm6367_vm0, %v13274_v17, %v6383_v26  ;;  %v6388_v24 = vsel %vm6361_vm10, %v13302_v8, %v6387_v51  ;;  %v6395_v15 = vsel %vm6361_vm10, %v13342_v0, %v6394_v54  ;;  %v14846_v54 = vld [vmem:[#allocation411_spill] sm:$0xff] }
 0x89d   : > { %v6294_v4 = vmax.f32 %v6292_v60, %v6293_v40  ;;  %v6378_v36 = vsel %vm6369_vm2, %v13236_v39, %v6377_v61  ;;  %v6385_v58 = vsel %vm6369_vm2, %v13282_v52, %v6384_v59  ;;  %v6389_v31 = vsel %vm6363_vm12, %v14829_v50, %v6388_v24  ;;  %v14841_v60 = vld [vmem:[#allocation5_spill] sm:$0xff] }
 0x89e   : > { %v6396_v43 = vsel %vm6363_vm12, %v13344_v12, %v6395_v15  ;;  %v6379_v17 = vsel %vm6371_vm4, %v14830_v32, %v6378_v36  ;;  %v6386_v8 = vsel %vm6371_vm4, %v14831_v21, %v6385_v58  ;;  %v6390_v0 = vsel %vm6365_vm15, %v14832_v34, %v6389_v31 }
 0x89f   : > { %v6397_v39 = vsel %vm6365_vm15, %v14833_v28, %v6396_v43  ;;  %v6391_v52 = vsel %vm6367_vm0, %v14834_v27, %v6390_v0  ;;  %v6401_v12 = vsel %vm6359_vm8, %v13378_v63, %v13372_v5  ;;  %v6408_v41 = vsel %vm6359_vm8, %v13418_v47, %v13412_v22  ;;  %v14839_v5 = vld [vmem:[#allocation408_spill] sm:$0xff] }
 0x8a0   : > { %v6398_v23 = vsel %vm6367_vm0, %v14835_v45, %v6397_v39  ;;  %v6392_v49 = vsel %vm6369_vm2, %v14836_v2, %v6391_v52  ;;  %v6402_v13 = vsel %vm6361_vm10, %v13386_v38, %v6401_v12  ;;  %v6409_v10 = vsel %vm6361_vm10, %v13426_v6, %v6408_v41  ;;  %v14842_v6 = vld [vmem:[#allocation4_spill] sm:$0xff] }
 0x8a1   : > { %v6399_v35 = vsel %vm6369_vm2, %v14837_v20, %v6398_v23  ;;  %v6393_v53 = vsel %vm6371_vm4, %v14838_v57, %v6392_v49  ;;  %v6403_v22 = vsel %vm6363_vm12, %v13388_v48, %v6402_v13  ;;  %v6410_v47 = vsel %vm6363_vm12, %v13428_v46, %v6409_v10 }
 0x8a2   : > { %v6400_v63 = vsel %vm6371_vm4, %v14839_v5, %v6399_v35  ;;  %v6404_v29 = vsel %vm6365_vm15, %v14840_v11, %v6403_v22  ;;  %v6411_v38 = vsel %vm6365_vm15, %v13430_v7, %v6410_v47  ;;  %v6417_v18 = vsel %vm6363_vm12, %v14842_v6, %v14841_v60 }
 0x8a3   : > { %v6430_v55 = vcombine.low %v13459_v44, %v6386_v8  ;;  %v6405_v25 = vsel %vm6367_vm0, %v14843_v19, %v6404_v29  ;;  %v6412_v48 = vsel %vm6367_vm0, %v13432_v1, %v6411_v38  ;;  %v6418_v46 = vsel %vm6365_vm15, %v6273_v9, %v6417_v18 }
 0x8a4   : > { %v6446_v40 = vcombine.low %v6379_v17, %v6393_v53  ;;  %v6406_v37 = vsel %vm6369_vm2, %v14844_v3, %v6405_v25  ;;  %v6413_v7 = vsel %vm6369_vm2, %v13443_v14, %v6412_v48  ;;  %v6419_v30 = vsel %vm6367_vm0, %v6280_v16, %v6418_v46 }
 0x8a5   : > { %v6438_v51 = vrot.slane %v6430_v55, %v14845_v56  ;;  %v6407_v33 = vsel %vm6371_vm4, %v14846_v54, %v6406_v37  ;;  %v6414_v26 = vsel %vm6371_vm4, %v13447_v62, %v6413_v7  ;;  %v6420_v1 = vsel %vm6369_vm2, %v6287_v42, %v6419_v30 }
 0x8a6   : > { %v6454_v9 = vrot.slane %v6446_v40, %v14845_v56  ;;  %v6421_v61 = vsel %vm6371_vm4, %v6294_v4, %v6420_v1  ;;  %v6462_v59 = vcombine.low %v6400_v63, %v6414_v26  ;;  %v6431_v24 = vcombine.high %v13459_v44, %v6386_v8  ;;  %v14847_v44 = vld [vmem:[#allocation2_spill] sm:$0xff] }
 0x8a7   : > { %v6478_v14 = vcombine.low %v6407_v33, %v6421_v61  ;;  %v7602_v16 = vmov 1934713408   ;;  %v6447_v31 = vcombine.high %v6379_v17, %v6393_v53  ;;  %v6463_v43 = vcombine.high %v6400_v63, %v6414_v26 }
 0x8a8   : > { %v6495_v15 = vcombine.high %v6438_v51, %v6454_v9  ;;  %v6497_v36 = vunpack.c.l.s4 %v7602_v16  ;;  %v6470_v58 = vrot.slane %v6462_v59, %v14845_v56  ;;  %v6445_v50 = vrot.slane %v6431_v24, %v14845_v56 }
 0x8a9   : > { %v6486_v62 = vrot.slane %v6478_v14, %v14845_v56  ;;  %v6494_v32 = vcombine.low %v6438_v51, %v6454_v9  ;;  %v6479_v21 = vcombine.high %v6407_v33, %v6421_v61  ;;  %v6461_v4 = vrot.slane %v6447_v31, %v14845_v56 }
 0x8aa   : > { %v6498_v42 = vunpack.c.0.s8 %v6497_v36  ;;  %v6477_v34 = vrot.slane %v6463_v43, %v14845_v56 }
 0x8ab   : > { %v6527_v0 = vcombine.high %v6470_v58, %v6486_v62  ;;  %v6526_v28 = vcombine.low %v6470_v58, %v6486_v62  ;;  %v6493_v39 = vrot.slane %v6479_v21, %v14845_v56  ;;  %v6510_v27 = vcombine.low %v6445_v50, %v6461_v4 }
 0x8ac   : > { %v6501_v8 = vsub.s32 %v6498_v42, %v14847_v44  ;;  %v6511_v52 = vcombine.high %v6445_v50, %v6461_v4 }
 0x8ad   : > { %v6542_v2 = vcombine.low %v6477_v34, %v6493_v39  ;;  %v6543_v20 = vcombine.high %v6477_v34, %v6493_v39 }
 0x8ae   : > { %v6509_v45 = vrot.slane %v6495_v15, %v6501_v8  ;;  %v6541_v17 = vrot.slane %v6527_v0, %v6501_v8  ;;  %v6502_v23 = vrot.slane %v6494_v32, %v6501_v8  ;;  %v6534_v12 = vrot.slane %v6526_v28, %v6501_v8 }
 0x8af   : > { %v6518_v41 = vrot.slane %v6510_v27, %v6501_v8  ;;  %v6525_v49 = vrot.slane %v6511_v52, %v6501_v8  ;;  %v6550_v53 = vrot.slane %v6542_v2, %v6501_v8  ;;  %v6557_v5 = vrot.slane %v6543_v20, %v6501_v8 }
 0x8b0   : > { %v6560_v35 = vcombine.low %v6509_v45, %v6541_v17  ;;  %v6559_v13 = vcombine.high %v6502_v23, %v6534_v12  ;;  %v6561_v10 = vcombine.high %v6509_v45, %v6541_v17  ;;  %v6558_v57 = vcombine.low %v6502_v23, %v6534_v12 }
 0x8b1   : > { %v6562_v63 = vcombine.low %v6518_v41, %v6550_v53  ;;  %v6564_v22 = vcombine.low %v6525_v49, %v6557_v5  ;;  %v6563_v47 = vcombine.high %v6518_v41, %v6550_v53  ;;  %v6565_v11 = vcombine.high %v6525_v49, %v6557_v5 }
 0x8b2   : > { %6571 = vrot.lane.b32.xlu1 %v6560_v35, %s7588_s21  ;;  %6567 = vrot.lane.b32.xlu0 %v6559_v13, %s7586_s19  ;;  %s6661_s19 = sshll.u32 %s14849_s13, 3 }
 0x8b6   : > { %6579 = vrot.lane.b32.xlu1 %v6562_v63, %s7592_s25  ;;  %6575 = vrot.lane.b32.xlu0 %v6561_v10, %s7590_s23  ;;  %s168_s25 = scalar_lea.vmem %s13594_s3, %s6661_s19 }
 0x8ba   : > { %6587 = vrot.lane.b32.xlu1 %v6564_v22, %s7596_s29  ;;  %6583 = vrot.lane.b32.xlu0 %v6563_v47, %s7594_s27 }
 0x8be   : > { %6591 = vrot.lane.b32.xlu0 %v6565_v11, %s7598_s4 }
 0x924   : > { %v6572_v29 = vpop.permute.xlu1 %6571  ;;  %v6568_v38 = vpop.permute.xlu0 %6567 }
 0x925   : > { %v6594_v60 = vsel %vm2926_vm1, %v6558_v57, %v6568_v38 }
 0x926   : > { %v6595_v55 = vsel %vm2992_vm3, %v6594_v60, %v6572_v29 }
 0x928   : > { %v6580_v6 = vpop.permute.xlu1 %6579  ;;  %v6576_v18 = vpop.permute.xlu0 %6575 }
 0x929   : > { %v6596_v19 = vsel %vm3058_vm5, %v6595_v55, %v6576_v18 }
 0x92a   : > { %v6597_v48 = vsel %vm14743_vm6, %v6596_v19, %v6580_v6 }
 0x92c   : > { %v6584_v25 = vpop.permute.xlu0 %6583  ;;  %v6588_v46 = vpop.permute.xlu1 %6587 }
 0x92d   : > { %v6598_v40 = vsel %vm3190_vm9, %v6597_v48, %v6584_v25 }
 0x92e   : > { %v6599_v37 = vsel %vm3256_vm11, %v6598_v40, %v6588_v46 }
 0x930   : > { %v6592_v3 = vpop.permute.xlu0 %6591 }
 0x931   : > { %v6600_v7 = vsel %vm3322_vm14, %v6599_v37, %v6592_v3 }
 0x932   : > { %6601 = vst.msk [vmem:[%s168_s25] sm:$0xff] %vm4796_vm13, %v6600_v7 }
 0x933 PF: > { %s13_s12 = sadd.s32 1, %s7583_s12  }
 0x934   : > { %p10_p4 = scmp.ge.s32.totalorder %s13_s12, 4  }
 0x936   :  { %12 = sbr.rel (!%p10_p4) target bundleno = 1 (0x1), region = 66 }

</bundles_post_ra>
